<compile_context>
chip_gen: v7x
topology: tpu7x:2x2x1
jax: 0.10.0
libtpu: 0.0.40
codegen_flags: <defaults>
</compile_context>

<pallas_src>
import functools

import jax
import jax.numpy as jnp
from jax import lax
from jax.experimental import pallas as pl
from jax.experimental.pallas import tpu as pltpu

RATES = (1, 2, 4, 8)


# ------------------------------ fused Pallas kernel ------------------------------ #
def _aggregate_kernel(x_ref, wb_ref, bb_ref, wf_ref, bf_ref, o_ref, cat_ref,
                      *, H, W, rates):
    """Fused AggregateBlock forward for one batch element.

    x_ref:   (1, H+2R, W+2R, Cin)   input reflect-padded with R = max(rates)
    wb_ref:  (n_rates, 3, 3*Cin, Cq) branch weights, per-dy im2col layout (dx-major)
    bb_ref:  (1, dim)                concatenated branch biases
    wf_ref:  (3, 3*dim, dim)         fuse weights, per-dy im2col layout
    bf_ref:  (1, dim)                fuse bias
    o_ref:   (1, H, W, dim)          output
    cat_ref: (H+2, W+2, dim) fp32    VMEM scratch holding reflect(1)-padded `cat`
    """
    R = max(rates)
    cq = wb_ref.shape[-1]            # dim // 4
    dim = wf_ref.shape[-1]

    # ---- dilated branches -> channel-concatenated, lane-dense activation -------- #
    branch_accs = []
    for i, r in enumerate(rates):
        off = R - r                   # rate-r reflect pad is a sub-window of the rate-R pad
        acc = jnp.zeros((H, W, cq), jnp.float32)
        for dy in range(3):
            r0 = off + dy * r
            # im2col over dx: (H, W, 3*Cin) @ (3*Cin, Cq)  -> one MXU matmul per dy
            patch = jnp.concatenate(
                [x_ref[0, r0:r0 + H, off + dx * r:off + dx * r + W, :]
                 for dx in range(3)], axis=-1)
            acc = acc + jnp.dot(patch, wb_ref[i, dy],
                                preferred_element_type=jnp.float32)
        branch_accs.append(acc)
    cat = jnp.concatenate(branch_accs, axis=-1)                 # (H, W, dim)
    cat = jnp.maximum(cat + bb_ref[...].astype(jnp.float32), 0.0)

    # ---- in-VMEM reflect(1) halo (never written back to HBM) -------------------- #
    body = jnp.concatenate([cat[1:2], cat, cat[H - 2:H - 1]], axis=0)   # (H+2, W, dim)
    cat_ref[:, 1:W + 1, :] = body
    cat_ref[:, 0:1, :] = body[:, 1:2, :]
    cat_ref[:, W + 1:W + 2, :] = body[:, W - 2:W - 1, :]

    # ---- 3x3 fuse conv on the VMEM scratch -------------------------------------- #
    accf = jnp.zeros((H, W, dim), jnp.float32)
    for dy in range(3):
        patch = jnp.concatenate(
            [cat_ref[dy:dy + H, dx:dx + W, :] for dx in range(3)], axis=-1)
        accf = accf + jnp.dot(patch, wf_ref[dy],
                              preferred_element_type=jnp.float32)
    accf = accf + bf_ref[...].astype(jnp.float32)
    o_ref[0] = accf.astype(o_ref.dtype)


# ------------------------------ parameters --------------------------------------- #
def init_params(key, dim, rates=RATES):
    """Deterministic synthetic weights (HWIO layout), matching the module shapes."""
    params = {}
    keys = jax.random.split(key, 2 * len(rates) + 2)
    cq = dim // 4
    for i, _ in enumerate(rates):
        params[f"w{i}"] = 0.1 * jax.random.normal(keys[2 * i], (3, 3, dim, cq),
                                                  jnp.float32)
        params[f"b{i}"] = 0.1 * jax.random.normal(keys[2 * i + 1], (cq,),
                                                  jnp.float32)
    params["wf"] = 0.1 * jax.random.normal(keys[-2], (3, 3, dim, dim), jnp.float32)
    params["bf"] = 0.1 * jax.random.normal(keys[-1], (dim,), jnp.float32)
    return params


# ------------------------------ forward wrapper ----------------------------------- #
def aggregate_block(x_nchw, params, rates=RATES):
    """Forward pass equivalent to the PyTorch AggregateBlock.  x: (N, C, H, W)."""
    x = jnp.transpose(x_nchw, (0, 2, 3, 1))            # NCHW -> NHWC
    N, H, W, C = x.shape
    R = max(rates)
    assert H > R and W > R, "single rate-R reflect pad requires H, W > max(rates)"
    assert C % 4 == 0
    cq = C // 4

    # Pad once with the max rate; every branch's halo is a sub-window of this pad.
    x_pad = jnp.pad(x, ((0, 0), (R, R), (R, R), (0, 0)), mode="reflect")

    # Per-dy im2col weight layout: (3,3,Cin,Cout) -> (3, 3*Cin, Cout) (dx-major rows).
    wb = jnp.stack([params[f"w{i}"].reshape(3, 3 * C, cq)
                    for i in range(len(rates))])                     # (nr, 3, 3C, cq)
    bb = jnp.concatenate([params[f"b{i}"] for i in range(len(rates))]).reshape(1, C)
    wf = params["wf"].reshape(3, 3 * C, C)
    bf = params["bf"].reshape(1, C)

    Hp, Wp = H + 2 * R, W + 2 * R
    kernel = functools.partial(_aggregate_kernel, H=H, W=W, rates=tuple(rates))

    flops = int(2 * 9 * H * W * (C * cq * len(rates) + C * C) * N)
    bytes_accessed = int(4 * (x_pad.size + wb.size + bb.size + wf.size + bf.size
                              + N * H * W * C))

    out_nhwc = pl.pallas_call(
        kernel,
        out_shape=jax.ShapeDtypeStruct((N, H, W, C), x.dtype),
        grid_spec=pltpu.PrefetchScalarGridSpec(
            num_scalar_prefetch=0,
            grid=(N,),
            in_specs=[
                pl.BlockSpec((1, Hp, Wp, C), lambda n: (n, 0, 0, 0)),
                pl.BlockSpec(wb.shape, lambda n: (0, 0, 0, 0)),
                pl.BlockSpec(bb.shape, lambda n: (0, 0)),
                pl.BlockSpec(wf.shape, lambda n: (0, 0, 0)),
                pl.BlockSpec(bf.shape, lambda n: (0, 0)),
            ],
            out_specs=pl.BlockSpec((1, H, W, C), lambda n: (n, 0, 0, 0)),
            scratch_shapes=[pltpu.VMEM((H + 2, W + 2, C), jnp.float32)],
        ),
        compiler_params=pltpu.CompilerParams(
            dimension_semantics=("parallel",)),
        cost_estimate=pl.CostEstimate(
            flops=flops, transcendentals=0, bytes_accessed=bytes_accessed),
    )(x_pad, wb, bb, wf, bf)

    return jnp.transpose(out_nhwc, (0, 3, 1, 2))       # NHWC -> NCHW


# ------------------------------ pure-JAX reference --------------------------------- #
def _conv_ref(x_pad, w, b, rate, relu):
    y = lax.conv_general_dilated(
        x_pad, w, window_strides=(1, 1), padding="VALID",
        rhs_dilation=(rate, rate),
        dimension_numbers=("NHWC", "HWIO", "NHWC"))
    y = y + b
    return jnp.maximum(y, 0.0) if relu else y


def aggregate_block_ref(x_nchw, params, rates=RATES):
    x = jnp.transpose(x_nchw, (0, 2, 3, 1))
    outs = []
    for i, r in enumerate(rates):
        xp = jnp.pad(x, ((0, 0), (r, r), (r, r), (0, 0)), mode="reflect")
        outs.append(_conv_ref(xp, params[f"w{i}"], params[f"b{i}"], r, True))
    cat = jnp.concatenate(outs, axis=-1)
    catp = jnp.pad(cat, ((0, 0), (1, 1), (1, 1), (0, 0)), mode="reflect")
    out = _conv_ref(catp, params["wf"], params["bf"], 1, False)
    return jnp.transpose(out, (0, 3, 1, 2))


# ----------------------------------- main ------------------------------------------ #
if __name__ == "__main__":
    key = jax.random.PRNGKey(0)
    k_x, k_p = jax.random.split(key)

    N, dim, H, W = 2, 8, 16, 16          # dim must be divisible by 4; H, W > 8
    x = jax.random.normal(k_x, (N, dim, H, W), jnp.float32)   # NCHW like PyTorch
    params = init_params(k_p, dim)

    out = jax.block_until_ready(aggregate_block(x, params))
    ref = jax.block_until_ready(aggregate_block_ref(x, params))

    assert out.shape == (N, dim, H, W)
    assert jnp.allclose(out, ref, atol=2e-4, rtol=2e-4), "mismatch vs reference"

    print("KERNEL_OK")
</pallas_src>

<mosaic_0001>
module attributes {stable_mosaic.version = 11 : i64} {
  func.func @_aggregate_kernel(%arg0: i32, %arg1: memref<1x32x32x8xf32, #tpu.memory_space<vmem>>, %arg2: memref<4x3x24x2xf32, #tpu.memory_space<vmem>>, %arg3: memref<1x8xf32, #tpu.memory_space<vmem>>, %arg4: memref<3x24x8xf32, #tpu.memory_space<vmem>>, %arg5: memref<1x8xf32, #tpu.memory_space<vmem>>, %arg6: memref<1x16x16x8xf32, #tpu.memory_space<vmem>>, %arg7: memref<18x18x8xf32, #tpu.memory_space<vmem>>) attributes {dimension_semantics = [#tpu.dimension_semantics<parallel>], iteration_bounds = array<i64: 2>, scalar_prefetch = 0 : i64, scratch_operands = 1 : i64, tpu.core_type = #tpu.core_type<tc>, window_params = [{transform_indices = @transform_0, window_bounds = array<i64: 1, 32, 32, 8>}, {pipeline_mode = #tpu.pipeline_mode<synchronous>, transform_indices = @transform_1, window_bounds = array<i64: 4, 3, 24, 2>}, {pipeline_mode = #tpu.pipeline_mode<synchronous>, transform_indices = @transform_2, window_bounds = array<i64: 1, 8>}, {pipeline_mode = #tpu.pipeline_mode<synchronous>, transform_indices = @transform_3, window_bounds = array<i64: 3, 24, 8>}, {pipeline_mode = #tpu.pipeline_mode<synchronous>, transform_indices = @transform_4, window_bounds = array<i64: 1, 8>}, {transform_indices = @transform_5, window_bounds = array<i64: 1, 16, 16, 8>}]} {
    %cst = arith.constant 0.000000e+00 : f32
    %0 = vector.broadcast %cst : f32 to vector<16x16x2xf32>
    %c0 = arith.constant 0 : index
    %c7 = arith.constant 7 : index
    %c7_0 = arith.constant 7 : index
    %c0_1 = arith.constant 0 : index
    %1 = vector.load %arg1[%c0, %c7, %c7_0, %c0_1] : memref<1x32x32x8xf32, #tpu.memory_space<vmem>>, vector<1x16x16x8xf32>
    %2 = vector.shape_cast %1 : vector<1x16x16x8xf32> to vector<16x16x8xf32>
    %c0_2 = arith.constant 0 : index
    %c7_3 = arith.constant 7 : index
    %c8 = arith.constant 8 : index
    %c0_4 = arith.constant 0 : index
    %3 = vector.load %arg1[%c0_2, %c7_3, %c8, %c0_4] : memref<1x32x32x8xf32, #tpu.memory_space<vmem>>, vector<1x16x16x8xf32>
    %4 = vector.shape_cast %3 : vector<1x16x16x8xf32> to vector<16x16x8xf32>
    %c0_5 = arith.constant 0 : index
    %c7_6 = arith.constant 7 : index
    %c9 = arith.constant 9 : index
    %c0_7 = arith.constant 0 : index
    %5 = vector.load %arg1[%c0_5, %c7_6, %c9, %c0_7] : memref<1x32x32x8xf32, #tpu.memory_space<vmem>>, vector<1x16x16x8xf32>
    %6 = vector.shape_cast %5 : vector<1x16x16x8xf32> to vector<16x16x8xf32>
    %7 = tpu.concatenate %2, %4, %6 in 2 : vector<16x16x8xf32>, vector<16x16x8xf32>, vector<16x16x8xf32> -> vector<16x16x24xf32>
    %c0_8 = arith.constant 0 : index
    %c0_9 = arith.constant 0 : index
    %c0_10 = arith.constant 0 : index
    %c0_11 = arith.constant 0 : index
    %8 = vector.load %arg2[%c0_8, %c0_9, %c0_10, %c0_11] : memref<4x3x24x2xf32, #tpu.memory_space<vmem>>, vector<1x1x24x2xf32>
    %9 = vector.shape_cast %8 : vector<1x1x24x2xf32> to vector<24x2xf32>
    %cst_12 = arith.constant dense<0.000000e+00> : vector<16x16x2xf32>
    %10 = tpu.matmul %7, %9, %cst_12 {dimension_numbers = #tpu.dot_dimension_numbers<[2], [0], [0, 1], [1], [0, 0, 0, 1, 1, 1], [], []>} : vector<16x16x24xf32>, vector<24x2xf32>, vector<16x16x2xf32> -> vector<16x16x2xf32>
    %11 = arith.addf %0, %10 : vector<16x16x2xf32>
    %c0_13 = arith.constant 0 : index
    %c8_14 = arith.constant 8 : index
    %c7_15 = arith.constant 7 : index
    %c0_16 = arith.constant 0 : index
    %12 = vector.load %arg1[%c0_13, %c8_14, %c7_15, %c0_16] : memref<1x32x32x8xf32, #tpu.memory_space<vmem>>, vector<1x16x16x8xf32>
    %13 = vector.shape_cast %12 : vector<1x16x16x8xf32> to vector<16x16x8xf32>
    %c0_17 = arith.constant 0 : index
    %c8_18 = arith.constant 8 : index
    %c8_19 = arith.constant 8 : index
    %c0_20 = arith.constant 0 : index
    %14 = vector.load %arg1[%c0_17, %c8_18, %c8_19, %c0_20] : memref<1x32x32x8xf32, #tpu.memory_space<vmem>>, vector<1x16x16x8xf32>
    %15 = vector.shape_cast %14 : vector<1x16x16x8xf32> to vector<16x16x8xf32>
    %c0_21 = arith.constant 0 : index
    %c8_22 = arith.constant 8 : index
    %c9_23 = arith.constant 9 : index
    %c0_24 = arith.constant 0 : index
    %16 = vector.load %arg1[%c0_21, %c8_22, %c9_23, %c0_24] : memref<1x32x32x8xf32, #tpu.memory_space<vmem>>, vector<1x16x16x8xf32>
    %17 = vector.shape_cast %16 : vector<1x16x16x8xf32> to vector<16x16x8xf32>
    %18 = tpu.concatenate %13, %15, %17 in 2 : vector<16x16x8xf32>, vector<16x16x8xf32>, vector<16x16x8xf32> -> vector<16x16x24xf32>
    %c0_25 = arith.constant 0 : index
    %c1 = arith.constant 1 : index
    %c0_26 = arith.constant 0 : index
    %c0_27 = arith.constant 0 : index
    %19 = vector.load %arg2[%c0_25, %c1, %c0_26, %c0_27] : memref<4x3x24x2xf32, #tpu.memory_space<vmem>>, vector<1x1x24x2xf32>
    %20 = vector.shape_cast %19 : vector<1x1x24x2xf32> to vector<24x2xf32>
    %cst_28 = arith.constant dense<0.000000e+00> : vector<16x16x2xf32>
    %21 = tpu.matmul %18, %20, %cst_28 {dimension_numbers = #tpu.dot_dimension_numbers<[2], [0], [0, 1], [1], [0, 0, 0, 1, 1, 1], [], []>} : vector<16x16x24xf32>, vector<24x2xf32>, vector<16x16x2xf32> -> vector<16x16x2xf32>
    %22 = arith.addf %11, %21 : vector<16x16x2xf32>
    %c0_29 = arith.constant 0 : index
    %c9_30 = arith.constant 9 : index
    %c7_31 = arith.constant 7 : index
    %c0_32 = arith.constant 0 : index
    %23 = vector.load %arg1[%c0_29, %c9_30, %c7_31, %c0_32] : memref<1x32x32x8xf32, #tpu.memory_space<vmem>>, vector<1x16x16x8xf32>
    %24 = vector.shape_cast %23 : vector<1x16x16x8xf32> to vector<16x16x8xf32>
    %c0_33 = arith.constant 0 : index
    %c9_34 = arith.constant 9 : index
    %c8_35 = arith.constant 8 : index
    %c0_36 = arith.constant 0 : index
    %25 = vector.load %arg1[%c0_33, %c9_34, %c8_35, %c0_36] : memref<1x32x32x8xf32, #tpu.memory_space<vmem>>, vector<1x16x16x8xf32>
    %26 = vector.shape_cast %25 : vector<1x16x16x8xf32> to vector<16x16x8xf32>
    %c0_37 = arith.constant 0 : index
    %c9_38 = arith.constant 9 : index
    %c9_39 = arith.constant 9 : index
    %c0_40 = arith.constant 0 : index
    %27 = vector.load %arg1[%c0_37, %c9_38, %c9_39, %c0_40] : memref<1x32x32x8xf32, #tpu.memory_space<vmem>>, vector<1x16x16x8xf32>
    %28 = vector.shape_cast %27 : vector<1x16x16x8xf32> to vector<16x16x8xf32>
    %29 = tpu.concatenate %24, %26, %28 in 2 : vector<16x16x8xf32>, vector<16x16x8xf32>, vector<16x16x8xf32> -> vector<16x16x24xf32>
    %c0_41 = arith.constant 0 : index
    %c2 = arith.constant 2 : index
    %c0_42 = arith.constant 0 : index
    %c0_43 = arith.constant 0 : index
    %30 = vector.load %arg2[%c0_41, %c2, %c0_42, %c0_43] : memref<4x3x24x2xf32, #tpu.memory_space<vmem>>, vector<1x1x24x2xf32>
    %31 = vector.shape_cast %30 : vector<1x1x24x2xf32> to vector<24x2xf32>
    %cst_44 = arith.constant dense<0.000000e+00> : vector<16x16x2xf32>
    %32 = tpu.matmul %29, %31, %cst_44 {dimension_numbers = #tpu.dot_dimension_numbers<[2], [0], [0, 1], [1], [0, 0, 0, 1, 1, 1], [], []>} : vector<16x16x24xf32>, vector<24x2xf32>, vector<16x16x2xf32> -> vector<16x16x2xf32>
    %33 = arith.addf %22, %32 : vector<16x16x2xf32>
    %cst_45 = arith.constant 0.000000e+00 : f32
    %34 = vector.broadcast %cst_45 : f32 to vector<16x16x2xf32>
    %c0_46 = arith.constant 0 : index
    %c6 = arith.constant 6 : index
    %c6_47 = arith.constant 6 : index
    %c0_48 = arith.constant 0 : index
    %35 = vector.load %arg1[%c0_46, %c6, %c6_47, %c0_48] : memref<1x32x32x8xf32, #tpu.memory_space<vmem>>, vector<1x16x16x8xf32>
    %36 = vector.shape_cast %35 : vector<1x16x16x8xf32> to vector<16x16x8xf32>
    %c0_49 = arith.constant 0 : index
    %c6_50 = arith.constant 6 : index
    %c8_51 = arith.constant 8 : index
    %c0_52 = arith.constant 0 : index
    %37 = vector.load %arg1[%c0_49, %c6_50, %c8_51, %c0_52] : memref<1x32x32x8xf32, #tpu.memory_space<vmem>>, vector<1x16x16x8xf32>
    %38 = vector.shape_cast %37 : vector<1x16x16x8xf32> to vector<16x16x8xf32>
    %c0_53 = arith.constant 0 : index
    %c6_54 = arith.constant 6 : index
    %c10 = arith.constant 10 : index
    %c0_55 = arith.constant 0 : index
    %39 = vector.load %arg1[%c0_53, %c6_54, %c10, %c0_55] : memref<1x32x32x8xf32, #tpu.memory_space<vmem>>, vector<1x16x16x8xf32>
    %40 = vector.shape_cast %39 : vector<1x16x16x8xf32> to vector<16x16x8xf32>
    %41 = tpu.concatenate %36, %38, %40 in 2 : vector<16x16x8xf32>, vector<16x16x8xf32>, vector<16x16x8xf32> -> vector<16x16x24xf32>
    %c1_56 = arith.constant 1 : index
    %c0_57 = arith.constant 0 : index
    %c0_58 = arith.constant 0 : index
    %c0_59 = arith.constant 0 : index
    %42 = vector.load %arg2[%c1_56, %c0_57, %c0_58, %c0_59] : memref<4x3x24x2xf32, #tpu.memory_space<vmem>>, vector<1x1x24x2xf32>
    %43 = vector.shape_cast %42 : vector<1x1x24x2xf32> to vector<24x2xf32>
    %cst_60 = arith.constant dense<0.000000e+00> : vector<16x16x2xf32>
    %44 = tpu.matmul %41, %43, %cst_60 {dimension_numbers = #tpu.dot_dimension_numbers<[2], [0], [0, 1], [1], [0, 0, 0, 1, 1, 1], [], []>} : vector<16x16x24xf32>, vector<24x2xf32>, vector<16x16x2xf32> -> vector<16x16x2xf32>
    %45 = arith.addf %34, %44 : vector<16x16x2xf32>
    %c0_61 = arith.constant 0 : index
    %c8_62 = arith.constant 8 : index
    %c6_63 = arith.constant 6 : index
    %c0_64 = arith.constant 0 : index
    %46 = vector.load %arg1[%c0_61, %c8_62, %c6_63, %c0_64] : memref<1x32x32x8xf32, #tpu.memory_space<vmem>>, vector<1x16x16x8xf32>
    %47 = vector.shape_cast %46 : vector<1x16x16x8xf32> to vector<16x16x8xf32>
    %c0_65 = arith.constant 0 : index
    %c8_66 = arith.constant 8 : index
    %c8_67 = arith.constant 8 : index
    %c0_68 = arith.constant 0 : index
    %48 = vector.load %arg1[%c0_65, %c8_66, %c8_67, %c0_68] : memref<1x32x32x8xf32, #tpu.memory_space<vmem>>, vector<1x16x16x8xf32>
    %49 = vector.shape_cast %48 : vector<1x16x16x8xf32> to vector<16x16x8xf32>
    %c0_69 = arith.constant 0 : index
    %c8_70 = arith.constant 8 : index
    %c10_71 = arith.constant 10 : index
    %c0_72 = arith.constant 0 : index
    %50 = vector.load %arg1[%c0_69, %c8_70, %c10_71, %c0_72] : memref<1x32x32x8xf32, #tpu.memory_space<vmem>>, vector<1x16x16x8xf32>
    %51 = vector.shape_cast %50 : vector<1x16x16x8xf32> to vector<16x16x8xf32>
    %52 = tpu.concatenate %47, %49, %51 in 2 : vector<16x16x8xf32>, vector<16x16x8xf32>, vector<16x16x8xf32> -> vector<16x16x24xf32>
    %c1_73 = arith.constant 1 : index
    %c1_74 = arith.constant 1 : index
    %c0_75 = arith.constant 0 : index
    %c0_76 = arith.constant 0 : index
    %53 = vector.load %arg2[%c1_73, %c1_74, %c0_75, %c0_76] : memref<4x3x24x2xf32, #tpu.memory_space<vmem>>, vector<1x1x24x2xf32>
    %54 = vector.shape_cast %53 : vector<1x1x24x2xf32> to vector<24x2xf32>
    %cst_77 = arith.constant dense<0.000000e+00> : vector<16x16x2xf32>
    %55 = tpu.matmul %52, %54, %cst_77 {dimension_numbers = #tpu.dot_dimension_numbers<[2], [0], [0, 1], [1], [0, 0, 0, 1, 1, 1], [], []>} : vector<16x16x24xf32>, vector<24x2xf32>, vector<16x16x2xf32> -> vector<16x16x2xf32>
    %56 = arith.addf %45, %55 : vector<16x16x2xf32>
    %c0_78 = arith.constant 0 : index
    %c10_79 = arith.constant 10 : index
    %c6_80 = arith.constant 6 : index
    %c0_81 = arith.constant 0 : index
    %57 = vector.load %arg1[%c0_78, %c10_79, %c6_80, %c0_81] : memref<1x32x32x8xf32, #tpu.memory_space<vmem>>, vector<1x16x16x8xf32>
    %58 = vector.shape_cast %57 : vector<1x16x16x8xf32> to vector<16x16x8xf32>
    %c0_82 = arith.constant 0 : index
    %c10_83 = arith.constant 10 : index
    %c8_84 = arith.constant 8 : index
    %c0_85 = arith.constant 0 : index
    %59 = vector.load %arg1[%c0_82, %c10_83, %c8_84, %c0_85] : memref<1x32x32x8xf32, #tpu.memory_space<vmem>>, vector<1x16x16x8xf32>
    %60 = vector.shape_cast %59 : vector<1x16x16x8xf32> to vector<16x16x8xf32>
    %c0_86 = arith.constant 0 : index
    %c10_87 = arith.constant 10 : index
    %c10_88 = arith.constant 10 : index
    %c0_89 = arith.constant 0 : index
    %61 = vector.load %arg1[%c0_86, %c10_87, %c10_88, %c0_89] : memref<1x32x32x8xf32, #tpu.memory_space<vmem>>, vector<1x16x16x8xf32>
    %62 = vector.shape_cast %61 : vector<1x16x16x8xf32> to vector<16x16x8xf32>
    %63 = tpu.concatenate %58, %60, %62 in 2 : vector<16x16x8xf32>, vector<16x16x8xf32>, vector<16x16x8xf32> -> vector<16x16x24xf32>
    %c1_90 = arith.constant 1 : index
    %c2_91 = arith.constant 2 : index
    %c0_92 = arith.constant 0 : index
    %c0_93 = arith.constant 0 : index
    %64 = vector.load %arg2[%c1_90, %c2_91, %c0_92, %c0_93] : memref<4x3x24x2xf32, #tpu.memory_space<vmem>>, vector<1x1x24x2xf32>
    %65 = vector.shape_cast %64 : vector<1x1x24x2xf32> to vector<24x2xf32>
    %cst_94 = arith.constant dense<0.000000e+00> : vector<16x16x2xf32>
    %66 = tpu.matmul %63, %65, %cst_94 {dimension_numbers = #tpu.dot_dimension_numbers<[2], [0], [0, 1], [1], [0, 0, 0, 1, 1, 1], [], []>} : vector<16x16x24xf32>, vector<24x2xf32>, vector<16x16x2xf32> -> vector<16x16x2xf32>
    %67 = arith.addf %56, %66 : vector<16x16x2xf32>
    %cst_95 = arith.constant 0.000000e+00 : f32
    %68 = vector.broadcast %cst_95 : f32 to vector<16x16x2xf32>
    %c0_96 = arith.constant 0 : index
    %c4 = arith.constant 4 : index
    %c4_97 = arith.constant 4 : index
    %c0_98 = arith.constant 0 : index
    %69 = vector.load %arg1[%c0_96, %c4, %c4_97, %c0_98] : memref<1x32x32x8xf32, #tpu.memory_space<vmem>>, vector<1x16x16x8xf32>
    %70 = vector.shape_cast %69 : vector<1x16x16x8xf32> to vector<16x16x8xf32>
    %c0_99 = arith.constant 0 : index
    %c4_100 = arith.constant 4 : index
    %c8_101 = arith.constant 8 : index
    %c0_102 = arith.constant 0 : index
    %71 = vector.load %arg1[%c0_99, %c4_100, %c8_101, %c0_102] : memref<1x32x32x8xf32, #tpu.memory_space<vmem>>, vector<1x16x16x8xf32>
    %72 = vector.shape_cast %71 : vector<1x16x16x8xf32> to vector<16x16x8xf32>
    %c0_103 = arith.constant 0 : index
    %c4_104 = arith.constant 4 : index
    %c12 = arith.constant 12 : index
    %c0_105 = arith.constant 0 : index
    %73 = vector.load %arg1[%c0_103, %c4_104, %c12, %c0_105] : memref<1x32x32x8xf32, #tpu.memory_space<vmem>>, vector<1x16x16x8xf32>
    %74 = vector.shape_cast %73 : vector<1x16x16x8xf32> to vector<16x16x8xf32>
    %75 = tpu.concatenate %70, %72, %74 in 2 : vector<16x16x8xf32>, vector<16x16x8xf32>, vector<16x16x8xf32> -> vector<16x16x24xf32>
    %c2_106 = arith.constant 2 : index
    %c0_107 = arith.constant 0 : index
    %c0_108 = arith.constant 0 : index
    %c0_109 = arith.constant 0 : index
    %76 = vector.load %arg2[%c2_106, %c0_107, %c0_108, %c0_109] : memref<4x3x24x2xf32, #tpu.memory_space<vmem>>, vector<1x1x24x2xf32>
    %77 = vector.shape_cast %76 : vector<1x1x24x2xf32> to vector<24x2xf32>
    %cst_110 = arith.constant dense<0.000000e+00> : vector<16x16x2xf32>
    %78 = tpu.matmul %75, %77, %cst_110 {dimension_numbers = #tpu.dot_dimension_numbers<[2], [0], [0, 1], [1], [0, 0, 0, 1, 1, 1], [], []>} : vector<16x16x24xf32>, vector<24x2xf32>, vector<16x16x2xf32> -> vector<16x16x2xf32>
    %79 = arith.addf %68, %78 : vector<16x16x2xf32>
    %c0_111 = arith.constant 0 : index
    %c8_112 = arith.constant 8 : index
    %c4_113 = arith.constant 4 : index
    %c0_114 = arith.constant 0 : index
    %80 = vector.load %arg1[%c0_111, %c8_112, %c4_113, %c0_114] : memref<1x32x32x8xf32, #tpu.memory_space<vmem>>, vector<1x16x16x8xf32>
    %81 = vector.shape_cast %80 : vector<1x16x16x8xf32> to vector<16x16x8xf32>
    %c0_115 = arith.constant 0 : index
    %c8_116 = arith.constant 8 : index
    %c8_117 = arith.constant 8 : index
    %c0_118 = arith.constant 0 : index
    %82 = vector.load %arg1[%c0_115, %c8_116, %c8_117, %c0_118] : memref<1x32x32x8xf32, #tpu.memory_space<vmem>>, vector<1x16x16x8xf32>
    %83 = vector.shape_cast %82 : vector<1x16x16x8xf32> to vector<16x16x8xf32>
    %c0_119 = arith.constant 0 : index
    %c8_120 = arith.constant 8 : index
    %c12_121 = arith.constant 12 : index
    %c0_122 = arith.constant 0 : index
    %84 = vector.load %arg1[%c0_119, %c8_120, %c12_121, %c0_122] : memref<1x32x32x8xf32, #tpu.memory_space<vmem>>, vector<1x16x16x8xf32>
    %85 = vector.shape_cast %84 : vector<1x16x16x8xf32> to vector<16x16x8xf32>
    %86 = tpu.concatenate %81, %83, %85 in 2 : vector<16x16x8xf32>, vector<16x16x8xf32>, vector<16x16x8xf32> -> vector<16x16x24xf32>
    %c2_123 = arith.constant 2 : index
    %c1_124 = arith.constant 1 : index
    %c0_125 = arith.constant 0 : index
    %c0_126 = arith.constant 0 : index
    %87 = vector.load %arg2[%c2_123, %c1_124, %c0_125, %c0_126] : memref<4x3x24x2xf32, #tpu.memory_space<vmem>>, vector<1x1x24x2xf32>
    %88 = vector.shape_cast %87 : vector<1x1x24x2xf32> to vector<24x2xf32>
    %cst_127 = arith.constant dense<0.000000e+00> : vector<16x16x2xf32>
    %89 = tpu.matmul %86, %88, %cst_127 {dimension_numbers = #tpu.dot_dimension_numbers<[2], [0], [0, 1], [1], [0, 0, 0, 1, 1, 1], [], []>} : vector<16x16x24xf32>, vector<24x2xf32>, vector<16x16x2xf32> -> vector<16x16x2xf32>
    %90 = arith.addf %79, %89 : vector<16x16x2xf32>
    %c0_128 = arith.constant 0 : index
    %c12_129 = arith.constant 12 : index
    %c4_130 = arith.constant 4 : index
    %c0_131 = arith.constant 0 : index
    %91 = vector.load %arg1[%c0_128, %c12_129, %c4_130, %c0_131] : memref<1x32x32x8xf32, #tpu.memory_space<vmem>>, vector<1x16x16x8xf32>
    %92 = vector.shape_cast %91 : vector<1x16x16x8xf32> to vector<16x16x8xf32>
    %c0_132 = arith.constant 0 : index
    %c12_133 = arith.constant 12 : index
    %c8_134 = arith.constant 8 : index
    %c0_135 = arith.constant 0 : index
    %93 = vector.load %arg1[%c0_132, %c12_133, %c8_134, %c0_135] : memref<1x32x32x8xf32, #tpu.memory_space<vmem>>, vector<1x16x16x8xf32>
    %94 = vector.shape_cast %93 : vector<1x16x16x8xf32> to vector<16x16x8xf32>
    %c0_136 = arith.constant 0 : index
    %c12_137 = arith.constant 12 : index
    %c12_138 = arith.constant 12 : index
    %c0_139 = arith.constant 0 : index
    %95 = vector.load %arg1[%c0_136, %c12_137, %c12_138, %c0_139] : memref<1x32x32x8xf32, #tpu.memory_space<vmem>>, vector<1x16x16x8xf32>
    %96 = vector.shape_cast %95 : vector<1x16x16x8xf32> to vector<16x16x8xf32>
    %97 = tpu.concatenate %92, %94, %96 in 2 : vector<16x16x8xf32>, vector<16x16x8xf32>, vector<16x16x8xf32> -> vector<16x16x24xf32>
    %c2_140 = arith.constant 2 : index
    %c2_141 = arith.constant 2 : index
    %c0_142 = arith.constant 0 : index
    %c0_143 = arith.constant 0 : index
    %98 = vector.load %arg2[%c2_140, %c2_141, %c0_142, %c0_143] : memref<4x3x24x2xf32, #tpu.memory_space<vmem>>, vector<1x1x24x2xf32>
    %99 = vector.shape_cast %98 : vector<1x1x24x2xf32> to vector<24x2xf32>
    %cst_144 = arith.constant dense<0.000000e+00> : vector<16x16x2xf32>
    %100 = tpu.matmul %97, %99, %cst_144 {dimension_numbers = #tpu.dot_dimension_numbers<[2], [0], [0, 1], [1], [0, 0, 0, 1, 1, 1], [], []>} : vector<16x16x24xf32>, vector<24x2xf32>, vector<16x16x2xf32> -> vector<16x16x2xf32>
    %101 = arith.addf %90, %100 : vector<16x16x2xf32>
    %cst_145 = arith.constant 0.000000e+00 : f32
    %102 = vector.broadcast %cst_145 : f32 to vector<16x16x2xf32>
    %c0_146 = arith.constant 0 : index
    %c0_147 = arith.constant 0 : index
    %c0_148 = arith.constant 0 : index
    %c0_149 = arith.constant 0 : index
    %103 = vector.load %arg1[%c0_146, %c0_147, %c0_148, %c0_149] : memref<1x32x32x8xf32, #tpu.memory_space<vmem>>, vector<1x16x16x8xf32>
    %104 = vector.shape_cast %103 : vector<1x16x16x8xf32> to vector<16x16x8xf32>
    %c0_150 = arith.constant 0 : index
    %c0_151 = arith.constant 0 : index
    %c8_152 = arith.constant 8 : index
    %c0_153 = arith.constant 0 : index
    %105 = vector.load %arg1[%c0_150, %c0_151, %c8_152, %c0_153] : memref<1x32x32x8xf32, #tpu.memory_space<vmem>>, vector<1x16x16x8xf32>
    %106 = vector.shape_cast %105 : vector<1x16x16x8xf32> to vector<16x16x8xf32>
    %c0_154 = arith.constant 0 : index
    %c0_155 = arith.constant 0 : index
    %c16 = arith.constant 16 : index
    %c0_156 = arith.constant 0 : index
    %107 = vector.load %arg1[%c0_154, %c0_155, %c16, %c0_156] : memref<1x32x32x8xf32, #tpu.memory_space<vmem>>, vector<1x16x16x8xf32>
    %108 = vector.shape_cast %107 : vector<1x16x16x8xf32> to vector<16x16x8xf32>
    %109 = tpu.concatenate %104, %106, %108 in 2 : vector<16x16x8xf32>, vector<16x16x8xf32>, vector<16x16x8xf32> -> vector<16x16x24xf32>
    %c3 = arith.constant 3 : index
    %c0_157 = arith.constant 0 : index
    %c0_158 = arith.constant 0 : index
    %c0_159 = arith.constant 0 : index
    %110 = vector.load %arg2[%c3, %c0_157, %c0_158, %c0_159] : memref<4x3x24x2xf32, #tpu.memory_space<vmem>>, vector<1x1x24x2xf32>
    %111 = vector.shape_cast %110 : vector<1x1x24x2xf32> to vector<24x2xf32>
    %cst_160 = arith.constant dense<0.000000e+00> : vector<16x16x2xf32>
    %112 = tpu.matmul %109, %111, %cst_160 {dimension_numbers = #tpu.dot_dimension_numbers<[2], [0], [0, 1], [1], [0, 0, 0, 1, 1, 1], [], []>} : vector<16x16x24xf32>, vector<24x2xf32>, vector<16x16x2xf32> -> vector<16x16x2xf32>
    %113 = arith.addf %102, %112 : vector<16x16x2xf32>
    %c0_161 = arith.constant 0 : index
    %c8_162 = arith.constant 8 : index
    %c0_163 = arith.constant 0 : index
    %c0_164 = arith.constant 0 : index
    %114 = vector.load %arg1[%c0_161, %c8_162, %c0_163, %c0_164] : memref<1x32x32x8xf32, #tpu.memory_space<vmem>>, vector<1x16x16x8xf32>
    %115 = vector.shape_cast %114 : vector<1x16x16x8xf32> to vector<16x16x8xf32>
    %c0_165 = arith.constant 0 : index
    %c8_166 = arith.constant 8 : index
    %c8_167 = arith.constant 8 : index
    %c0_168 = arith.constant 0 : index
    %116 = vector.load %arg1[%c0_165, %c8_166, %c8_167, %c0_168] : memref<1x32x32x8xf32, #tpu.memory_space<vmem>>, vector<1x16x16x8xf32>
    %117 = vector.shape_cast %116 : vector<1x16x16x8xf32> to vector<16x16x8xf32>
    %c0_169 = arith.constant 0 : index
    %c8_170 = arith.constant 8 : index
    %c16_171 = arith.constant 16 : index
    %c0_172 = arith.constant 0 : index
    %118 = vector.load %arg1[%c0_169, %c8_170, %c16_171, %c0_172] : memref<1x32x32x8xf32, #tpu.memory_space<vmem>>, vector<1x16x16x8xf32>
    %119 = vector.shape_cast %118 : vector<1x16x16x8xf32> to vector<16x16x8xf32>
    %120 = tpu.concatenate %115, %117, %119 in 2 : vector<16x16x8xf32>, vector<16x16x8xf32>, vector<16x16x8xf32> -> vector<16x16x24xf32>
    %c3_173 = arith.constant 3 : index
    %c1_174 = arith.constant 1 : index
    %c0_175 = arith.constant 0 : index
    %c0_176 = arith.constant 0 : index
    %121 = vector.load %arg2[%c3_173, %c1_174, %c0_175, %c0_176] : memref<4x3x24x2xf32, #tpu.memory_space<vmem>>, vector<1x1x24x2xf32>
    %122 = vector.shape_cast %121 : vector<1x1x24x2xf32> to vector<24x2xf32>
    %cst_177 = arith.constant dense<0.000000e+00> : vector<16x16x2xf32>
    %123 = tpu.matmul %120, %122, %cst_177 {dimension_numbers = #tpu.dot_dimension_numbers<[2], [0], [0, 1], [1], [0, 0, 0, 1, 1, 1], [], []>} : vector<16x16x24xf32>, vector<24x2xf32>, vector<16x16x2xf32> -> vector<16x16x2xf32>
    %124 = arith.addf %113, %123 : vector<16x16x2xf32>
    %c0_178 = arith.constant 0 : index
    %c16_179 = arith.constant 16 : index
    %c0_180 = arith.constant 0 : index
    %c0_181 = arith.constant 0 : index
    %125 = vector.load %arg1[%c0_178, %c16_179, %c0_180, %c0_181] : memref<1x32x32x8xf32, #tpu.memory_space<vmem>>, vector<1x16x16x8xf32>
    %126 = vector.shape_cast %125 : vector<1x16x16x8xf32> to vector<16x16x8xf32>
    %c0_182 = arith.constant 0 : index
    %c16_183 = arith.constant 16 : index
    %c8_184 = arith.constant 8 : index
    %c0_185 = arith.constant 0 : index
    %127 = vector.load %arg1[%c0_182, %c16_183, %c8_184, %c0_185] : memref<1x32x32x8xf32, #tpu.memory_space<vmem>>, vector<1x16x16x8xf32>
    %128 = vector.shape_cast %127 : vector<1x16x16x8xf32> to vector<16x16x8xf32>
    %c0_186 = arith.constant 0 : index
    %c16_187 = arith.constant 16 : index
    %c16_188 = arith.constant 16 : index
    %c0_189 = arith.constant 0 : index
    %129 = vector.load %arg1[%c0_186, %c16_187, %c16_188, %c0_189] : memref<1x32x32x8xf32, #tpu.memory_space<vmem>>, vector<1x16x16x8xf32>
    %130 = vector.shape_cast %129 : vector<1x16x16x8xf32> to vector<16x16x8xf32>
    %131 = tpu.concatenate %126, %128, %130 in 2 : vector<16x16x8xf32>, vector<16x16x8xf32>, vector<16x16x8xf32> -> vector<16x16x24xf32>
    %c3_190 = arith.constant 3 : index
    %c2_191 = arith.constant 2 : index
    %c0_192 = arith.constant 0 : index
    %c0_193 = arith.constant 0 : index
    %132 = vector.load %arg2[%c3_190, %c2_191, %c0_192, %c0_193] : memref<4x3x24x2xf32, #tpu.memory_space<vmem>>, vector<1x1x24x2xf32>
    %133 = vector.shape_cast %132 : vector<1x1x24x2xf32> to vector<24x2xf32>
    %cst_194 = arith.constant dense<0.000000e+00> : vector<16x16x2xf32>
    %134 = tpu.matmul %131, %133, %cst_194 {dimension_numbers = #tpu.dot_dimension_numbers<[2], [0], [0, 1], [1], [0, 0, 0, 1, 1, 1], [], []>} : vector<16x16x24xf32>, vector<24x2xf32>, vector<16x16x2xf32> -> vector<16x16x2xf32>
    %135 = arith.addf %124, %134 : vector<16x16x2xf32>
    %136 = tpu.concatenate %33, %67, %101, %135 in 2 : vector<16x16x2xf32>, vector<16x16x2xf32>, vector<16x16x2xf32>, vector<16x16x2xf32> -> vector<16x16x8xf32>
    %c0_195 = arith.constant 0 : index
    %c0_196 = arith.constant 0 : index
    %137 = vector.load %arg3[%c0_195, %c0_196] : memref<1x8xf32, #tpu.memory_space<vmem>>, vector<1x8xf32>
    %138 = vector.shape_cast %137 : vector<1x8xf32> to vector<1x1x8xf32>
    %139 = vector.broadcast %138 : vector<1x1x8xf32> to vector<16x16x8xf32>
    %140 = arith.addf %136, %139 : vector<16x16x8xf32>
    %cst_197 = arith.constant 0.000000e+00 : f32
    %141 = vector.broadcast %cst_197 : f32 to vector<16x16x8xf32>
    %142 = arith.maximumf %140, %141 : vector<16x16x8xf32>
    %143 = vector.extract_strided_slice %142 {offsets = [1, 0, 0], sizes = [1, 16, 8], strides = [1, 1, 1]} : vector<16x16x8xf32> to vector<1x16x8xf32>
    %144 = vector.extract_strided_slice %142 {offsets = [14, 0, 0], sizes = [1, 16, 8], strides = [1, 1, 1]} : vector<16x16x8xf32> to vector<1x16x8xf32>
    %145 = tpu.concatenate %143, %142, %144 in 0 : vector<1x16x8xf32>, vector<16x16x8xf32>, vector<1x16x8xf32> -> vector<18x16x8xf32>
    %c0_198 = arith.constant 0 : index
    %c1_199 = arith.constant 1 : index
    %c0_200 = arith.constant 0 : index
    %146 = vector.load %arg7[%c0_198, %c1_199, %c0_200] : memref<18x18x8xf32, #tpu.memory_space<vmem>>, vector<18x16x8xf32>
    tpu.vector_store %arg7[%c0_198, %c1_199, %c0_200], %145 {strides = array<i32>} : memref<18x18x8xf32, #tpu.memory_space<vmem>>, vector<18x16x8xf32>,
    %147 = vector.extract_strided_slice %145 {offsets = [0, 1, 0], sizes = [18, 1, 8], strides = [1, 1, 1]} : vector<18x16x8xf32> to vector<18x1x8xf32>
    %c0_201 = arith.constant 0 : index
    %c0_202 = arith.constant 0 : index
    %c0_203 = arith.constant 0 : index
    %148 = vector.load %arg7[%c0_201, %c0_202, %c0_203] : memref<18x18x8xf32, #tpu.memory_space<vmem>>, vector<18x1x8xf32>
    tpu.vector_store %arg7[%c0_201, %c0_202, %c0_203], %147 {strides = array<i32>} : memref<18x18x8xf32, #tpu.memory_space<vmem>>, vector<18x1x8xf32>,
    %149 = vector.extract_strided_slice %145 {offsets = [0, 14, 0], sizes = [18, 1, 8], strides = [1, 1, 1]} : vector<18x16x8xf32> to vector<18x1x8xf32>
    %c0_204 = arith.constant 0 : index
    %c17 = arith.constant 17 : index
    %c0_205 = arith.constant 0 : index
    %150 = vector.load %arg7[%c0_204, %c17, %c0_205] : memref<18x18x8xf32, #tpu.memory_space<vmem>>, vector<18x1x8xf32>
    tpu.vector_store %arg7[%c0_204, %c17, %c0_205], %149 {strides = array<i32>} : memref<18x18x8xf32, #tpu.memory_space<vmem>>, vector<18x1x8xf32>,
    %cst_206 = arith.constant 0.000000e+00 : f32
    %151 = vector.broadcast %cst_206 : f32 to vector<16x16x8xf32>
    %c0_207 = arith.constant 0 : index
    %c0_208 = arith.constant 0 : index
    %c0_209 = arith.constant 0 : index
    %152 = vector.load %arg7[%c0_207, %c0_208, %c0_209] : memref<18x18x8xf32, #tpu.memory_space<vmem>>, vector<16x16x8xf32>
    %c0_210 = arith.constant 0 : index
    %c1_211 = arith.constant 1 : index
    %c0_212 = arith.constant 0 : index
    %153 = vector.load %arg7[%c0_210, %c1_211, %c0_212] : memref<18x18x8xf32, #tpu.memory_space<vmem>>, vector<16x16x8xf32>
    %c0_213 = arith.constant 0 : index
    %c2_214 = arith.constant 2 : index
    %c0_215 = arith.constant 0 : index
    %154 = vector.load %arg7[%c0_213, %c2_214, %c0_215] : memref<18x18x8xf32, #tpu.memory_space<vmem>>, vector<16x16x8xf32>
    %155 = tpu.concatenate %152, %153, %154 in 2 : vector<16x16x8xf32>, vector<16x16x8xf32>, vector<16x16x8xf32> -> vector<16x16x24xf32>
    %c0_216 = arith.constant 0 : index
    %c0_217 = arith.constant 0 : index
    %c0_218 = arith.constant 0 : index
    %156 = vector.load %arg4[%c0_216, %c0_217, %c0_218] : memref<3x24x8xf32, #tpu.memory_space<vmem>>, vector<1x24x8xf32>
    %157 = vector.shape_cast %156 : vector<1x24x8xf32> to vector<24x8xf32>
    %cst_219 = arith.constant dense<0.000000e+00> : vector<16x16x8xf32>
    %158 = tpu.matmul %155, %157, %cst_219 {dimension_numbers = #tpu.dot_dimension_numbers<[2], [0], [0, 1], [1], [0, 0, 0, 1, 1, 1], [], []>} : vector<16x16x24xf32>, vector<24x8xf32>, vector<16x16x8xf32> -> vector<16x16x8xf32>
    %159 = arith.addf %151, %158 : vector<16x16x8xf32>
    %c1_220 = arith.constant 1 : index
    %c0_221 = arith.constant 0 : index
    %c0_222 = arith.constant 0 : index
    %160 = vector.load %arg7[%c1_220, %c0_221, %c0_222] : memref<18x18x8xf32, #tpu.memory_space<vmem>>, vector<16x16x8xf32>
    %c1_223 = arith.constant 1 : index
    %c1_224 = arith.constant 1 : index
    %c0_225 = arith.constant 0 : index
    %161 = vector.load %arg7[%c1_223, %c1_224, %c0_225] : memref<18x18x8xf32, #tpu.memory_space<vmem>>, vector<16x16x8xf32>
    %c1_226 = arith.constant 1 : index
    %c2_227 = arith.constant 2 : index
    %c0_228 = arith.constant 0 : index
    %162 = vector.load %arg7[%c1_226, %c2_227, %c0_228] : memref<18x18x8xf32, #tpu.memory_space<vmem>>, vector<16x16x8xf32>
    %163 = tpu.concatenate %160, %161, %162 in 2 : vector<16x16x8xf32>, vector<16x16x8xf32>, vector<16x16x8xf32> -> vector<16x16x24xf32>
    %c1_229 = arith.constant 1 : index
    %c0_230 = arith.constant 0 : index
    %c0_231 = arith.constant 0 : index
    %164 = vector.load %arg4[%c1_229, %c0_230, %c0_231] : memref<3x24x8xf32, #tpu.memory_space<vmem>>, vector<1x24x8xf32>
    %165 = vector.shape_cast %164 : vector<1x24x8xf32> to vector<24x8xf32>
    %cst_232 = arith.constant dense<0.000000e+00> : vector<16x16x8xf32>
    %166 = tpu.matmul %163, %165, %cst_232 {dimension_numbers = #tpu.dot_dimension_numbers<[2], [0], [0, 1], [1], [0, 0, 0, 1, 1, 1], [], []>} : vector<16x16x24xf32>, vector<24x8xf32>, vector<16x16x8xf32> -> vector<16x16x8xf32>
    %167 = arith.addf %159, %166 : vector<16x16x8xf32>
    %c2_233 = arith.constant 2 : index
    %c0_234 = arith.constant 0 : index
    %c0_235 = arith.constant 0 : index
    %168 = vector.load %arg7[%c2_233, %c0_234, %c0_235] : memref<18x18x8xf32, #tpu.memory_space<vmem>>, vector<16x16x8xf32>
    %c2_236 = arith.constant 2 : index
    %c1_237 = arith.constant 1 : index
    %c0_238 = arith.constant 0 : index
    %169 = vector.load %arg7[%c2_236, %c1_237, %c0_238] : memref<18x18x8xf32, #tpu.memory_space<vmem>>, vector<16x16x8xf32>
    %c2_239 = arith.constant 2 : index
    %c2_240 = arith.constant 2 : index
    %c0_241 = arith.constant 0 : index
    %170 = vector.load %arg7[%c2_239, %c2_240, %c0_241] : memref<18x18x8xf32, #tpu.memory_space<vmem>>, vector<16x16x8xf32>
    %171 = tpu.concatenate %168, %169, %170 in 2 : vector<16x16x8xf32>, vector<16x16x8xf32>, vector<16x16x8xf32> -> vector<16x16x24xf32>
    %c2_242 = arith.constant 2 : index
    %c0_243 = arith.constant 0 : index
    %c0_244 = arith.constant 0 : index
    %172 = vector.load %arg4[%c2_242, %c0_243, %c0_244] : memref<3x24x8xf32, #tpu.memory_space<vmem>>, vector<1x24x8xf32>
    %173 = vector.shape_cast %172 : vector<1x24x8xf32> to vector<24x8xf32>
    %cst_245 = arith.constant dense<0.000000e+00> : vector<16x16x8xf32>
    %174 = tpu.matmul %171, %173, %cst_245 {dimension_numbers = #tpu.dot_dimension_numbers<[2], [0], [0, 1], [1], [0, 0, 0, 1, 1, 1], [], []>} : vector<16x16x24xf32>, vector<24x8xf32>, vector<16x16x8xf32> -> vector<16x16x8xf32>
    %175 = arith.addf %167, %174 : vector<16x16x8xf32>
    %c0_246 = arith.constant 0 : index
    %c0_247 = arith.constant 0 : index
    %176 = vector.load %arg5[%c0_246, %c0_247] : memref<1x8xf32, #tpu.memory_space<vmem>>, vector<1x8xf32>
    %177 = vector.shape_cast %176 : vector<1x8xf32> to vector<1x1x8xf32>
    %178 = vector.broadcast %177 : vector<1x1x8xf32> to vector<16x16x8xf32>
    %179 = arith.addf %175, %178 : vector<16x16x8xf32>
    %c0_248 = arith.constant 0 : index
    %c0_249 = arith.constant 0 : index
    %c0_250 = arith.constant 0 : index
    %c0_251 = arith.constant 0 : index
    %180 = vector.load %arg6[%c0_248, %c0_249, %c0_250, %c0_251] : memref<1x16x16x8xf32, #tpu.memory_space<vmem>>, vector<1x16x16x8xf32>
    %181 = vector.shape_cast %180 : vector<1x16x16x8xf32> to vector<16x16x8xf32>
    %182 = vector.shape_cast %179 : vector<16x16x8xf32> to vector<1x16x16x8xf32>
    tpu.vector_store %arg6[%c0_248, %c0_249, %c0_250, %c0_251], %182 {strides = array<i32>} : memref<1x16x16x8xf32, #tpu.memory_space<vmem>>, vector<1x16x16x8xf32>,
    return
  }
  func.func @transform_0(%arg0: i32) -> (i32, i32, i32, i32) {
    %c0_i32 = arith.constant 0 : i32
    %c0_i32_0 = arith.constant 0 : i32
    %c0_i32_1 = arith.constant 0 : i32
    %c0_i32_2 = arith.constant 0 : i32
    return %arg0, %c0_i32, %c0_i32_0, %c0_i32_1 : i32, i32, i32, i32
  }
  func.func @transform_1(%arg0: i32) -> (i32, i32, i32, i32) {
    %c0_i32 = arith.constant 0 : i32
    %c0_i32_0 = arith.constant 0 : i32
    %c0_i32_1 = arith.constant 0 : i32
    %c0_i32_2 = arith.constant 0 : i32
    %c0_i32_3 = arith.constant 0 : i32
    return %c0_i32, %c0_i32_0, %c0_i32_1, %c0_i32_2 : i32, i32, i32, i32
  }
  func.func @transform_2(%arg0: i32) -> (i32, i32) {
    %c0_i32 = arith.constant 0 : i32
    %c0_i32_0 = arith.constant 0 : i32
    %c0_i32_1 = arith.constant 0 : i32
    return %c0_i32, %c0_i32_0 : i32, i32
  }
  func.func @transform_3(%arg0: i32) -> (i32, i32, i32) {
    %c0_i32 = arith.constant 0 : i32
    %c0_i32_0 = arith.constant 0 : i32
    %c0_i32_1 = arith.constant 0 : i32
    %c0_i32_2 = arith.constant 0 : i32
    return %c0_i32, %c0_i32_0, %c0_i32_1 : i32, i32, i32
  }
  func.func @transform_4(%arg0: i32) -> (i32, i32) {
    %c0_i32 = arith.constant 0 : i32
    %c0_i32_0 = arith.constant 0 : i32
    %c0_i32_1 = arith.constant 0 : i32
    return %c0_i32, %c0_i32_0 : i32, i32
  }
  func.func @transform_5(%arg0: i32) -> (i32, i32, i32, i32) {
    %c0_i32 = arith.constant 0 : i32
    %c0_i32_0 = arith.constant 0 : i32
    %c0_i32_1 = arith.constant 0 : i32
    %c0_i32_2 = arith.constant 0 : i32
    return %arg0, %c0_i32, %c0_i32_0, %c0_i32_1 : i32, i32, i32, i32
  }
}

</mosaic_0001>

<bundles_post_ra>
// kernel: tpu_custom_call.1
= control target key start
LH: loop header
LB: loop body
LE: loop exit
PB: predicated region body
PF: predicated region fallthrough
CT: control target
= control target key end

     0   :  { %s14856_s18 = smov 0   ;;  %s21521_s0 = inlined_call_operand.vmem [shape: f32[2,32,32,8], index: 0, kind: input, shape index: {}]   ;;  %s21522_s1 = inlined_call_operand.vmem [shape: f32[4,3,24,2], index: 1, kind: input, shape index: {}]   ;;  %s21523_s2 = inlined_call_operand.vmem [shape: f32[1,8], index: 2, kind: input, shape index: {}]   ;;  %s21524_s3 = inlined_call_operand.vmem [shape: f32[3,24,8], index: 3, kind: input, shape index: {}]   ;;  %s21525_s4 = inlined_call_operand.vmem [shape: f32[1,8], index: 4, kind: input, shape index: {}]   ;;  %s21526_s5 = inlined_call_operand.vmem [shape: f32[2,16,16,8], index: 5, kind: output, shape index: {}]  }
   0x1 LB: > { %s11641_s19 = sadd.s32 4294967295, %s14819_s18   ;;  %p11645_p0 = scmp.ge.s32.totalorder %s14819_s18, 1  ;;  %s14819_s18 = sphi %s14856_s18, %s15_s18  }
   0x2   : > { %p187_p1 = scmp.lt.s32.totalorder %s14819_s18, 3 }
   0x4   : > { %p188_p2 = pnand %p11645_p0, %p187_p1 }
   0x6   : > { %191 = sbr.rel (%p188_p2) target bundleno = 2412 (0x96c), region = 40 }
   0xd   : > { %p215_p3 = scmp.lt.s32.totalorder %s11641_s19, 1  ;;  %s14821_s24 = smov 8   ;;  %v644_v24 = vld [vmem:[%s21522_s1] sm:$0xff]  ;;  %v645_v25 = vld [vmem:[%s21522_s1 + $0x8] sm:$0xff]  ;;  %v15015_v31 = vld [vmem:[%s21522_s1 + $0x10] sm:$0xff]  ;;  %vm578_vm0 = vcmask 64512  }
   0xe   : > { %v14998_v28 = vpack.c.bf16 %v645_v25, %v644_v24  ;;  %21662 = vst [vmem:[#allocation16_spill] sm:$0xff] %v15015_v31  ;;  %s14822_s6 = smov 16   ;;  %vm611_vm1 = vcmask 130048   ;;  %vm1068_vm2 = vcmask 195584   ;;  %s14823_s13 = smov 2   ;;  %vm9015_vm3 = vcmask 15360  }
   0xf   : > { %s22315_s19 = smov (!%p215_p3, %s11641_s19), 1  ;;  %s14824_s14 = smov 4   ;;  %vm9048_vm4 = vcmask 31744   ;;  %vm9081_vm5 = vcmask 48128   ;;  %vm9240_vm6 = vcmask 63494   ;;  %vm9221_vm7 = vcmask 58369  }
  0x10   : > { %s13053_s20 = sshll.u32 %s22315_s19, 10  ;;  %14395 = vmatprep.subr.bf16.mxu0 %v14998_v28 }
  0x11   : > { %s14870_s23 = scalar_lea.vmem %s21521_s0, %s13053_s20  ;;  %14397 = vmatpush3.bf16.msra.mxu0 %v14998_v28 }
  0x12   : > { %v14873_v0 = vld [vmem:[%s14870_s23 + $0x108] sm:$0xff]  ;;  %v14880_v2 = vld [vmem:[%s14870_s23 + $0x110] sm:$0xff]  ;;  %13638 = vmatprep.subr.mxu0 %v15015_v31 }
  0x13   : > { %v11682_v1 = vld [vmem:[%s14870_s23 + $0xe8] sm:$0xff]  ;;  %358 = vrot.lane.b32.xlu1 %v14873_v0, %s14821_s24  ;;  %v11683_v3 = vld [vmem:[%s14870_s23 + $0xf0] sm:$0xff] }
  0x14   : > { %354 = vrot.lane.b32.xlu0 %v11682_v1, %s14821_s24  ;;  %v14887_v4 = vld [vmem:[%s14870_s23 + $0x130] sm:$0xff]  ;;  %v14890_v5 = vld [vmem:[%s14870_s23 + $0x128] sm:$0xff] }
  0x15   : > { %21649 = vst [vmem:[#allocation3_spill] sm:$0xff] %v14887_v4  ;;  %21650 = vst [vmem:[#allocation4_spill] sm:$0xff] %v14890_v5  ;;  %v14897_v6 = vld [vmem:[%s14870_s23 + $0x150] sm:$0xff]  ;;  %v14900_v7 = vld [vmem:[%s14870_s23 + $0x148] sm:$0xff]  ;;  %13639 = vmatpush3.msra.mxu0 %v15015_v31 }
  0x16   : > { %21651 = vst [vmem:[#allocation5_spill] sm:$0xff] %v14897_v6  ;;  %21652 = vst [vmem:[#allocation6_spill] sm:$0xff] %v14900_v7  ;;  %v14907_v8 = vld [vmem:[%s14870_s23 + $0x170] sm:$0xff]  ;;  %v14910_v9 = vld [vmem:[%s14870_s23 + $0x168] sm:$0xff] }
  0x17   : > { %360 = vrot.lane.b32.xlu1 %v14880_v2, %s14821_s24  ;;  %21653 = vst [vmem:[#allocation7_spill] sm:$0xff] %v14907_v8  ;;  %21654 = vst [vmem:[#allocation8_spill] sm:$0xff] %v14910_v9  ;;  %v14917_v10 = vld [vmem:[%s14870_s23 + $0x190] sm:$0xff]  ;;  %v14920_v11 = vld [vmem:[%s14870_s23 + $0x188] sm:$0xff] }
  0x18   : > { %356 = vrot.lane.b32.xlu0 %v11683_v3, %s14821_s24  ;;  %21655 = vst [vmem:[#allocation9_spill] sm:$0xff] %v14920_v11  ;;  %v14927_v12 = vld [vmem:[%s14870_s23 + $0x1b0] sm:$0xff]  ;;  %v14930_v13 = vld [vmem:[%s14870_s23 + $0x1a8] sm:$0xff] }
  0x19   : > { %v14937_v14 = vld [vmem:[%s14870_s23 + $0x1d0] sm:$0xff]  ;;  %v14940_v15 = vld [vmem:[%s14870_s23 + $0x1c8] sm:$0xff] }
  0x1a   : > { %v14947_v16 = vld [vmem:[%s14870_s23 + $0x1f0] sm:$0xff]  ;;  %v14950_v17 = vld [vmem:[%s14870_s23 + $0x1e8] sm:$0xff] }
  0x1b   : > { %364 = vrot.lane.b32.xlu1 %v14887_v4, %s14821_s24  ;;  %v14957_v18 = vld [vmem:[%s14870_s23 + $0x210] sm:$0xff]  ;;  %v14960_v19 = vld [vmem:[%s14870_s23 + $0x208] sm:$0xff] }
  0x1c   : > { %362 = vrot.lane.b32.xlu0 %v14890_v5, %s14821_s24  ;;  %v14967_v20 = vld [vmem:[%s14870_s23 + $0x230] sm:$0xff]  ;;  %v14970_v21 = vld [vmem:[%s14870_s23 + $0x228] sm:$0xff] }
  0x1d   : > { %v14977_v22 = vld [vmem:[%s14870_s23 + $0x250] sm:$0xff]  ;;  %v14980_v23 = vld [vmem:[%s14870_s23 + $0x248] sm:$0xff] }
  0x1e   : > { %21656 = vst [vmem:[#allocation10_spill] sm:$0xff] %v14977_v22  ;;  %21657 = vst [vmem:[#allocation11_spill] sm:$0xff] %v14980_v23  ;;  %v14993_v26 = vld [vmem:[%s14870_s23 + $0x270] sm:$0xff]  ;;  %v14996_v27 = vld [vmem:[%s14870_s23 + $0x268] sm:$0xff] }
  0x1f   : > { %368 = vrot.lane.b32.xlu1 %v14897_v6, %s14821_s24  ;;  %21658 = vst [vmem:[#allocation12_spill] sm:$0xff] %v14993_v26  ;;  %21659 = vst [vmem:[#allocation13_spill] sm:$0xff] %v14996_v27  ;;  %v15006_v29 = vld [vmem:[%s14870_s23 + $0x290] sm:$0xff]  ;;  %v15009_v30 = vld [vmem:[%s14870_s23 + $0x288] sm:$0xff] }
  0x20   : > { %366 = vrot.lane.b32.xlu0 %v14900_v7, %s14821_s24  ;;  %21660 = vst [vmem:[#allocation14_spill] sm:$0xff] %v15006_v29  ;;  %21661 = vst [vmem:[#allocation15_spill] sm:$0xff] %v15009_v30  ;;  %v15023_v32 = vld [vmem:[%s14870_s23 + $0x2b0] sm:$0xff]  ;;  %v15026_v33 = vld [vmem:[%s14870_s23 + $0x2a8] sm:$0xff] }
  0x21   : > { %v15034_v34 = vld [vmem:[%s14870_s23 + $0x2d0] sm:$0xff]  ;;  %v15037_v35 = vld [vmem:[%s14870_s23 + $0x2c8] sm:$0xff] }
  0x22   : > { %v11715_v36 = vld [vmem:[%s14870_s23 + $0xf1] sm:$0xff]  ;;  %v11714_v37 = vld [vmem:[%s14870_s23 + $0xe9] sm:$0xff] }
  0x23   : > { %372 = vrot.lane.b32.xlu1 %v14907_v8, %s14821_s24  ;;  %v15048_v38 = vld [vmem:[%s14870_s23 + $0x111] sm:$0xff]  ;;  %v15051_v39 = vld [vmem:[%s14870_s23 + $0x109] sm:$0xff] }
  0x24   : > { %370 = vrot.lane.b32.xlu0 %v14910_v9, %s14821_s24  ;;  %v15058_v40 = vld [vmem:[%s14870_s23 + $0x131] sm:$0xff]  ;;  %v15061_v41 = vld [vmem:[%s14870_s23 + $0x129] sm:$0xff] }
  0x25   : > { %v15068_v42 = vld [vmem:[%s14870_s23 + $0x151] sm:$0xff]  ;;  %v15071_v43 = vld [vmem:[%s14870_s23 + $0x149] sm:$0xff] }
  0x26   : > { %v15078_v44 = vld [vmem:[%s14870_s23 + $0x171] sm:$0xff]  ;;  %v15081_v45 = vld [vmem:[%s14870_s23 + $0x169] sm:$0xff] }
  0x27   : > { %376 = vrot.lane.b32.xlu1 %v14917_v10, %s14821_s24  ;;  %v15088_v46 = vld [vmem:[%s14870_s23 + $0x191] sm:$0xff]  ;;  %v15091_v47 = vld [vmem:[%s14870_s23 + $0x189] sm:$0xff] }
  0x28   : > { %374 = vrot.lane.b32.xlu0 %v14920_v11, %s14821_s24  ;;  %v15098_v48 = vld [vmem:[%s14870_s23 + $0x1b1] sm:$0xff]  ;;  %v15101_v49 = vld [vmem:[%s14870_s23 + $0x1a9] sm:$0xff] }
  0x29   : > { %v15108_v50 = vld [vmem:[%s14870_s23 + $0x1d1] sm:$0xff]  ;;  %v15111_v51 = vld [vmem:[%s14870_s23 + $0x1c9] sm:$0xff] }
  0x2a   : > { %v15118_v52 = vld [vmem:[%s14870_s23 + $0x1f1] sm:$0xff]  ;;  %v15121_v53 = vld [vmem:[%s14870_s23 + $0x1e9] sm:$0xff] }
  0x2b   : > { %380 = vrot.lane.b32.xlu1 %v14927_v12, %s14821_s24  ;;  %v15128_v54 = vld [vmem:[%s14870_s23 + $0x211] sm:$0xff]  ;;  %v15131_v55 = vld [vmem:[%s14870_s23 + $0x209] sm:$0xff] }
  0x2c   : > { %378 = vrot.lane.b32.xlu0 %v14930_v13, %s14821_s24  ;;  %v15138_v56 = vld [vmem:[%s14870_s23 + $0x231] sm:$0xff]  ;;  %v15141_v57 = vld [vmem:[%s14870_s23 + $0x229] sm:$0xff] }
  0x2d   : > { %v15148_v58 = vld [vmem:[%s14870_s23 + $0x251] sm:$0xff]  ;;  %v15151_v59 = vld [vmem:[%s14870_s23 + $0x249] sm:$0xff] }
  0x2e   : > { %21663 = vst [vmem:[#allocation17_spill] sm:$0xff] %v15151_v59  ;;  %v15158_v60 = vld [vmem:[%s14870_s23 + $0x271] sm:$0xff]  ;;  %v15161_v61 = vld [vmem:[%s14870_s23 + $0x269] sm:$0xff] }
  0x2f   : > { %384 = vrot.lane.b32.xlu1 %v14937_v14, %s14821_s24  ;;  %21664 = vst [vmem:[#allocation18_spill] sm:$0xff] %v15158_v60  ;;  %21665 = vst [vmem:[#allocation19_spill] sm:$0xff] %v15161_v61  ;;  %v15168_v62 = vld [vmem:[%s14870_s23 + $0x291] sm:$0xff]  ;;  %v15171_v63 = vld [vmem:[%s14870_s23 + $0x289] sm:$0xff] }
  0x30   : > { %382 = vrot.lane.b32.xlu0 %v14940_v15, %s14821_s24  ;;  %21666 = vst [vmem:[#allocation20_spill] sm:$0xff] %v15168_v62  ;;  %21667 = vst [vmem:[#allocation21_spill] sm:$0xff] %v15171_v63  ;;  %v15182_v24 = vld [vmem:[%s14870_s23 + $0x2b1] sm:$0xff]  ;;  %v15185_v25 = vld [vmem:[%s14870_s23 + $0x2a9] sm:$0xff] }
  0x31   : > { %21668 = vst [vmem:[#allocation22_spill] sm:$0xff] %v15182_v24  ;;  %21669 = vst [vmem:[#allocation23_spill] sm:$0xff] %v15185_v25  ;;  %v15196_v31 = vld [vmem:[%s14870_s23 + $0x2d1] sm:$0xff] }
  0x32   : > { %21670 = vst [vmem:[#allocation24_spill] sm:$0xff] %v15196_v31 }
  0x33   : > { %388 = vrot.lane.b32.xlu1 %v14947_v16, %s14821_s24 }
  0x34   : > { %386 = vrot.lane.b32.xlu0 %v14950_v17, %s14821_s24 }
  0x37   : > { %392 = vrot.lane.b32.xlu1 %v14957_v18, %s14821_s24 }
  0x38   : > { %390 = vrot.lane.b32.xlu0 %v14960_v19, %s14821_s24 }
  0x3b   : > { %396 = vrot.lane.b32.xlu1 %v14967_v20, %s14821_s24 }
  0x3c   : > { %394 = vrot.lane.b32.xlu0 %v14970_v21, %s14821_s24 }
  0x3f   : > { %400 = vrot.lane.b32.xlu1 %v14977_v22, %s14821_s24 }
  0x40   : > { %398 = vrot.lane.b32.xlu0 %v14980_v23, %s14821_s24 }
  0x43   : > { %404 = vrot.lane.b32.xlu1 %v14993_v26, %s14821_s24 }
  0x44   : > { %402 = vrot.lane.b32.xlu0 %v14996_v27, %s14821_s24 }
  0x47   : > { %408 = vrot.lane.b32.xlu1 %v15006_v29, %s14821_s24 }
  0x48   : > { %406 = vrot.lane.b32.xlu0 %v15009_v30, %s14821_s24 }
  0x4b   : > { %412 = vrot.lane.b32.xlu1 %v15023_v32, %s14821_s24 }
  0x4c   : > { %410 = vrot.lane.b32.xlu0 %v15026_v33, %s14821_s24 }
  0x4f   : > { %416 = vrot.lane.b32.xlu1 %v15034_v34, %s14821_s24 }
  0x50   : > { %414 = vrot.lane.b32.xlu0 %v15037_v35, %s14821_s24 }
  0x53   : > { %484 = vrot.lane.b32.xlu1 %v11715_v36, %s14822_s6 }
  0x54   : > { %482 = vrot.lane.b32.xlu0 %v11714_v37, %s14822_s6 }
  0x57   : > { %488 = vrot.lane.b32.xlu1 %v15048_v38, %s14822_s6 }
  0x58   : > { %486 = vrot.lane.b32.xlu0 %v15051_v39, %s14822_s6 }
  0x5b   : > { %492 = vrot.lane.b32.xlu1 %v15058_v40, %s14822_s6 }
  0x5c   : > { %490 = vrot.lane.b32.xlu0 %v15061_v41, %s14822_s6 }
  0x5f   : > { %496 = vrot.lane.b32.xlu1 %v15068_v42, %s14822_s6 }
  0x60   : > { %494 = vrot.lane.b32.xlu0 %v15071_v43, %s14822_s6 }
  0x63   : > { %500 = vrot.lane.b32.xlu1 %v15078_v44, %s14822_s6 }
  0x64   : > { %498 = vrot.lane.b32.xlu0 %v15081_v45, %s14822_s6 }
  0x67   : > { %504 = vrot.lane.b32.xlu1 %v15088_v46, %s14822_s6 }
  0x68   : > { %502 = vrot.lane.b32.xlu0 %v15091_v47, %s14822_s6 }
  0x6b   : > { %508 = vrot.lane.b32.xlu1 %v15098_v48, %s14822_s6 }
  0x6c   : > { %506 = vrot.lane.b32.xlu0 %v15101_v49, %s14822_s6 }
  0x6f   : > { %512 = vrot.lane.b32.xlu1 %v15108_v50, %s14822_s6 }
  0x70   : > { %510 = vrot.lane.b32.xlu0 %v15111_v51, %s14822_s6 }
  0x73   : > { %516 = vrot.lane.b32.xlu1 %v15118_v52, %s14822_s6 }
  0x74   : > { %514 = vrot.lane.b32.xlu0 %v15121_v53, %s14822_s6 }
  0x77   : > { %520 = vrot.lane.b32.xlu1 %v15128_v54, %s14822_s6 }
  0x78   : > { %518 = vrot.lane.b32.xlu0 %v15131_v55, %s14822_s6 }
  0x7b   : > { %524 = vrot.lane.b32.xlu1 %v15138_v56, %s14822_s6 }
  0x7c   : > { %522 = vrot.lane.b32.xlu0 %v15141_v57, %s14822_s6 }
  0x7f   : > { %528 = vrot.lane.b32.xlu1 %v15148_v58, %s14822_s6 }
  0x80   : > { %526 = vrot.lane.b32.xlu0 %v15151_v59, %s14822_s6 }
  0x83   : > { %532 = vrot.lane.b32.xlu1 %v15158_v60, %s14822_s6 }
  0x84   : > { %530 = vrot.lane.b32.xlu0 %v15161_v61, %s14822_s6 }
  0x85   : > { %v15173_v1 = vpop.permute.xlu1 %358 }
  0x86   : > { %v15175_v3 = vpop.permute.xlu0 %354 }
  0x87   : > { %536 = vrot.lane.b32.xlu1 %v15168_v62, %s14822_s6  ;;  %v15199_v62 = vld [vmem:[%s14870_s23 + $0x2c9] sm:$0xff] }
  0x88   : > { %534 = vrot.lane.b32.xlu0 %v15171_v63, %s14822_s6  ;;  %21671 = vst [vmem:[#allocation25_spill] sm:$0xff] %v15199_v62 }
  0x89   : > { %v15187_v36 = vpop.permute.xlu1 %360 }
  0x8a   : > { %v15189_v37 = vpop.permute.xlu0 %356 }
  0x8b   : > { %540 = vrot.lane.b32.xlu1 %v15182_v24, %s14822_s6 }
  0x8c   : > { %538 = vrot.lane.b32.xlu0 %v15185_v25, %s14822_s6 }
  0x8d   : > { %v15201_v61 = vpop.permute.xlu1 %364 }
  0x8e   : > { %v15203_v63 = vpop.permute.xlu0 %362 }
  0x8f   : > { %544 = vrot.lane.b32.xlu1 %v15196_v31, %s14822_s6 }
  0x90   : > { %542 = vrot.lane.b32.xlu0 %v15199_v62, %s14822_s6 }
  0x91   : > { %v15209_v60 = vpop.permute.xlu1 %368 }
  0x92   : > { %v15211_v24 = vpop.permute.xlu0 %366 }
  0x93   : > { %778 = vrot.lane.b32.xlu1 %v14880_v2, %s14821_s24 }
  0x94   : > { %776 = vrot.lane.b32.xlu0 %v14873_v0, %s14821_s24 }
  0x95   : > { %v15217_v25 = vpop.permute.xlu1 %372 }
  0x96   : > { %v15219_v59 = vpop.permute.xlu0 %370 }
  0x97   : > { %782 = vrot.lane.b32.xlu1 %v14887_v4, %s14821_s24 }
  0x98   : > { %780 = vrot.lane.b32.xlu0 %v14890_v5, %s14821_s24 }
  0x99   : > { %v15225_v62 = vpop.permute.xlu1 %376 }
  0x9a   : > { %v15227_v31 = vpop.permute.xlu0 %374 }
  0x9b   : > { %786 = vrot.lane.b32.xlu1 %v14897_v6, %s14821_s24 }
  0x9c   : > { %784 = vrot.lane.b32.xlu0 %v14900_v7, %s14821_s24 }
  0x9d   : > { %v15233_v0 = vpop.permute.xlu1 %380 }
  0x9e   : > { %v15235_v2 = vpop.permute.xlu0 %378 }
  0x9f   : > { %790 = vrot.lane.b32.xlu1 %v14907_v8, %s14821_s24 }
  0xa0   : > { %788 = vrot.lane.b32.xlu0 %v14910_v9, %s14821_s24 }
  0xa1   : > { %v15241_v5 = vpop.permute.xlu1 %384 }
  0xa2   : > { %v15243_v4 = vpop.permute.xlu0 %382 }
  0xa3   : > { %794 = vrot.lane.b32.xlu1 %v14917_v10, %s14821_s24 }
  0xa4   : > { %792 = vrot.lane.b32.xlu0 %v14920_v11, %s14821_s24 }
  0xa5   : > { %v15249_v7 = vpop.permute.xlu1 %388 }
  0xa6   : > { %21672 = vst [vmem:[#allocation26_spill] sm:$0xff] %v15249_v7  ;;  %v15251_v6 = vpop.permute.xlu0 %386 }
  0xa7   : > { %21673 = vst [vmem:[#allocation27_spill] sm:$0xff] %v15251_v6  ;;  %798 = vrot.lane.b32.xlu1 %v14927_v12, %s14821_s24 }
  0xa8   : > { %796 = vrot.lane.b32.xlu0 %v14930_v13, %s14821_s24 }
  0xa9   : > { %v15257_v9 = vpop.permute.xlu1 %392 }
  0xaa   : > { %21674 = vst [vmem:[#allocation28_spill] sm:$0xff] %v15257_v9  ;;  %v15259_v8 = vpop.permute.xlu0 %390 }
  0xab   : > { %21675 = vst [vmem:[#allocation29_spill] sm:$0xff] %v15259_v8  ;;  %802 = vrot.lane.b32.xlu1 %v14937_v14, %s14821_s24 }
  0xac   : > { %800 = vrot.lane.b32.xlu0 %v14940_v15, %s14821_s24 }
  0xad   : > { %v15265_v11 = vpop.permute.xlu1 %396 }
  0xae   : > { %21676 = vst [vmem:[#allocation30_spill] sm:$0xff] %v15265_v11  ;;  %v15267_v7 = vpop.permute.xlu0 %394 }
  0xaf   : > { %21677 = vst [vmem:[#allocation31_spill] sm:$0xff] %v15267_v7  ;;  %806 = vrot.lane.b32.xlu1 %v14947_v16, %s14821_s24 }
  0xb0   : > { %804 = vrot.lane.b32.xlu0 %v14950_v17, %s14821_s24 }
  0xb1   : > { %v15273_v6 = vpop.permute.xlu1 %400 }
  0xb2   : > { %21678 = vst [vmem:[#allocation32_spill] sm:$0xff] %v15273_v6  ;;  %v15275_v9 = vpop.permute.xlu0 %398 }
  0xb3   : > { %21679 = vst [vmem:[#allocation33_spill] sm:$0xff] %v15275_v9  ;;  %810 = vrot.lane.b32.xlu1 %v14957_v18, %s14821_s24 }
  0xb4   : > { %808 = vrot.lane.b32.xlu0 %v14960_v19, %s14821_s24 }
  0xb5   : > { %v15281_v8 = vpop.permute.xlu1 %404 }
  0xb6   : > { %21680 = vst [vmem:[#allocation34_spill] sm:$0xff] %v15281_v8  ;;  %v15283_v11 = vpop.permute.xlu0 %402 }
  0xb7   : > { %21681 = vst [vmem:[#allocation35_spill] sm:$0xff] %v15283_v11  ;;  %814 = vrot.lane.b32.xlu1 %v14967_v20, %s14821_s24 }
  0xb8   : > { %812 = vrot.lane.b32.xlu0 %v14970_v21, %s14821_s24 }
  0xb9   : > { %v15289_v6 = vpop.permute.xlu1 %408 }
  0xba   : > { %21682 = vst [vmem:[#allocation36_spill] sm:$0xff] %v15289_v6  ;;  %v15291_v9 = vpop.permute.xlu0 %406  ;;  %v11842_v6 = vld [vmem:[%s21522_s1 + $0x18] sm:$0xff] }
  0xbb   : > { %21683 = vst [vmem:[#allocation37_spill] sm:$0xff] %v15291_v9  ;;  %818 = vrot.lane.b32.xlu1 %v14977_v22, %s14821_s24  ;;  %v11843_v9 = vld [vmem:[%s21522_s1 + $0x20] sm:$0xff] }
  0xbc   : > { %816 = vrot.lane.b32.xlu0 %v14980_v23, %s14821_s24  ;;  %v11651_v23 = vld [vmem:[%s14870_s23 + $0xef] sm:$0xff] }
  0xbd   : > { %v15297_v8 = vpop.permute.xlu1 %412 }
  0xbe   : > { %21684 = vst [vmem:[#allocation38_spill] sm:$0xff] %v15297_v8  ;;  %v15299_v11 = vpop.permute.xlu0 %410 }
  0xbf   : > { %21685 = vst [vmem:[#allocation39_spill] sm:$0xff] %v15299_v11  ;;  %822 = vrot.lane.b32.xlu1 %v14993_v26, %s14821_s24  ;;  %v14390_v11 = vpack.c.bf16 %v11843_v9, %v11842_v6  ;;  %v11650_v26 = vld [vmem:[%s14870_s23 + $0xe7] sm:$0xff]  ;;  %v15329_v9 = vld [vmem:[%s14870_s23 + $0x10f] sm:$0xff] }
  0xc0   : > { %820 = vrot.lane.b32.xlu0 %v14996_v27, %s14821_s24  ;;  %v579_v27 = vsel %vm578_vm0, %v11650_v26, %v15175_v3  ;;  %v15326_v6 = vld [vmem:[%s14870_s23 + $0x107] sm:$0xff] }
  0xc1   : > { %v15311_v7 = vpop.permute.xlu1 %416  ;;  %14391 = vmatprep.subr.bf16.mxu1 %v14390_v11  ;;  %v11844_v26 = vld [vmem:[%s21522_s1 + $0x28] sm:$0xff] }
  0xc2   : > { %21686 = vst [vmem:[#allocation40_spill] sm:$0xff] %v15311_v7  ;;  %v15313_v8 = vpop.permute.xlu0 %414  ;;  %v580_v7 = vsel %vm578_vm0, %v11651_v23, %v15189_v37  ;;  %14393 = vmatpush3.bf16.msra.mxu1 %v14390_v11  ;;  %v15349_v23 = vld [vmem:[%s14870_s23 + $0x12f] sm:$0xff] }
  0xc3   : > { %21687 = vst [vmem:[#allocation41_spill] sm:$0xff] %v15313_v8  ;;  %826 = vrot.lane.b32.xlu1 %v15006_v29, %s14821_s24  ;;  %13584 = vmatprep.subr.mxu1 %v11844_v26 }
  0xc4   : > { %824 = vrot.lane.b32.xlu0 %v15009_v30, %s14821_s24 }
  0xc5   : > { %v485_v8 = vpop.permute.xlu1 %484 }
  0xc6   : > { %v483_v22 = vpop.permute.xlu0 %482  ;;  %v613_v30 = vsel %vm611_vm1, %v580_v7, %v485_v8  ;;  %v581_v7 = vsel %vm578_vm0, %v15326_v6, %v15173_v1  ;;  %v582_v8 = vsel %vm578_vm0, %v15329_v9, %v15187_v36  ;;  %13585 = vmatpush3.msra.mxu1 %v11844_v26  ;;  %v15366_v1 = vld [vmem:[%s14870_s23 + $0x2e8] sm:$0xff]  ;;  %v584_v36 = vsel %vm578_vm0, %v15349_v23, %v15201_v61 }
  0xc7   : > { %v612_v29 = vsel %vm611_vm1, %v579_v27, %v483_v22  ;;  %830 = vrot.lane.b32.xlu1 %v15023_v32, %s14821_s24  ;;  %v15352_v27 = vld [vmem:[%s14870_s23 + $0x127] sm:$0xff]  ;;  %14450 = vmatprep.subr.bf16.mxu1 %v14998_v28 }
  0xc8   : > { %828 = vrot.lane.b32.xlu0 %v15026_v33, %s14821_s24  ;;  %13640 = vmatprep.mubr.msk.f32.mxu0 %vm1068_vm2, %v612_v29  ;;  %v583_v37 = vsel %vm578_vm0, %v15352_v27, %v15203_v63 }
  0xc9   : > { %13641 = vmatmul.mubr.msk.f32.vlgmr.msra.gmra.mrb[0].mxu0 %vm1068_vm2, %v613_v30  ;;  %v489_v11 = vpop.permute.xlu1 %488  ;;  %v15363_v30 = vld [vmem:[%s14870_s23 + $0x2f0] sm:$0xff] }
  0xca   : > { %v487_v22 = vpop.permute.xlu0 %486  ;;  %v615_v29 = vsel %vm611_vm1, %v582_v8, %v489_v11  ;;  %v15376_v8 = vld [vmem:[%s14870_s23 + $0x14f] sm:$0xff]  ;;  %v15379_v11 = vld [vmem:[%s14870_s23 + $0x147] sm:$0xff] }
  0xcb   : > { %v614_v3 = vsel %vm611_vm1, %v581_v7, %v487_v22  ;;  %834 = vrot.lane.b32.xlu1 %v15034_v34, %s14821_s24  ;;  %v586_v61 = vsel %vm578_vm0, %v15376_v8, %v15209_v60  ;;  %v585_v63 = vsel %vm578_vm0, %v15379_v11, %v15211_v24 }
  0xcc   : > { %832 = vrot.lane.b32.xlu0 %v15037_v35, %s14821_s24  ;;  %13643 = vmatprep.mubr.msk.f32.mxu0 %vm1068_vm2, %v614_v3 }
  0xcd   : > { %13644 = vmatmul.mubr.msk.f32.gmra.mrb[2].mxu0 %vm1068_vm2, %v615_v29  ;;  %v493_v26 = vpop.permute.xlu1 %492 }
  0xce   : > { %v491_v7 = vpop.permute.xlu0 %490  ;;  %v617_v22 = vsel %vm611_vm1, %v584_v36, %v493_v26  ;;  %v15399_v26 = vld [vmem:[%s14870_s23 + $0x167] sm:$0xff] }
  0xcf   : > { %v616_v3 = vsel %vm611_vm1, %v583_v37, %v491_v7  ;;  %838 = vrot.lane.b32.xlu1 %v15363_v30, %s14821_s24  ;;  %v15396_v37 = vld [vmem:[%s14870_s23 + $0x16f] sm:$0xff]  ;;  %v587_v24 = vsel %vm578_vm0, %v15399_v26, %v15219_v59 }
  0xd0   : > { %836 = vrot.lane.b32.xlu0 %v15366_v1, %s14821_s24  ;;  %13646 = vmatprep.mubr.msk.f32.mxu0 %vm1068_vm2, %v616_v3  ;;  %v588_v60 = vsel %vm578_vm0, %v15396_v37, %v15217_v25 }
  0xd1   : > { %13647 = vmatmul.mubr.msk.f32.gmra.mrb[4].mxu0 %vm1068_vm2, %v617_v22  ;;  %v497_v29 = vpop.permute.xlu1 %496 }
  0xd2   : > { %v495_v36 = vpop.permute.xlu0 %494  ;;  %v619_v7 = vsel %vm611_vm1, %v586_v61, %v497_v29 }
  0xd3   : > { %v618_v3 = vsel %vm611_vm1, %v585_v63, %v495_v36  ;;  %906 = vrot.lane.b32.xlu1 %v15048_v38, %s14822_s6  ;;  %v15416_v38 = vld [vmem:[%s14870_s23 + $0x18f] sm:$0xff]  ;;  %v15419_v63 = vld [vmem:[%s14870_s23 + $0x187] sm:$0xff] }
  0xd4   : > { %904 = vrot.lane.b32.xlu0 %v15051_v39, %s14822_s6  ;;  %13649 = vmatprep.mubr.msk.f32.mxu0 %vm1068_vm2, %v618_v3  ;;  %v590_v59 = vsel %vm578_vm0, %v15416_v38, %v15225_v62  ;;  %v589_v25 = vsel %vm578_vm0, %v15419_v63, %v15227_v31  ;;  %v15439_v3 = vld [vmem:[%s14870_s23 + $0x1a7] sm:$0xff] }
  0xd5   : > { %13650 = vmatmul.mubr.msk.f32.gmra.mrb[6].mxu0 %vm1068_vm2, %v619_v7  ;;  %v501_v22 = vpop.permute.xlu1 %500  ;;  %v591_v62 = vsel %vm578_vm0, %v15439_v3, %v15235_v2 }
  0xd6   : > { %v499_v61 = vpop.permute.xlu0 %498  ;;  %v621_v39 = vsel %vm611_vm1, %v588_v60, %v501_v22 }
  0xd7   : > { %v620_v29 = vsel %vm611_vm1, %v587_v24, %v499_v61  ;;  %910 = vrot.lane.b32.xlu1 %v15058_v40, %s14822_s6  ;;  %v15436_v40 = vld [vmem:[%s14870_s23 + $0x1af] sm:$0xff] }
  0xd8   : > { %908 = vrot.lane.b32.xlu0 %v15061_v41, %s14822_s6  ;;  %13652 = vmatprep.mubr.msk.f32.mxu0 %vm1068_vm2, %v620_v29  ;;  %v592_v31 = vsel %vm578_vm0, %v15436_v40, %v15233_v0  ;;  %v15456_v61 = vld [vmem:[%s14870_s23 + $0x1cf] sm:$0xff] }
  0xd9   : > { %13653 = vmatmul.mubr.msk.f32.gmra.mrb[8].mxu0 %vm1068_vm2, %v621_v39  ;;  %v505_v36 = vpop.permute.xlu1 %504  ;;  %v594_v0 = vsel %vm578_vm0, %v15456_v61, %v15241_v5 }
  0xda   : > { %v503_v7 = vpop.permute.xlu0 %502  ;;  %v623_v41 = vsel %vm611_vm1, %v590_v59, %v505_v36 }
  0xdb   : > { %v622_v60 = vsel %vm611_vm1, %v589_v25, %v503_v7  ;;  %914 = vrot.lane.b32.xlu1 %v15068_v42, %s14822_s6  ;;  %v15459_v42 = vld [vmem:[%s14870_s23 + $0x1c7] sm:$0xff] }
  0xdc   : > { %912 = vrot.lane.b32.xlu0 %v15071_v43, %s14822_s6  ;;  %13655 = vmatprep.mubr.msk.f32.mxu0 %vm1068_vm2, %v622_v60  ;;  %v593_v2 = vsel %vm578_vm0, %v15459_v42, %v15243_v4 }
  0xdd   : > { %13656 = vmatmul.mubr.msk.f32.gmra.mrb[10].mxu0 %vm1068_vm2, %v623_v41  ;;  %v509_v24 = vpop.permute.xlu1 %508 }
  0xde   : > { %v507_v22 = vpop.permute.xlu0 %506  ;;  %v625_v43 = vsel %vm611_vm1, %v592_v31, %v509_v24  ;;  %v21705_v31 = vld [vmem:[#allocation21_spill] sm:$0xff] }
  0xdf   : > { %v624_v39 = vsel %vm611_vm1, %v591_v62, %v507_v22  ;;  %918 = vrot.lane.b32.xlu1 %v15078_v44, %s14822_s6  ;;  %v21708_v22 = vld [vmem:[#allocation22_spill] sm:$0xff] }
  0xe0   : > { %916 = vrot.lane.b32.xlu0 %v15081_v45, %s14822_s6  ;;  %13658 = vmatprep.mubr.msk.f32.mxu0 %vm1068_vm2, %v624_v39 }
  0xe1   : > { %13659 = vmatmul.mubr.msk.f32.gmra.mrb[12].mxu0 %vm1068_vm2, %v625_v43  ;;  %v513_v29 = vpop.permute.xlu1 %512  ;;  %v21709_v43 = vld [vmem:[#allocation23_spill] sm:$0xff] }
  0xe2   : > { %v511_v59 = vpop.permute.xlu0 %510  ;;  %v627_v25 = vsel %vm611_vm1, %v594_v0, %v513_v29  ;;  %v21713_v29 = vld [vmem:[#allocation25_spill] sm:$0xff] }
  0xe3   : > { %v626_v44 = vsel %vm611_vm1, %v593_v2, %v511_v59  ;;  %922 = vrot.lane.b32.xlu1 %v15088_v46, %s14822_s6  ;;  %v21712_v2 = vld [vmem:[#allocation24_spill] sm:$0xff] }
  0xe4   : > { %920 = vrot.lane.b32.xlu0 %v15091_v47, %s14822_s6  ;;  %13661 = vmatprep.mubr.msk.f32.mxu0 %vm1068_vm2, %v626_v44  ;;  %v15564_v59 = vld [vmem:[%s14870_s23 + $0x2f1] sm:$0xff] }
  0xe5   : > { %13662 = vmatmul.mubr.msk.f32.gmra.mrb[14].mxu0 %vm1068_vm2, %v627_v25  ;;  %v15483_v5 = vpop.permute.xlu1 %516  ;;  %v15567_v25 = vld [vmem:[%s14870_s23 + $0x2e9] sm:$0xff] }
  0xe6   : > { %v15485_v4 = vpop.permute.xlu0 %514  ;;  %21714 = vst [vmem:[#allocation24_spill] sm:$0xff] %v15567_v25 }
  0xe7   : > { %926 = vrot.lane.b32.xlu1 %v15098_v48, %s14822_s6 }
  0xe8   : > { %924 = vrot.lane.b32.xlu0 %v15101_v49, %s14822_s6 }
  0xe9   : > { %v15491_v45 = vpop.permute.xlu1 %520 }
  0xea   : > { %21688 = vst [vmem:[#allocation42_spill] sm:$0xff] %v15491_v45  ;;  %v15493_v46 = vpop.permute.xlu0 %518 }
  0xeb   : > { %930 = vrot.lane.b32.xlu1 %v15108_v50, %s14822_s6 }
  0xec   : > { %928 = vrot.lane.b32.xlu0 %v15111_v51, %s14822_s6 }
  0xed   : > { %v15499_v47 = vpop.permute.xlu1 %524 }
  0xee   : > { %21689 = vst [vmem:[#allocation43_spill] sm:$0xff] %v15499_v47  ;;  %v15501_v36 = vpop.permute.xlu0 %522 }
  0xef   : > { %21690 = vst [vmem:[#allocation44_spill] sm:$0xff] %v15501_v36  ;;  %934 = vrot.lane.b32.xlu1 %v15118_v52, %s14822_s6 }
  0xf0   : > { %932 = vrot.lane.b32.xlu0 %v15121_v53, %s14822_s6 }
  0xf1   : > { %v15507_v48 = vpop.permute.xlu1 %528 }
  0xf2   : > { %21691 = vst [vmem:[#allocation45_spill] sm:$0xff] %v15507_v48  ;;  %v15509_v49 = vpop.permute.xlu0 %526 }
  0xf3   : > { %21692 = vst [vmem:[#allocation46_spill] sm:$0xff] %v15509_v49  ;;  %938 = vrot.lane.b32.xlu1 %v15128_v54, %s14822_s6  ;;  %v21697_v54 = vld [vmem:[#allocation17_spill] sm:$0xff]  ;;  %v21752_v49 = vld [vmem:[#allocation14_spill] sm:$0xff] }
  0xf4   : > { %936 = vrot.lane.b32.xlu0 %v15131_v55, %s14822_s6 }
  0xf5   : > { %v15515_v50 = vpop.permute.xlu1 %532 }
  0xf6   : > { %21693 = vst [vmem:[#allocation47_spill] sm:$0xff] %v15515_v50  ;;  %v15517_v51 = vpop.permute.xlu0 %530 }
  0xf7   : > { %21694 = vst [vmem:[#allocation48_spill] sm:$0xff] %v15517_v51  ;;  %942 = vrot.lane.b32.xlu1 %v15138_v56, %s14822_s6  ;;  %v21700_v56 = vld [vmem:[#allocation18_spill] sm:$0xff]  ;;  %v21748_v51 = vld [vmem:[#allocation12_spill] sm:$0xff] }
  0xf8   : > { %940 = vrot.lane.b32.xlu0 %v15141_v57, %s14822_s6  ;;  %v21701_v57 = vld [vmem:[#allocation19_spill] sm:$0xff] }
  0xf9   : > { %v15523_v52 = vpop.permute.xlu1 %536 }
  0xfa   : > { %21695 = vst [vmem:[#allocation49_spill] sm:$0xff] %v15523_v52  ;;  %v15525_v53 = vpop.permute.xlu0 %534 }
  0xfb   : > { %21696 = vst [vmem:[#allocation50_spill] sm:$0xff] %v15525_v53  ;;  %946 = vrot.lane.b32.xlu1 %v15148_v58, %s14822_s6  ;;  %v21704_v58 = vld [vmem:[#allocation20_spill] sm:$0xff]  ;;  %v21744_v53 = vld [vmem:[#allocation10_spill] sm:$0xff] }
  0xfc   : > { %944 = vrot.lane.b32.xlu0 %v21697_v54, %s14822_s6 }
  0xfd   : > { %v15531_v55 = vpop.permute.xlu1 %540 }
  0xfe   : > { %21698 = vst [vmem:[#allocation17_spill] sm:$0xff] %v15531_v55  ;;  %v15533_v7 = vpop.permute.xlu0 %538  ;;  %v21727_v55 = vld [vmem:[#allocation7_spill] sm:$0xff] }
  0xff   : > { %21699 = vst [vmem:[#allocation51_spill] sm:$0xff] %v15533_v7  ;;  %950 = vrot.lane.b32.xlu1 %v21700_v56, %s14822_s6 }
 0x100   : > { %948 = vrot.lane.b32.xlu0 %v21701_v57, %s14822_s6 }
 0x101   : > { %v15539_v41 = vpop.permute.xlu1 %544 }
 0x102   : > { %21702 = vst [vmem:[#allocation18_spill] sm:$0xff] %v15539_v41  ;;  %v15541_v60 = vpop.permute.xlu0 %542 }
 0x103   : > { %21703 = vst [vmem:[#allocation19_spill] sm:$0xff] %v15541_v60  ;;  %954 = vrot.lane.b32.xlu1 %v21704_v58, %s14822_s6  ;;  %v21719_v58 = vld [vmem:[#allocation3_spill] sm:$0xff] }
 0x104   : > { %952 = vrot.lane.b32.xlu0 %v21705_v31, %s14822_s6  ;;  %v21720_v31 = vld [vmem:[#allocation4_spill] sm:$0xff] }
 0x105   : > { %v15547_v62 = vpop.permute.xlu1 %778 }
 0x106   : > { %21706 = vst [vmem:[#allocation20_spill] sm:$0xff] %v15547_v62  ;;  %v15549_v24 = vpop.permute.xlu0 %776 }
 0x107   : > { %21707 = vst [vmem:[#allocation21_spill] sm:$0xff] %v15549_v24  ;;  %958 = vrot.lane.b32.xlu1 %v21708_v22, %s14822_s6 }
 0x108   : > { %956 = vrot.lane.b32.xlu0 %v21709_v43, %s14822_s6 }
 0x109   : > { %v15555_v39 = vpop.permute.xlu1 %782 }
 0x10a   : > { %21710 = vst [vmem:[#allocation22_spill] sm:$0xff] %v15555_v39  ;;  %v15557_v0 = vpop.permute.xlu0 %780 }
 0x10b   : > { %21711 = vst [vmem:[#allocation23_spill] sm:$0xff] %v15557_v0  ;;  %962 = vrot.lane.b32.xlu1 %v21712_v2, %s14822_s6  ;;  %v21723_v2 = vld [vmem:[#allocation5_spill] sm:$0xff] }
 0x10c   : > { %960 = vrot.lane.b32.xlu0 %v21713_v29, %s14822_s6  ;;  %v21724_v29 = vld [vmem:[#allocation6_spill] sm:$0xff] }
 0x10d   : > { %v15569_v44 = vpop.permute.xlu1 %786 }
 0x10e   : > { %21715 = vst [vmem:[#allocation25_spill] sm:$0xff] %v15569_v44  ;;  %v15571_v54 = vpop.permute.xlu0 %784 }
 0x10f   : > { %21716 = vst [vmem:[#allocation52_spill] sm:$0xff] %v15571_v54  ;;  %966 = vrot.lane.b32.xlu1 %v15564_v59, %s14822_s6 }
 0x110   : > { %964 = vrot.lane.b32.xlu0 %v15567_v25, %s14822_s6  ;;  %v1000_v25 = vsel %vm578_vm0, %v15326_v6, %v15549_v24 }
 0x111   : > { %v15577_v56 = vpop.permute.xlu1 %790 }
 0x112   : > { %21717 = vst [vmem:[#allocation53_spill] sm:$0xff] %v15577_v56  ;;  %v15579_v57 = vpop.permute.xlu0 %788 }
 0x113   : > { %21718 = vst [vmem:[#allocation54_spill] sm:$0xff] %v15579_v57  ;;  %1842 = vrot.lane.b32.xlu1 %v21719_v58, %s14821_s24  ;;  %v21728_v58 = vld [vmem:[#allocation8_spill] sm:$0xff] }
 0x114   : > { %1840 = vrot.lane.b32.xlu0 %v21720_v31, %s14821_s24 }
 0x115   : > { %v15585_v22 = vpop.permute.xlu1 %794 }
 0x116   : > { %21721 = vst [vmem:[#allocation3_spill] sm:$0xff] %v15585_v22  ;;  %v15587_v43 = vpop.permute.xlu0 %792 }
 0x117   : > { %21722 = vst [vmem:[#allocation4_spill] sm:$0xff] %v15587_v43  ;;  %1846 = vrot.lane.b32.xlu1 %v21723_v2, %s14821_s24  ;;  %v21731_v2 = vld [vmem:[#allocation9_spill] sm:$0xff] }
 0x118   : > { %1844 = vrot.lane.b32.xlu0 %v21724_v29, %s14821_s24 }
 0x119   : > { %v15593_v41 = vpop.permute.xlu1 %798 }
 0x11a   : > { %21725 = vst [vmem:[#allocation5_spill] sm:$0xff] %v15593_v41  ;;  %v15595_v60 = vpop.permute.xlu0 %796 }
 0x11b   : > { %21726 = vst [vmem:[#allocation6_spill] sm:$0xff] %v15595_v60  ;;  %1850 = vrot.lane.b32.xlu1 %v21727_v55, %s14821_s24 }
 0x11c   : > { %1848 = vrot.lane.b32.xlu0 %v21728_v58, %s14821_s24 }
 0x11d   : > { %v15601_v31 = vpop.permute.xlu1 %802 }
 0x11e   : > { %21729 = vst [vmem:[#allocation7_spill] sm:$0xff] %v15601_v31  ;;  %v15603_v7 = vpop.permute.xlu0 %800 }
 0x11f   : > { %21730 = vst [vmem:[#allocation8_spill] sm:$0xff] %v15603_v7  ;;  %1854 = vrot.lane.b32.xlu1 %v14917_v10, %s14821_s24 }
 0x120   : > { %1852 = vrot.lane.b32.xlu0 %v21731_v2, %s14821_s24 }
 0x121   : > { %v15609_v29 = vpop.permute.xlu1 %806 }
 0x122   : > { %21732 = vst [vmem:[#allocation9_spill] sm:$0xff] %v15609_v29  ;;  %v15611_v52 = vpop.permute.xlu0 %804 }
 0x123   : > { %21733 = vst [vmem:[#allocation55_spill] sm:$0xff] %v15611_v52  ;;  %1858 = vrot.lane.b32.xlu1 %v14927_v12, %s14821_s24 }
 0x124   : > { %1856 = vrot.lane.b32.xlu0 %v14930_v13, %s14821_s24 }
 0x125   : > { %v15617_v55 = vpop.permute.xlu1 %810 }
 0x126   : > { %21734 = vst [vmem:[#allocation56_spill] sm:$0xff] %v15617_v55  ;;  %v15619_v58 = vpop.permute.xlu0 %808 }
 0x127   : > { %21735 = vst [vmem:[#allocation57_spill] sm:$0xff] %v15619_v58  ;;  %1862 = vrot.lane.b32.xlu1 %v14937_v14, %s14821_s24 }
 0x128   : > { %1860 = vrot.lane.b32.xlu0 %v14940_v15, %s14821_s24 }
 0x129   : > { %v15625_v10 = vpop.permute.xlu1 %814 }
 0x12a   : > { %21736 = vst [vmem:[#allocation58_spill] sm:$0xff] %v15625_v10  ;;  %v15627_v2 = vpop.permute.xlu0 %812 }
 0x12b   : > { %21737 = vst [vmem:[#allocation59_spill] sm:$0xff] %v15627_v2  ;;  %1866 = vrot.lane.b32.xlu1 %v14947_v16, %s14821_s24 }
 0x12c   : > { %1864 = vrot.lane.b32.xlu0 %v14950_v17, %s14821_s24 }
 0x12d   : > { %v15633_v12 = vpop.permute.xlu1 %818 }
 0x12e   : > { %21738 = vst [vmem:[#allocation60_spill] sm:$0xff] %v15633_v12  ;;  %v15635_v13 = vpop.permute.xlu0 %816 }
 0x12f   : > { %21739 = vst [vmem:[#allocation61_spill] sm:$0xff] %v15635_v13  ;;  %1870 = vrot.lane.b32.xlu1 %v14957_v18, %s14821_s24  ;;  %v21745_v18 = vld [vmem:[#allocation11_spill] sm:$0xff] }
 0x130   : > { %1868 = vrot.lane.b32.xlu0 %v14960_v19, %s14821_s24 }
 0x131   : > { %v15641_v14 = vpop.permute.xlu1 %822 }
 0x132   : > { %21740 = vst [vmem:[#allocation62_spill] sm:$0xff] %v15641_v14  ;;  %v15643_v15 = vpop.permute.xlu0 %820 }
 0x133   : > { %21741 = vst [vmem:[#allocation63_spill] sm:$0xff] %v15643_v15  ;;  %1874 = vrot.lane.b32.xlu1 %v14967_v20, %s14821_s24  ;;  %v21749_v20 = vld [vmem:[#allocation13_spill] sm:$0xff] }
 0x134   : > { %1872 = vrot.lane.b32.xlu0 %v14970_v21, %s14821_s24 }
 0x135   : > { %v15649_v16 = vpop.permute.xlu1 %826 }
 0x136   : > { %21742 = vst [vmem:[#allocation64_spill] sm:$0xff] %v15649_v16  ;;  %v15651_v17 = vpop.permute.xlu0 %824 }
 0x137   : > { %21743 = vst [vmem:[#allocation65_spill] sm:$0xff] %v15651_v17  ;;  %1878 = vrot.lane.b32.xlu1 %v21744_v53, %s14821_s24  ;;  %v21753_v53 = vld [vmem:[#allocation15_spill] sm:$0xff] }
 0x138   : > { %1876 = vrot.lane.b32.xlu0 %v21745_v18, %s14821_s24  ;;  %v12005_v18 = vld [vmem:[%s21522_s1 + $0x30] sm:$0xff] }
 0x139   : > { %v15657_v19 = vpop.permute.xlu1 %830 }
 0x13a   : > { %21746 = vst [vmem:[#allocation10_spill] sm:$0xff] %v15657_v19  ;;  %v15659_v50 = vpop.permute.xlu0 %828 }
 0x13b   : > { %21747 = vst [vmem:[#allocation11_spill] sm:$0xff] %v15659_v50  ;;  %1882 = vrot.lane.b32.xlu1 %v21748_v51, %s14821_s24  ;;  %v12006_v51 = vld [vmem:[%s21522_s1 + $0x38] sm:$0xff] }
 0x13c   : > { %1880 = vrot.lane.b32.xlu0 %v21749_v20, %s14821_s24  ;;  %v14398_v36 = vpack.c.bf16 %v12006_v51, %v12005_v18 }
 0x13d   : > { %v15665_v21 = vpop.permute.xlu1 %834 }
 0x13e   : > { %21750 = vst [vmem:[#allocation12_spill] sm:$0xff] %v15665_v21  ;;  %v15667_v48 = vpop.permute.xlu0 %832  ;;  %14399 = vmatprep.subr.bf16.mxu0 %v14398_v36 }
 0x13f   : > { %21751 = vst [vmem:[#allocation13_spill] sm:$0xff] %v15667_v48  ;;  %1886 = vrot.lane.b32.xlu1 %v21752_v49, %s14821_s24  ;;  %v1001_v49 = vsel %vm578_vm0, %v15329_v9, %v15547_v62  ;;  %14401 = vmatpush3.bf16.msra.mxu0 %v14398_v36  ;;  %v1002_v9 = vsel %vm578_vm0, %v15352_v27, %v15557_v0  ;;  %v11971_v27 = vld [vmem:[%s14870_s23 + $0x308] sm:$0xff]  ;;  %v21756_v36 = vld [vmem:[#allocation16_spill] sm:$0xff] }
 0x140   : > { %1884 = vrot.lane.b32.xlu0 %v21753_v53, %s14821_s24  ;;  %v11912_v0 = vld [vmem:[%s14870_s23 + $0x14f] sm:$0xff] }
 0x141   : > { %v15679_v47 = vpop.permute.xlu1 %838 }
 0x142   : > { %21754 = vst [vmem:[#allocation14_spill] sm:$0xff] %v15679_v47  ;;  %v15681_v20 = vpop.permute.xlu0 %836 }
 0x143   : > { %21755 = vst [vmem:[#allocation15_spill] sm:$0xff] %v15681_v20  ;;  %1890 = vrot.lane.b32.xlu1 %v15023_v32, %s14821_s24  ;;  %v12007_v32 = vld [vmem:[%s21522_s1 + $0x40] sm:$0xff] }
 0x144   : > { %1888 = vrot.lane.b32.xlu0 %v15026_v33, %s14821_s24  ;;  %13692 = vmatprep.subr.mxu0 %v12007_v32  ;;  %v1003_v33 = vsel %vm578_vm0, %v15349_v23, %v15555_v39  ;;  %v11972_v23 = vld [vmem:[%s14870_s23 + $0x310] sm:$0xff]  ;;  %v11911_v39 = vld [vmem:[%s14870_s23 + $0x147] sm:$0xff] }
 0x145   : > { %v907_v53 = vpop.permute.xlu1 %906  ;;  %13693 = vmatpush3.msra.mxu0 %v12007_v32  ;;  %v1006_v32 = vsel %vm578_vm0, %v15399_v26, %v15579_v57  ;;  %v1009_v26 = vsel %vm578_vm0, %v15416_v38, %v15585_v22  ;;  %v11977_v38 = vld [vmem:[%s14870_s23 + $0x169] sm:$0xff] }
 0x146   : > { %v905_v45 = vpop.permute.xlu0 %904  ;;  %v1033_v18 = vsel %vm611_vm1, %v1001_v49, %v907_v53  ;;  %v16255_v22 = vld [vmem:[%s14870_s23 + $0x268] sm:$0xff] }
 0x147   : > { %v1032_v51 = vsel %vm611_vm1, %v1000_v25, %v905_v45  ;;  %1894 = vrot.lane.b32.xlu1 %v15034_v34, %s14821_s24  ;;  %21787 = vst [vmem:[#allocation16_spill] sm:$0xff] %v16255_v22 }
 0x148   : > { %1892 = vrot.lane.b32.xlu0 %v15037_v35, %s14821_s24  ;;  %13586 = vmatprep.mubr.msk.f32.mxu1 %vm1068_vm2, %v1032_v51 }
 0x149   : > { %13587 = vmatmul.mubr.msk.f32.vlgmr.msra.gmra.mrb[0].mxu1 %vm1068_vm2, %v1033_v18  ;;  %v911_v6 = vpop.permute.xlu1 %910  ;;  %v11973_v18 = vld [vmem:[%s14870_s23 + $0x129] sm:$0xff] }
 0x14a   : > { %v909_v34 = vpop.permute.xlu0 %908  ;;  %v1035_v45 = vsel %vm611_vm1, %v1003_v33, %v911_v6  ;;  %14452 = vmatpush3.bf16.msra.mxu1 %v14998_v28  ;;  %v1005_v28 = vsel %vm578_vm0, %v15376_v8, %v15569_v44  ;;  %v11974_v8 = vld [vmem:[%s14870_s23 + $0x131] sm:$0xff] }
 0x14b   : > { %v1034_v35 = vsel %vm611_vm1, %v1002_v9, %v909_v34  ;;  %1898 = vrot.lane.b32.xlu1 %v15363_v30, %s14821_s24  ;;  %14451 = vmatprep.subr.mxu1 %v21756_v36  ;;  %v1004_v30 = vsel %vm578_vm0, %v15379_v11, %v15571_v54  ;;  %v1007_v11 = vsel %vm578_vm0, %v15396_v37, %v15577_v56  ;;  %v11976_v34 = vld [vmem:[%s14870_s23 + $0x151] sm:$0xff]  ;;  %v11975_v37 = vld [vmem:[%s14870_s23 + $0x149] sm:$0xff] }
 0x14c   : > { %1896 = vrot.lane.b32.xlu0 %v15366_v1, %s14821_s24  ;;  %13589 = vmatprep.mubr.msk.f32.mxu1 %vm1068_vm2, %v1034_v35  ;;  %v1008_v35 = vsel %vm578_vm0, %v15419_v63, %v15587_v43  ;;  %v1011_v63 = vsel %vm578_vm0, %v15436_v40, %v15593_v41  ;;  %v11980_v40 = vld [vmem:[%s14870_s23 + $0x191] sm:$0xff]  ;;  %v11909_v41 = vld [vmem:[%s14870_s23 + $0x127] sm:$0xff] }
 0x14d   : > { %13590 = vmatmul.mubr.msk.f32.gmra.mrb[2].mxu1 %vm1068_vm2, %v1035_v45  ;;  %v915_v25 = vpop.permute.xlu1 %914  ;;  %v16252_v43 = vld [vmem:[%s14870_s23 + $0x270] sm:$0xff] }
 0x14e   : > { %v913_v1 = vpop.permute.xlu0 %912  ;;  %v1037_v49 = vsel %vm611_vm1, %v1005_v28, %v915_v25  ;;  %14453 = vmatpush3.msra.mxu1 %v21756_v36  ;;  %v11978_v28 = vld [vmem:[%s14870_s23 + $0x171] sm:$0xff] }
 0x14f   : > { %v1036_v53 = vsel %vm611_vm1, %v1004_v30, %v913_v1  ;;  %1902 = vrot.lane.b32.xlu1 %v11972_v23, %s14821_s24  ;;  %v1010_v30 = vsel %vm578_vm0, %v15439_v3, %v15595_v60  ;;  %v1013_v3 = vsel %vm578_vm0, %v15456_v61, %v15601_v31  ;;  %v11982_v61 = vld [vmem:[%s14870_s23 + $0x1b1] sm:$0xff] }
 0x150   : > { %1900 = vrot.lane.b32.xlu0 %v11971_v27, %s14821_s24  ;;  %13592 = vmatprep.mubr.msk.f32.mxu1 %vm1068_vm2, %v1036_v53  ;;  %v11910_v60 = vld [vmem:[%s14870_s23 + $0x12f] sm:$0xff] }
 0x151   : > { %13593 = vmatmul.mubr.msk.f32.gmra.mrb[4].mxu1 %vm1068_vm2, %v1037_v49  ;;  %v919_v51 = vpop.permute.xlu1 %918 }
 0x152   : > { %v917_v33 = vpop.permute.xlu0 %916  ;;  %v1039_v6 = vsel %vm611_vm1, %v1007_v11, %v919_v51  ;;  %v1012_v11 = vsel %vm578_vm0, %v15459_v42, %v15603_v7  ;;  %v11981_v42 = vld [vmem:[%s14870_s23 + $0x1a9] sm:$0xff] }
 0x153   : > { %v1038_v9 = vsel %vm611_vm1, %v1006_v32, %v917_v33  ;;  %1970 = vrot.lane.b32.xlu1 %v11974_v8, %s14822_s6  ;;  %v11979_v8 = vld [vmem:[%s14870_s23 + $0x189] sm:$0xff] }
 0x154   : > { %1968 = vrot.lane.b32.xlu0 %v11973_v18, %s14822_s6  ;;  %13595 = vmatprep.mubr.msk.f32.mxu1 %vm1068_vm2, %v1038_v9  ;;  %v15793_v9 = vld [vmem:[%s14870_s23 + $0x1e7] sm:$0xff] }
 0x155   : > { %13596 = vmatmul.mubr.msk.f32.gmra.mrb[6].mxu1 %vm1068_vm2, %v1039_v6  ;;  %v923_v45 = vpop.permute.xlu1 %922  ;;  %v15788_v6 = vld [vmem:[%s14870_s23 + $0x1ef] sm:$0xff] }
 0x156   : > { %v921_v23 = vpop.permute.xlu0 %920  ;;  %v1041_v27 = vsel %vm611_vm1, %v1009_v26, %v923_v45  ;;  %v1014_v26 = vsel %vm578_vm0, %v15793_v9, %v15611_v52  ;;  %v16236_v52 = vld [vmem:[%s14870_s23 + $0x250] sm:$0xff] }
 0x157   : > { %v1040_v36 = vsel %vm611_vm1, %v1008_v35, %v921_v23  ;;  %1974 = vrot.lane.b32.xlu1 %v11976_v34, %s14822_s6  ;;  %v1015_v34 = vsel %vm578_vm0, %v15788_v6, %v15609_v29  ;;  %v16239_v29 = vld [vmem:[%s14870_s23 + $0x248] sm:$0xff] }
 0x158   : > { %1972 = vrot.lane.b32.xlu0 %v11975_v37, %s14822_s6  ;;  %13598 = vmatprep.mubr.msk.f32.mxu1 %vm1068_vm2, %v1040_v36  ;;  %v15813_v36 = vld [vmem:[%s14870_s23 + $0x207] sm:$0xff] }
 0x159   : > { %13599 = vmatmul.mubr.msk.f32.gmra.mrb[8].mxu1 %vm1068_vm2, %v1041_v27  ;;  %v927_v25 = vpop.permute.xlu1 %926  ;;  %v15808_v27 = vld [vmem:[%s14870_s23 + $0x20f] sm:$0xff] }
 0x15a   : > { %v925_v1 = vpop.permute.xlu0 %924  ;;  %v1043_v49 = vsel %vm611_vm1, %v1011_v63, %v927_v25  ;;  %v1017_v63 = vsel %vm578_vm0, %v15808_v27, %v15617_v55 }
 0x15b   : > { %v1042_v53 = vsel %vm611_vm1, %v1010_v30, %v925_v1  ;;  %1978 = vrot.lane.b32.xlu1 %v11978_v28, %s14822_s6  ;;  %v11984_v28 = vld [vmem:[%s14870_s23 + $0x1d1] sm:$0xff]  ;;  %v1016_v30 = vsel %vm578_vm0, %v15813_v36, %v15619_v58 }
 0x15c   : > { %1976 = vrot.lane.b32.xlu0 %v11977_v38, %s14822_s6  ;;  %13601 = vmatprep.mubr.msk.f32.mxu1 %vm1068_vm2, %v1042_v53  ;;  %v11983_v38 = vld [vmem:[%s14870_s23 + $0x1c9] sm:$0xff] }
 0x15d   : > { %13602 = vmatmul.mubr.msk.f32.gmra.mrb[10].mxu1 %vm1068_vm2, %v1043_v49  ;;  %v931_v18 = vpop.permute.xlu1 %930 }
 0x15e   : > { %v929_v51 = vpop.permute.xlu0 %928  ;;  %v1045_v32 = vsel %vm611_vm1, %v1013_v3, %v931_v18  ;;  %v11986_v3 = vld [vmem:[%s14870_s23 + $0x1f1] sm:$0xff]  ;;  %v11985_v18 = vld [vmem:[%s14870_s23 + $0x1e9] sm:$0xff] }
 0x15f   : > { %v1044_v33 = vsel %vm611_vm1, %v1012_v11, %v929_v51  ;;  %1982 = vrot.lane.b32.xlu1 %v11980_v40, %s14822_s6  ;;  %v15828_v40 = vld [vmem:[%s14870_s23 + $0x22f] sm:$0xff] }
 0x160   : > { %1980 = vrot.lane.b32.xlu0 %v11979_v8, %s14822_s6  ;;  %13604 = vmatprep.mubr.msk.f32.mxu1 %vm1068_vm2, %v1044_v33  ;;  %v15833_v8 = vld [vmem:[%s14870_s23 + $0x227] sm:$0xff]  ;;  %v1019_v11 = vsel %vm578_vm0, %v15828_v40, %v15625_v10 }
 0x161   : > { %13605 = vmatmul.mubr.msk.f32.gmra.mrb[12].mxu1 %vm1068_vm2, %v1045_v32  ;;  %v935_v37 = vpop.permute.xlu1 %934  ;;  %v1018_v32 = vsel %vm578_vm0, %v15833_v8, %v15627_v2  ;;  %v16222_v2 = vld [vmem:[%s14870_s23 + $0x230] sm:$0xff]  ;;  %v16225_v10 = vld [vmem:[%s14870_s23 + $0x228] sm:$0xff] }
 0x162   : > { %v933_v45 = vpop.permute.xlu0 %932  ;;  %v1047_v35 = vsel %vm611_vm1, %v1015_v34, %v935_v37  ;;  %v15848_v34 = vld [vmem:[%s14870_s23 + $0x24f] sm:$0xff]  ;;  %v15853_v37 = vld [vmem:[%s14870_s23 + $0x247] sm:$0xff] }
 0x163   : > { %v1046_v23 = vsel %vm611_vm1, %v1014_v26, %v933_v45  ;;  %1986 = vrot.lane.b32.xlu1 %v11982_v61, %s14822_s6  ;;  %v11988_v26 = vld [vmem:[%s14870_s23 + $0x211] sm:$0xff]  ;;  %v11987_v45 = vld [vmem:[%s14870_s23 + $0x209] sm:$0xff] }
 0x164   : > { %1984 = vrot.lane.b32.xlu0 %v11981_v42, %s14822_s6  ;;  %13607 = vmatprep.mubr.msk.f32.mxu1 %vm1068_vm2, %v1046_v23 }
 0x165   : > { %13608 = vmatmul.mubr.msk.f32.gmra.mrb[14].mxu1 %vm1068_vm2, %v1047_v35  ;;  %v939_v25 = vpop.permute.xlu1 %938  ;;  %v1021_v35 = vsel %vm578_vm0, %v15848_v34, %v15633_v12 }
 0x166   : > { %v937_v1 = vpop.permute.xlu0 %936  ;;  %v1049_v49 = vsel %vm611_vm1, %v1017_v63, %v939_v25 }
 0x167   : > { %v1048_v53 = vsel %vm611_vm1, %v1016_v30, %v937_v1  ;;  %1990 = vrot.lane.b32.xlu1 %v11984_v28, %s14822_s6  ;;  %v1020_v28 = vsel %vm578_vm0, %v15853_v37, %v15635_v13  ;;  %v15868_v30 = vld [vmem:[%s14870_s23 + $0x26f] sm:$0xff]  ;;  %v15873_v1 = vld [vmem:[%s14870_s23 + $0x267] sm:$0xff] }
 0x168   : > { %1988 = vrot.lane.b32.xlu0 %v11983_v38, %s14822_s6  ;;  %13610 = vmatprep.mubr.msk.f32.mxu1 %vm1068_vm2, %v1048_v53  ;;  %v11989_v53 = vld [vmem:[%s14870_s23 + $0x229] sm:$0xff] }
 0x169   : > { %13611 = vmatmul.mubr.msk.f32.gmra.mrb[16].mxu1 %vm1068_vm2, %v1049_v49  ;;  %v943_v51 = vpop.permute.xlu1 %942  ;;  %v11990_v49 = vld [vmem:[%s14870_s23 + $0x231] sm:$0xff] }
 0x16a   : > { %v941_v33 = vpop.permute.xlu0 %940  ;;  %v1051_v61 = vsel %vm611_vm1, %v1019_v11, %v943_v51  ;;  %v1022_v11 = vsel %vm578_vm0, %v15873_v1, %v15643_v15  ;;  %v16208_v15 = vld [vmem:[%s14870_s23 + $0x210] sm:$0xff] }
 0x16b   : > { %v1050_v42 = vsel %vm611_vm1, %v1018_v32, %v941_v33  ;;  %1994 = vrot.lane.b32.xlu1 %v11986_v3, %s14822_s6  ;;  %v1023_v3 = vsel %vm578_vm0, %v15868_v30, %v15641_v14  ;;  %v16211_v14 = vld [vmem:[%s14870_s23 + $0x208] sm:$0xff] }
 0x16c   : > { %1992 = vrot.lane.b32.xlu0 %v11985_v18, %s14822_s6  ;;  %13613 = vmatprep.mubr.msk.f32.mxu1 %vm1068_vm2, %v1050_v42  ;;  %v15893_v42 = vld [vmem:[%s14870_s23 + $0x287] sm:$0xff] }
 0x16d   : > { %13614 = vmatmul.mubr.msk.f32.gmra.mrb[18].mxu1 %vm1068_vm2, %v1051_v61  ;;  %v947_v23 = vpop.permute.xlu1 %946  ;;  %v15888_v61 = vld [vmem:[%s14870_s23 + $0x28f] sm:$0xff] }
 0x16e   : > { %v945_v38 = vpop.permute.xlu0 %944  ;;  %v1053_v63 = vsel %vm611_vm1, %v1021_v35, %v947_v23  ;;  %v1025_v35 = vsel %vm578_vm0, %v15888_v61, %v15649_v16 }
 0x16f   : > { %v1052_v25 = vsel %vm611_vm1, %v1020_v28, %v945_v38  ;;  %1998 = vrot.lane.b32.xlu1 %v11988_v26, %s14822_s6  ;;  %v11992_v26 = vld [vmem:[%s14870_s23 + $0x251] sm:$0xff]  ;;  %v1024_v28 = vsel %vm578_vm0, %v15893_v42, %v15651_v17 }
 0x170   : > { %1996 = vrot.lane.b32.xlu0 %v11987_v45, %s14822_s6  ;;  %13616 = vmatprep.mubr.msk.f32.mxu1 %vm1068_vm2, %v1052_v25  ;;  %v11991_v45 = vld [vmem:[%s14870_s23 + $0x249] sm:$0xff] }
 0x171   : > { %13617 = vmatmul.mubr.msk.f32.gmra.mrb[20].mxu1 %vm1068_vm2, %v1053_v63  ;;  %v951_v18 = vpop.permute.xlu1 %950 }
 0x172   : > { %v949_v51 = vpop.permute.xlu0 %948  ;;  %v1055_v32 = vsel %vm611_vm1, %v1023_v3, %v951_v18  ;;  %v11994_v3 = vld [vmem:[%s14870_s23 + $0x271] sm:$0xff]  ;;  %v11993_v18 = vld [vmem:[%s14870_s23 + $0x269] sm:$0xff] }
 0x173   : > { %v1054_v33 = vsel %vm611_vm1, %v1022_v11, %v949_v51  ;;  %2002 = vrot.lane.b32.xlu1 %v11990_v49, %s14822_s6  ;;  %v15908_v49 = vld [vmem:[%s14870_s23 + $0x2af] sm:$0xff] }
 0x174   : > { %2000 = vrot.lane.b32.xlu0 %v11989_v53, %s14822_s6  ;;  %13619 = vmatprep.mubr.msk.f32.mxu1 %vm1068_vm2, %v1054_v33  ;;  %v15913_v53 = vld [vmem:[%s14870_s23 + $0x2a7] sm:$0xff]  ;;  %v1027_v11 = vsel %vm578_vm0, %v15908_v49, %v15657_v19 }
 0x175   : > { %13620 = vmatmul.mubr.msk.f32.gmra.mrb[22].mxu1 %vm1068_vm2, %v1055_v32  ;;  %v955_v23 = vpop.permute.xlu1 %954  ;;  %v1026_v32 = vsel %vm578_vm0, %v15913_v53, %v15659_v50  ;;  %v16194_v50 = vld [vmem:[%s14870_s23 + $0x1f0] sm:$0xff]  ;;  %v16197_v19 = vld [vmem:[%s14870_s23 + $0x1e8] sm:$0xff] }
 0x176   : > { %v953_v38 = vpop.permute.xlu0 %952  ;;  %v1057_v63 = vsel %vm611_vm1, %v1025_v35, %v955_v23  ;;  %v15928_v35 = vld [vmem:[%s14870_s23 + $0x2cf] sm:$0xff]  ;;  %v15933_v23 = vld [vmem:[%s14870_s23 + $0x2c7] sm:$0xff] }
 0x177   : > { %v1056_v25 = vsel %vm611_vm1, %v1024_v28, %v953_v38  ;;  %2006 = vrot.lane.b32.xlu1 %v11992_v26, %s14822_s6  ;;  %v11996_v28 = vld [vmem:[%s14870_s23 + $0x291] sm:$0xff]  ;;  %v11995_v38 = vld [vmem:[%s14870_s23 + $0x289] sm:$0xff] }
 0x178   : > { %2004 = vrot.lane.b32.xlu0 %v11991_v45, %s14822_s6  ;;  %13622 = vmatprep.mubr.msk.f32.mxu1 %vm1068_vm2, %v1056_v25 }
 0x179   : > { %13623 = vmatmul.mubr.msk.f32.gmra.mrb[24].mxu1 %vm1068_vm2, %v1057_v63  ;;  %v959_v51 = vpop.permute.xlu1 %958  ;;  %v1029_v63 = vsel %vm578_vm0, %v15928_v35, %v15665_v21 }
 0x17a   : > { %v957_v33 = vpop.permute.xlu0 %956  ;;  %v1059_v26 = vsel %vm611_vm1, %v1027_v11, %v959_v51 }
 0x17b   : > { %v1058_v45 = vsel %vm611_vm1, %v1026_v32, %v957_v33  ;;  %2010 = vrot.lane.b32.xlu1 %v11994_v3, %s14822_s6  ;;  %v1028_v3 = vsel %vm578_vm0, %v15933_v23, %v15667_v48  ;;  %v15948_v32 = vld [vmem:[%s14870_s23 + $0x2ef] sm:$0xff]  ;;  %v15951_v33 = vld [vmem:[%s14870_s23 + $0x2e7] sm:$0xff] }
 0x17c   : > { %2008 = vrot.lane.b32.xlu0 %v11993_v18, %s14822_s6  ;;  %13625 = vmatprep.mubr.msk.f32.mxu1 %vm1068_vm2, %v1058_v45  ;;  %v11997_v45 = vld [vmem:[%s14870_s23 + $0x2a9] sm:$0xff] }
 0x17d   : > { %13626 = vmatmul.mubr.msk.f32.gmra.mrb[26].mxu1 %vm1068_vm2, %v1059_v26  ;;  %v963_v25 = vpop.permute.xlu1 %962  ;;  %v11998_v26 = vld [vmem:[%s14870_s23 + $0x2b1] sm:$0xff]  ;;  %v11999_v48 = vld [vmem:[%s14870_s23 + $0x2c9] sm:$0xff] }
 0x17e   : > { %v961_v18 = vpop.permute.xlu0 %960  ;;  %v1061_v11 = vsel %vm611_vm1, %v1029_v63, %v963_v25  ;;  %v1031_v63 = vsel %vm578_vm0, %v15948_v32, %v15679_v47  ;;  %v12000_v47 = vld [vmem:[%s14870_s23 + $0x2d1] sm:$0xff] }
 0x17f   : > { %v1060_v51 = vsel %vm611_vm1, %v1028_v3, %v961_v18  ;;  %2014 = vrot.lane.b32.xlu1 %v11996_v28, %s14822_s6  ;;  %v1030_v3 = vsel %vm578_vm0, %v15951_v33, %v15681_v20 }
 0x180   : > { %2012 = vrot.lane.b32.xlu0 %v11995_v38, %s14822_s6  ;;  %13628 = vmatprep.mubr.msk.f32.mxu1 %vm1068_vm2, %v1060_v51  ;;  %v21757_v51 = vld [vmem:[#allocation27_spill] sm:$0xff] }
 0x181   : > { %13629 = vmatmul.mubr.msk.f32.gmra.mrb[28].mxu1 %vm1068_vm2, %v1061_v11  ;;  %v967_v25 = vpop.permute.xlu1 %966  ;;  %v595_v11 = vsel %vm578_vm0, %v15793_v9, %v21757_v51  ;;  %v12004_v51 = vld [vmem:[%s14870_s23 + $0x311] sm:$0xff] }
 0x182   : > { %v965_v28 = vpop.permute.xlu0 %964  ;;  %v1063_v18 = vsel %vm611_vm1, %v1031_v63, %v967_v25  ;;  %v628_v20 = vsel %vm611_vm1, %v595_v11, %v15485_v4  ;;  %v12003_v11 = vld [vmem:[%s14870_s23 + $0x309] sm:$0xff] }
 0x183   : > { %v1062_v38 = vsel %vm611_vm1, %v1030_v3, %v965_v28  ;;  %2018 = vrot.lane.b32.xlu1 %v11998_v26, %s14822_s6  ;;  %v21758_v26 = vld [vmem:[#allocation26_spill] sm:$0xff] }
 0x184   : > { %2016 = vrot.lane.b32.xlu0 %v11997_v45, %s14822_s6  ;;  %13631 = vmatprep.mubr.msk.f32.mxu1 %vm1068_vm2, %v1062_v38  ;;  %v596_v9 = vsel %vm578_vm0, %v15788_v6, %v21758_v26  ;;  %v21759_v45 = vld [vmem:[#allocation29_spill] sm:$0xff]  ;;  %v21764_v26 = vld [vmem:[#allocation44_spill] sm:$0xff] }
 0x185   : > { %13632 = vmatmul.mubr.msk.f32.gmra.mrb[30].mxu1 %vm1068_vm2, %v1063_v18  ;;  %v15978_v63 = vpop.permute.xlu1 %1842  ;;  %v597_v4 = vsel %vm578_vm0, %v15813_v36, %v21759_v45  ;;  %v629_v3 = vsel %vm611_vm1, %v596_v9, %v15483_v5  ;;  %v21761_v5 = vld [vmem:[#allocation24_spill] sm:$0xff]  ;;  %v21763_v18 = vld [vmem:[#allocation42_spill] sm:$0xff] }
 0x186   : > { %v15980_v25 = vpop.permute.xlu0 %1840  ;;  %13664 = vmatprep.mubr.msk.f32.mxu1 %vm1068_vm2, %v628_v20  ;;  %v630_v20 = vsel %vm611_vm1, %v597_v4, %v15493_v46  ;;  %v21762_v46 = vld [vmem:[#allocation31_spill] sm:$0xff]  ;;  %v21765_v45 = vld [vmem:[#allocation30_spill] sm:$0xff]  ;;  %v21766_v4 = vld [vmem:[#allocation33_spill] sm:$0xff]  ;;  %v2065_v57 = vsel %vm578_vm0, %v11910_v60, %v15978_v63 }
 0x187   : > { %2022 = vrot.lane.b32.xlu1 %v12000_v47, %s14822_s6  ;;  %v21760_v47 = vld [vmem:[#allocation28_spill] sm:$0xff]  ;;  %v599_v36 = vsel %vm578_vm0, %v15833_v8, %v21762_v46  ;;  %v600_v8 = vsel %vm578_vm0, %v15828_v40, %v21765_v45  ;;  %v21768_v46 = vld [vmem:[#allocation46_spill] sm:$0xff]  ;;  %v12075_v45 = vld [vmem:[%s14870_s23 + $0xf0] sm:$0xff]  ;;  %v2064_v56 = vsel %vm578_vm0, %v11909_v41, %v15980_v25 }
 0x188   : > { %2020 = vrot.lane.b32.xlu0 %v11999_v48, %s14822_s6  ;;  %v598_v48 = vsel %vm578_vm0, %v15808_v27, %v21760_v47  ;;  %v632_v27 = vsel %vm611_vm1, %v599_v36, %v21764_v26  ;;  %v21771_v26 = vld [vmem:[#allocation45_spill] sm:$0xff]  ;;  %v16271_v41 = vld [vmem:[%s14870_s23 + $0x290] sm:$0xff]  ;;  %v16274_v60 = vld [vmem:[%s14870_s23 + $0x288] sm:$0xff] }
 0x189   : > { %13665 = vmatmul.mubr.msk.f32.vlgmr.msra.gmra.mrb[16].mxu1 %vm1068_vm2, %v629_v3  ;;  %v15996_v28 = vpop.permute.xlu1 %1846  ;;  %v631_v38 = vsel %vm611_vm1, %v598_v48, %v21763_v18  ;;  %v601_v3 = vsel %vm578_vm0, %v15853_v37, %v21766_v4  ;;  %v12073_v48 = vld [vmem:[%s14870_s23 + $0xd0] sm:$0xff]  ;;  %v21772_v4 = vld [vmem:[#allocation48_spill] sm:$0xff]  ;;  %v11913_v25 = vld [vmem:[%s14870_s23 + $0x167] sm:$0xff] }
 0x18a   : > { %v15998_v6 = vpop.permute.xlu0 %1844  ;;  %13667 = vmatprep.mubr.msk.f32.mxu1 %vm1068_vm2, %v630_v20  ;;  %v21767_v20 = vld [vmem:[#allocation43_spill] sm:$0xff]  ;;  %v634_v36 = vsel %vm611_vm1, %v601_v3, %v21768_v46  ;;  %v2067_v63 = vsel %vm578_vm0, %v11912_v0, %v15996_v28 }
 0x18b   : > { %2026 = vrot.lane.b32.xlu1 %v15564_v59, %s14822_s6  ;;  %v633_v47 = vsel %vm611_vm1, %v600_v8, %v21767_v20  ;;  %v12074_v8 = vld [vmem:[%s14870_s23 + $0xe8] sm:$0xff]  ;;  %v21775_v46 = vld [vmem:[#allocation47_spill] sm:$0xff] }
 0x18c   : > { %2024 = vrot.lane.b32.xlu0 %v21761_v5, %s14822_s6  ;;  %v12072_v5 = vld [vmem:[%s14870_s23 + $0xc8] sm:$0xff] }
 0x18d   : > { %13668 = vmatmul.mubr.msk.f32.gmra.mrb[18].mxu1 %vm1068_vm2, %v631_v38  ;;  %v16018_v59 = vpop.permute.xlu1 %1850  ;;  %v21769_v38 = vld [vmem:[#allocation32_spill] sm:$0xff] }
 0x18e   : > { %v16020_v9 = vpop.permute.xlu0 %1848  ;;  %13670 = vmatprep.mubr.msk.f32.mxu1 %vm1068_vm2, %v632_v27  ;;  %v602_v37 = vsel %vm578_vm0, %v15848_v34, %v21769_v38  ;;  %v12077_v38 = vld [vmem:[%s14870_s23 + $0x110] sm:$0xff] }
 0x18f   : > { %2030 = vrot.lane.b32.xlu1 %v12004_v51, %s14822_s6  ;;  %v21770_v51 = vld [vmem:[#allocation35_spill] sm:$0xff]  ;;  %v635_v27 = vsel %vm611_vm1, %v602_v37, %v21771_v26  ;;  %v12076_v37 = vld [vmem:[%s14870_s23 + $0x108] sm:$0xff]  ;;  %v2068_v28 = vsel %vm578_vm0, %v11913_v25, %v16020_v9 }
 0x190   : > { %2028 = vrot.lane.b32.xlu0 %v12003_v11, %s14822_s6  ;;  %v603_v11 = vsel %vm578_vm0, %v15873_v1, %v21770_v51  ;;  %v21776_v51 = vld [vmem:[#allocation50_spill] sm:$0xff] }
 0x191   : > { %13671 = vmatmul.mubr.msk.f32.gmra.mrb[20].mxu1 %vm1068_vm2, %v633_v47  ;;  %v16038_v40 = vpop.permute.xlu1 %1854  ;;  %v636_v3 = vsel %vm611_vm1, %v603_v11, %v21772_v4  ;;  %v21773_v47 = vld [vmem:[#allocation34_spill] sm:$0xff]  ;;  %v21779_v4 = vld [vmem:[#allocation49_spill] sm:$0xff] }
 0x192   : > { %v16040_v18 = vpop.permute.xlu0 %1852  ;;  %13673 = vmatprep.mubr.msk.f32.mxu1 %vm1068_vm2, %v634_v36  ;;  %v604_v1 = vsel %vm578_vm0, %v15868_v30, %v21773_v47  ;;  %v12079_v47 = vld [vmem:[%s14870_s23 + $0x130] sm:$0xff] }
 0x193   : > { %2616 = vrot.lane.b32.xlu1 %v12073_v48, %s14821_s24  ;;  %v21774_v48 = vld [vmem:[#allocation37_spill] sm:$0xff]  ;;  %v637_v36 = vsel %vm611_vm1, %v604_v1, %v21775_v46  ;;  %v12078_v1 = vld [vmem:[%s14870_s23 + $0x128] sm:$0xff] }
 0x194   : > { %2614 = vrot.lane.b32.xlu0 %v12072_v5, %s14821_s24  ;;  %v605_v5 = vsel %vm578_vm0, %v15893_v42, %v21774_v48  ;;  %v21780_v48 = vld [vmem:[#allocation51_spill] sm:$0xff] }
 0x195   : > { %13674 = vmatmul.mubr.msk.f32.gmra.mrb[22].mxu1 %vm1068_vm2, %v635_v27  ;;  %v16058_v34 = vpop.permute.xlu1 %1858  ;;  %v638_v11 = vsel %vm611_vm1, %v605_v5, %v21776_v51  ;;  %v21777_v27 = vld [vmem:[#allocation36_spill] sm:$0xff]  ;;  %v21783_v51 = vld [vmem:[#allocation17_spill] sm:$0xff]  ;;  %v12104_v9 = vld [vmem:[%s14870_s23 + $0xca] sm:$0xff] }
 0x196   : > { %v16060_v20 = vpop.permute.xlu0 %1856  ;;  %13676 = vmatprep.mubr.msk.f32.mxu1 %vm1068_vm2, %v636_v3  ;;  %v606_v42 = vsel %vm578_vm0, %v15888_v61, %v21777_v27  ;;  %v16114_v27 = vld [vmem:[%s14870_s23 + $0x150] sm:$0xff] }
 0x197   : > { %2620 = vrot.lane.b32.xlu1 %v12075_v45, %s14821_s24  ;;  %v21778_v45 = vld [vmem:[#allocation39_spill] sm:$0xff]  ;;  %v639_v3 = vsel %vm611_vm1, %v606_v42, %v21779_v4  ;;  %v16117_v42 = vld [vmem:[%s14870_s23 + $0x148] sm:$0xff] }
 0x198   : > { %2618 = vrot.lane.b32.xlu0 %v12074_v8, %s14821_s24  ;;  %v607_v8 = vsel %vm578_vm0, %v15913_v53, %v21778_v45  ;;  %v21784_v45 = vld [vmem:[#allocation19_spill] sm:$0xff] }
 0x199   : > { %13677 = vmatmul.mubr.msk.f32.gmra.mrb[24].mxu1 %vm1068_vm2, %v637_v36  ;;  %v16078_v30 = vpop.permute.xlu1 %1862  ;;  %v640_v5 = vsel %vm611_vm1, %v607_v8, %v21780_v48  ;;  %v21781_v36 = vld [vmem:[#allocation38_spill] sm:$0xff]  ;;  %v16137_v48 = vld [vmem:[%s14870_s23 + $0x170] sm:$0xff] }
 0x19a   : > { %v16080_v26 = vpop.permute.xlu0 %1860  ;;  %13679 = vmatprep.mubr.msk.f32.mxu1 %vm1068_vm2, %v638_v11  ;;  %v608_v53 = vsel %vm578_vm0, %v15908_v49, %v21781_v36 }
 0x19b   : > { %2624 = vrot.lane.b32.xlu1 %v12077_v38, %s14821_s24  ;;  %v21782_v38 = vld [vmem:[#allocation41_spill] sm:$0xff]  ;;  %v641_v11 = vsel %vm611_vm1, %v608_v53, %v21783_v51  ;;  %v16152_v53 = vld [vmem:[%s14870_s23 + $0x190] sm:$0xff] }
 0x19c   : > { %2622 = vrot.lane.b32.xlu0 %v12076_v37, %s14821_s24  ;;  %v609_v37 = vsel %vm578_vm0, %v15933_v23, %v21782_v38  ;;  %v21785_v23 = vld [vmem:[#allocation40_spill] sm:$0xff]  ;;  %v16155_v38 = vld [vmem:[%s14870_s23 + $0x188] sm:$0xff] }
 0x19d   : > { %13680 = vmatmul.mubr.msk.f32.gmra.mrb[26].mxu1 %vm1068_vm2, %v639_v3  ;;  %v16098_v61 = vpop.permute.xlu1 %1866  ;;  %v642_v49 = vsel %vm611_vm1, %v609_v37, %v21784_v45  ;;  %v610_v3 = vsel %vm578_vm0, %v15928_v35, %v21785_v23  ;;  %v16169_v45 = vld [vmem:[%s14870_s23 + $0x1a8] sm:$0xff] }
 0x19e   : > { %v16100_v46 = vpop.permute.xlu0 %1864  ;;  %13682 = vmatprep.mubr.msk.f32.mxu1 %vm1068_vm2, %v640_v5  ;;  %v16140_v5 = vld [vmem:[%s14870_s23 + $0x168] sm:$0xff] }
 0x19f   : > { %2628 = vrot.lane.b32.xlu1 %v12079_v47, %s14821_s24  ;;  %v21786_v47 = vld [vmem:[#allocation18_spill] sm:$0xff] }
 0x1a0   : > { %2626 = vrot.lane.b32.xlu0 %v12078_v1, %s14821_s24  ;;  %v643_v1 = vsel %vm611_vm1, %v610_v3, %v21786_v47  ;;  %v16180_v3 = vld [vmem:[%s14870_s23 + $0x1d0] sm:$0xff]  ;;  %v16183_v47 = vld [vmem:[%s14870_s23 + $0x1c8] sm:$0xff] }
 0x1a1   : > { %13683 = vmatmul.mubr.msk.f32.gmra.mrb[28].mxu1 %vm1068_vm2, %v641_v11  ;;  %v16122_v8 = vpop.permute.xlu1 %1870  ;;  %v16166_v11 = vld [vmem:[%s14870_s23 + $0x1b0] sm:$0xff] }
 0x1a2   : > { %v16124_v4 = vpop.permute.xlu0 %1868  ;;  %13685 = vmatprep.mubr.msk.f32.mxu1 %vm1068_vm2, %v642_v49 }
 0x1a3   : > { %2632 = vrot.lane.b32.xlu1 %v16114_v27, %s14821_s24 }
 0x1a4   : > { %2630 = vrot.lane.b32.xlu0 %v16117_v42, %s14821_s24 }
 0x1a5   : > { %13686 = vmatmul.mubr.msk.f32.gmra.mrb[30].mxu1 %vm1068_vm2, %v643_v1  ;;  %v16143_v36 = vpop.permute.xlu1 %1874 }
 0x1a6   : > { %v16145_v35 = vpop.permute.xlu0 %1872 }
 0x1a7   : > { %2636 = vrot.lane.b32.xlu1 %v16137_v48, %s14821_s24 }
 0x1a8   : > { %2634 = vrot.lane.b32.xlu0 %v16140_v5, %s14821_s24 }
 0x1a9   : > { %v16157_v37 = vpop.permute.xlu1 %1878 }
 0x1aa   : > { %v16159_v51 = vpop.permute.xlu0 %1876 }
 0x1ab   : > { %2640 = vrot.lane.b32.xlu1 %v16152_v53, %s14821_s24 }
 0x1ac   : > { %2638 = vrot.lane.b32.xlu0 %v16155_v38, %s14821_s24 }
 0x1ad   : > { %v16171_v49 = vpop.permute.xlu1 %1882 }
 0x1ae   : > { %v16173_v23 = vpop.permute.xlu0 %1880 }
 0x1af   : > { %2644 = vrot.lane.b32.xlu1 %v16166_v11, %s14821_s24 }
 0x1b0   : > { %2642 = vrot.lane.b32.xlu0 %v16169_v45, %s14821_s24 }
 0x1b1   : > { %v16185_v1 = vpop.permute.xlu1 %1886 }
 0x1b2   : > { %v16187_v21 = vpop.permute.xlu0 %1884 }
 0x1b3   : > { %2648 = vrot.lane.b32.xlu1 %v16180_v3, %s14821_s24 }
 0x1b4   : > { %2646 = vrot.lane.b32.xlu0 %v16183_v47, %s14821_s24 }
 0x1b5   : > { %v16199_v17 = vpop.permute.xlu1 %1890 }
 0x1b6   : > { %v16201_v16 = vpop.permute.xlu0 %1888 }
 0x1b7   : > { %2652 = vrot.lane.b32.xlu1 %v16194_v50, %s14821_s24 }
 0x1b8   : > { %2650 = vrot.lane.b32.xlu0 %v16197_v19, %s14821_s24 }
 0x1b9   : > { %v16213_v13 = vpop.permute.xlu1 %1894 }
 0x1ba   : > { %v16215_v12 = vpop.permute.xlu0 %1892 }
 0x1bb   : > { %2656 = vrot.lane.b32.xlu1 %v16208_v15, %s14821_s24 }
 0x1bc   : > { %2654 = vrot.lane.b32.xlu0 %v16211_v14, %s14821_s24 }
 0x1bd   : > { %v16227_v58 = vpop.permute.xlu1 %1898 }
 0x1be   : > { %v16229_v55 = vpop.permute.xlu0 %1896 }
 0x1bf   : > { %2660 = vrot.lane.b32.xlu1 %v16222_v2, %s14821_s24 }
 0x1c0   : > { %2658 = vrot.lane.b32.xlu0 %v16225_v10, %s14821_s24 }
 0x1c1   : > { %v16241_v7 = vpop.permute.xlu1 %1902 }
 0x1c2   : > { %v16243_v31 = vpop.permute.xlu0 %1900 }
 0x1c3   : > { %2664 = vrot.lane.b32.xlu1 %v16236_v52, %s14821_s24 }
 0x1c4   : > { %2662 = vrot.lane.b32.xlu0 %v16239_v29, %s14821_s24 }
 0x1c5   : > { %v1971_v54 = vpop.permute.xlu1 %1970 }
 0x1c6   : > { %v1969_v44 = vpop.permute.xlu0 %1968  ;;  %v2097_v24 = vsel %vm611_vm1, %v2065_v57, %v1971_v54  ;;  %v11914_v57 = vld [vmem:[%s14870_s23 + $0x16f] sm:$0xff] }
 0x1c7   : > { %v2096_v62 = vsel %vm611_vm1, %v2064_v56, %v1969_v44  ;;  %2668 = vrot.lane.b32.xlu1 %v16252_v43, %s14821_s24  ;;  %v2066_v44 = vsel %vm578_vm0, %v11911_v39, %v15998_v6  ;;  %v16294_v39 = vld [vmem:[%s14870_s23 + $0x2a8] sm:$0xff]  ;;  %v2069_v0 = vsel %vm578_vm0, %v11914_v57, %v16018_v59  ;;  %v12105_v59 = vld [vmem:[%s14870_s23 + $0xd2] sm:$0xff] }
 0x1c8   : > { %2666 = vrot.lane.b32.xlu0 %v16255_v22, %s14821_s24  ;;  %13694 = vmatprep.mubr.msk.f32.mxu0 %vm1068_vm2, %v2096_v62 }
 0x1c9   : > { %13695 = vmatmul.mubr.msk.f32.vlgmr.msra.gmra.mrb[0].mxu0 %vm1068_vm2, %v2097_v24  ;;  %v1975_v54 = vpop.permute.xlu1 %1974  ;;  %v16291_v24 = vld [vmem:[%s14870_s23 + $0x2b0] sm:$0xff] }
 0x1ca   : > { %v1973_v56 = vpop.permute.xlu0 %1972  ;;  %v2099_v62 = vsel %vm611_vm1, %v2067_v63, %v1975_v54  ;;  %v11915_v54 = vld [vmem:[%s14870_s23 + $0x187] sm:$0xff] }
 0x1cb   : > { %v2098_v22 = vsel %vm611_vm1, %v2066_v44, %v1973_v56  ;;  %2672 = vrot.lane.b32.xlu1 %v16271_v41, %s14821_s24  ;;  %v11916_v44 = vld [vmem:[%s14870_s23 + $0x18f] sm:$0xff]  ;;  %v2070_v25 = vsel %vm578_vm0, %v11915_v54, %v16040_v18 }
 0x1cc   : > { %2670 = vrot.lane.b32.xlu0 %v16274_v60, %s14821_s24  ;;  %13697 = vmatprep.mubr.msk.f32.mxu0 %vm1068_vm2, %v2098_v22  ;;  %v2071_v57 = vsel %vm578_vm0, %v11916_v44, %v16038_v40  ;;  %v12107_v40 = vld [vmem:[%s14870_s23 + $0xf2] sm:$0xff]  ;;  %v12106_v18 = vld [vmem:[%s14870_s23 + $0xea] sm:$0xff] }
 0x1cd   : > { %13698 = vmatmul.mubr.msk.f32.gmra.mrb[2].mxu0 %vm1068_vm2, %v2099_v62  ;;  %v1979_v6 = vpop.permute.xlu1 %1978 }
 0x1ce   : > { %v1977_v63 = vpop.permute.xlu0 %1976  ;;  %v2101_v22 = vsel %vm611_vm1, %v2069_v0, %v1979_v6  ;;  %v11917_v6 = vld [vmem:[%s14870_s23 + $0x1a7] sm:$0xff] }
 0x1cf   : > { %v2100_v56 = vsel %vm611_vm1, %v2068_v28, %v1977_v63  ;;  %2676 = vrot.lane.b32.xlu1 %v16291_v24, %s14821_s24  ;;  %v11918_v28 = vld [vmem:[%s14870_s23 + $0x1af] sm:$0xff]  ;;  %v2072_v54 = vsel %vm578_vm0, %v11917_v6, %v16060_v20 }
 0x1d0   : > { %2674 = vrot.lane.b32.xlu0 %v16294_v39, %s14821_s24  ;;  %13700 = vmatprep.mubr.msk.f32.mxu0 %vm1068_vm2, %v2100_v56  ;;  %v2073_v44 = vsel %vm578_vm0, %v11918_v28, %v16058_v34  ;;  %v16339_v34 = vld [vmem:[%s14870_s23 + $0x112] sm:$0xff]  ;;  %v16342_v20 = vld [vmem:[%s14870_s23 + $0x10a] sm:$0xff] }
 0x1d1   : > { %13701 = vmatmul.mubr.msk.f32.gmra.mrb[4].mxu0 %vm1068_vm2, %v2101_v22  ;;  %v1983_v62 = vpop.permute.xlu1 %1982 }
 0x1d2   : > { %v1981_v0 = vpop.permute.xlu0 %1980  ;;  %v2103_v63 = vsel %vm611_vm1, %v2071_v57, %v1983_v62 }
 0x1d3   : > { %v2102_v56 = vsel %vm611_vm1, %v2070_v25, %v1981_v0  ;;  %2744 = vrot.lane.b32.xlu1 %v12105_v59, %s14822_s6  ;;  %v11920_v59 = vld [vmem:[%s14870_s23 + $0x1cf] sm:$0xff] }
 0x1d4   : > { %2742 = vrot.lane.b32.xlu0 %v12104_v9, %s14822_s6  ;;  %13703 = vmatprep.mubr.msk.f32.mxu0 %vm1068_vm2, %v2102_v56  ;;  %v11919_v9 = vld [vmem:[%s14870_s23 + $0x1c7] sm:$0xff]  ;;  %v2075_v0 = vsel %vm578_vm0, %v11920_v59, %v16078_v30  ;;  %v11922_v56 = vld [vmem:[%s14870_s23 + $0x1ef] sm:$0xff] }
 0x1d5   : > { %13704 = vmatmul.mubr.msk.f32.gmra.mrb[6].mxu0 %vm1068_vm2, %v2103_v63  ;;  %v1987_v22 = vpop.permute.xlu1 %1986  ;;  %v2074_v28 = vsel %vm578_vm0, %v11919_v9, %v16080_v26  ;;  %v16359_v30 = vld [vmem:[%s14870_s23 + $0x132] sm:$0xff]  ;;  %v16362_v26 = vld [vmem:[%s14870_s23 + $0x12a] sm:$0xff] }
 0x1d6   : > { %v1985_v57 = vpop.permute.xlu0 %1984  ;;  %v2105_v25 = vsel %vm611_vm1, %v2073_v44, %v1987_v22  ;;  %v11924_v9 = vld [vmem:[%s14870_s23 + $0x20f] sm:$0xff] }
 0x1d7   : > { %v2104_v62 = vsel %vm611_vm1, %v2072_v54, %v1985_v57  ;;  %2748 = vrot.lane.b32.xlu1 %v12107_v40, %s14822_s6  ;;  %v11921_v40 = vld [vmem:[%s14870_s23 + $0x1e7] sm:$0xff]  ;;  %v2077_v54 = vsel %vm578_vm0, %v11922_v56, %v16098_v61  ;;  %v16379_v61 = vld [vmem:[%s14870_s23 + $0x152] sm:$0xff] }
 0x1d8   : > { %2746 = vrot.lane.b32.xlu0 %v12106_v18, %s14822_s6  ;;  %13706 = vmatprep.mubr.msk.f32.mxu0 %vm1068_vm2, %v2104_v62  ;;  %v2076_v22 = vsel %vm578_vm0, %v11921_v40, %v16100_v46  ;;  %v16382_v46 = vld [vmem:[%s14870_s23 + $0x14a] sm:$0xff] }
 0x1d9   : > { %13707 = vmatmul.mubr.msk.f32.gmra.mrb[8].mxu0 %vm1068_vm2, %v2105_v25  ;;  %v1991_v6 = vpop.permute.xlu1 %1990  ;;  %v11923_v25 = vld [vmem:[%s14870_s23 + $0x207] sm:$0xff]  ;;  %v11926_v40 = vld [vmem:[%s14870_s23 + $0x22f] sm:$0xff] }
 0x1da   : > { %v1989_v63 = vpop.permute.xlu0 %1988  ;;  %v2107_v18 = vsel %vm611_vm1, %v2075_v0, %v1991_v6  ;;  %v2078_v6 = vsel %vm578_vm0, %v11923_v25, %v16124_v4  ;;  %v16402_v4 = vld [vmem:[%s14870_s23 + $0x16a] sm:$0xff] }
 0x1db   : > { %v2106_v44 = vsel %vm611_vm1, %v2074_v28, %v1989_v63  ;;  %2752 = vrot.lane.b32.xlu1 %v16339_v34, %s14822_s6  ;;  %v2079_v28 = vsel %vm578_vm0, %v11924_v9, %v16122_v8  ;;  %v16399_v8 = vld [vmem:[%s14870_s23 + $0x172] sm:$0xff] }
 0x1dc   : > { %2750 = vrot.lane.b32.xlu0 %v16342_v20, %s14822_s6  ;;  %13709 = vmatprep.mubr.msk.f32.mxu0 %vm1068_vm2, %v2106_v44  ;;  %v11928_v25 = vld [vmem:[%s14870_s23 + $0x24f] sm:$0xff] }
 0x1dd   : > { %13710 = vmatmul.mubr.msk.f32.gmra.mrb[10].mxu0 %vm1068_vm2, %v2107_v18  ;;  %v1995_v57 = vpop.permute.xlu1 %1994  ;;  %v11925_v18 = vld [vmem:[%s14870_s23 + $0x227] sm:$0xff] }
 0x1de   : > { %v1993_v59 = vpop.permute.xlu0 %1992  ;;  %v2109_v62 = vsel %vm611_vm1, %v2077_v54, %v1995_v57  ;;  %v2080_v57 = vsel %vm578_vm0, %v11925_v18, %v16145_v35  ;;  %v16422_v35 = vld [vmem:[%s14870_s23 + $0x18a] sm:$0xff] }
 0x1df   : > { %v2108_v0 = vsel %vm611_vm1, %v2076_v22, %v1993_v59  ;;  %2756 = vrot.lane.b32.xlu1 %v16359_v30, %s14822_s6  ;;  %v2081_v22 = vsel %vm578_vm0, %v11926_v40, %v16143_v36  ;;  %v16419_v36 = vld [vmem:[%s14870_s23 + $0x192] sm:$0xff] }
 0x1e0   : > { %2754 = vrot.lane.b32.xlu0 %v16362_v26, %s14822_s6  ;;  %13712 = vmatprep.mubr.msk.f32.mxu0 %vm1068_vm2, %v2108_v0  ;;  %v11930_v18 = vld [vmem:[%s14870_s23 + $0x26f] sm:$0xff] }
 0x1e1   : > { %13713 = vmatmul.mubr.msk.f32.gmra.mrb[12].mxu0 %vm1068_vm2, %v2109_v62  ;;  %v1999_v63 = vpop.permute.xlu1 %1998  ;;  %v11927_v62 = vld [vmem:[%s14870_s23 + $0x247] sm:$0xff] }
 0x1e2   : > { %v1997_v56 = vpop.permute.xlu0 %1996  ;;  %v2111_v44 = vsel %vm611_vm1, %v2079_v28, %v1999_v63  ;;  %v2082_v63 = vsel %vm578_vm0, %v11927_v62, %v16159_v51  ;;  %v16442_v51 = vld [vmem:[%s14870_s23 + $0x1aa] sm:$0xff] }
 0x1e3   : > { %v2110_v54 = vsel %vm611_vm1, %v2078_v6, %v1997_v56  ;;  %2760 = vrot.lane.b32.xlu1 %v16379_v61, %s14822_s6  ;;  %v2083_v6 = vsel %vm578_vm0, %v11928_v25, %v16157_v37  ;;  %v16439_v37 = vld [vmem:[%s14870_s23 + $0x1b2] sm:$0xff] }
 0x1e4   : > { %2758 = vrot.lane.b32.xlu0 %v16382_v46, %s14822_s6  ;;  %13715 = vmatprep.mubr.msk.f32.mxu0 %vm1068_vm2, %v2110_v54  ;;  %v11932_v62 = vld [vmem:[%s14870_s23 + $0x28f] sm:$0xff] }
 0x1e5   : > { %13716 = vmatmul.mubr.msk.f32.gmra.mrb[14].mxu0 %vm1068_vm2, %v2111_v44  ;;  %v2003_v59 = vpop.permute.xlu1 %2002  ;;  %v11929_v44 = vld [vmem:[%s14870_s23 + $0x267] sm:$0xff] }
 0x1e6   : > { %v2001_v9 = vpop.permute.xlu0 %2000  ;;  %v2113_v0 = vsel %vm611_vm1, %v2081_v22, %v2003_v59  ;;  %v2084_v59 = vsel %vm578_vm0, %v11929_v44, %v16173_v23  ;;  %v16462_v23 = vld [vmem:[%s14870_s23 + $0x1ca] sm:$0xff] }
 0x1e7   : > { %v2112_v28 = vsel %vm611_vm1, %v2080_v57, %v2001_v9  ;;  %2764 = vrot.lane.b32.xlu1 %v16399_v8, %s14822_s6  ;;  %v2085_v57 = vsel %vm578_vm0, %v11930_v18, %v16171_v49  ;;  %v16459_v49 = vld [vmem:[%s14870_s23 + $0x1d2] sm:$0xff] }
 0x1e8   : > { %2762 = vrot.lane.b32.xlu0 %v16402_v4, %s14822_s6  ;;  %13718 = vmatprep.mubr.msk.f32.mxu0 %vm1068_vm2, %v2112_v28  ;;  %v11934_v44 = vld [vmem:[%s14870_s23 + $0x2af] sm:$0xff] }
 0x1e9   : > { %13719 = vmatmul.mubr.msk.f32.gmra.mrb[16].mxu0 %vm1068_vm2, %v2113_v0  ;;  %v2007_v56 = vpop.permute.xlu1 %2006  ;;  %v11931_v0 = vld [vmem:[%s14870_s23 + $0x287] sm:$0xff] }
 0x1ea   : > { %v2005_v40 = vpop.permute.xlu0 %2004  ;;  %v2115_v54 = vsel %vm611_vm1, %v2083_v6, %v2007_v56  ;;  %v2086_v56 = vsel %vm578_vm0, %v11931_v0, %v16187_v21  ;;  %v16479_v21 = vld [vmem:[%s14870_s23 + $0x1f2] sm:$0xff] }
 0x1eb   : > { %v2114_v22 = vsel %vm611_vm1, %v2082_v63, %v2005_v40  ;;  %2768 = vrot.lane.b32.xlu1 %v16419_v36, %s14822_s6  ;;  %v2087_v63 = vsel %vm578_vm0, %v11932_v62, %v16185_v1  ;;  %v16482_v1 = vld [vmem:[%s14870_s23 + $0x1ea] sm:$0xff] }
 0x1ec   : > { %2766 = vrot.lane.b32.xlu0 %v16422_v35, %s14822_s6  ;;  %13721 = vmatprep.mubr.msk.f32.mxu0 %vm1068_vm2, %v2114_v22  ;;  %v11936_v0 = vld [vmem:[%s14870_s23 + $0x2cf] sm:$0xff] }
 0x1ed   : > { %13722 = vmatmul.mubr.msk.f32.gmra.mrb[18].mxu0 %vm1068_vm2, %v2115_v54  ;;  %v2011_v9 = vpop.permute.xlu1 %2010  ;;  %v11933_v54 = vld [vmem:[%s14870_s23 + $0x2a7] sm:$0xff] }
 0x1ee   : > { %v2009_v25 = vpop.permute.xlu0 %2008  ;;  %v2117_v28 = vsel %vm611_vm1, %v2085_v57, %v2011_v9  ;;  %v2088_v9 = vsel %vm578_vm0, %v11933_v54, %v16201_v16  ;;  %v16499_v16 = vld [vmem:[%s14870_s23 + $0x212] sm:$0xff] }
 0x1ef   : > { %v2116_v6 = vsel %vm611_vm1, %v2084_v59, %v2009_v25  ;;  %2772 = vrot.lane.b32.xlu1 %v16439_v37, %s14822_s6  ;;  %v2089_v59 = vsel %vm578_vm0, %v11934_v44, %v16199_v17  ;;  %v16502_v17 = vld [vmem:[%s14870_s23 + $0x20a] sm:$0xff] }
 0x1f0   : > { %2770 = vrot.lane.b32.xlu0 %v16442_v51, %s14822_s6  ;;  %13724 = vmatprep.mubr.msk.f32.mxu0 %vm1068_vm2, %v2116_v6 }
 0x1f1   : > { %13725 = vmatmul.mubr.msk.f32.gmra.mrb[20].mxu0 %vm1068_vm2, %v2117_v28  ;;  %v2015_v40 = vpop.permute.xlu1 %2014  ;;  %v11935_v28 = vld [vmem:[%s14870_s23 + $0x2c7] sm:$0xff] }
 0x1f2   : > { %v2013_v18 = vpop.permute.xlu0 %2012  ;;  %v2119_v22 = vsel %vm611_vm1, %v2087_v63, %v2015_v40  ;;  %v2090_v40 = vsel %vm578_vm0, %v11935_v28, %v16215_v12  ;;  %v16517_v12 = vld [vmem:[%s14870_s23 + $0x232] sm:$0xff] }
 0x1f3   : > { %v2118_v57 = vsel %vm611_vm1, %v2086_v56, %v2013_v18  ;;  %2776 = vrot.lane.b32.xlu1 %v16459_v49, %s14822_s6  ;;  %v2091_v56 = vsel %vm578_vm0, %v11936_v0, %v16213_v13  ;;  %v16520_v13 = vld [vmem:[%s14870_s23 + $0x22a] sm:$0xff] }
 0x1f4   : > { %2774 = vrot.lane.b32.xlu0 %v16462_v23, %s14822_s6  ;;  %13727 = vmatprep.mubr.msk.f32.mxu0 %vm1068_vm2, %v2118_v57  ;;  %v2093_v57 = vsel %vm578_vm0, %v15948_v32, %v16227_v58  ;;  %v11939_v0 = vld [vmem:[%s14870_s23 + $0x307] sm:$0xff]  ;;  %v16538_v58 = vld [vmem:[%s14870_s23 + $0x252] sm:$0xff] }
 0x1f5   : > { %13728 = vmatmul.mubr.msk.f32.gmra.mrb[22].mxu0 %vm1068_vm2, %v2119_v22  ;;  %v2019_v25 = vpop.permute.xlu1 %2018  ;;  %v12203_v32 = vld [vmem:[%s21522_s1 + $0x60] sm:$0xff] }
 0x1f6   : > { %v2017_v62 = vpop.permute.xlu0 %2016  ;;  %v2121_v6 = vsel %vm611_vm1, %v2089_v59, %v2019_v25  ;;  %v2092_v59 = vsel %vm578_vm0, %v15951_v33, %v16229_v55  ;;  %v16542_v55 = vld [vmem:[%s14870_s23 + $0x24a] sm:$0xff] }
 0x1f7   : > { %v2120_v63 = vsel %vm611_vm1, %v2088_v9, %v2017_v62  ;;  %2780 = vrot.lane.b32.xlu1 %v16479_v21, %s14822_s6  ;;  %v11940_v62 = vld [vmem:[%s14870_s23 + $0x30f] sm:$0xff] }
 0x1f8   : > { %2778 = vrot.lane.b32.xlu0 %v16482_v1, %s14822_s6  ;;  %13730 = vmatprep.mubr.msk.f32.mxu0 %vm1068_vm2, %v2120_v63  ;;  %v12204_v33 = vld [vmem:[%s21522_s1 + $0x68] sm:$0xff]  ;;  %v2095_v63 = vsel %vm578_vm0, %v11940_v62, %v16241_v7  ;;  %v16563_v7 = vld [vmem:[%s14870_s23 + $0x272] sm:$0xff] }
 0x1f9   : > { %13731 = vmatmul.mubr.msk.f32.gmra.mrb[24].mxu0 %vm1068_vm2, %v2121_v6  ;;  %v2023_v18 = vpop.permute.xlu1 %2022  ;;  %v16584_v62 = vld [vmem:[%s14870_s23 + $0x28a] sm:$0xff] }
 0x1fa   : > { %v2021_v44 = vpop.permute.xlu0 %2020  ;;  %v2123_v54 = vsel %vm611_vm1, %v2091_v56, %v2023_v18  ;;  %v2094_v56 = vsel %vm578_vm0, %v11939_v0, %v16243_v31  ;;  %v16566_v31 = vld [vmem:[%s14870_s23 + $0x26a] sm:$0xff] }
 0x1fb   : > { %v2122_v22 = vsel %vm611_vm1, %v2090_v40, %v2021_v44  ;;  %2784 = vrot.lane.b32.xlu1 %v16499_v16, %s14822_s6  ;;  %v14402_v44 = vpack.c.bf16 %v12204_v33, %v12203_v32  ;;  %v16598_v32 = vld [vmem:[%s14870_s23 + $0x2aa] sm:$0xff] }
 0x1fc   : > { %2782 = vrot.lane.b32.xlu0 %v16502_v17, %s14822_s6  ;;  %13733 = vmatprep.mubr.msk.f32.mxu0 %vm1068_vm2, %v2122_v22 }
 0x1fd   : > { %13734 = vmatmul.mubr.msk.f32.gmra.mrb[26].mxu0 %vm1068_vm2, %v2123_v54  ;;  %v2027_v9 = vpop.permute.xlu1 %2026  ;;  %14403 = vmatprep.subr.bf16.mxu1 %v14402_v44 }
 0x1fe   : > { %v2025_v25 = vpop.permute.xlu0 %2024  ;;  %v2125_v28 = vsel %vm611_vm1, %v2093_v57, %v2027_v9  ;;  %14405 = vmatpush3.bf16.msra.mxu1 %v14402_v44  ;;  %v12205_v9 = vld [vmem:[%s21522_s1 + $0x70] sm:$0xff] }
 0x1ff   : > { %v2124_v6 = vsel %vm611_vm1, %v2092_v59, %v2025_v25  ;;  %2788 = vrot.lane.b32.xlu1 %v16517_v12, %s14822_s6  ;;  %v16581_v25 = vld [vmem:[%s14870_s23 + $0x292] sm:$0xff]  ;;  %13746 = vmatprep.subr.mxu1 %v12205_v9 }
 0x200   : > { %2786 = vrot.lane.b32.xlu0 %v16520_v13, %s14822_s6  ;;  %13736 = vmatprep.mubr.msk.f32.mxu0 %vm1068_vm2, %v2124_v6  ;;  %v16595_v6 = vld [vmem:[%s14870_s23 + $0x2b2] sm:$0xff] }
 0x201   : > { %13737 = vmatmul.mubr.msk.f32.gmra.mrb[28].mxu0 %vm1068_vm2, %v2125_v28  ;;  %v2031_v40 = vpop.permute.xlu1 %2030 }
 0x202   : > { %v2029_v18 = vpop.permute.xlu0 %2028  ;;  %v2127_v54 = vsel %vm611_vm1, %v2095_v63, %v2031_v40  ;;  %13747 = vmatpush3.msra.mxu1 %v12205_v9 }
 0x203   : > { %v2126_v22 = vsel %vm611_vm1, %v2094_v56, %v2029_v18  ;;  %2792 = vrot.lane.b32.xlu1 %v16538_v58, %s14822_s6 }
 0x204   : > { %2790 = vrot.lane.b32.xlu0 %v16542_v55, %s14822_s6  ;;  %13739 = vmatprep.mubr.msk.f32.mxu0 %vm1068_vm2, %v2126_v22 }
 0x205   : > { %13740 = vmatmul.mubr.msk.f32.gmra.mrb[30].mxu0 %vm1068_vm2, %v2127_v54  ;;  %v16569_v57 = vpop.permute.xlu1 %2616 }
 0x206   : > { %21788 = vst [vmem:[#allocation27_spill] sm:$0xff] %v16569_v57  ;;  %v16571_v59 = vpop.permute.xlu0 %2614 }
 0x207   : > { %21789 = vst [vmem:[#allocation26_spill] sm:$0xff] %v16571_v59  ;;  %2796 = vrot.lane.b32.xlu1 %v16563_v7, %s14822_s6 }
 0x208   : > { %2794 = vrot.lane.b32.xlu0 %v16566_v31, %s14822_s6 }
 0x209   : > { %v16586_v0 = vpop.permute.xlu1 %2620 }
 0x20a   : > { %21790 = vst [vmem:[#allocation29_spill] sm:$0xff] %v16586_v0  ;;  %v16588_v28 = vpop.permute.xlu0 %2618 }
 0x20b   : > { %21791 = vst [vmem:[#allocation28_spill] sm:$0xff] %v16588_v28  ;;  %2800 = vrot.lane.b32.xlu1 %v16581_v25, %s14822_s6 }
 0x20c   : > { %2798 = vrot.lane.b32.xlu0 %v16584_v62, %s14822_s6 }
 0x20d   : > { %v16600_v33 = vpop.permute.xlu1 %2624 }
 0x20e   : > { %21792 = vst [vmem:[#allocation24_spill] sm:$0xff] %v16600_v33  ;;  %v16602_v63 = vpop.permute.xlu0 %2622 }
 0x20f   : > { %21793 = vst [vmem:[#allocation31_spill] sm:$0xff] %v16602_v63  ;;  %2804 = vrot.lane.b32.xlu1 %v16595_v6, %s14822_s6 }
 0x210   : > { %2802 = vrot.lane.b32.xlu0 %v16598_v32, %s14822_s6 }
 0x211   : > { %v16608_v56 = vpop.permute.xlu1 %2628 }
 0x212   : > { %21794 = vst [vmem:[#allocation42_spill] sm:$0xff] %v16608_v56  ;;  %v16610_v40 = vpop.permute.xlu0 %2626 }
 0x213   : > { %21795 = vst [vmem:[#allocation44_spill] sm:$0xff] %v16610_v40  ;;  %3004 = vrot.lane.b32.xlu1 %v16339_v34, %s14822_s6 }
 0x214   : > { %3002 = vrot.lane.b32.xlu0 %v16342_v20, %s14822_s6 }
 0x215   : > { %v16616_v18 = vpop.permute.xlu1 %2632 }
 0x216   : > { %21796 = vst [vmem:[#allocation30_spill] sm:$0xff] %v16616_v18  ;;  %v16618_v44 = vpop.permute.xlu0 %2630 }
 0x217   : > { %21797 = vst [vmem:[#allocation33_spill] sm:$0xff] %v16618_v44  ;;  %3008 = vrot.lane.b32.xlu1 %v16359_v30, %s14822_s6 }
 0x218   : > { %3006 = vrot.lane.b32.xlu0 %v16362_v26, %s14822_s6 }
 0x219   : > { %v16624_v54 = vpop.permute.xlu1 %2636 }
 0x21a   : > { %21798 = vst [vmem:[#allocation43_spill] sm:$0xff] %v16624_v54  ;;  %v16626_v22 = vpop.permute.xlu0 %2634 }
 0x21b   : > { %21799 = vst [vmem:[#allocation46_spill] sm:$0xff] %v16626_v22  ;;  %3012 = vrot.lane.b32.xlu1 %v16379_v61, %s14822_s6 }
 0x21c   : > { %3010 = vrot.lane.b32.xlu0 %v16382_v46, %s14822_s6  ;;  %v16632_v34 = vpop.f32.mrb[0].mxu1 }
 0x21d   : > { %v16634_v20 = vpop.f32.mrb[1].mxu1  ;;  %v16636_v9 = vpop.permute.xlu1 %2640 }
 0x21e   : > { %21800 = vst [vmem:[#allocation32_spill] sm:$0xff] %v16636_v9  ;;  %v16638_v30 = vpop.permute.xlu0 %2638 }
 0x21f   : > { %21801 = vst [vmem:[#allocation35_spill] sm:$0xff] %v16638_v30  ;;  %3016 = vrot.lane.b32.xlu1 %v16399_v8, %s14822_s6 }
 0x220   : > { %3014 = vrot.lane.b32.xlu0 %v16402_v4, %s14822_s6  ;;  %v16644_v26 = vpop.f32.mrb[2].mxu1 }
 0x221   : > { %v16646_v54 = vpop.f32.mrb[3].mxu1  ;;  %v16648_v22 = vpop.permute.xlu1 %2644 }
 0x222   : > { %21802 = vst [vmem:[#allocation45_spill] sm:$0xff] %v16648_v22  ;;  %v16650_v18 = vpop.permute.xlu0 %2642 }
 0x223   : > { %21803 = vst [vmem:[#allocation48_spill] sm:$0xff] %v16650_v18  ;;  %3020 = vrot.lane.b32.xlu1 %v16419_v36, %s14822_s6 }
 0x224   : > { %3018 = vrot.lane.b32.xlu0 %v16422_v35, %s14822_s6  ;;  %v16656_v9 = vpop.f32.mrb[4].mxu1 }
 0x225   : > { %v16658_v30 = vpop.f32.mrb[5].mxu1  ;;  %v16660_v44 = vpop.permute.xlu1 %2648 }
 0x226   : > { %21804 = vst [vmem:[#allocation34_spill] sm:$0xff] %v16660_v44  ;;  %v16662_v56 = vpop.permute.xlu0 %2646 }
 0x227   : > { %21805 = vst [vmem:[#allocation37_spill] sm:$0xff] %v16662_v56  ;;  %3024 = vrot.lane.b32.xlu1 %v16439_v37, %s14822_s6 }
 0x228   : > { %3022 = vrot.lane.b32.xlu0 %v16442_v51, %s14822_s6  ;;  %v16668_v22 = vpop.f32.mrb[6].mxu1 }
 0x229   : > { %v16670_v18 = vpop.f32.mrb[7].mxu1  ;;  %v16672_v40 = vpop.permute.xlu1 %2652 }
 0x22a   : > { %21806 = vst [vmem:[#allocation47_spill] sm:$0xff] %v16672_v40  ;;  %v16674_v33 = vpop.permute.xlu0 %2650 }
 0x22b   : > { %21807 = vst [vmem:[#allocation50_spill] sm:$0xff] %v16674_v33  ;;  %3028 = vrot.lane.b32.xlu1 %v16459_v49, %s14822_s6 }
 0x22c   : > { %3026 = vrot.lane.b32.xlu0 %v16462_v23, %s14822_s6  ;;  %v16680_v44 = vpop.f32.mrb[8].mxu1 }
 0x22d   : > { %v16682_v56 = vpop.f32.mrb[9].mxu1  ;;  %v16684_v63 = vpop.permute.xlu1 %2656 }
 0x22e   : > { %21808 = vst [vmem:[#allocation36_spill] sm:$0xff] %v16682_v56  ;;  %21809 = vst [vmem:[#allocation39_spill] sm:$0xff] %v16684_v63  ;;  %v16686_v0 = vpop.permute.xlu0 %2654 }
 0x22f   : > { %21810 = vst [vmem:[#allocation49_spill] sm:$0xff] %v16686_v0  ;;  %3032 = vrot.lane.b32.xlu1 %v16479_v21, %s14822_s6 }
 0x230   : > { %3030 = vrot.lane.b32.xlu0 %v16482_v1, %s14822_s6  ;;  %v16692_v40 = vpop.f32.mrb[10].mxu1 }
 0x231   : > { %21811 = vst [vmem:[#allocation51_spill] sm:$0xff] %v16692_v40  ;;  %v16694_v33 = vpop.f32.mrb[11].mxu1  ;;  %v16696_v28 = vpop.permute.xlu1 %2660 }
 0x232   : > { %21812 = vst [vmem:[#allocation38_spill] sm:$0xff] %v16694_v33  ;;  %21813 = vst [vmem:[#allocation41_spill] sm:$0xff] %v16696_v28  ;;  %v16698_v57 = vpop.permute.xlu0 %2658 }
 0x233   : > { %21814 = vst [vmem:[#allocation17_spill] sm:$0xff] %v16698_v57  ;;  %3036 = vrot.lane.b32.xlu1 %v16499_v16, %s14822_s6 }
 0x234   : > { %3034 = vrot.lane.b32.xlu0 %v16502_v17, %s14822_s6  ;;  %v16704_v63 = vpop.f32.mrb[12].mxu1 }
 0x235   : > { %v16706_v0 = vpop.f32.mrb[13].mxu1  ;;  %v16708_v59 = vpop.permute.xlu1 %2664 }
 0x236   : > { %21815 = vst [vmem:[#allocation19_spill] sm:$0xff] %v16708_v59  ;;  %v16710_v56 = vpop.permute.xlu0 %2662 }
 0x237   : > { %21816 = vst [vmem:[#allocation40_spill] sm:$0xff] %v16710_v56  ;;  %3040 = vrot.lane.b32.xlu1 %v16517_v12, %s14822_s6 }
 0x238   : > { %3038 = vrot.lane.b32.xlu0 %v16520_v13, %s14822_s6  ;;  %v16716_v28 = vpop.f32.mrb[14].mxu1 }
 0x239   : > { %v16718_v57 = vpop.f32.mrb[15].mxu1  ;;  %v16720_v33 = vpop.permute.xlu1 %2668 }
 0x23a   : > { %21817 = vst [vmem:[#allocation18_spill] sm:$0xff] %v16720_v33  ;;  %v16722_v40 = vpop.permute.xlu0 %2666  ;;  %v12136_v33 = vld [vmem:[%s21522_s1 + $0x48] sm:$0xff] }
 0x23b   : > { %21818 = vst [vmem:[#allocation66_spill] sm:$0xff] %v16722_v40  ;;  %3044 = vrot.lane.b32.xlu1 %v16538_v58, %s14822_s6  ;;  %v12137_v58 = vld [vmem:[%s21522_s1 + $0x50] sm:$0xff] }
 0x23c   : > { %3042 = vrot.lane.b32.xlu0 %v16542_v55, %s14822_s6 }
 0x23d   : > { %v16728_v59 = vpop.permute.xlu1 %2672 }
 0x23e   : > { %21819 = vst [vmem:[#allocation67_spill] sm:$0xff] %v16728_v59  ;;  %v16730_v56 = vpop.permute.xlu0 %2670  ;;  %v16744_v59 = vpack.c.bf16 %v12137_v58, %v12136_v33  ;;  %v16762_v33 = vld [vmem:[%s14870_s23 + $0x2d2] sm:$0xff]  ;;  %v16765_v58 = vld [vmem:[%s14870_s23 + $0x2ca] sm:$0xff] }
 0x23f   : > { %21820 = vst [vmem:[#allocation68_spill] sm:$0xff] %v16730_v56  ;;  %3048 = vrot.lane.b32.xlu1 %v16563_v7, %s14822_s6 }
 0x240   : > { %3046 = vrot.lane.b32.xlu0 %v16566_v31, %s14822_s6  ;;  %14407 = vmatprep.subr.bf16.mxu1 %v16744_v59 }
 0x241   : > { %v16742_v55 = vpop.permute.xlu1 %2676 }
 0x242   : > { %21821 = vst [vmem:[#allocation69_spill] sm:$0xff] %v16742_v55  ;;  %v16746_v56 = vpop.permute.xlu0 %2674 }
 0x243   : > { %21822 = vst [vmem:[#allocation70_spill] sm:$0xff] %v16746_v56  ;;  %3052 = vrot.lane.b32.xlu1 %v16581_v25, %s14822_s6 }
 0x244   : > { %3050 = vrot.lane.b32.xlu0 %v16584_v62, %s14822_s6  ;;  %v16776_v62 = vld [vmem:[%s14870_s23 + $0x2f2] sm:$0xff] }
 0x245   : > { %v16753_v7 = vpop.permute.xlu1 %2744 }
 0x246   : > { %v16755_v31 = vpop.permute.xlu0 %2742 }
 0x247   : > { %3056 = vrot.lane.b32.xlu1 %v16595_v6, %s14822_s6  ;;  %v16779_v6 = vld [vmem:[%s14870_s23 + $0x2ea] sm:$0xff] }
 0x248   : > { %3054 = vrot.lane.b32.xlu0 %v16598_v32, %s14822_s6 }
 0x249   : > { %v16767_v25 = vpop.permute.xlu1 %2748 }
 0x24a   : > { %21823 = vst [vmem:[#allocation71_spill] sm:$0xff] %v16767_v25  ;;  %v16769_v55 = vpop.permute.xlu0 %2746 }
 0x24b   : > { %21824 = vst [vmem:[#allocation72_spill] sm:$0xff] %v16769_v55  ;;  %3060 = vrot.lane.b32.xlu1 %v16762_v33, %s14822_s6 }
 0x24c   : > { %3058 = vrot.lane.b32.xlu0 %v16765_v58, %s14822_s6 }
 0x24d   : > { %v16781_v56 = vpop.permute.xlu1 %2752 }
 0x24e   : > { %21825 = vst [vmem:[#allocation73_spill] sm:$0xff] %v16781_v56  ;;  %v16783_v32 = vpop.permute.xlu0 %2750 }
 0x24f   : > { %21826 = vst [vmem:[#allocation74_spill] sm:$0xff] %v16783_v32  ;;  %3064 = vrot.lane.b32.xlu1 %v16776_v62, %s14822_s6 }
 0x250   : > { %3062 = vrot.lane.b32.xlu0 %v16779_v6, %s14822_s6 }
 0x251   : > { %v16789_v40 = vpop.permute.xlu1 %2756 }
 0x252   : > { %21827 = vst [vmem:[#allocation75_spill] sm:$0xff] %v16789_v40  ;;  %v16791_v25 = vpop.permute.xlu0 %2754 }
 0x253   : > { %21828 = vst [vmem:[#allocation76_spill] sm:$0xff] %v16791_v25  ;;  %3939 = vrot.lane.b32.xlu1 %v16114_v27, %s14821_s24 }
 0x254   : > { %3937 = vrot.lane.b32.xlu0 %v16117_v42, %s14821_s24 }
 0x255   : > { %v16797_v55 = vpop.permute.xlu1 %2760 }
 0x256   : > { %21829 = vst [vmem:[#allocation77_spill] sm:$0xff] %v16797_v55  ;;  %v16799_v56 = vpop.permute.xlu0 %2758 }
 0x257   : > { %21830 = vst [vmem:[#allocation78_spill] sm:$0xff] %v16799_v56  ;;  %3943 = vrot.lane.b32.xlu1 %v16137_v48, %s14821_s24  ;;  %v12330_v56 = vld [vmem:[%s14870_s23 + $0x308] sm:$0xff] }
 0x258   : > { %3941 = vrot.lane.b32.xlu0 %v16140_v5, %s14821_s24 }
 0x259   : > { %v16805_v32 = vpop.permute.xlu1 %2764 }
 0x25a   : > { %21831 = vst [vmem:[#allocation79_spill] sm:$0xff] %v16805_v32  ;;  %v16807_v40 = vpop.permute.xlu0 %2762 }
 0x25b   : > { %21832 = vst [vmem:[#allocation80_spill] sm:$0xff] %v16807_v40  ;;  %3947 = vrot.lane.b32.xlu1 %v16152_v53, %s14821_s24 }
 0x25c   : > { %3945 = vrot.lane.b32.xlu0 %v16155_v38, %s14821_s24  ;;  %v16813_v27 = vpop.f32.mrb[16].mxu1 }
 0x25d   : > { %v16815_v42 = vpop.f32.mrb[17].mxu1  ;;  %v16817_v55 = vpop.permute.xlu1 %2768 }
 0x25e   : > { %21833 = vst [vmem:[#allocation81_spill] sm:$0xff] %v16817_v55  ;;  %v16819_v48 = vpop.permute.xlu0 %2766 }
 0x25f   : > { %21834 = vst [vmem:[#allocation82_spill] sm:$0xff] %v16819_v48  ;;  %3951 = vrot.lane.b32.xlu1 %v16166_v11, %s14821_s24 }
 0x260   : > { %3949 = vrot.lane.b32.xlu0 %v16169_v45, %s14821_s24  ;;  %v16825_v5 = vpop.f32.mrb[18].mxu1 }
 0x261   : > { %v16827_v53 = vpop.f32.mrb[19].mxu1  ;;  %v16829_v32 = vpop.permute.xlu1 %2772 }
 0x262   : > { %21835 = vst [vmem:[#allocation83_spill] sm:$0xff] %v16829_v32  ;;  %v16831_v38 = vpop.permute.xlu0 %2770 }
 0x263   : > { %21836 = vst [vmem:[#allocation84_spill] sm:$0xff] %v16831_v38  ;;  %3955 = vrot.lane.b32.xlu1 %v16180_v3, %s14821_s24 }
 0x264   : > { %3953 = vrot.lane.b32.xlu0 %v16183_v47, %s14821_s24  ;;  %v16837_v55 = vpop.f32.mrb[20].mxu1 }
 0x265   : > { %v16839_v11 = vpop.f32.mrb[21].mxu1  ;;  %v16841_v48 = vpop.permute.xlu1 %2776 }
 0x266   : > { %21837 = vst [vmem:[#allocation85_spill] sm:$0xff] %v16841_v48  ;;  %v16843_v45 = vpop.permute.xlu0 %2774 }
 0x267   : > { %21838 = vst [vmem:[#allocation86_spill] sm:$0xff] %v16843_v45  ;;  %3959 = vrot.lane.b32.xlu1 %v16194_v50, %s14821_s24 }
 0x268   : > { %3957 = vrot.lane.b32.xlu0 %v16197_v19, %s14821_s24  ;;  %v16849_v32 = vpop.f32.mrb[22].mxu1 }
 0x269   : > { %v16851_v3 = vpop.f32.mrb[23].mxu1  ;;  %v16853_v38 = vpop.permute.xlu1 %2780 }
 0x26a   : > { %21839 = vst [vmem:[#allocation87_spill] sm:$0xff] %v16853_v38  ;;  %v16855_v47 = vpop.permute.xlu0 %2778 }
 0x26b   : > { %21840 = vst [vmem:[#allocation88_spill] sm:$0xff] %v16855_v47  ;;  %3963 = vrot.lane.b32.xlu1 %v16208_v15, %s14821_s24 }
 0x26c   : > { %3961 = vrot.lane.b32.xlu0 %v16211_v14, %s14821_s24  ;;  %v16861_v48 = vpop.f32.mrb[24].mxu1 }
 0x26d   : > { %v16863_v50 = vpop.f32.mrb[25].mxu1  ;;  %v16865_v45 = vpop.permute.xlu1 %2784 }
 0x26e   : > { %21841 = vst [vmem:[#allocation89_spill] sm:$0xff] %v16865_v45  ;;  %v16867_v19 = vpop.permute.xlu0 %2782 }
 0x26f   : > { %21842 = vst [vmem:[#allocation90_spill] sm:$0xff] %v16867_v19  ;;  %3967 = vrot.lane.b32.xlu1 %v16222_v2, %s14821_s24 }
 0x270   : > { %3965 = vrot.lane.b32.xlu0 %v16225_v10, %s14821_s24  ;;  %v16873_v38 = vpop.f32.mrb[26].mxu1 }
 0x271   : > { %21843 = vst [vmem:[#allocation91_spill] sm:$0xff] %v16873_v38  ;;  %v16875_v15 = vpop.f32.mrb[27].mxu1  ;;  %v16877_v47 = vpop.permute.xlu1 %2788 }
 0x272   : > { %21844 = vst [vmem:[#allocation92_spill] sm:$0xff] %v16875_v15  ;;  %21845 = vst [vmem:[#allocation93_spill] sm:$0xff] %v16877_v47  ;;  %v16879_v14 = vpop.permute.xlu0 %2786  ;;  %v21851_v47 = vld [vmem:[#allocation16_spill] sm:$0xff]  ;;  %v16974_v15 = vld [vmem:[%s14870_s23 + $0x146] sm:$0xff] }
 0x273   : > { %21846 = vst [vmem:[#allocation94_spill] sm:$0xff] %v16879_v14  ;;  %3971 = vrot.lane.b32.xlu1 %v16236_v52, %s14821_s24 }
 0x274   : > { %3969 = vrot.lane.b32.xlu0 %v16239_v29, %s14821_s24  ;;  %v16885_v45 = vpop.f32.mrb[28].mxu1 }
 0x275   : > { %21847 = vst [vmem:[#allocation95_spill] sm:$0xff] %v16885_v45  ;;  %v16887_v2 = vpop.f32.mrb[29].mxu1  ;;  %v16889_v10 = vpop.permute.xlu1 %2792  ;;  %v16944_v45 = vld [vmem:[%s14870_s23 + $0x126] sm:$0xff] }
 0x276   : > { %21848 = vst [vmem:[#allocation96_spill] sm:$0xff] %v16887_v2  ;;  %21849 = vst [vmem:[#allocation97_spill] sm:$0xff] %v16889_v10  ;;  %v16891_v19 = vpop.permute.xlu0 %2790 }
 0x277   : > { %21850 = vst [vmem:[#allocation98_spill] sm:$0xff] %v16891_v19  ;;  %3975 = vrot.lane.b32.xlu1 %v16252_v43, %s14821_s24  ;;  %21863 = vst [vmem:[#allocation107_spill] sm:$0xff] %v16944_v45 }
 0x278   : > { %3973 = vrot.lane.b32.xlu0 %v21851_v47, %s14821_s24  ;;  %v16897_v52 = vpop.f32.mrb[30].mxu1 }
 0x279   : > { %21852 = vst [vmem:[#allocation16_spill] sm:$0xff] %v16897_v52  ;;  %v16899_v29 = vpop.f32.mrb[31].mxu1  ;;  %v16901_v14 = vpop.permute.xlu1 %2796 }
 0x27a   : > { %21853 = vst [vmem:[#allocation99_spill] sm:$0xff] %v16899_v29  ;;  %21854 = vst [vmem:[#allocation100_spill] sm:$0xff] %v16901_v14  ;;  %v16903_v40 = vpop.permute.xlu0 %2794  ;;  %v12327_v14 = vld [vmem:[%s14870_s23 + $0x2d0] sm:$0xff] }
 0x27b   : > { %21855 = vst [vmem:[#allocation101_spill] sm:$0xff] %v16903_v40  ;;  %3979 = vrot.lane.b32.xlu1 %v16271_v41, %s14821_s24  ;;  %v12326_v40 = vld [vmem:[%s14870_s23 + $0x2c8] sm:$0xff] }
 0x27c   : > { %3977 = vrot.lane.b32.xlu0 %v16274_v60, %s14821_s24  ;;  %v16922_v41 = vld [vmem:[%s14870_s23 + $0x10e] sm:$0xff]  ;;  %v16927_v60 = vld [vmem:[%s14870_s23 + $0x106] sm:$0xff] }
 0x27d   : > { %v16909_v43 = vpop.permute.xlu1 %2800 }
 0x27e   : > { %21856 = vst [vmem:[#allocation102_spill] sm:$0xff] %v16909_v43  ;;  %v16911_v47 = vpop.permute.xlu0 %2798  ;;  %v12328_v43 = vld [vmem:[%s14870_s23 + $0x2e8] sm:$0xff] }
 0x27f   : > { %21857 = vst [vmem:[#allocation103_spill] sm:$0xff] %v16911_v47  ;;  %3983 = vrot.lane.b32.xlu1 %v16291_v24, %s14821_s24  ;;  %v12329_v24 = vld [vmem:[%s14870_s23 + $0x2f0] sm:$0xff] }
 0x280   : > { %3981 = vrot.lane.b32.xlu0 %v16294_v39, %s14821_s24  ;;  %v21860_v39 = vld [vmem:[#allocation20_spill] sm:$0xff] }
 0x281   : > { %v16919_v10 = vpop.permute.xlu1 %2804  ;;  %v3099_v47 = vsel %vm578_vm0, %v16922_v41, %v21860_v39  ;;  %v12331_v39 = vld [vmem:[%s14870_s23 + $0x310] sm:$0xff] }
 0x282   : > { %21858 = vst [vmem:[#allocation104_spill] sm:$0xff] %v16919_v10  ;;  %v16924_v19 = vpop.permute.xlu0 %2802  ;;  %v16937_v10 = vld [vmem:[%s14870_s23 + $0x12e] sm:$0xff] }
 0x283   : > { %21859 = vst [vmem:[#allocation105_spill] sm:$0xff] %v16924_v19  ;;  %3987 = vrot.lane.b32.xlu1 %v12327_v14, %s14821_s24  ;;  %21861 = vst [vmem:[#allocation106_spill] sm:$0xff] %v16937_v10  ;;  %v21862_v19 = vld [vmem:[#allocation21_spill] sm:$0xff] }
 0x284   : > { %3985 = vrot.lane.b32.xlu0 %v12326_v40, %s14821_s24  ;;  %v3098_v2 = vsel %vm578_vm0, %v16927_v60, %v21862_v19 }
 0x285   : > { %v3005_v29 = vpop.permute.xlu1 %3004 }
 0x286   : > { %v3131_v52 = vsel %vm611_vm1, %v3099_v47, %v3005_v29  ;;  %v3003_v14 = vpop.permute.xlu0 %3002  ;;  %v21864_v29 = vld [vmem:[#allocation22_spill] sm:$0xff] }
 0x287   : > { %v3130_v40 = vsel %vm611_vm1, %v3098_v2, %v3003_v14  ;;  %3991 = vrot.lane.b32.xlu1 %v12329_v24, %s14821_s24  ;;  %v3101_v47 = vsel %vm578_vm0, %v16937_v10, %v21864_v29  ;;  %v12138_v2 = vld [vmem:[%s21522_s1 + $0x58] sm:$0xff]  ;;  %v12367_v24 = vld [vmem:[%s21522_s1 + $0x80] sm:$0xff] }
 0x288   : > { %3989 = vrot.lane.b32.xlu0 %v12328_v43, %s14821_s24  ;;  %13748 = vmatprep.mubr.msk.f32.mxu1 %vm1068_vm2, %v3130_v40  ;;  %v12366_v43 = vld [vmem:[%s21522_s1 + $0x78] sm:$0xff]  ;;  %v21865_v40 = vld [vmem:[#allocation23_spill] sm:$0xff] }
 0x289   : > { %13749 = vmatmul.mubr.msk.f32.vlgmr.msra.gmra.mrb[32].mxu1 %vm1068_vm2, %v3131_v52  ;;  %v3009_v19 = vpop.permute.xlu1 %3008  ;;  %v16966_v52 = vld [vmem:[%s14870_s23 + $0x14e] sm:$0xff]  ;;  %v3100_v29 = vsel %vm578_vm0, %v16944_v45, %v21865_v40  ;;  %v16982_v25 = vpack.c.bf16 %v12367_v24, %v12366_v43  ;;  %v21866_v40 = vld [vmem:[#allocation25_spill] sm:$0xff] }
 0x28a   : > { %v3133_v14 = vsel %vm611_vm1, %v3101_v47, %v3009_v19  ;;  %v3007_v10 = vpop.permute.xlu0 %3006  ;;  %14409 = vmatpush3.bf16.msra.mxu1 %v16744_v59  ;;  %v12333_v19 = vld [vmem:[%s14870_s23 + $0x330] sm:$0xff]  ;;  %v12332_v47 = vld [vmem:[%s14870_s23 + $0x328] sm:$0xff]  ;;  %v3103_v59 = vsel %vm578_vm0, %v16966_v52, %v21866_v40 }
 0x28b   : > { %v3132_v38 = vsel %vm611_vm1, %v3100_v29, %v3007_v10  ;;  %3995 = vrot.lane.b32.xlu1 %v12331_v39, %s14821_s24  ;;  %13800 = vmatprep.subr.mxu1 %v12138_v2  ;;  %v16989_v29 = vld [vmem:[%s14870_s23 + $0x16e] sm:$0xff]  ;;  %v16996_v43 = vld [vmem:[%s14870_s23 + $0x166] sm:$0xff] }
 0x28c   : > { %3993 = vrot.lane.b32.xlu0 %v12330_v56, %s14821_s24  ;;  %13751 = vmatprep.mubr.msk.f32.mxu1 %vm1068_vm2, %v3132_v38  ;;  %v21867_v56 = vld [vmem:[#allocation52_spill] sm:$0xff] }
 0x28d   : > { %13752 = vmatmul.mubr.msk.f32.gmra.mrb[34].mxu1 %vm1068_vm2, %v3133_v14  ;;  %v3013_v10 = vpop.permute.xlu1 %3012  ;;  %v3102_v38 = vsel %vm578_vm0, %v16974_v15, %v21867_v56  ;;  %v21868_v14 = vld [vmem:[#allocation53_spill] sm:$0xff] }
 0x28e   : > { %v3135_v39 = vsel %vm611_vm1, %v3103_v59, %v3013_v10  ;;  %v3011_v45 = vpop.permute.xlu0 %3010  ;;  %13801 = vmatpush3.msra.mxu1 %v12138_v2  ;;  %v3105_v59 = vsel %vm578_vm0, %v16989_v29, %v21868_v14  ;;  %v17008_v10 = vld [vmem:[%s14870_s23 + $0x18e] sm:$0xff]  ;;  %v17035_v14 = vld [vmem:[%s14870_s23 + $0x1a6] sm:$0xff] }
 0x28f   : > { %v3134_v24 = vsel %vm611_vm1, %v3102_v38, %v3011_v45  ;;  %3999 = vrot.lane.b32.xlu1 %v12333_v19, %s14821_s24  ;;  %14411 = vmatprep.subr.bf16.mxu1 %v16982_v25  ;;  %v21869_v19 = vld [vmem:[#allocation54_spill] sm:$0xff] }
 0x290   : > { %3997 = vrot.lane.b32.xlu0 %v12332_v47, %s14821_s24  ;;  %13754 = vmatprep.mubr.msk.f32.mxu1 %vm1068_vm2, %v3134_v24  ;;  %v3104_v47 = vsel %vm578_vm0, %v16996_v43, %v21869_v19  ;;  %v17015_v24 = vld [vmem:[%s14870_s23 + $0x186] sm:$0xff]  ;;  %v17028_v19 = vld [vmem:[%s14870_s23 + $0x1ae] sm:$0xff] }
 0x291   : > { %13755 = vmatmul.mubr.msk.f32.gmra.mrb[36].mxu1 %vm1068_vm2, %v3135_v39  ;;  %v3017_v2 = vpop.permute.xlu1 %3016  ;;  %v21870_v39 = vld [vmem:[#allocation3_spill] sm:$0xff] }
 0x292   : > { %v3137_v45 = vsel %vm611_vm1, %v3105_v59, %v3017_v2  ;;  %v3015_v38 = vpop.permute.xlu0 %3014  ;;  %v3107_v59 = vsel %vm578_vm0, %v17008_v10, %v21870_v39 }
 0x293   : > { %v3136_v56 = vsel %vm611_vm1, %v3104_v47, %v3015_v38  ;;  %4067 = vrot.lane.b32.xlu1 %v16379_v61, %s14822_s6  ;;  %v21871_v38 = vld [vmem:[#allocation4_spill] sm:$0xff] }
 0x294   : > { %4065 = vrot.lane.b32.xlu0 %v16382_v46, %s14822_s6  ;;  %13757 = vmatprep.mubr.msk.f32.mxu1 %vm1068_vm2, %v3136_v56  ;;  %v3106_v61 = vsel %vm578_vm0, %v17015_v24, %v21871_v38  ;;  %v17048_v38 = vld [vmem:[%s14870_s23 + $0x1ce] sm:$0xff] }
 0x295   : > { %13758 = vmatmul.mubr.msk.f32.gmra.mrb[38].mxu1 %vm1068_vm2, %v3137_v45  ;;  %v3021_v2 = vpop.permute.xlu1 %3020  ;;  %v21872_v45 = vld [vmem:[#allocation5_spill] sm:$0xff] }
 0x296   : > { %v3139_v47 = vsel %vm611_vm1, %v3107_v59, %v3021_v2  ;;  %v3019_v46 = vpop.permute.xlu0 %3018  ;;  %v3109_v59 = vsel %vm578_vm0, %v17028_v19, %v21872_v45 }
 0x297   : > { %v3138_v56 = vsel %vm611_vm1, %v3106_v61, %v3019_v46  ;;  %4071 = vrot.lane.b32.xlu1 %v16399_v8, %s14822_s6  ;;  %v21873_v46 = vld [vmem:[#allocation6_spill] sm:$0xff] }
 0x298   : > { %4069 = vrot.lane.b32.xlu0 %v16402_v4, %s14822_s6  ;;  %13760 = vmatprep.mubr.msk.f32.mxu1 %vm1068_vm2, %v3138_v56  ;;  %v3108_v8 = vsel %vm578_vm0, %v17035_v14, %v21873_v46  ;;  %v17055_v4 = vld [vmem:[%s14870_s23 + $0x1c6] sm:$0xff]  ;;  %v21875_v46 = vld [vmem:[#allocation7_spill] sm:$0xff] }
 0x299   : > { %13761 = vmatmul.mubr.msk.f32.gmra.mrb[40].mxu1 %vm1068_vm2, %v3139_v47  ;;  %v3025_v2 = vpop.permute.xlu1 %3024  ;;  %v3111_v45 = vsel %vm578_vm0, %v17048_v38, %v21875_v46 }
 0x29a   : > { %v3141_v61 = vsel %vm611_vm1, %v3109_v59, %v3025_v2  ;;  %v3023_v39 = vpop.permute.xlu0 %3022 }
 0x29b   : > { %v3140_v47 = vsel %vm611_vm1, %v3108_v8, %v3023_v39  ;;  %4075 = vrot.lane.b32.xlu1 %v16419_v36, %s14822_s6  ;;  %v17071_v8 = vld [vmem:[%s14870_s23 + $0x1ee] sm:$0xff] }
 0x29c   : > { %4073 = vrot.lane.b32.xlu0 %v16422_v35, %s14822_s6  ;;  %v13696_v56 = vpop.f32.mrb[0].mxu0  ;;  %13763 = vmatprep.mubr.msk.f32.mxu1 %vm1068_vm2, %v3140_v47  ;;  %v21877_v47 = vld [vmem:[#allocation8_spill] sm:$0xff] }
 0x29d   : > { %v17064_v59 = vadd.f32 %v13696_v56, %v16632_v34  ;;  %v2294_v2 = vpop.f32.mrb[1].mxu0  ;;  %13764 = vmatmul.mubr.msk.f32.gmra.mrb[42].mxu1 %vm1068_vm2, %v3141_v61  ;;  %v3029_v39 = vpop.permute.xlu1 %3028  ;;  %v3110_v34 = vsel %vm578_vm0, %v17055_v4, %v21877_v47 }
 0x29e   : > { %v17074_v36 = vadd.f32 %v2294_v2, %v16634_v20  ;;  %v3143_v35 = vsel %vm611_vm1, %v3111_v45, %v3029_v39  ;;  %v3027_v56 = vpop.permute.xlu0 %3026  ;;  %v21879_v39 = vld [vmem:[#allocation9_spill] sm:$0xff] }
 0x29f   : > { %21874 = vst [vmem:[#allocation25_spill] sm:$0xff] %v17064_v59  ;;  %v17081_v59 = vld [vmem:[%s14870_s23 + $0x1e6] sm:$0xff]  ;;  %v3142_v61 = vsel %vm611_vm1, %v3110_v34, %v3027_v56  ;;  %4079 = vrot.lane.b32.xlu1 %v16439_v37, %s14822_s6  ;;  %v17097_v56 = vld [vmem:[%s14870_s23 + $0x20e] sm:$0xff] }
 0x2a0   : > { %21876 = vst [vmem:[#allocation7_spill] sm:$0xff] %v17074_v36  ;;  %4077 = vrot.lane.b32.xlu0 %v16442_v51, %s14822_s6  ;;  %v13699_v20 = vpop.f32.mrb[2].mxu0  ;;  %13766 = vmatprep.mubr.msk.f32.mxu1 %vm1068_vm2, %v3142_v61  ;;  %v3113_v36 = vsel %vm578_vm0, %v17071_v8, %v21879_v39  ;;  %v21881_v61 = vld [vmem:[#allocation55_spill] sm:$0xff] }
 0x2a1   : > { %v17090_v45 = vadd.f32 %v13699_v20, %v16644_v26  ;;  %v2304_v2 = vpop.f32.mrb[3].mxu0  ;;  %13767 = vmatmul.mubr.msk.f32.gmra.mrb[44].mxu1 %vm1068_vm2, %v3143_v35  ;;  %v3033_v34 = vpop.permute.xlu1 %3032  ;;  %v3112_v26 = vsel %vm578_vm0, %v17081_v59, %v21881_v61 }
 0x2a2   : > { %v17100_v37 = vadd.f32 %v2304_v2, %v16646_v54  ;;  %v3145_v51 = vsel %vm611_vm1, %v3113_v36, %v3033_v34  ;;  %v3031_v20 = vpop.permute.xlu0 %3030  ;;  %v21883_v34 = vld [vmem:[#allocation56_spill] sm:$0xff] }
 0x2a3   : > { %21878 = vst [vmem:[#allocation8_spill] sm:$0xff] %v17090_v45  ;;  %v17107_v45 = vld [vmem:[%s14870_s23 + $0x206] sm:$0xff]  ;;  %v3144_v35 = vsel %vm611_vm1, %v3112_v26, %v3031_v20  ;;  %4083 = vrot.lane.b32.xlu1 %v16459_v49, %s14822_s6  ;;  %v17123_v20 = vld [vmem:[%s14870_s23 + $0x22e] sm:$0xff] }
 0x2a4   : > { %21880 = vst [vmem:[#allocation9_spill] sm:$0xff] %v17100_v37  ;;  %4081 = vrot.lane.b32.xlu0 %v16462_v23, %s14822_s6  ;;  %v13702_v54 = vpop.f32.mrb[4].mxu0  ;;  %13769 = vmatprep.mubr.msk.f32.mxu1 %vm1068_vm2, %v3144_v35  ;;  %v3115_v37 = vsel %vm578_vm0, %v17097_v56, %v21883_v34  ;;  %v21885_v35 = vld [vmem:[#allocation57_spill] sm:$0xff] }
 0x2a5   : > { %v17116_v36 = vadd.f32 %v13702_v54, %v16656_v9  ;;  %v2314_v2 = vpop.f32.mrb[5].mxu0  ;;  %13770 = vmatmul.mubr.msk.f32.gmra.mrb[46].mxu1 %vm1068_vm2, %v3145_v51  ;;  %v3037_v26 = vpop.permute.xlu1 %3036  ;;  %v3114_v9 = vsel %vm578_vm0, %v17107_v45, %v21885_v35  ;;  %v21900_v35 = vld [vmem:[#allocation63_spill] sm:$0xff] }
 0x2a6   : > { %v17126_v49 = vadd.f32 %v2314_v2, %v16658_v30  ;;  %v3147_v23 = vsel %vm611_vm1, %v3115_v37, %v3037_v26  ;;  %v3035_v54 = vpop.permute.xlu0 %3034  ;;  %v21887_v26 = vld [vmem:[#allocation58_spill] sm:$0xff] }
 0x2a7   : > { %21882 = vst [vmem:[#allocation108_spill] sm:$0xff] %v17116_v36  ;;  %v17133_v36 = vld [vmem:[%s14870_s23 + $0x226] sm:$0xff]  ;;  %v3146_v51 = vsel %vm611_vm1, %v3114_v9, %v3035_v54  ;;  %4087 = vrot.lane.b32.xlu1 %v16479_v21, %s14822_s6  ;;  %v17149_v54 = vld [vmem:[%s14870_s23 + $0x24e] sm:$0xff] }
 0x2a8   : > { %21884 = vst [vmem:[#allocation109_spill] sm:$0xff] %v17126_v49  ;;  %4085 = vrot.lane.b32.xlu0 %v16482_v1, %s14822_s6  ;;  %v13705_v30 = vpop.f32.mrb[6].mxu0  ;;  %13772 = vmatprep.mubr.msk.f32.mxu1 %vm1068_vm2, %v3146_v51  ;;  %v3117_v49 = vsel %vm578_vm0, %v17123_v20, %v21887_v26  ;;  %v21889_v51 = vld [vmem:[#allocation59_spill] sm:$0xff] }
 0x2a9   : > { %v17142_v37 = vadd.f32 %v13705_v30, %v16668_v22  ;;  %v2324_v2 = vpop.f32.mrb[7].mxu0  ;;  %13773 = vmatmul.mubr.msk.f32.gmra.mrb[48].mxu1 %vm1068_vm2, %v3147_v23  ;;  %v3041_v9 = vpop.permute.xlu1 %3040  ;;  %v3116_v22 = vsel %vm578_vm0, %v17133_v36, %v21889_v51  ;;  %v21894_v51 = vld [vmem:[#allocation61_spill] sm:$0xff] }
 0x2aa   : > { %v17152_v21 = vadd.f32 %v2324_v2, %v16670_v18  ;;  %v3149_v1 = vsel %vm611_vm1, %v3117_v49, %v3041_v9  ;;  %v3039_v30 = vpop.permute.xlu0 %3038  ;;  %v21891_v9 = vld [vmem:[#allocation60_spill] sm:$0xff] }
 0x2ab   : > { %21886 = vst [vmem:[#allocation110_spill] sm:$0xff] %v17142_v37  ;;  %v17159_v37 = vld [vmem:[%s14870_s23 + $0x246] sm:$0xff]  ;;  %v3148_v23 = vsel %vm611_vm1, %v3116_v22, %v3039_v30  ;;  %4091 = vrot.lane.b32.xlu1 %v16499_v16, %s14822_s6  ;;  %v3119_v22 = vsel %vm578_vm0, %v17149_v54, %v21891_v9  ;;  %v17175_v16 = vld [vmem:[%s14870_s23 + $0x26e] sm:$0xff] }
 0x2ac   : > { %21888 = vst [vmem:[#allocation111_spill] sm:$0xff] %v17152_v21  ;;  %4089 = vrot.lane.b32.xlu0 %v16502_v17, %s14822_s6  ;;  %v13708_v18 = vpop.f32.mrb[8].mxu0  ;;  %13775 = vmatprep.mubr.msk.f32.mxu1 %vm1068_vm2, %v3148_v23  ;;  %v21892_v21 = vld [vmem:[#allocation36_spill] sm:$0xff]  ;;  %v17203_v9 = vld [vmem:[%s14870_s23 + $0x28e] sm:$0xff] }
 0x2ad   : > { %v17168_v49 = vadd.f32 %v13708_v18, %v16680_v44  ;;  %v2334_v2 = vpop.f32.mrb[9].mxu0  ;;  %13776 = vmatmul.mubr.msk.f32.gmra.mrb[50].mxu1 %vm1068_vm2, %v3149_v1  ;;  %v3045_v30 = vpop.permute.xlu1 %3044  ;;  %v3118_v44 = vsel %vm578_vm0, %v17159_v37, %v21894_v51 }
 0x2ae   : > { %v17178_v17 = vadd.f32 %v2334_v2, %v21892_v21  ;;  %v3151_v23 = vsel %vm611_vm1, %v3119_v22, %v3045_v30  ;;  %v3043_v18 = vpop.permute.xlu0 %3042  ;;  %v12351_v2 = vld [vmem:[%s14870_s23 + $0x252] sm:$0xff]  ;;  %v12350_v22 = vld [vmem:[%s14870_s23 + $0x24a] sm:$0xff] }
 0x2af   : > { %21890 = vst [vmem:[#allocation112_spill] sm:$0xff] %v17168_v49  ;;  %v17185_v49 = vld [vmem:[%s14870_s23 + $0x266] sm:$0xff]  ;;  %v3150_v1 = vsel %vm611_vm1, %v3118_v44, %v3043_v18  ;;  %4095 = vrot.lane.b32.xlu1 %v16517_v12, %s14822_s6  ;;  %v21895_v30 = vld [vmem:[#allocation51_spill] sm:$0xff] }
 0x2b0   : > { %21893 = vst [vmem:[#allocation36_spill] sm:$0xff] %v17178_v17  ;;  %4093 = vrot.lane.b32.xlu0 %v16520_v13, %s14822_s6  ;;  %v13711_v21 = vpop.f32.mrb[10].mxu0  ;;  %13778 = vmatprep.mubr.msk.f32.mxu1 %vm1068_vm2, %v3150_v1  ;;  %v21897_v44 = vld [vmem:[#allocation62_spill] sm:$0xff] }
 0x2b1   : > { %v17196_v17 = vadd.f32 %v13711_v21, %v21895_v30  ;;  %v2344_v51 = vpop.f32.mrb[11].mxu0  ;;  %13779 = vmatmul.mubr.msk.f32.gmra.mrb[52].mxu1 %vm1068_vm2, %v3151_v23  ;;  %v3121_v12 = vsel %vm578_vm0, %v17175_v16, %v21897_v44  ;;  %v3049_v18 = vpop.permute.xlu1 %3048  ;;  %v21898_v13 = vld [vmem:[#allocation38_spill] sm:$0xff]  ;;  %v3120_v21 = vsel %vm578_vm0, %v17185_v49, %v21900_v35  ;;  %v21904_v35 = vld [vmem:[#allocation65_spill] sm:$0xff] }
 0x2b2   : > { %v17206_v26 = vadd.f32 %v2344_v51, %v21898_v13  ;;  %v3153_v1 = vsel %vm611_vm1, %v3121_v12, %v3049_v18  ;;  %v3047_v30 = vpop.permute.xlu0 %3046  ;;  %v12353_v51 = vld [vmem:[%s14870_s23 + $0x272] sm:$0xff]  ;;  %v12352_v12 = vld [vmem:[%s14870_s23 + $0x26a] sm:$0xff] }
 0x2b3   : > { %21896 = vst [vmem:[#allocation51_spill] sm:$0xff] %v17196_v17  ;;  %v17213_v17 = vld [vmem:[%s14870_s23 + $0x286] sm:$0xff]  ;;  %v3152_v23 = vsel %vm611_vm1, %v3120_v21, %v3047_v30  ;;  %4099 = vrot.lane.b32.xlu1 %v12351_v2, %s14822_s6  ;;  %v17229_v30 = vld [vmem:[%s14870_s23 + $0x2ae] sm:$0xff] }
 0x2b4   : > { %21899 = vst [vmem:[#allocation38_spill] sm:$0xff] %v17206_v26  ;;  %4097 = vrot.lane.b32.xlu0 %v12350_v22, %s14822_s6  ;;  %v13714_v44 = vpop.f32.mrb[12].mxu0  ;;  %13781 = vmatprep.mubr.msk.f32.mxu1 %vm1068_vm2, %v3152_v23  ;;  %v21902_v26 = vld [vmem:[#allocation64_spill] sm:$0xff] }
 0x2b5   : > { %v17222_v18 = vadd.f32 %v13714_v44, %v16704_v63  ;;  %v2354_v13 = vpop.f32.mrb[13].mxu0  ;;  %13782 = vmatmul.mubr.msk.f32.gmra.mrb[54].mxu1 %vm1068_vm2, %v3153_v1  ;;  %v3123_v2 = vsel %vm578_vm0, %v17203_v9, %v21902_v26  ;;  %v3053_v21 = vpop.permute.xlu1 %3052  ;;  %v3122_v63 = vsel %vm578_vm0, %v17213_v17, %v21904_v35 }
 0x2b6   : > { %v17232_v22 = vadd.f32 %v2354_v13, %v16706_v0  ;;  %v3155_v23 = vsel %vm611_vm1, %v3123_v2, %v3053_v21  ;;  %v3051_v44 = vpop.permute.xlu0 %3050  ;;  %v12355_v0 = vld [vmem:[%s14870_s23 + $0x292] sm:$0xff]  ;;  %v12354_v13 = vld [vmem:[%s14870_s23 + $0x28a] sm:$0xff] }
 0x2b7   : > { %21901 = vst [vmem:[#allocation113_spill] sm:$0xff] %v17222_v18  ;;  %v17239_v18 = vld [vmem:[%s14870_s23 + $0x2a6] sm:$0xff]  ;;  %v3154_v1 = vsel %vm611_vm1, %v3122_v63, %v3051_v44  ;;  %4103 = vrot.lane.b32.xlu1 %v12353_v51, %s14822_s6 }
 0x2b8   : > { %21903 = vst [vmem:[#allocation114_spill] sm:$0xff] %v17232_v22  ;;  %4101 = vrot.lane.b32.xlu0 %v12352_v12, %s14822_s6  ;;  %v13717_v26 = vpop.f32.mrb[14].mxu0  ;;  %13784 = vmatprep.mubr.msk.f32.mxu1 %vm1068_vm2, %v3154_v1  ;;  %v21906_v63 = vld [vmem:[#allocation10_spill] sm:$0xff]  ;;  %v21908_v22 = vld [vmem:[#allocation11_spill] sm:$0xff] }
 0x2b9   : > { %v17248_v2 = vadd.f32 %v13717_v26, %v16716_v28  ;;  %v2364_v21 = vpop.f32.mrb[15].mxu0  ;;  %13785 = vmatmul.mubr.msk.f32.gmra.mrb[56].mxu1 %vm1068_vm2, %v3155_v23  ;;  %v3125_v51 = vsel %vm578_vm0, %v17229_v30, %v21906_v63  ;;  %v3057_v44 = vpop.permute.xlu1 %3056  ;;  %v3124_v28 = vsel %vm578_vm0, %v17239_v18, %v21908_v22  ;;  %v17268_v23 = vld [vmem:[%s14870_s23 + $0x2c6] sm:$0xff] }
 0x2ba   : > { %v17255_v12 = vadd.f32 %v2364_v21, %v16718_v57  ;;  %v3157_v1 = vsel %vm611_vm1, %v3125_v51, %v3057_v44  ;;  %v3055_v26 = vpop.permute.xlu0 %3054  ;;  %v12357_v21 = vld [vmem:[%s14870_s23 + $0x2b2] sm:$0xff]  ;;  %v12356_v51 = vld [vmem:[%s14870_s23 + $0x2aa] sm:$0xff]  ;;  %v21912_v22 = vld [vmem:[#allocation13_spill] sm:$0xff] }
 0x2bb   : > { %21905 = vst [vmem:[#allocation115_spill] sm:$0xff] %v17248_v2  ;;  %v17262_v2 = vld [vmem:[%s14870_s23 + $0x2ce] sm:$0xff]  ;;  %v3156_v35 = vsel %vm611_vm1, %v3124_v28, %v3055_v26  ;;  %4107 = vrot.lane.b32.xlu1 %v12355_v0, %s14822_s6  ;;  %v21910_v28 = vld [vmem:[#allocation12_spill] sm:$0xff]  ;;  %v3126_v63 = vsel %vm578_vm0, %v17268_v23, %v21912_v22 }
 0x2bc   : > { %21907 = vst [vmem:[#allocation116_spill] sm:$0xff] %v17255_v12  ;;  %4105 = vrot.lane.b32.xlu0 %v12354_v13, %s14822_s6  ;;  %v13720_v57 = vpop.f32.mrb[16].mxu0  ;;  %13787 = vmatprep.mubr.msk.f32.mxu1 %vm1068_vm2, %v3156_v35  ;;  %v3127_v0 = vsel %vm578_vm0, %v17262_v2, %v21910_v28  ;;  %v21916_v22 = vld [vmem:[#allocation15_spill] sm:$0xff] }
 0x2bd   : > { %v17274_v44 = vadd.f32 %v13720_v57, %v16813_v27  ;;  %v2374_v12 = vpop.f32.mrb[17].mxu0  ;;  %13788 = vmatmul.mubr.msk.f32.gmra.mrb[58].mxu1 %vm1068_vm2, %v3157_v1  ;;  %v3061_v13 = vpop.permute.xlu1 %3060  ;;  %v17288_v57 = vld [vmem:[%s14870_s23 + $0x2ee] sm:$0xff]  ;;  %v17294_v1 = vld [vmem:[%s14870_s23 + $0x2e6] sm:$0xff] }
 0x2be   : > { %v17281_v26 = vadd.f32 %v2374_v12, %v16815_v42  ;;  %v3159_v35 = vsel %vm611_vm1, %v3127_v0, %v3061_v13  ;;  %v3059_v27 = vpop.permute.xlu0 %3058  ;;  %v12040_v12 = vld [vmem:[%s14870_s23 + $0xc6] sm:$0xff] }
 0x2bf   : > { %21909 = vst [vmem:[#allocation117_spill] sm:$0xff] %v17274_v44  ;;  %v3158_v44 = vsel %vm611_vm1, %v3126_v63, %v3059_v27  ;;  %4111 = vrot.lane.b32.xlu1 %v12357_v21, %s14822_s6 }
 0x2c0   : > { %21911 = vst [vmem:[#allocation118_spill] sm:$0xff] %v17281_v26  ;;  %4109 = vrot.lane.b32.xlu0 %v12356_v51, %s14822_s6  ;;  %v13723_v42 = vpop.f32.mrb[18].mxu0  ;;  %13790 = vmatprep.mubr.msk.f32.mxu1 %vm1068_vm2, %v3158_v44  ;;  %v21914_v26 = vld [vmem:[#allocation14_spill] sm:$0xff]  ;;  %v3128_v44 = vsel %vm578_vm0, %v17294_v1, %v21916_v22 }
 0x2c1   : > { %v17299_v0 = vadd.f32 %v13723_v42, %v16825_v5  ;;  %v2384_v13 = vpop.f32.mrb[19].mxu0  ;;  %13791 = vmatmul.mubr.msk.f32.gmra.mrb[60].mxu1 %vm1068_vm2, %v3159_v35  ;;  %v3129_v63 = vsel %vm578_vm0, %v17288_v57, %v21914_v26  ;;  %v3065_v21 = vpop.permute.xlu1 %3064  ;;  %v12041_v35 = vld [vmem:[%s14870_s23 + $0xce] sm:$0xff] }
 0x2c2   : > { %v17306_v51 = vadd.f32 %v2384_v13, %v16827_v53  ;;  %v3161_v27 = vsel %vm611_vm1, %v3129_v63, %v3065_v21  ;;  %v3063_v5 = vpop.permute.xlu0 %3062  ;;  %v12042_v63 = vld [vmem:[%s14870_s23 + $0xe6] sm:$0xff]  ;;  %v12273_v26 = vld [vmem:[%s14870_s23 + $0x16e] sm:$0xff] }
 0x2c3   : > { %21913 = vst [vmem:[#allocation119_spill] sm:$0xff] %v17299_v0  ;;  %v3160_v42 = vsel %vm611_vm1, %v3128_v44, %v3063_v5  ;;  %4115 = vrot.lane.b32.xlu1 %v16762_v33, %s14822_s6  ;;  %v21917_v0 = vld [vmem:[#allocation26_spill] sm:$0xff] }
 0x2c4   : > { %21915 = vst [vmem:[#allocation120_spill] sm:$0xff] %v17306_v51  ;;  %4113 = vrot.lane.b32.xlu0 %v16765_v58, %s14822_s6  ;;  %v2838_v53 = vsel %vm578_vm0, %v12040_v12, %v21917_v0  ;;  %v13726_v13 = vpop.f32.mrb[20].mxu0  ;;  %13793 = vmatprep.mubr.msk.f32.mxu1 %vm1068_vm2, %v3160_v42  ;;  %v21920_v0 = vld [vmem:[#allocation27_spill] sm:$0xff] }
 0x2c5   : > { %v2870_v21 = vsel %vm611_vm1, %v2838_v53, %v16755_v31  ;;  %v17325_v44 = vadd.f32 %v13726_v13, %v16837_v55  ;;  %v2394_v33 = vpop.f32.mrb[21].mxu0  ;;  %13794 = vmatmul.mubr.msk.f32.gmra.mrb[62].mxu1 %vm1068_vm2, %v3161_v27  ;;  %v17328_v58 = vpop.permute.xlu1 %3939  ;;  %v2839_v42 = vsel %vm578_vm0, %v12041_v35, %v21920_v0  ;;  %v12043_v55 = vld [vmem:[%s14870_s23 + $0xee] sm:$0xff]  ;;  %v21921_v31 = vld [vmem:[#allocation28_spill] sm:$0xff] }
 0x2c6   : > { %v17331_v5 = vadd.f32 %v2394_v33, %v16839_v11  ;;  %v17333_v12 = vpop.permute.xlu0 %3937  ;;  %13802 = vmatprep.mubr.msk.f32.mxu1 %vm1068_vm2, %v2870_v21  ;;  %v2840_v27 = vsel %vm578_vm0, %v12042_v63, %v21921_v31  ;;  %v2871_v11 = vsel %vm611_vm1, %v2839_v42, %v16753_v7  ;;  %v12363_v13 = vld [vmem:[%s14870_s23 + $0x312] sm:$0xff]  ;;  %v12362_v33 = vld [vmem:[%s14870_s23 + $0x30a] sm:$0xff] }
 0x2c7   : > { %21918 = vst [vmem:[#allocation26_spill] sm:$0xff] %v17325_v44  ;;  %4119 = vrot.lane.b32.xlu1 %v16776_v62, %s14822_s6  ;;  %v21922_v21 = vld [vmem:[#allocation72_spill] sm:$0xff]  ;;  %v12368_v7 = vld [vmem:[%s21522_s1 + $0x88] sm:$0xff]  ;;  %v21926_v31 = vld [vmem:[#allocation31_spill] sm:$0xff] }
 0x2c8   : > { %21919 = vst [vmem:[#allocation121_spill] sm:$0xff] %v17331_v5  ;;  %4117 = vrot.lane.b32.xlu0 %v16779_v6, %s14822_s6  ;;  %v13729_v53 = vpop.f32.mrb[22].mxu0  ;;  %v2872_v5 = vsel %vm611_vm1, %v2840_v27, %v21922_v21  ;;  %v2842_v27 = vsel %vm578_vm0, %v16927_v60, %v21926_v31  ;;  %v12365_v21 = vld [vmem:[%s14870_s23 + $0x332] sm:$0xff] }
 0x2c9   : > { %v17352_v35 = vadd.f32 %v13729_v53, %v16849_v32  ;;  %v2404_v62 = vpop.f32.mrb[23].mxu0  ;;  %13803 = vmatmul.mubr.msk.f32.vlgmr.msra.gmra.mrb[32].mxu1 %vm1068_vm2, %v2871_v11  ;;  %v17355_v6 = vpop.permute.xlu1 %3943  ;;  %v21925_v32 = vld [vmem:[#allocation29_spill] sm:$0xff]  ;;  %v21927_v11 = vld [vmem:[#allocation71_spill] sm:$0xff] }
 0x2ca   : > { %v17361_v63 = vadd.f32 %v2404_v62, %v16851_v3  ;;  %v17363_v0 = vpop.permute.xlu0 %3941  ;;  %13805 = vmatprep.mubr.msk.f32.mxu1 %vm1068_vm2, %v2872_v5  ;;  %14413 = vmatpush3.bf16.msra.mxu1 %v16982_v25  ;;  %v2841_v42 = vsel %vm578_vm0, %v12043_v55, %v21925_v32  ;;  %v12364_v62 = vld [vmem:[%s14870_s23 + $0x32a] sm:$0xff] }
 0x2cb   : > { %21923 = vst [vmem:[#allocation27_spill] sm:$0xff] %v17352_v35  ;;  %4123 = vrot.lane.b32.xlu1 %v12363_v13, %s14822_s6  ;;  %v2873_v3 = vsel %vm611_vm1, %v2841_v42, %v21927_v11  ;;  %13854 = vmatprep.subr.mxu1 %v12368_v7  ;;  %v21928_v5 = vld [vmem:[#allocation74_spill] sm:$0xff]  ;;  %v21931_v42 = vld [vmem:[#allocation24_spill] sm:$0xff] }
 0x2cc   : > { %21924 = vst [vmem:[#allocation28_spill] sm:$0xff] %v17361_v63  ;;  %4121 = vrot.lane.b32.xlu0 %v12362_v33, %s14822_s6  ;;  %v13732_v53 = vpop.f32.mrb[24].mxu0  ;;  %v2874_v25 = vsel %vm611_vm1, %v2842_v27, %v21928_v5  ;;  %v2843_v31 = vsel %vm578_vm0, %v16922_v41, %v21931_v42  ;;  %v21933_v27 = vld [vmem:[#allocation107_spill] sm:$0xff]  ;;  %v21989_v63 = vld [vmem:[#allocation18_spill] sm:$0xff] }
 0x2cd   : > { %v17381_v55 = vadd.f32 %v13732_v53, %v16861_v48  ;;  %v2414_v13 = vpop.f32.mrb[25].mxu0  ;;  %13806 = vmatmul.mubr.msk.f32.gmra.mrb[34].mxu1 %vm1068_vm2, %v2873_v3  ;;  %v17384_v33 = vpop.permute.xlu1 %3947  ;;  %v21932_v48 = vld [vmem:[#allocation44_spill] sm:$0xff]  ;;  %v21934_v3 = vld [vmem:[#allocation73_spill] sm:$0xff]  ;;  %v12434_v5 = vld [vmem:[%s14870_s23 + $0x90] sm:$0xff] }
 0x2ce   : > { %v17387_v60 = vadd.f32 %v2414_v13, %v16863_v50  ;;  %v17389_v32 = vpop.permute.xlu0 %3945  ;;  %13808 = vmatprep.mubr.msk.f32.mxu1 %vm1068_vm2, %v2874_v25  ;;  %13855 = vmatpush3.msra.mxu1 %v12368_v7  ;;  %v2844_v11 = vsel %vm578_vm0, %v21933_v27, %v21932_v48  ;;  %v2875_v50 = vsel %vm611_vm1, %v2843_v31, %v21934_v3  ;;  %v12433_v25 = vld [vmem:[%s14870_s23 + $0x88] sm:$0xff]  ;;  %v21935_v7 = vld [vmem:[#allocation76_spill] sm:$0xff]  ;;  %v21936_v41 = vld [vmem:[#allocation91_spill] sm:$0xff] }
 0x2cf   : > { %21929 = vst [vmem:[#allocation72_spill] sm:$0xff] %v17381_v55  ;;  %4127 = vrot.lane.b32.xlu1 %v12365_v21, %s14822_s6  ;;  %v2876_v13 = vsel %vm611_vm1, %v2844_v11, %v21935_v7  ;;  %v21938_v48 = vld [vmem:[#allocation92_spill] sm:$0xff]  ;;  %v21940_v3 = vld [vmem:[#allocation42_spill] sm:$0xff]  ;;  %v21942_v11 = vld [vmem:[#allocation33_spill] sm:$0xff] }
 0x2d0   : > { %21930 = vst [vmem:[#allocation29_spill] sm:$0xff] %v17387_v60  ;;  %4125 = vrot.lane.b32.xlu0 %v12364_v62, %s14822_s6  ;;  %v13735_v53 = vpop.f32.mrb[26].mxu0  ;;  %v21941_v60 = vld [vmem:[#allocation106_spill] sm:$0xff] }
 0x2d1   : > { %v17407_v42 = vadd.f32 %v13735_v53, %v21936_v41  ;;  %v2424_v21 = vpop.f32.mrb[27].mxu0  ;;  %13809 = vmatmul.mubr.msk.f32.gmra.mrb[36].mxu1 %vm1068_vm2, %v2875_v50  ;;  %v17410_v62 = vpop.permute.xlu1 %3951  ;;  %v2845_v55 = vsel %vm578_vm0, %v21941_v60, %v21940_v3  ;;  %v2846_v50 = vsel %vm578_vm0, %v16974_v15, %v21942_v11  ;;  %v21943_v53 = vld [vmem:[#allocation75_spill] sm:$0xff]  ;;  %v21947_v15 = vld [vmem:[#allocation96_spill] sm:$0xff] }
 0x2d2   : > { %v17413_v27 = vadd.f32 %v2424_v21, %v21938_v48  ;;  %v17415_v31 = vpop.permute.xlu0 %3949  ;;  %13811 = vmatprep.mubr.msk.f32.mxu1 %vm1068_vm2, %v2876_v13  ;;  %v2877_v7 = vsel %vm611_vm1, %v2845_v55, %v21943_v53  ;;  %v12436_v21 = vld [vmem:[%s14870_s23 + $0xb0] sm:$0xff]  ;;  %v12435_v48 = vld [vmem:[%s14870_s23 + $0xa8] sm:$0xff] }
 0x2d3   : > { %21937 = vst [vmem:[#allocation31_spill] sm:$0xff] %v17407_v42  ;;  %4697 = vrot.lane.b32.xlu1 %v12434_v5, %s14821_s24  ;;  %v21944_v13 = vld [vmem:[#allocation78_spill] sm:$0xff]  ;;  %v21945_v60 = vld [vmem:[#allocation95_spill] sm:$0xff] }
 0x2d4   : > { %21939 = vst [vmem:[#allocation71_spill] sm:$0xff] %v17413_v27  ;;  %4695 = vrot.lane.b32.xlu0 %v12433_v25, %s14821_s24  ;;  %v13738_v41 = vpop.f32.mrb[28].mxu0  ;;  %v2878_v27 = vsel %vm611_vm1, %v2846_v50, %v21944_v13  ;;  %v21949_v53 = vld [vmem:[#allocation30_spill] sm:$0xff] }
 0x2d5   : > { %v17433_v3 = vadd.f32 %v13738_v41, %v21945_v60  ;;  %v2434_v5 = vpop.f32.mrb[29].mxu0  ;;  %13812 = vmatmul.mubr.msk.f32.gmra.mrb[38].mxu1 %vm1068_vm2, %v2877_v7  ;;  %v17436_v25 = vpop.permute.xlu1 %3955  ;;  %v2847_v42 = vsel %vm578_vm0, %v16966_v52, %v21949_v53  ;;  %v21950_v50 = vld [vmem:[#allocation46_spill] sm:$0xff]  ;;  %v21951_v41 = vld [vmem:[#allocation77_spill] sm:$0xff]  ;;  %v21953_v52 = vld [vmem:[#allocation16_spill] sm:$0xff] }
 0x2d6   : > { %v17439_v11 = vadd.f32 %v2434_v5, %v21947_v15  ;;  %v17441_v55 = vpop.permute.xlu0 %3953  ;;  %13814 = vmatprep.mubr.msk.f32.mxu1 %vm1068_vm2, %v2878_v27  ;;  %v2848_v7 = vsel %vm578_vm0, %v16996_v43, %v21950_v50  ;;  %v2879_v13 = vsel %vm611_vm1, %v2847_v42, %v21951_v41  ;;  %v12438_v5 = vld [vmem:[%s14870_s23 + $0xd0] sm:$0xff]  ;;  %v12437_v27 = vld [vmem:[%s14870_s23 + $0xc8] sm:$0xff]  ;;  %v21952_v15 = vld [vmem:[#allocation80_spill] sm:$0xff] }
 0x2d7   : > { %21946 = vst [vmem:[#allocation74_spill] sm:$0xff] %v17433_v3  ;;  %4701 = vrot.lane.b32.xlu1 %v12436_v21, %s14821_s24  ;;  %v21955_v43 = vld [vmem:[#allocation99_spill] sm:$0xff] }
 0x2d8   : > { %21948 = vst [vmem:[#allocation24_spill] sm:$0xff] %v17439_v11  ;;  %4699 = vrot.lane.b32.xlu0 %v12435_v48, %s14821_s24  ;;  %v13741_v60 = vpop.f32.mrb[30].mxu0  ;;  %v2880_v11 = vsel %vm611_vm1, %v2848_v7, %v21952_v15  ;;  %v21957_v41 = vld [vmem:[#allocation43_spill] sm:$0xff] }
 0x2d9   : > { %v17459_v53 = vadd.f32 %v13741_v60, %v21953_v52  ;;  %v2444_v21 = vpop.f32.mrb[31].mxu0  ;;  %13815 = vmatmul.mubr.msk.f32.gmra.mrb[40].mxu1 %vm1068_vm2, %v2879_v13  ;;  %v17462_v48 = vpop.permute.xlu1 %3959  ;;  %v2849_v3 = vsel %vm578_vm0, %v16989_v29, %v21957_v41  ;;  %v21958_v7 = vld [vmem:[#allocation35_spill] sm:$0xff] }
 0x2da   : > { %v17465_v50 = vadd.f32 %v2444_v21, %v21955_v43  ;;  %v17467_v42 = vpop.permute.xlu0 %3957  ;;  %13817 = vmatprep.mubr.msk.f32.mxu1 %vm1068_vm2, %v2880_v11  ;;  %v2850_v13 = vsel %vm578_vm0, %v17015_v24, %v21958_v7  ;;  %v21959_v60 = vld [vmem:[#allocation79_spill] sm:$0xff]  ;;  %v12439_v21 = vld [vmem:[%s14870_s23 + $0xe8] sm:$0xff]  ;;  %v21963_v7 = vld [vmem:[#allocation81_spill] sm:$0xff] }
 0x2db   : > { %21954 = vst [vmem:[#allocation44_spill] sm:$0xff] %v17459_v53  ;;  %4705 = vrot.lane.b32.xlu1 %v12438_v5, %s14821_s24  ;;  %v2881_v15 = vsel %vm611_vm1, %v2849_v3, %v21959_v60  ;;  %v12440_v52 = vld [vmem:[%s14870_s23 + $0xf0] sm:$0xff]  ;;  %v21960_v11 = vld [vmem:[#allocation82_spill] sm:$0xff]  ;;  %v21962_v3 = vld [vmem:[#allocation48_spill] sm:$0xff] }
 0x2dc   : > { %21956 = vst [vmem:[#allocation107_spill] sm:$0xff] %v17465_v50  ;;  %4703 = vrot.lane.b32.xlu0 %v12437_v27, %s14821_s24  ;;  %v2882_v43 = vsel %vm611_vm1, %v2850_v13, %v21960_v11  ;;  %v21961_v27 = vld [vmem:[#allocation32_spill] sm:$0xff]  ;;  %v2852_v41 = vsel %vm578_vm0, %v17035_v14, %v21962_v3  ;;  %v12442_v60 = vld [vmem:[%s14870_s23 + $0x110] sm:$0xff] }
 0x2dd   : > { %13818 = vmatmul.mubr.msk.f32.gmra.mrb[42].mxu1 %vm1068_vm2, %v2881_v15  ;;  %v17485_v29 = vpop.permute.xlu1 %3963  ;;  %v2851_v24 = vsel %vm578_vm0, %v17008_v10, %v21961_v27  ;;  %v12441_v15 = vld [vmem:[%s14870_s23 + $0x108] sm:$0xff]  ;;  %v21964_v11 = vld [vmem:[#allocation84_spill] sm:$0xff]  ;;  %v21966_v27 = vld [vmem:[#allocation37_spill] sm:$0xff] }
 0x2de   : > { %v17487_v5 = vpop.permute.xlu0 %3961  ;;  %13820 = vmatprep.mubr.msk.f32.mxu1 %vm1068_vm2, %v2882_v43  ;;  %v2883_v13 = vsel %vm611_vm1, %v2851_v24, %v21963_v7  ;;  %v2884_v43 = vsel %vm611_vm1, %v2852_v41, %v21964_v11  ;;  %v2854_v24 = vsel %vm578_vm0, %v17055_v4, %v21966_v27  ;;  %v21967_v3 = vld [vmem:[#allocation83_spill] sm:$0xff]  ;;  %v21968_v11 = vld [vmem:[#allocation86_spill] sm:$0xff]  ;;  %v21971_v27 = vld [vmem:[#allocation85_spill] sm:$0xff] }
 0x2df   : > { %4709 = vrot.lane.b32.xlu1 %v12440_v52, %s14821_s24  ;;  %v12444_v7 = vld [vmem:[%s14870_s23 + $0x130] sm:$0xff] }
 0x2e0   : > { %4707 = vrot.lane.b32.xlu0 %v12439_v21, %s14821_s24  ;;  %v21965_v21 = vld [vmem:[#allocation45_spill] sm:$0xff]  ;;  %v21985_v50 = vld [vmem:[#allocation19_spill] sm:$0xff] }
 0x2e1   : > { %13821 = vmatmul.mubr.msk.f32.gmra.mrb[44].mxu1 %vm1068_vm2, %v2883_v13  ;;  %v17505_v10 = vpop.permute.xlu1 %3967  ;;  %v2853_v14 = vsel %vm578_vm0, %v17028_v19, %v21965_v21  ;;  %v12443_v13 = vld [vmem:[%s14870_s23 + $0x128] sm:$0xff] }
 0x2e2   : > { %v17507_v52 = vpop.permute.xlu0 %3965  ;;  %13823 = vmatprep.mubr.msk.f32.mxu1 %vm1068_vm2, %v2884_v43  ;;  %v2885_v41 = vsel %vm611_vm1, %v2853_v14, %v21967_v3  ;;  %v2886_v43 = vsel %vm611_vm1, %v2854_v24, %v21968_v11  ;;  %v21970_v21 = vld [vmem:[#allocation50_spill] sm:$0xff]  ;;  %v12446_v3 = vld [vmem:[%s14870_s23 + $0x150] sm:$0xff]  ;;  %v21972_v11 = vld [vmem:[#allocation88_spill] sm:$0xff] }
 0x2e3   : > { %4713 = vrot.lane.b32.xlu1 %v12442_v60, %s14821_s24  ;;  %v2856_v14 = vsel %vm578_vm0, %v17081_v59, %v21970_v21  ;;  %v21975_v21 = vld [vmem:[#allocation87_spill] sm:$0xff] }
 0x2e4   : > { %4711 = vrot.lane.b32.xlu0 %v12441_v15, %s14821_s24  ;;  %v21969_v15 = vld [vmem:[#allocation34_spill] sm:$0xff] }
 0x2e5   : > { %13824 = vmatmul.mubr.msk.f32.gmra.mrb[46].mxu1 %vm1068_vm2, %v2885_v41  ;;  %v17525_v19 = vpop.permute.xlu1 %3971  ;;  %v2855_v4 = vsel %vm578_vm0, %v17048_v38, %v21969_v15  ;;  %v12445_v41 = vld [vmem:[%s14870_s23 + $0x148] sm:$0xff]  ;;  %v21974_v15 = vld [vmem:[#allocation49_spill] sm:$0xff] }
 0x2e6   : > { %v17527_v60 = vpop.permute.xlu0 %3969  ;;  %13826 = vmatprep.mubr.msk.f32.mxu1 %vm1068_vm2, %v2886_v43  ;;  %v2887_v24 = vsel %vm611_vm1, %v2855_v4, %v21971_v27  ;;  %v2888_v43 = vsel %vm611_vm1, %v2856_v14, %v21972_v11  ;;  %v2858_v4 = vsel %vm578_vm0, %v17107_v45, %v21974_v15  ;;  %v12448_v27 = vld [vmem:[%s14870_s23 + $0x170] sm:$0xff]  ;;  %v21976_v11 = vld [vmem:[#allocation90_spill] sm:$0xff]  ;;  %v21979_v15 = vld [vmem:[#allocation89_spill] sm:$0xff] }
 0x2e7   : > { %4717 = vrot.lane.b32.xlu1 %v12444_v7, %s14821_s24  ;;  %v12271_v51 = vld [vmem:[%s14870_s23 + $0x14e] sm:$0xff] }
 0x2e8   : > { %4715 = vrot.lane.b32.xlu0 %v12443_v13, %s14821_s24  ;;  %v21973_v13 = vld [vmem:[#allocation47_spill] sm:$0xff] }
 0x2e9   : > { %13827 = vmatmul.mubr.msk.f32.gmra.mrb[48].mxu1 %vm1068_vm2, %v2887_v24  ;;  %v17545_v38 = vpop.permute.xlu1 %3975  ;;  %v2857_v59 = vsel %vm578_vm0, %v17071_v8, %v21973_v13  ;;  %v12447_v24 = vld [vmem:[%s14870_s23 + $0x168] sm:$0xff]  ;;  %v21978_v13 = vld [vmem:[#allocation17_spill] sm:$0xff] }
 0x2ea   : > { %v17547_v7 = vpop.permute.xlu0 %3973  ;;  %13829 = vmatprep.mubr.msk.f32.mxu1 %vm1068_vm2, %v2888_v43  ;;  %v2889_v14 = vsel %vm611_vm1, %v2857_v59, %v21975_v21  ;;  %v2890_v43 = vsel %vm611_vm1, %v2858_v4, %v21976_v11  ;;  %v2860_v59 = vsel %vm578_vm0, %v17133_v36, %v21978_v13  ;;  %v17581_v21 = vld [vmem:[%s14870_s23 + $0x190] sm:$0xff]  ;;  %v21980_v11 = vld [vmem:[#allocation94_spill] sm:$0xff]  ;;  %v21983_v13 = vld [vmem:[#allocation93_spill] sm:$0xff] }
 0x2eb   : > { %4721 = vrot.lane.b32.xlu1 %v12446_v3, %s14821_s24 }
 0x2ec   : > { %4719 = vrot.lane.b32.xlu0 %v12445_v41, %s14821_s24  ;;  %v21977_v41 = vld [vmem:[#allocation39_spill] sm:$0xff] }
 0x2ed   : > { %13830 = vmatmul.mubr.msk.f32.gmra.mrb[50].mxu1 %vm1068_vm2, %v2889_v14  ;;  %v17565_v8 = vpop.permute.xlu1 %3979  ;;  %v2859_v45 = vsel %vm578_vm0, %v17097_v56, %v21977_v41  ;;  %v17584_v14 = vld [vmem:[%s14870_s23 + $0x188] sm:$0xff]  ;;  %v2892_v56 = vsel %vm611_vm1, %v2860_v59, %v21980_v11  ;;  %v21982_v41 = vld [vmem:[#allocation40_spill] sm:$0xff] }
 0x2ee   : > { %v17567_v3 = vpop.permute.xlu0 %3977  ;;  %13832 = vmatprep.mubr.msk.f32.mxu1 %vm1068_vm2, %v2890_v43  ;;  %v2891_v4 = vsel %vm611_vm1, %v2859_v45, %v21979_v15  ;;  %v21981_v43 = vld [vmem:[#allocation41_spill] sm:$0xff]  ;;  %v2862_v45 = vsel %vm578_vm0, %v17159_v37, %v21982_v41  ;;  %v17607_v15 = vld [vmem:[%s14870_s23 + $0x1b0] sm:$0xff]  ;;  %v2863_v37 = vsel %vm578_vm0, %v17149_v54, %v21985_v50 }
 0x2ef   : > { %4725 = vrot.lane.b32.xlu1 %v12448_v27, %s14821_s24  ;;  %v2861_v36 = vsel %vm578_vm0, %v17123_v20, %v21981_v43  ;;  %v21984_v20 = vld [vmem:[#allocation98_spill] sm:$0xff]  ;;  %v21988_v54 = vld [vmem:[#allocation101_spill] sm:$0xff] }
 0x2f0   : > { %4723 = vrot.lane.b32.xlu0 %v12447_v24, %s14821_s24  ;;  %v2893_v59 = vsel %vm611_vm1, %v2861_v36, %v21983_v13  ;;  %v2894_v11 = vsel %vm611_vm1, %v2862_v45, %v21984_v20  ;;  %v21986_v36 = vld [vmem:[#allocation66_spill] sm:$0xff]  ;;  %v21987_v45 = vld [vmem:[#allocation97_spill] sm:$0xff] }
 0x2f1   : > { %13833 = vmatmul.mubr.msk.f32.gmra.mrb[52].mxu1 %vm1068_vm2, %v2891_v4  ;;  %v17589_v27 = vpop.permute.xlu1 %3983  ;;  %v17610_v4 = vld [vmem:[%s14870_s23 + $0x1a8] sm:$0xff]  ;;  %v2864_v41 = vsel %vm578_vm0, %v17185_v49, %v21986_v36  ;;  %v2895_v13 = vsel %vm611_vm1, %v2863_v37, %v21987_v45  ;;  %v2865_v49 = vsel %vm578_vm0, %v17175_v16, %v21989_v63  ;;  %v21990_v37 = vld [vmem:[#allocation68_spill] sm:$0xff]  ;;  %v21992_v16 = vld [vmem:[#allocation103_spill] sm:$0xff] }
 0x2f2   : > { %v17591_v24 = vpop.permute.xlu0 %3981  ;;  %13835 = vmatprep.mubr.msk.f32.mxu1 %vm1068_vm2, %v2892_v56  ;;  %v17636_v20 = vld [vmem:[%s14870_s23 + $0x1c8] sm:$0xff]  ;;  %v2896_v50 = vsel %vm611_vm1, %v2864_v41, %v21988_v54  ;;  %v2866_v36 = vsel %vm578_vm0, %v17213_v17, %v21990_v37  ;;  %v21991_v41 = vld [vmem:[#allocation100_spill] sm:$0xff]  ;;  %v21993_v17 = vld [vmem:[#allocation67_spill] sm:$0xff] }
 0x2f3   : > { %4729 = vrot.lane.b32.xlu1 %v17581_v21, %s14821_s24  ;;  %v2897_v45 = vsel %vm611_vm1, %v2865_v49, %v21991_v41  ;;  %v17662_v54 = vld [vmem:[%s14870_s23 + $0x1e8] sm:$0xff]  ;;  %v2898_v63 = vsel %vm611_vm1, %v2866_v36, %v21992_v16  ;;  %v2867_v49 = vsel %vm578_vm0, %v17203_v9, %v21993_v17  ;;  %v17685_v16 = vld [vmem:[%s14870_s23 + $0x210] sm:$0xff]  ;;  %v21996_v9 = vld [vmem:[#allocation105_spill] sm:$0xff] }
 0x2f4   : > { %4727 = vrot.lane.b32.xlu0 %v17584_v14, %s14821_s24  ;;  %v21994_v37 = vld [vmem:[#allocation70_spill] sm:$0xff] }
 0x2f5   : > { %13836 = vmatmul.mubr.msk.f32.gmra.mrb[54].mxu1 %vm1068_vm2, %v2893_v59  ;;  %v17615_v56 = vpop.permute.xlu1 %3987  ;;  %v17633_v59 = vld [vmem:[%s14870_s23 + $0x1d0] sm:$0xff]  ;;  %v2868_v36 = vsel %vm578_vm0, %v17239_v18, %v21994_v37  ;;  %v21995_v41 = vld [vmem:[#allocation102_spill] sm:$0xff]  ;;  %v21997_v18 = vld [vmem:[#allocation69_spill] sm:$0xff] }
 0x2f6   : > { %v17617_v43 = vpop.permute.xlu0 %3985  ;;  %13838 = vmatprep.mubr.msk.f32.mxu1 %vm1068_vm2, %v2894_v11  ;;  %v2900_v17 = vsel %vm611_vm1, %v2868_v36, %v21996_v9  ;;  %v12270_v37 = vld [vmem:[%s14870_s23 + $0x146] sm:$0xff]  ;;  %v21998_v36 = vld [vmem:[#allocation104_spill] sm:$0xff] }
 0x2f7   : > { %4733 = vrot.lane.b32.xlu1 %v17607_v15, %s14821_s24  ;;  %v17713_v9 = vld [vmem:[%s14870_s23 + $0x228] sm:$0xff] }
 0x2f8   : > { %4731 = vrot.lane.b32.xlu0 %v17610_v4, %s14821_s24 }
 0x2f9   : > { %13839 = vmatmul.mubr.msk.f32.gmra.mrb[56].mxu1 %vm1068_vm2, %v2895_v13  ;;  %v17641_v11 = vpop.permute.xlu1 %3991  ;;  %v17659_v13 = vld [vmem:[%s14870_s23 + $0x1f0] sm:$0xff] }
 0x2fa   : > { %v17643_v53 = vpop.permute.xlu0 %3989  ;;  %13841 = vmatprep.mubr.msk.f32.mxu1 %vm1068_vm2, %v2896_v50 }
 0x2fb   : > { %4737 = vrot.lane.b32.xlu1 %v17633_v59, %s14821_s24 }
 0x2fc   : > { %4735 = vrot.lane.b32.xlu0 %v17636_v20, %s14821_s24 }
 0x2fd   : > { %13842 = vmatmul.mubr.msk.f32.gmra.mrb[58].mxu1 %vm1068_vm2, %v2897_v45  ;;  %v17667_v50 = vpop.permute.xlu1 %3995  ;;  %v2899_v45 = vsel %vm611_vm1, %v2867_v49, %v21995_v41  ;;  %v2869_v49 = vsel %vm578_vm0, %v17229_v30, %v21997_v18  ;;  %v4161_v18 = vsel %vm578_vm0, %v12270_v37, %v17333_v12  ;;  %v4164_v12 = vsel %vm578_vm0, %v12273_v26, %v17355_v6  ;;  %v17753_v26 = vld [vmem:[%s14870_s23 + $0x268] sm:$0xff] }
 0x2fe   : > { %v17669_v35 = vpop.permute.xlu0 %3993  ;;  %13844 = vmatprep.mubr.msk.f32.mxu1 %vm1068_vm2, %v2898_v63  ;;  %v17688_v63 = vld [vmem:[%s14870_s23 + $0x208] sm:$0xff]  ;;  %v2901_v41 = vsel %vm611_vm1, %v2869_v49, %v21998_v36 }
 0x2ff   : > { %4741 = vrot.lane.b32.xlu1 %v17659_v13, %s14821_s24  ;;  %v12272_v36 = vld [vmem:[%s14870_s23 + $0x166] sm:$0xff] }
 0x300   : > { %4739 = vrot.lane.b32.xlu0 %v17662_v54, %s14821_s24 }
 0x301   : > { %13845 = vmatmul.mubr.msk.f32.gmra.mrb[60].mxu1 %vm1068_vm2, %v2899_v45  ;;  %v17693_v44 = vpop.permute.xlu1 %3999  ;;  %v17710_v45 = vld [vmem:[%s14870_s23 + $0x230] sm:$0xff] }
 0x302   : > { %v17696_v22 = vpop.permute.xlu0 %3997  ;;  %13847 = vmatprep.mubr.msk.f32.mxu1 %vm1068_vm2, %v2900_v17  ;;  %v4162_v17 = vsel %vm578_vm0, %v12271_v51, %v17328_v58  ;;  %v17730_v51 = vld [vmem:[%s14870_s23 + $0x250] sm:$0xff]  ;;  %v17733_v58 = vld [vmem:[%s14870_s23 + $0x248] sm:$0xff] }
 0x303   : > { %4745 = vrot.lane.b32.xlu1 %v17685_v16, %s14821_s24 }
 0x304   : > { %4743 = vrot.lane.b32.xlu0 %v17688_v63, %s14821_s24 }
 0x305   : > { %13848 = vmatmul.mubr.msk.f32.gmra.mrb[62].mxu1 %vm1068_vm2, %v2901_v41  ;;  %v4068_v30 = vpop.permute.xlu1 %4067  ;;  %v4163_v41 = vsel %vm578_vm0, %v12272_v36, %v17363_v0 }
 0x306   : > { %v4194_v28 = vsel %vm611_vm1, %v4162_v17, %v4068_v30  ;;  %v4066_v49 = vpop.permute.xlu0 %4065  ;;  %v12275_v17 = vld [vmem:[%s14870_s23 + $0x18e] sm:$0xff] }
 0x307   : > { %v4193_v34 = vsel %vm611_vm1, %v4161_v18, %v4066_v49  ;;  %4749 = vrot.lane.b32.xlu1 %v17710_v45, %s14821_s24  ;;  %v12274_v18 = vld [vmem:[%s14870_s23 + $0x186] sm:$0xff]  ;;  %v4166_v6 = vsel %vm578_vm0, %v12275_v17, %v17384_v33  ;;  %v12465_v33 = vld [vmem:[%s14870_s23 + $0x94] sm:$0xff] }
 0x308   : > { %4747 = vrot.lane.b32.xlu0 %v17713_v9, %s14821_s24  ;;  %13856 = vmatprep.mubr.msk.f32.mxu1 %vm1068_vm2, %v4193_v34  ;;  %v4165_v36 = vsel %vm578_vm0, %v12274_v18, %v17389_v32  ;;  %v12402_v32 = vld [vmem:[%s14870_s23 + $0x8c] sm:$0xff] }
 0x309   : > { %13857 = vmatmul.mubr.msk.f32.vlgmr.msra.gmra.mrb[32].mxu1 %vm1068_vm2, %v4194_v28  ;;  %v4072_v37 = vpop.permute.xlu1 %4071  ;;  %v17750_v28 = vld [vmem:[%s14870_s23 + $0x270] sm:$0xff] }
 0x30a   : > { %v4196_v30 = vsel %vm611_vm1, %v4164_v12, %v4072_v37  ;;  %v4070_v34 = vpop.permute.xlu0 %4069  ;;  %v12277_v12 = vld [vmem:[%s14870_s23 + $0x1ae] sm:$0xff] }
 0x30b   : > { %v4195_v49 = vsel %vm611_vm1, %v4163_v41, %v4070_v34  ;;  %4753 = vrot.lane.b32.xlu1 %v17730_v51, %s14821_s24  ;;  %v12276_v34 = vld [vmem:[%s14870_s23 + $0x1a6] sm:$0xff]  ;;  %v4168_v17 = vsel %vm578_vm0, %v12277_v12, %v17410_v62  ;;  %v12466_v62 = vld [vmem:[%s14870_s23 + $0xb4] sm:$0xff] }
 0x30c   : > { %4751 = vrot.lane.b32.xlu0 %v17733_v58, %s14821_s24  ;;  %13859 = vmatprep.mubr.msk.f32.mxu1 %vm1068_vm2, %v4195_v49  ;;  %v4167_v18 = vsel %vm578_vm0, %v12276_v34, %v17415_v31  ;;  %v12404_v12 = vld [vmem:[%s14870_s23 + $0xac] sm:$0xff] }
 0x30d   : > { %13860 = vmatmul.mubr.msk.f32.gmra.mrb[34].mxu1 %vm1068_vm2, %v4196_v30  ;;  %v4076_v0 = vpop.permute.xlu1 %4075 }
 0x30e   : > { %v4198_v37 = vsel %vm611_vm1, %v4166_v6, %v4076_v0  ;;  %v4074_v41 = vpop.permute.xlu0 %4073  ;;  %v12279_v6 = vld [vmem:[%s14870_s23 + $0x1ce] sm:$0xff] }
 0x30f   : > { %v4197_v49 = vsel %vm611_vm1, %v4165_v36, %v4074_v41  ;;  %4757 = vrot.lane.b32.xlu1 %v17750_v28, %s14821_s24  ;;  %v12278_v41 = vld [vmem:[%s14870_s23 + $0x1c6] sm:$0xff]  ;;  %v4170_v31 = vsel %vm578_vm0, %v12279_v6, %v17436_v25  ;;  %v12467_v25 = vld [vmem:[%s14870_s23 + $0xd4] sm:$0xff] }
 0x310   : > { %4755 = vrot.lane.b32.xlu0 %v17753_v26, %s14821_s24  ;;  %13862 = vmatprep.mubr.msk.f32.mxu1 %vm1068_vm2, %v4197_v49  ;;  %v4169_v34 = vsel %vm578_vm0, %v12278_v41, %v17441_v55  ;;  %v12406_v6 = vld [vmem:[%s14870_s23 + $0xcc] sm:$0xff] }
 0x311   : > { %13863 = vmatmul.mubr.msk.f32.gmra.mrb[36].mxu1 %vm1068_vm2, %v4198_v37  ;;  %v4080_v30 = vpop.permute.xlu1 %4079  ;;  %v12283_v41 = vld [vmem:[%s14870_s23 + $0x20e] sm:$0xff] }
 0x312   : > { %v4200_v0 = vsel %vm611_vm1, %v4168_v17, %v4080_v30  ;;  %v4078_v36 = vpop.permute.xlu0 %4077  ;;  %v12281_v17 = vld [vmem:[%s14870_s23 + $0x1ee] sm:$0xff]  ;;  %v12280_v30 = vld [vmem:[%s14870_s23 + $0x1e6] sm:$0xff] }
 0x313   : > { %v4199_v49 = vsel %vm611_vm1, %v4167_v18, %v4078_v36  ;;  %4825 = vrot.lane.b32.xlu1 %v12465_v33, %s14822_s6  ;;  %v4172_v55 = vsel %vm578_vm0, %v12281_v17, %v17462_v48  ;;  %v4171_v36 = vsel %vm578_vm0, %v12280_v30, %v17467_v42  ;;  %v12468_v48 = vld [vmem:[%s14870_s23 + $0xf4] sm:$0xff]  ;;  %v4174_v42 = vsel %vm578_vm0, %v12283_v41, %v17485_v29 }
 0x314   : > { %4823 = vrot.lane.b32.xlu0 %v12402_v32, %s14822_s6  ;;  %13865 = vmatprep.mubr.msk.f32.mxu1 %vm1068_vm2, %v4199_v49  ;;  %v17826_v29 = vld [vmem:[%s14870_s23 + $0x114] sm:$0xff] }
 0x315   : > { %13866 = vmatmul.mubr.msk.f32.gmra.mrb[38].mxu1 %vm1068_vm2, %v4200_v0  ;;  %v4084_v37 = vpop.permute.xlu1 %4083 }
 0x316   : > { %v4202_v33 = vsel %vm611_vm1, %v4170_v31, %v4084_v37  ;;  %v4082_v32 = vpop.permute.xlu0 %4081  ;;  %v12408_v37 = vld [vmem:[%s14870_s23 + $0xec] sm:$0xff] }
 0x317   : > { %v4201_v18 = vsel %vm611_vm1, %v4169_v34, %v4082_v32  ;;  %4829 = vrot.lane.b32.xlu1 %v12466_v62, %s14822_s6 }
 0x318   : > { %4827 = vrot.lane.b32.xlu0 %v12404_v12, %s14822_s6  ;;  %13868 = vmatprep.mubr.msk.f32.mxu1 %vm1068_vm2, %v4201_v18  ;;  %v12282_v12 = vld [vmem:[%s14870_s23 + $0x206] sm:$0xff] }
 0x319   : > { %13869 = vmatmul.mubr.msk.f32.gmra.mrb[40].mxu1 %vm1068_vm2, %v4202_v33  ;;  %v4088_v0 = vpop.permute.xlu1 %4087  ;;  %v4173_v17 = vsel %vm578_vm0, %v12282_v12, %v17487_v5  ;;  %v12285_v33 = vld [vmem:[%s14870_s23 + $0x22e] sm:$0xff]  ;;  %v12284_v18 = vld [vmem:[%s14870_s23 + $0x226] sm:$0xff] }
 0x31a   : > { %v4204_v49 = vsel %vm611_vm1, %v4172_v55, %v4088_v0  ;;  %v4086_v62 = vpop.permute.xlu0 %4085  ;;  %v4176_v5 = vsel %vm578_vm0, %v12285_v33, %v17505_v10  ;;  %v4175_v55 = vsel %vm578_vm0, %v12284_v18, %v17507_v52  ;;  %v12287_v0 = vld [vmem:[%s14870_s23 + $0x24e] sm:$0xff]  ;;  %v12288_v33 = vld [vmem:[%s14870_s23 + $0x266] sm:$0xff] }
 0x31b   : > { %v4203_v31 = vsel %vm611_vm1, %v4171_v36, %v4086_v62  ;;  %4833 = vrot.lane.b32.xlu1 %v12467_v25, %s14822_s6  ;;  %v12286_v62 = vld [vmem:[%s14870_s23 + $0x246] sm:$0xff]  ;;  %v17846_v10 = vld [vmem:[%s14870_s23 + $0x134] sm:$0xff]  ;;  %v4178_v52 = vsel %vm578_vm0, %v12287_v0, %v17525_v19  ;;  %v4179_v18 = vsel %vm578_vm0, %v12288_v33, %v17547_v7 }
 0x31c   : > { %4831 = vrot.lane.b32.xlu0 %v12406_v6, %s14822_s6  ;;  %13871 = vmatprep.mubr.msk.f32.mxu1 %vm1068_vm2, %v4203_v31  ;;  %v17866_v19 = vld [vmem:[%s14870_s23 + $0x154] sm:$0xff]  ;;  %v12290_v0 = vld [vmem:[%s14870_s23 + $0x286] sm:$0xff] }
 0x31d   : > { %13872 = vmatmul.mubr.msk.f32.gmra.mrb[42].mxu1 %vm1068_vm2, %v4204_v49  ;;  %v4092_v34 = vpop.permute.xlu1 %4091  ;;  %v17836_v49 = vld [vmem:[%s14870_s23 + $0x10c] sm:$0xff] }
 0x31e   : > { %v4206_v32 = vsel %vm611_vm1, %v4174_v42, %v4092_v34  ;;  %v4090_v30 = vpop.permute.xlu0 %4089 }
 0x31f   : > { %v4205_v25 = vsel %vm611_vm1, %v4173_v17, %v4090_v30  ;;  %4837 = vrot.lane.b32.xlu1 %v12468_v48, %s14822_s6  ;;  %v4177_v48 = vsel %vm578_vm0, %v12286_v62, %v17527_v60  ;;  %v17856_v17 = vld [vmem:[%s14870_s23 + $0x12c] sm:$0xff]  ;;  %v4181_v62 = vsel %vm578_vm0, %v12290_v0, %v17567_v3 }
 0x320   : > { %4835 = vrot.lane.b32.xlu0 %v12408_v37, %s14822_s6  ;;  %13874 = vmatprep.mubr.msk.f32.mxu1 %vm1068_vm2, %v4205_v25  ;;  %v12289_v37 = vld [vmem:[%s14870_s23 + $0x26e] sm:$0xff] }
 0x321   : > { %13875 = vmatmul.mubr.msk.f32.gmra.mrb[44].mxu1 %vm1068_vm2, %v4206_v32  ;;  %v4096_v6 = vpop.permute.xlu1 %4095  ;;  %v4180_v60 = vsel %vm578_vm0, %v12289_v37, %v17545_v38  ;;  %v12291_v25 = vld [vmem:[%s14870_s23 + $0x28e] sm:$0xff]  ;;  %v12292_v37 = vld [vmem:[%s14870_s23 + $0x2a6] sm:$0xff] }
 0x322   : > { %v4208_v36 = vsel %vm611_vm1, %v4176_v5, %v4096_v6  ;;  %v4094_v41 = vpop.permute.xlu0 %4093  ;;  %v17886_v38 = vld [vmem:[%s14870_s23 + $0x174] sm:$0xff]  ;;  %v4182_v7 = vsel %vm578_vm0, %v12291_v25, %v17565_v8  ;;  %v4183_v33 = vsel %vm578_vm0, %v12292_v37, %v17591_v24  ;;  %v4186_v24 = vsel %vm578_vm0, %v17262_v2, %v17615_v56 }
 0x323   : > { %v4207_v12 = vsel %vm611_vm1, %v4175_v55, %v4094_v41  ;;  %4841 = vrot.lane.b32.xlu1 %v17826_v29, %s14822_s6  ;;  %v17876_v55 = vld [vmem:[%s14870_s23 + $0x14c] sm:$0xff]  ;;  %v17906_v8 = vld [vmem:[%s14870_s23 + $0x194] sm:$0xff] }
 0x324   : > { %4839 = vrot.lane.b32.xlu0 %v17836_v49, %s14822_s6  ;;  %13877 = vmatprep.mubr.msk.f32.mxu1 %vm1068_vm2, %v4207_v12  ;;  %v12293_v12 = vld [vmem:[%s14870_s23 + $0x2ae] sm:$0xff] }
 0x325   : > { %13878 = vmatmul.mubr.msk.f32.gmra.mrb[46].mxu1 %vm1068_vm2, %v4208_v36  ;;  %v4100_v31 = vpop.permute.xlu1 %4099  ;;  %v4184_v3 = vsel %vm578_vm0, %v12293_v12, %v17589_v27  ;;  %v17924_v27 = vld [vmem:[%s14870_s23 + $0x1b4] sm:$0xff] }
 0x326   : > { %v4210_v42 = vsel %vm611_vm1, %v4178_v52, %v4100_v31  ;;  %v4098_v34 = vpop.permute.xlu0 %4097  ;;  %v17944_v2 = vld [vmem:[%s14870_s23 + $0x1d4] sm:$0xff] }
 0x327   : > { %v4209_v32 = vsel %vm611_vm1, %v4177_v48, %v4098_v34  ;;  %4845 = vrot.lane.b32.xlu1 %v17846_v10, %s14822_s6  ;;  %v17896_v48 = vld [vmem:[%s14870_s23 + $0x16c] sm:$0xff] }
 0x328   : > { %4843 = vrot.lane.b32.xlu0 %v17856_v17, %s14822_s6  ;;  %13880 = vmatprep.mubr.msk.f32.mxu1 %vm1068_vm2, %v4209_v32 }
 0x329   : > { %13881 = vmatmul.mubr.msk.f32.gmra.mrb[48].mxu1 %vm1068_vm2, %v4210_v42  ;;  %v4104_v30 = vpop.permute.xlu1 %4103 }
 0x32a   : > { %v4212_v5 = vsel %vm611_vm1, %v4180_v60, %v4104_v30  ;;  %v4102_v6 = vpop.permute.xlu0 %4101  ;;  %v17915_v30 = vld [vmem:[%s14870_s23 + $0x18c] sm:$0xff] }
 0x32b   : > { %v4211_v36 = vsel %vm611_vm1, %v4179_v18, %v4102_v6  ;;  %4849 = vrot.lane.b32.xlu1 %v17866_v19, %s14822_s6 }
 0x32c   : > { %4847 = vrot.lane.b32.xlu0 %v17876_v55, %s14822_s6  ;;  %13883 = vmatprep.mubr.msk.f32.mxu1 %vm1068_vm2, %v4211_v36  ;;  %v17935_v36 = vld [vmem:[%s14870_s23 + $0x1ac] sm:$0xff] }
 0x32d   : > { %13884 = vmatmul.mubr.msk.f32.gmra.mrb[50].mxu1 %vm1068_vm2, %v4212_v5  ;;  %v4108_v41 = vpop.permute.xlu1 %4107  ;;  %v4185_v5 = vsel %vm578_vm0, %v17268_v23, %v17617_v43  ;;  %v4188_v23 = vsel %vm578_vm0, %v17288_v57, %v17641_v11  ;;  %v4187_v43 = vsel %vm578_vm0, %v17294_v1, %v17643_v53  ;;  %v17966_v57 = vld [vmem:[%s14870_s23 + $0x1f4] sm:$0xff] }
 0x32e   : > { %v4214_v52 = vsel %vm611_vm1, %v4182_v7, %v4108_v41  ;;  %v4106_v31 = vpop.permute.xlu0 %4105  ;;  %v12299_v41 = vld [vmem:[%s14870_s23 + $0x30e] sm:$0xff] }
 0x32f   : > { %v4213_v42 = vsel %vm611_vm1, %v4181_v62, %v4106_v31  ;;  %4853 = vrot.lane.b32.xlu1 %v17886_v38, %s14822_s6  ;;  %v12298_v31 = vld [vmem:[%s14870_s23 + $0x306] sm:$0xff]  ;;  %v4190_v1 = vsel %vm578_vm0, %v12299_v41, %v17667_v50 }
 0x330   : > { %4851 = vrot.lane.b32.xlu0 %v17896_v48, %s14822_s6  ;;  %13886 = vmatprep.mubr.msk.f32.mxu1 %vm1068_vm2, %v4213_v42  ;;  %v4189_v11 = vsel %vm578_vm0, %v12298_v31, %v17669_v35  ;;  %v12301_v42 = vld [vmem:[%s14870_s23 + $0x32e] sm:$0xff] }
 0x331   : > { %13887 = vmatmul.mubr.msk.f32.gmra.mrb[52].mxu1 %vm1068_vm2, %v4214_v52  ;;  %v4112_v34 = vpop.permute.xlu1 %4111  ;;  %v17956_v52 = vld [vmem:[%s14870_s23 + $0x1cc] sm:$0xff]  ;;  %v17986_v35 = vld [vmem:[%s14870_s23 + $0x214] sm:$0xff] }
 0x332   : > { %v4216_v32 = vsel %vm611_vm1, %v4184_v3, %v4112_v34  ;;  %v4110_v60 = vpop.permute.xlu0 %4109  ;;  %v12532_v50 = vld [vmem:[%s21522_s1 + $0xa8] sm:$0xff] }
 0x333   : > { %v4215_v18 = vsel %vm611_vm1, %v4183_v33, %v4110_v60  ;;  %4857 = vrot.lane.b32.xlu1 %v17906_v8, %s14822_s6  ;;  %v17976_v33 = vld [vmem:[%s14870_s23 + $0x1ec] sm:$0xff] }
 0x334   : > { %4855 = vrot.lane.b32.xlu0 %v17915_v30, %s14822_s6  ;;  %13889 = vmatprep.mubr.msk.f32.mxu1 %vm1068_vm2, %v4215_v18  ;;  %v12533_v18 = vld [vmem:[%s21522_s1 + $0xb0] sm:$0xff] }
 0x335   : > { %13890 = vmatmul.mubr.msk.f32.gmra.mrb[54].mxu1 %vm1068_vm2, %v4216_v32  ;;  %v4116_v25 = vpop.permute.xlu1 %4115  ;;  %v12300_v32 = vld [vmem:[%s14870_s23 + $0x326] sm:$0xff] }
 0x336   : > { %v4218_v6 = vsel %vm611_vm1, %v4186_v24, %v4116_v25  ;;  %v4114_v0 = vpop.permute.xlu0 %4113  ;;  %v4192_v24 = vsel %vm578_vm0, %v12301_v42, %v17693_v44  ;;  %v18010_v44 = vld [vmem:[%s14870_s23 + $0x234] sm:$0xff]  ;;  %v18018_v41 = vld [vmem:[%s14870_s23 + $0x22c] sm:$0xff] }
 0x337   : > { %v4217_v7 = vsel %vm611_vm1, %v4185_v5, %v4114_v0  ;;  %4861 = vrot.lane.b32.xlu1 %v17924_v27, %s14822_s6  ;;  %v14414_v5 = vpack.c.bf16 %v12533_v18, %v12532_v50 }
 0x338   : > { %4859 = vrot.lane.b32.xlu0 %v17935_v36, %s14822_s6  ;;  %13892 = vmatprep.mubr.msk.f32.mxu1 %vm1068_vm2, %v4217_v7 }
 0x339   : > { %13893 = vmatmul.mubr.msk.f32.gmra.mrb[56].mxu1 %vm1068_vm2, %v4218_v6  ;;  %v4120_v56 = vpop.permute.xlu1 %4119  ;;  %v4191_v6 = vsel %vm578_vm0, %v12300_v32, %v17696_v22  ;;  %14415 = vmatprep.subr.bf16.mxu0 %v14414_v5 }
 0x33a   : > { %v4220_v62 = vsel %vm611_vm1, %v4188_v23, %v4120_v56  ;;  %v4118_v12 = vpop.permute.xlu0 %4117  ;;  %v18001_v23 = vld [vmem:[%s14870_s23 + $0x20c] sm:$0xff]  ;;  %14417 = vmatpush3.bf16.msra.mxu0 %v14414_v5 }
 0x33b   : > { %v4219_v37 = vsel %vm611_vm1, %v4187_v43, %v4118_v12  ;;  %4865 = vrot.lane.b32.xlu1 %v17944_v2, %s14822_s6  ;;  %v12479_v12 = vld [vmem:[%s14870_s23 + $0x254] sm:$0xff] }
 0x33c   : > { %4863 = vrot.lane.b32.xlu0 %v17956_v52, %s14822_s6  ;;  %13895 = vmatprep.mubr.msk.f32.mxu1 %vm1068_vm2, %v4219_v37 }
 0x33d   : > { %13896 = vmatmul.mubr.msk.f32.gmra.mrb[58].mxu1 %vm1068_vm2, %v4220_v62  ;;  %v4124_v53 = vpop.permute.xlu1 %4123  ;;  %v12534_v62 = vld [vmem:[%s21522_s1 + $0xb8] sm:$0xff] }
 0x33e   : > { %v4222_v3 = vsel %vm611_vm1, %v4190_v1, %v4124_v53  ;;  %v4122_v34 = vpop.permute.xlu0 %4121  ;;  %13908 = vmatprep.subr.mxu0 %v12534_v62  ;;  %v18033_v1 = vld [vmem:[%s14870_s23 + $0x24c] sm:$0xff]  ;;  %v12480_v53 = vld [vmem:[%s14870_s23 + $0x274] sm:$0xff] }
 0x33f   : > { %v4221_v60 = vsel %vm611_vm1, %v4189_v11, %v4122_v34  ;;  %4869 = vrot.lane.b32.xlu1 %v17966_v57, %s14822_s6  ;;  %13909 = vmatpush3.msra.mxu0 %v12534_v62 }
 0x340   : > { %4867 = vrot.lane.b32.xlu0 %v17976_v33, %s14822_s6  ;;  %13898 = vmatprep.mubr.msk.f32.mxu1 %vm1068_vm2, %v4221_v60 }
 0x341   : > { %13899 = vmatmul.mubr.msk.f32.gmra.mrb[60].mxu1 %vm1068_vm2, %v4222_v3  ;;  %v4128_v25 = vpop.permute.xlu1 %4127  ;;  %v18044_v3 = vld [vmem:[%s14870_s23 + $0x26c] sm:$0xff] }
 0x342   : > { %v4224_v0 = vsel %vm611_vm1, %v4192_v24, %v4128_v25  ;;  %v4126_v7 = vpop.permute.xlu0 %4125 }
 0x343   : > { %v4223_v56 = vsel %vm611_vm1, %v4191_v6, %v4126_v7  ;;  %4873 = vrot.lane.b32.xlu1 %v17986_v35, %s14822_s6 }
 0x344   : > { %4871 = vrot.lane.b32.xlu0 %v18001_v23, %s14822_s6  ;;  %13901 = vmatprep.mubr.msk.f32.mxu1 %vm1068_vm2, %v4223_v56 }
 0x345   : > { %13902 = vmatmul.mubr.msk.f32.gmra.mrb[62].mxu1 %vm1068_vm2, %v4224_v0  ;;  %v18013_v22 = vpop.permute.xlu1 %4697 }
 0x346   : > { %v18015_v43 = vpop.permute.xlu0 %4695 }
 0x347   : > { %4877 = vrot.lane.b32.xlu1 %v18010_v44, %s14822_s6 }
 0x348   : > { %4875 = vrot.lane.b32.xlu0 %v18018_v41, %s14822_s6 }
 0x349   : > { %v18028_v31 = vpop.permute.xlu1 %4701 }
 0x34a   : > { %v18030_v37 = vpop.permute.xlu0 %4699 }
 0x34b   : > { %4881 = vrot.lane.b32.xlu1 %v12479_v12, %s14822_s6 }
 0x34c   : > { %4879 = vrot.lane.b32.xlu0 %v18033_v1, %s14822_s6 }
 0x34d   : > { %v18039_v11 = vpop.permute.xlu1 %4705 }
 0x34e   : > { %v18041_v42 = vpop.permute.xlu0 %4703 }
 0x34f   : > { %4885 = vrot.lane.b32.xlu1 %v12480_v53, %s14822_s6 }
 0x350   : > { %4883 = vrot.lane.b32.xlu0 %v18044_v3, %s14822_s6 }
 0x351   : > { %v18049_v34 = vpop.permute.xlu1 %4709 }
 0x352   : > { %v18051_v32 = vpop.permute.xlu0 %4707 }
 0x353   : > { %5069 = vrot.lane.b32.xlu1 %v17826_v29, %s14822_s6 }
 0x354   : > { %5067 = vrot.lane.b32.xlu0 %v17836_v49, %s14822_s6 }
 0x355   : > { %v18057_v60 = vpop.permute.xlu1 %4713 }
 0x356   : > { %21999 = vst [vmem:[#allocation73_spill] sm:$0xff] %v18057_v60  ;;  %v18059_v50 = vpop.permute.xlu0 %4711 }
 0x357   : > { %5073 = vrot.lane.b32.xlu1 %v17846_v10, %s14822_s6 }
 0x358   : > { %5071 = vrot.lane.b32.xlu0 %v17856_v17, %s14822_s6 }
 0x359   : > { %v18065_v18 = vpop.permute.xlu1 %4717 }
 0x35a   : > { %22000 = vst [vmem:[#allocation76_spill] sm:$0xff] %v18065_v18  ;;  %v18067_v24 = vpop.permute.xlu0 %4715 }
 0x35b   : > { %22001 = vst [vmem:[#allocation91_spill] sm:$0xff] %v18067_v24  ;;  %5077 = vrot.lane.b32.xlu1 %v17866_v19, %s14822_s6 }
 0x35c   : > { %5075 = vrot.lane.b32.xlu0 %v17876_v55, %s14822_s6 }
 0x35d   : > { %v18073_v29 = vpop.permute.xlu1 %4721 }
 0x35e   : > { %22002 = vst [vmem:[#allocation92_spill] sm:$0xff] %v18073_v29  ;;  %v18075_v25 = vpop.permute.xlu0 %4719 }
 0x35f   : > { %22003 = vst [vmem:[#allocation42_spill] sm:$0xff] %v18075_v25  ;;  %5081 = vrot.lane.b32.xlu1 %v17886_v38, %s14822_s6 }
 0x360   : > { %5079 = vrot.lane.b32.xlu0 %v17896_v48, %s14822_s6 }
 0x361   : > { %v18081_v10 = vpop.permute.xlu1 %4725 }
 0x362   : > { %22004 = vst [vmem:[#allocation106_spill] sm:$0xff] %v18081_v10  ;;  %v18083_v5 = vpop.permute.xlu0 %4723  ;;  %v18180_v10 = vld [vmem:[%s14870_s23 + $0x2cc] sm:$0xff] }
 0x363   : > { %22005 = vst [vmem:[#allocation33_spill] sm:$0xff] %v18083_v5  ;;  %5085 = vrot.lane.b32.xlu1 %v17906_v8, %s14822_s6  ;;  %v12531_v5 = vld [vmem:[%s14870_s23 + $0x2f4] sm:$0xff] }
 0x364   : > { %5083 = vrot.lane.b32.xlu0 %v17915_v30, %s14822_s6 }
 0x365   : > { %v18089_v19 = vpop.permute.xlu1 %4729 }
 0x366   : > { %22006 = vst [vmem:[#allocation75_spill] sm:$0xff] %v18089_v19  ;;  %v18091_v6 = vpop.permute.xlu0 %4727  ;;  %v12529_v19 = vld [vmem:[%s14870_s23 + $0x2b4] sm:$0xff] }
 0x367   : > { %22007 = vst [vmem:[#allocation78_spill] sm:$0xff] %v18091_v6  ;;  %5089 = vrot.lane.b32.xlu1 %v17924_v27, %s14822_s6 }
 0x368   : > { %5087 = vrot.lane.b32.xlu0 %v17935_v36, %s14822_s6 }
 0x369   : > { %v18097_v38 = vpop.permute.xlu1 %4733 }
 0x36a   : > { %22008 = vst [vmem:[#allocation95_spill] sm:$0xff] %v18097_v38  ;;  %v18099_v0 = vpop.permute.xlu0 %4731 }
 0x36b   : > { %22009 = vst [vmem:[#allocation96_spill] sm:$0xff] %v18099_v0  ;;  %5093 = vrot.lane.b32.xlu1 %v17944_v2, %s14822_s6  ;;  %v12528_v0 = vld [vmem:[%s14870_s23 + $0x294] sm:$0xff] }
 0x36c   : > { %5091 = vrot.lane.b32.xlu0 %v17956_v52, %s14822_s6 }
 0x36d   : > { %v18105_v7 = vpop.permute.xlu1 %4737 }
 0x36e   : > { %22010 = vst [vmem:[#allocation30_spill] sm:$0xff] %v18105_v7  ;;  %v18107_v56 = vpop.permute.xlu0 %4735 }
 0x36f   : > { %22011 = vst [vmem:[#allocation46_spill] sm:$0xff] %v18107_v56  ;;  %5097 = vrot.lane.b32.xlu1 %v17966_v57, %s14822_s6 }
 0x370   : > { %5095 = vrot.lane.b32.xlu0 %v17976_v33, %s14822_s6 }
 0x371   : > { %v18113_v62 = vpop.permute.xlu1 %4741 }
 0x372   : > { %22012 = vst [vmem:[#allocation77_spill] sm:$0xff] %v18113_v62  ;;  %v18115_v38 = vpop.permute.xlu0 %4739 }
 0x373   : > { %22013 = vst [vmem:[#allocation80_spill] sm:$0xff] %v18115_v38  ;;  %5101 = vrot.lane.b32.xlu1 %v17986_v35, %s14822_s6 }
 0x374   : > { %5099 = vrot.lane.b32.xlu0 %v18001_v23, %s14822_s6 }
 0x375   : > { %v18121_v7 = vpop.permute.xlu1 %4745 }
 0x376   : > { %22014 = vst [vmem:[#allocation16_spill] sm:$0xff] %v18121_v7  ;;  %v18123_v56 = vpop.permute.xlu0 %4743 }
 0x377   : > { %22015 = vst [vmem:[#allocation99_spill] sm:$0xff] %v18123_v56  ;;  %5105 = vrot.lane.b32.xlu1 %v18010_v44, %s14822_s6 }
 0x378   : > { %5103 = vrot.lane.b32.xlu0 %v18018_v41, %s14822_s6 }
 0x379   : > { %v18129_v62 = vpop.permute.xlu1 %4749 }
 0x37a   : > { %22016 = vst [vmem:[#allocation43_spill] sm:$0xff] %v18129_v62  ;;  %v18131_v38 = vpop.permute.xlu0 %4747  ;;  %v12481_v62 = vld [vmem:[%s21522_s1 + $0x90] sm:$0xff] }
 0x37b   : > { %22017 = vst [vmem:[#allocation35_spill] sm:$0xff] %v18131_v38  ;;  %5109 = vrot.lane.b32.xlu1 %v12479_v12, %s14822_s6  ;;  %v12482_v12 = vld [vmem:[%s21522_s1 + $0x98] sm:$0xff] }
 0x37c   : > { %5107 = vrot.lane.b32.xlu0 %v18033_v1, %s14822_s6 }
 0x37d   : > { %v18136_v7 = vpop.permute.xlu1 %4753 }
 0x37e   : > { %22018 = vst [vmem:[#allocation79_spill] sm:$0xff] %v18136_v7  ;;  %v18138_v56 = vpop.permute.xlu0 %4751  ;;  %v18152_v7 = vpack.c.bf16 %v12482_v12, %v12481_v62  ;;  %v18169_v62 = vld [vmem:[%s14870_s23 + $0x2ac] sm:$0xff]  ;;  %v12530_v12 = vld [vmem:[%s14870_s23 + $0x2d4] sm:$0xff] }
 0x37f   : > { %22019 = vst [vmem:[#allocation82_spill] sm:$0xff] %v18138_v56  ;;  %5113 = vrot.lane.b32.xlu1 %v12480_v53, %s14822_s6  ;;  %v18157_v53 = vld [vmem:[%s14870_s23 + $0x28c] sm:$0xff] }
 0x380   : > { %5111 = vrot.lane.b32.xlu0 %v18044_v3, %s14822_s6  ;;  %14419 = vmatprep.subr.bf16.mxu0 %v18152_v7 }
 0x381   : > { %v18150_v38 = vpop.permute.xlu1 %4757 }
 0x382   : > { %22020 = vst [vmem:[#allocation32_spill] sm:$0xff] %v18150_v38  ;;  %v18154_v56 = vpop.permute.xlu0 %4755 }
 0x383   : > { %22021 = vst [vmem:[#allocation48_spill] sm:$0xff] %v18154_v56  ;;  %5117 = vrot.lane.b32.xlu1 %v12528_v0, %s14822_s6 }
 0x384   : > { %5115 = vrot.lane.b32.xlu0 %v18157_v53, %s14822_s6 }
 0x385   : > { %v18164_v6 = vpop.permute.xlu1 %4825 }
 0x386   : > { %v18166_v38 = vpop.permute.xlu0 %4823 }
 0x387   : > { %5121 = vrot.lane.b32.xlu1 %v12529_v19, %s14822_s6  ;;  %v18191_v19 = vld [vmem:[%s14870_s23 + $0x2ec] sm:$0xff] }
 0x388   : > { %5119 = vrot.lane.b32.xlu0 %v18169_v62, %s14822_s6 }
 0x389   : > { %v18175_v0 = vpop.permute.xlu1 %4829 }
 0x38a   : > { %v18177_v56 = vpop.permute.xlu0 %4827 }
 0x38b   : > { %5125 = vrot.lane.b32.xlu1 %v12530_v12, %s14822_s6 }
 0x38c   : > { %5123 = vrot.lane.b32.xlu0 %v18180_v10, %s14822_s6 }
 0x38d   : > { %v18186_v29 = vpop.permute.xlu1 %4833 }
 0x38e   : > { %v18188_v25 = vpop.permute.xlu0 %4831 }
 0x38f   : > { %5129 = vrot.lane.b32.xlu1 %v12531_v5, %s14822_s6 }
 0x390   : > { %5127 = vrot.lane.b32.xlu0 %v18191_v19, %s14822_s6 }
 0x391   : > { %v18196_v18 = vpop.permute.xlu1 %4837 }
 0x392   : > { %22022 = vst [vmem:[#allocation81_spill] sm:$0xff] %v18196_v18  ;;  %v18198_v24 = vpop.permute.xlu0 %4835 }
 0x393   : > { %5988 = vrot.lane.b32.xlu1 %v17581_v21, %s14821_s24 }
 0x394   : > { %5986 = vrot.lane.b32.xlu0 %v17584_v14, %s14821_s24 }
 0x395   : > { %v18204_v12 = vpop.permute.xlu1 %4841 }
 0x396   : > { %v18206_v60 = vpop.permute.xlu0 %4839 }
 0x397   : > { %5992 = vrot.lane.b32.xlu1 %v17607_v15, %s14821_s24 }
 0x398   : > { %5990 = vrot.lane.b32.xlu0 %v17610_v4, %s14821_s24 }
 0x399   : > { %v18212_v5 = vpop.permute.xlu1 %4845 }
 0x39a   : > { %v18214_v18 = vpop.permute.xlu0 %4843 }
 0x39b   : > { %5996 = vrot.lane.b32.xlu1 %v17633_v59, %s14821_s24 }
 0x39c   : > { %5994 = vrot.lane.b32.xlu0 %v17636_v20, %s14821_s24 }
 0x39d   : > { %v18220_v21 = vpop.permute.xlu1 %4849 }
 0x39e   : > { %22023 = vst [vmem:[#allocation84_spill] sm:$0xff] %v18220_v21  ;;  %v18222_v14 = vpop.permute.xlu0 %4847  ;;  %v18325_v21 = vld [vmem:[%s14870_s23 + $0x124] sm:$0xff] }
 0x39f   : > { %6000 = vrot.lane.b32.xlu1 %v17659_v13, %s14821_s24 }
 0x3a0   : > { %5998 = vrot.lane.b32.xlu0 %v17662_v54, %s14821_s24 }
 0x3a1   : > { %v18228_v15 = vpop.permute.xlu1 %4853 }
 0x3a2   : > { %22024 = vst [vmem:[#allocation45_spill] sm:$0xff] %v18228_v15  ;;  %v18230_v4 = vpop.permute.xlu0 %4851 }
 0x3a3   : > { %22025 = vst [vmem:[#allocation37_spill] sm:$0xff] %v18230_v4  ;;  %6004 = vrot.lane.b32.xlu1 %v17685_v16, %s14821_s24 }
 0x3a4   : > { %6002 = vrot.lane.b32.xlu0 %v17688_v63, %s14821_s24 }
 0x3a5   : > { %v18236_v59 = vpop.permute.xlu1 %4857 }
 0x3a6   : > { %22026 = vst [vmem:[#allocation83_spill] sm:$0xff] %v18236_v59  ;;  %v18238_v20 = vpop.permute.xlu0 %4855 }
 0x3a7   : > { %22027 = vst [vmem:[#allocation86_spill] sm:$0xff] %v18238_v20  ;;  %6008 = vrot.lane.b32.xlu1 %v17710_v45, %s14821_s24  ;;  %v18261_v45 = vld [vmem:[%s14870_s23 + $0x290] sm:$0xff] }
 0x3a8   : > { %6006 = vrot.lane.b32.xlu0 %v17713_v9, %s14821_s24  ;;  %v12647_v9 = vld [vmem:[%s14870_s23 + $0x288] sm:$0xff] }
 0x3a9   : > { %v18244_v13 = vpop.permute.xlu1 %4861 }
 0x3aa   : > { %22028 = vst [vmem:[#allocation34_spill] sm:$0xff] %v18244_v13  ;;  %v18246_v54 = vpop.permute.xlu0 %4859 }
 0x3ab   : > { %22029 = vst [vmem:[#allocation50_spill] sm:$0xff] %v18246_v54  ;;  %6012 = vrot.lane.b32.xlu1 %v17730_v51, %s14821_s24 }
 0x3ac   : > { %6010 = vrot.lane.b32.xlu0 %v17733_v58, %s14821_s24  ;;  %v18272_v58 = vld [vmem:[%s14870_s23 + $0x2b0] sm:$0xff] }
 0x3ad   : > { %v18252_v16 = vpop.permute.xlu1 %4865  ;;  %22034 = vst [vmem:[#allocation87_spill] sm:$0xff] %v18272_v58 }
 0x3ae   : > { %22030 = vst [vmem:[#allocation85_spill] sm:$0xff] %v18252_v16  ;;  %v18254_v63 = vpop.permute.xlu0 %4863 }
 0x3af   : > { %22031 = vst [vmem:[#allocation88_spill] sm:$0xff] %v18254_v63  ;;  %6016 = vrot.lane.b32.xlu1 %v17750_v28, %s14821_s24  ;;  %v12649_v28 = vld [vmem:[%s14870_s23 + $0x2a8] sm:$0xff] }
 0x3b0   : > { %6014 = vrot.lane.b32.xlu0 %v17753_v26, %s14821_s24 }
 0x3b1   : > { %v18264_v13 = vpop.permute.xlu1 %4869 }
 0x3b2   : > { %22032 = vst [vmem:[#allocation47_spill] sm:$0xff] %v18264_v13  ;;  %v18266_v51 = vpop.permute.xlu0 %4867  ;;  %v18283_v13 = vld [vmem:[%s14870_s23 + $0x2d0] sm:$0xff] }
 0x3b3   : > { %22033 = vst [vmem:[#allocation49_spill] sm:$0xff] %v18266_v51  ;;  %6020 = vrot.lane.b32.xlu1 %v18261_v45, %s14821_s24  ;;  %22037 = vst [vmem:[#allocation17_spill] sm:$0xff] %v18283_v13  ;;  %v12651_v51 = vld [vmem:[%s14870_s23 + $0x2c8] sm:$0xff] }
 0x3b4   : > { %6018 = vrot.lane.b32.xlu0 %v12647_v9, %s14821_s24 }
 0x3b5   : > { %v18275_v16 = vpop.permute.xlu1 %4873 }
 0x3b6   : > { %22035 = vst [vmem:[#allocation90_spill] sm:$0xff] %v18275_v16  ;;  %v18277_v26 = vpop.permute.xlu0 %4871  ;;  %v18294_v16 = vld [vmem:[%s14870_s23 + $0x2f0] sm:$0xff] }
 0x3b7   : > { %22036 = vst [vmem:[#allocation39_spill] sm:$0xff] %v18277_v26  ;;  %6024 = vrot.lane.b32.xlu1 %v18272_v58, %s14821_s24  ;;  %22040 = vst [vmem:[#allocation41_spill] sm:$0xff] %v18294_v16  ;;  %v12653_v26 = vld [vmem:[%s14870_s23 + $0x2e8] sm:$0xff]  ;;  %v12662_v58 = vld [vmem:[%s14870_s23 + $0x370] sm:$0xff] }
 0x3b8   : > { %6022 = vrot.lane.b32.xlu0 %v12649_v28, %s14821_s24 }
 0x3b9   : > { %v18286_v63 = vpop.permute.xlu1 %4877 }
 0x3ba   : > { %22038 = vst [vmem:[#allocation89_spill] sm:$0xff] %v18286_v63  ;;  %v18288_v9 = vpop.permute.xlu0 %4875  ;;  %v12656_v63 = vld [vmem:[%s14870_s23 + $0x310] sm:$0xff] }
 0x3bb   : > { %22039 = vst [vmem:[#allocation94_spill] sm:$0xff] %v18288_v9  ;;  %6028 = vrot.lane.b32.xlu1 %v18283_v13, %s14821_s24  ;;  %v12655_v9 = vld [vmem:[%s14870_s23 + $0x308] sm:$0xff] }
 0x3bc   : > { %6026 = vrot.lane.b32.xlu0 %v12651_v51, %s14821_s24  ;;  %v18311_v51 = vld [vmem:[%s14870_s23 + $0x104] sm:$0xff] }
 0x3bd   : > { %v18297_v54 = vpop.permute.xlu1 %4881 }
 0x3be   : > { %22041 = vst [vmem:[#allocation40_spill] sm:$0xff] %v18297_v54  ;;  %v18299_v28 = vpop.permute.xlu0 %4879  ;;  %v12658_v54 = vld [vmem:[%s14870_s23 + $0x330] sm:$0xff] }
 0x3bf   : > { %22042 = vst [vmem:[#allocation93_spill] sm:$0xff] %v18299_v28  ;;  %6032 = vrot.lane.b32.xlu1 %v18294_v16, %s14821_s24  ;;  %v12657_v28 = vld [vmem:[%s14870_s23 + $0x328] sm:$0xff]  ;;  %v22045_v16 = vld [vmem:[#allocation20_spill] sm:$0xff] }
 0x3c0   : > { %6030 = vrot.lane.b32.xlu0 %v12653_v26, %s14821_s24  ;;  %v5164_v26 = vsel %vm578_vm0, %v17836_v49, %v22045_v16  ;;  %v12660_v49 = vld [vmem:[%s14870_s23 + $0x350] sm:$0xff] }
 0x3c1   : > { %v18306_v59 = vpop.permute.xlu1 %4885 }
 0x3c2   : > { %22043 = vst [vmem:[#allocation98_spill] sm:$0xff] %v18306_v59  ;;  %v18308_v20 = vpop.permute.xlu0 %4883  ;;  %v22046_v59 = vld [vmem:[#allocation21_spill] sm:$0xff] }
 0x3c3   : > { %22044 = vst [vmem:[#allocation19_spill] sm:$0xff] %v18308_v20  ;;  %6036 = vrot.lane.b32.xlu1 %v12656_v63, %s14821_s24  ;;  %v5163_v20 = vsel %vm578_vm0, %v18311_v51, %v22046_v59 }
 0x3c4   : > { %6034 = vrot.lane.b32.xlu0 %v12655_v9, %s14821_s24  ;;  %v12659_v9 = vld [vmem:[%s14870_s23 + $0x348] sm:$0xff] }
 0x3c5   : > { %v5070_v15 = vpop.permute.xlu1 %5069 }
 0x3c6   : > { %v5196_v13 = vsel %vm611_vm1, %v5164_v26, %v5070_v15  ;;  %v5068_v4 = vpop.permute.xlu0 %5067  ;;  %v22047_v15 = vld [vmem:[#allocation22_spill] sm:$0xff] }
 0x3c7   : > { %v5195_v63 = vsel %vm611_vm1, %v5163_v20, %v5068_v4  ;;  %6040 = vrot.lane.b32.xlu1 %v12658_v54, %s14821_s24  ;;  %v5166_v26 = vsel %vm578_vm0, %v17856_v17, %v22047_v15  ;;  %v12483_v4 = vld [vmem:[%s21522_s1 + $0xa0] sm:$0xff]  ;;  %v12680_v54 = vld [vmem:[%s21522_s1 + $0xc8] sm:$0xff] }
 0x3c8   : > { %6038 = vrot.lane.b32.xlu0 %v12657_v28, %s14821_s24  ;;  %13910 = vmatprep.mubr.msk.f32.mxu0 %vm1068_vm2, %v5195_v63  ;;  %v12679_v20 = vld [vmem:[%s21522_s1 + $0xc0] sm:$0xff]  ;;  %v22048_v28 = vld [vmem:[#allocation23_spill] sm:$0xff] }
 0x3c9   : > { %13911 = vmatmul.mubr.msk.f32.vlgmr.msra.gmra.mrb[32].mxu0 %vm1068_vm2, %v5196_v13  ;;  %v5074_v59 = vpop.permute.xlu1 %5073  ;;  %v5165_v63 = vsel %vm578_vm0, %v18325_v21, %v22048_v28  ;;  %v18352_v15 = vld [vmem:[%s14870_s23 + $0x144] sm:$0xff] }
 0x3ca   : > { %v5198_v13 = vsel %vm611_vm1, %v5166_v26, %v5074_v59  ;;  %v5072_v17 = vpop.permute.xlu0 %5071  ;;  %14421 = vmatpush3.bf16.msra.mxu0 %v18152_v7  ;;  %v12661_v59 = vld [vmem:[%s14870_s23 + $0x368] sm:$0xff]  ;;  %v18360_v26 = vpack.c.bf16 %v12680_v54, %v12679_v20  ;;  %v5168_v7 = vsel %vm578_vm0, %v17876_v55, %v21866_v40  ;;  %v22050_v55 = vld [vmem:[#allocation53_spill] sm:$0xff] }
 0x3cb   : > { %v5197_v16 = vsel %vm611_vm1, %v5165_v63, %v5072_v17  ;;  %6044 = vrot.lane.b32.xlu1 %v12660_v49, %s14821_s24  ;;  %13962 = vmatprep.subr.mxu0 %v12483_v4  ;;  %v22049_v17 = vld [vmem:[#allocation52_spill] sm:$0xff]  ;;  %v5170_v54 = vsel %vm578_vm0, %v17896_v48, %v22050_v55  ;;  %v22052_v48 = vld [vmem:[#allocation3_spill] sm:$0xff] }
 0x3cc   : > { %6042 = vrot.lane.b32.xlu0 %v12659_v9, %s14821_s24  ;;  %13913 = vmatprep.mubr.msk.f32.mxu0 %vm1068_vm2, %v5197_v16  ;;  %v5167_v49 = vsel %vm578_vm0, %v18352_v15, %v22049_v17  ;;  %v18371_v9 = vld [vmem:[%s14870_s23 + $0x164] sm:$0xff] }
 0x3cd   : > { %13914 = vmatmul.mubr.msk.f32.gmra.mrb[34].mxu0 %vm1068_vm2, %v5198_v13  ;;  %v5078_v28 = vpop.permute.xlu1 %5077 }
 0x3ce   : > { %v5200_v63 = vsel %vm611_vm1, %v5168_v7, %v5078_v28  ;;  %v5076_v16 = vpop.permute.xlu0 %5075  ;;  %13963 = vmatpush3.msra.mxu0 %v12483_v4  ;;  %v22051_v28 = vld [vmem:[#allocation54_spill] sm:$0xff] }
 0x3cf   : > { %v5199_v20 = vsel %vm611_vm1, %v5167_v49, %v5076_v16  ;;  %6048 = vrot.lane.b32.xlu1 %v12662_v58, %s14821_s24  ;;  %14423 = vmatprep.subr.bf16.mxu0 %v18360_v26  ;;  %v5169_v58 = vsel %vm578_vm0, %v18371_v9, %v22051_v28 }
 0x3d0   : > { %6046 = vrot.lane.b32.xlu0 %v12661_v59, %s14821_s24  ;;  %13916 = vmatprep.mubr.msk.f32.mxu0 %vm1068_vm2, %v5199_v20  ;;  %v18387_v59 = vld [vmem:[%s14870_s23 + $0x184] sm:$0xff] }
 0x3d1   : > { %13917 = vmatmul.mubr.msk.f32.gmra.mrb[36].mxu0 %vm1068_vm2, %v5200_v63  ;;  %v5082_v4 = vpop.permute.xlu1 %5081  ;;  %v5172_v63 = vsel %vm578_vm0, %v17915_v30, %v22052_v48  ;;  %v18427_v48 = vld [vmem:[%s14870_s23 + $0x1c4] sm:$0xff] }
 0x3d2   : > { %v5202_v13 = vsel %vm611_vm1, %v5170_v54, %v5082_v4  ;;  %v5080_v7 = vpop.permute.xlu0 %5079  ;;  %v22053_v54 = vld [vmem:[#allocation4_spill] sm:$0xff] }
 0x3d3   : > { %v5201_v49 = vsel %vm611_vm1, %v5169_v58, %v5080_v7  ;;  %6116 = vrot.lane.b32.xlu1 %v17906_v8, %s14822_s6  ;;  %v5171_v4 = vsel %vm578_vm0, %v18387_v59, %v22053_v54  ;;  %v18404_v58 = vld [vmem:[%s14870_s23 + $0x1a4] sm:$0xff] }
 0x3d4   : > { %6114 = vrot.lane.b32.xlu0 %v17915_v30, %s14822_s6  ;;  %13919 = vmatprep.mubr.msk.f32.mxu0 %vm1068_vm2, %v5201_v49  ;;  %v12781_v30 = vld [vmem:[%s21522_s1 + $0xf0] sm:$0xff]  ;;  %v22054_v49 = vld [vmem:[#allocation5_spill] sm:$0xff] }
 0x3d5   : > { %13920 = vmatmul.mubr.msk.f32.gmra.mrb[38].mxu0 %vm1068_vm2, %v5202_v13  ;;  %v5086_v16 = vpop.permute.xlu1 %5085  ;;  %v12782_v13 = vld [vmem:[%s21522_s1 + $0xf8] sm:$0xff] }
 0x3d6   : > { %v5204_v20 = vsel %vm611_vm1, %v5172_v63, %v5086_v16  ;;  %v5084_v8 = vpop.permute.xlu0 %5083  ;;  %v5174_v63 = vsel %vm578_vm0, %v17935_v36, %v22054_v49  ;;  %v14426_v16 = vpack.c.bf16 %v12782_v13, %v12781_v30  ;;  %v5176_v30 = vsel %vm578_vm0, %v17956_v52, %v21875_v46 }
 0x3d7   : > { %v5203_v7 = vsel %vm611_vm1, %v5171_v4, %v5084_v8  ;;  %6120 = vrot.lane.b32.xlu1 %v17924_v27, %s14822_s6  ;;  %v22055_v8 = vld [vmem:[#allocation6_spill] sm:$0xff]  ;;  %v5175_v13 = vsel %vm578_vm0, %v18427_v48, %v21877_v47 }
 0x3d8   : > { %6118 = vrot.lane.b32.xlu0 %v17935_v36, %s14822_s6  ;;  %13922 = vmatprep.mubr.msk.f32.mxu0 %vm1068_vm2, %v5203_v7  ;;  %v5173_v7 = vsel %vm578_vm0, %v18404_v58, %v22055_v8 }
 0x3d9   : > { %13923 = vmatmul.mubr.msk.f32.gmra.mrb[40].mxu0 %vm1068_vm2, %v5204_v20  ;;  %v5090_v27 = vpop.permute.xlu1 %5089  ;;  %14427 = vmatprep.subr.bf16.mxu1 %v14426_v16 }
 0x3da   : > { %v5206_v4 = vsel %vm611_vm1, %v5174_v63, %v5090_v27  ;;  %v5088_v54 = vpop.permute.xlu0 %5087  ;;  %14429 = vmatpush3.bf16.msra.mxu1 %v14426_v16  ;;  %v18448_v27 = vld [vmem:[%s14870_s23 + $0x1e4] sm:$0xff] }
 0x3db   : > { %v5205_v28 = vsel %vm611_vm1, %v5173_v7, %v5088_v54  ;;  %6124 = vrot.lane.b32.xlu1 %v17944_v2, %s14822_s6 }
 0x3dc   : > { %6122 = vrot.lane.b32.xlu0 %v17956_v52, %s14822_s6  ;;  %v18434_v36 = vpop.f32.mrb[32].mxu1  ;;  %13925 = vmatprep.mubr.msk.f32.mxu0 %vm1068_vm2, %v5205_v28  ;;  %v12783_v52 = vld [vmem:[%s21522_s1 + $0x100] sm:$0xff] }
 0x3dd   : > { %22056 = vst [vmem:[#allocation66_spill] sm:$0xff] %v18434_v36  ;;  %v18437_v20 = vpop.f32.mrb[33].mxu1  ;;  %13926 = vmatmul.mubr.msk.f32.gmra.mrb[42].mxu0 %vm1068_vm2, %v5206_v4  ;;  %v5094_v54 = vpop.permute.xlu1 %5093  ;;  %14070 = vmatprep.subr.mxu1 %v12783_v52 }
 0x3de   : > { %22057 = vst [vmem:[#allocation97_spill] sm:$0xff] %v18437_v20  ;;  %v5208_v2 = vsel %vm611_vm1, %v5176_v30, %v5094_v54  ;;  %v5092_v63 = vpop.permute.xlu0 %5091  ;;  %14071 = vmatpush3.msra.mxu1 %v12783_v52  ;;  %v5177_v54 = vsel %vm578_vm0, %v18448_v27, %v21881_v61  ;;  %v22062_v52 = vld [vmem:[#allocation56_spill] sm:$0xff]  ;;  %v18520_v20 = vld [vmem:[%s14870_s23 + $0x244] sm:$0xff] }
 0x3df   : > { %v5207_v28 = vsel %vm611_vm1, %v5175_v13, %v5092_v63  ;;  %6128 = vrot.lane.b32.xlu1 %v17966_v57, %s14822_s6  ;;  %v5178_v57 = vsel %vm578_vm0, %v17976_v33, %v21879_v39  ;;  %v18472_v63 = vld [vmem:[%s14870_s23 + $0x204] sm:$0xff] }
 0x3e0   : > { %6126 = vrot.lane.b32.xlu0 %v17976_v33, %s14822_s6  ;;  %v18458_v16 = vpop.f32.mrb[34].mxu1  ;;  %13928 = vmatprep.mubr.msk.f32.mxu0 %vm1068_vm2, %v5207_v28 }
 0x3e1   : > { %22058 = vst [vmem:[#allocation101_spill] sm:$0xff] %v18458_v16  ;;  %v18461_v4 = vpop.f32.mrb[35].mxu1  ;;  %13929 = vmatmul.mubr.msk.f32.gmra.mrb[44].mxu0 %vm1068_vm2, %v5208_v2  ;;  %v5098_v7 = vpop.permute.xlu1 %5097 }
 0x3e2   : > { %22059 = vst [vmem:[#allocation18_spill] sm:$0xff] %v18461_v4  ;;  %v5210_v30 = vsel %vm611_vm1, %v5178_v57, %v5098_v7  ;;  %v5096_v13 = vpop.permute.xlu0 %5095  ;;  %v5180_v57 = vsel %vm578_vm0, %v18001_v23, %v22062_v52 }
 0x3e3   : > { %v5209_v28 = vsel %vm611_vm1, %v5177_v54, %v5096_v13  ;;  %6132 = vrot.lane.b32.xlu1 %v17986_v35, %s14822_s6  ;;  %v22063_v54 = vld [vmem:[#allocation57_spill] sm:$0xff] }
 0x3e4   : > { %6130 = vrot.lane.b32.xlu0 %v18001_v23, %s14822_s6  ;;  %v18479_v33 = vpop.f32.mrb[36].mxu1  ;;  %13931 = vmatprep.mubr.msk.f32.mxu0 %vm1068_vm2, %v5209_v28  ;;  %v5179_v13 = vsel %vm578_vm0, %v18472_v63, %v22063_v54  ;;  %v18547_v54 = vld [vmem:[%s14870_s23 + $0x264] sm:$0xff] }
 0x3e5   : > { %22060 = vst [vmem:[#allocation68_spill] sm:$0xff] %v18479_v33  ;;  %v18482_v2 = vpop.f32.mrb[37].mxu1  ;;  %13932 = vmatmul.mubr.msk.f32.gmra.mrb[46].mxu0 %vm1068_vm2, %v5210_v30  ;;  %v5102_v7 = vpop.permute.xlu1 %5101  ;;  %v18493_v33 = vld [vmem:[%s14870_s23 + $0x224] sm:$0xff]  ;;  %v18504_v30 = vld [vmem:[%s14870_s23 + $0x118] sm:$0xff] }
 0x3e6   : > { %22061 = vst [vmem:[#allocation100_spill] sm:$0xff] %v18482_v2  ;;  %v5212_v35 = vsel %vm611_vm1, %v5180_v57, %v5102_v7  ;;  %v5100_v4 = vpop.permute.xlu0 %5099  ;;  %v18507_v57 = vld [vmem:[%s14870_s23 + $0x110] sm:$0xff] }
 0x3e7   : > { %v5211_v28 = vsel %vm611_vm1, %v5179_v13, %v5100_v4  ;;  %6136 = vrot.lane.b32.xlu1 %v18010_v44, %s14822_s6  ;;  %v22066_v4 = vld [vmem:[#allocation58_spill] sm:$0xff] }
 0x3e8   : > { %6134 = vrot.lane.b32.xlu0 %v18018_v41, %s14822_s6  ;;  %v18500_v23 = vpop.f32.mrb[38].mxu1  ;;  %13934 = vmatprep.mubr.msk.f32.mxu0 %vm1068_vm2, %v5211_v28  ;;  %v5182_v44 = vsel %vm578_vm0, %v18018_v41, %v22066_v4 }
 0x3e9   : > { %22064 = vst [vmem:[#allocation103_spill] sm:$0xff] %v18500_v23  ;;  %v18509_v7 = vpop.f32.mrb[39].mxu1  ;;  %13935 = vmatmul.mubr.msk.f32.gmra.mrb[48].mxu0 %vm1068_vm2, %v5212_v35  ;;  %v5106_v13 = vpop.permute.xlu1 %5105  ;;  %v22067_v23 = vld [vmem:[#allocation59_spill] sm:$0xff]  ;;  %v18531_v35 = vld [vmem:[%s14870_s23 + $0x138] sm:$0xff] }
 0x3ea   : > { %22065 = vst [vmem:[#allocation67_spill] sm:$0xff] %v18509_v7  ;;  %v5214_v2 = vsel %vm611_vm1, %v5182_v44, %v5106_v13  ;;  %v5181_v28 = vsel %vm578_vm0, %v18493_v33, %v22067_v23  ;;  %v5104_v16 = vpop.permute.xlu0 %5103  ;;  %v18534_v44 = vld [vmem:[%s14870_s23 + $0x130] sm:$0xff] }
 0x3eb   : > { %v5213_v36 = vsel %vm611_vm1, %v5181_v28, %v5104_v16  ;;  %7101 = vrot.lane.b32.xlu1 %v18504_v30, %s14822_s6  ;;  %v22070_v16 = vld [vmem:[#allocation60_spill] sm:$0xff] }
 0x3ec   : > { %7099 = vrot.lane.b32.xlu0 %v18507_v57, %s14822_s6  ;;  %v18527_v41 = vpop.f32.mrb[40].mxu1  ;;  %13937 = vmatprep.mubr.msk.f32.mxu0 %vm1068_vm2, %v5213_v36  ;;  %v5184_v28 = vsel %vm578_vm0, %v18033_v1, %v22070_v16 }
 0x3ed   : > { %22068 = vst [vmem:[#allocation70_spill] sm:$0xff] %v18527_v41  ;;  %v18536_v13 = vpop.f32.mrb[41].mxu1  ;;  %13938 = vmatmul.mubr.msk.f32.gmra.mrb[50].mxu0 %vm1068_vm2, %v5214_v2  ;;  %v5110_v7 = vpop.permute.xlu1 %5109  ;;  %v22071_v41 = vld [vmem:[#allocation61_spill] sm:$0xff]  ;;  %v18558_v2 = vld [vmem:[%s14870_s23 + $0x158] sm:$0xff] }
 0x3ee   : > { %22069 = vst [vmem:[#allocation102_spill] sm:$0xff] %v18536_v13  ;;  %v5216_v23 = vsel %vm611_vm1, %v5184_v28, %v5110_v7  ;;  %v5183_v36 = vsel %vm578_vm0, %v18520_v20, %v22071_v41  ;;  %v5108_v4 = vpop.permute.xlu0 %5107  ;;  %22073 = vst [vmem:[#allocation69_spill] sm:$0xff] %v18558_v2  ;;  %v18561_v7 = vld [vmem:[%s14870_s23 + $0x150] sm:$0xff] }
 0x3ef   : > { %v5215_v52 = vsel %vm611_vm1, %v5183_v36, %v5108_v4  ;;  %7105 = vrot.lane.b32.xlu1 %v18531_v35, %s14822_s6  ;;  %22074 = vst [vmem:[#allocation104_spill] sm:$0xff] %v18561_v7  ;;  %v22076_v4 = vld [vmem:[#allocation62_spill] sm:$0xff] }
 0x3f0   : > { %7103 = vrot.lane.b32.xlu0 %v18534_v44, %s14822_s6  ;;  %v18554_v1 = vpop.f32.mrb[42].mxu1  ;;  %13940 = vmatprep.mubr.msk.f32.mxu0 %vm1068_vm2, %v5215_v52  ;;  %v5186_v36 = vsel %vm578_vm0, %v18044_v3, %v22076_v4  ;;  %v18583_v3 = vld [vmem:[%s14870_s23 + $0x178] sm:$0xff] }
 0x3f1   : > { %22072 = vst [vmem:[#allocation105_spill] sm:$0xff] %v18554_v1  ;;  %v18563_v28 = vpop.f32.mrb[43].mxu1  ;;  %13941 = vmatmul.mubr.msk.f32.gmra.mrb[52].mxu0 %vm1068_vm2, %v5216_v23  ;;  %v5114_v13 = vpop.permute.xlu1 %5113  ;;  %v22077_v1 = vld [vmem:[#allocation63_spill] sm:$0xff]  ;;  %v12508_v23 = vld [vmem:[%s14870_s23 + $0x284] sm:$0xff]  ;;  %22079 = vst [vmem:[#allocation5_spill] sm:$0xff] %v18583_v3 }
 0x3f2   : > { %22075 = vst [vmem:[#allocation52_spill] sm:$0xff] %v18563_v28  ;;  %v5218_v41 = vsel %vm611_vm1, %v5186_v36, %v5114_v13  ;;  %v5185_v52 = vsel %vm578_vm0, %v18547_v54, %v22077_v1  ;;  %v5112_v16 = vpop.permute.xlu0 %5111  ;;  %v18586_v13 = vld [vmem:[%s14870_s23 + $0x170] sm:$0xff] }
 0x3f3   : > { %v5217_v61 = vsel %vm611_vm1, %v5185_v52, %v5112_v16  ;;  %7109 = vrot.lane.b32.xlu1 %v18558_v2, %s14822_s6  ;;  %v22081_v16 = vld [vmem:[#allocation64_spill] sm:$0xff] }
 0x3f4   : > { %7107 = vrot.lane.b32.xlu0 %v18561_v7, %s14822_s6  ;;  %v18579_v28 = vpop.f32.mrb[44].mxu1  ;;  %13943 = vmatprep.mubr.msk.f32.mxu0 %vm1068_vm2, %v5217_v61  ;;  %v5188_v52 = vsel %vm578_vm0, %v18157_v53, %v22081_v16  ;;  %v18607_v53 = vld [vmem:[%s14870_s23 + $0x198] sm:$0xff] }
 0x3f5   : > { %22078 = vst [vmem:[#allocation53_spill] sm:$0xff] %v18579_v28  ;;  %v18588_v36 = vpop.f32.mrb[45].mxu1  ;;  %13944 = vmatmul.mubr.msk.f32.gmra.mrb[54].mxu0 %vm1068_vm2, %v5218_v41  ;;  %v5118_v1 = vpop.permute.xlu1 %5117  ;;  %v22082_v28 = vld [vmem:[#allocation65_spill] sm:$0xff]  ;;  %22084 = vst [vmem:[#allocation123_spill] sm:$0xff] %v18607_v53 }
 0x3f6   : > { %22080 = vst [vmem:[#allocation6_spill] sm:$0xff] %v18588_v36  ;;  %v5220_v4 = vsel %vm611_vm1, %v5188_v52, %v5118_v1  ;;  %v5187_v61 = vsel %vm578_vm0, %v12508_v23, %v22082_v28  ;;  %v5116_v2 = vpop.permute.xlu0 %5115  ;;  %v12510_v41 = vld [vmem:[%s14870_s23 + $0x2a4] sm:$0xff]  ;;  %v18610_v1 = vld [vmem:[%s14870_s23 + $0x190] sm:$0xff] }
 0x3f7   : > { %v5219_v7 = vsel %vm611_vm1, %v5187_v61, %v5116_v2  ;;  %7113 = vrot.lane.b32.xlu1 %v18583_v3, %s14822_s6  ;;  %v22086_v2 = vld [vmem:[#allocation10_spill] sm:$0xff] }
 0x3f8   : > { %7111 = vrot.lane.b32.xlu0 %v18586_v13, %s14822_s6  ;;  %v18603_v36 = vpop.f32.mrb[46].mxu1  ;;  %13946 = vmatprep.mubr.msk.f32.mxu0 %vm1068_vm2, %v5219_v7  ;;  %v5190_v52 = vsel %vm578_vm0, %v18169_v62, %v22086_v2  ;;  %v18631_v62 = vld [vmem:[%s14870_s23 + $0x1b8] sm:$0xff] }
 0x3f9   : > { %22083 = vst [vmem:[#allocation122_spill] sm:$0xff] %v18603_v36  ;;  %v18612_v23 = vpop.f32.mrb[47].mxu1  ;;  %13947 = vmatmul.mubr.msk.f32.gmra.mrb[56].mxu0 %vm1068_vm2, %v5220_v4  ;;  %v5122_v61 = vpop.permute.xlu1 %5121  ;;  %v22087_v36 = vld [vmem:[#allocation11_spill] sm:$0xff]  ;;  %v12512_v4 = vld [vmem:[%s14870_s23 + $0x2c4] sm:$0xff]  ;;  %22089 = vst [vmem:[#allocation126_spill] sm:$0xff] %v18631_v62 }
 0x3fa   : > { %22085 = vst [vmem:[#allocation124_spill] sm:$0xff] %v18612_v23  ;;  %v5222_v28 = vsel %vm611_vm1, %v5190_v52, %v5122_v61  ;;  %v5189_v7 = vsel %vm578_vm0, %v12510_v41, %v22087_v36  ;;  %v5120_v16 = vpop.permute.xlu0 %5119  ;;  %v18634_v41 = vld [vmem:[%s14870_s23 + $0x1b0] sm:$0xff]  ;;  %v22092_v52 = vld [vmem:[#allocation12_spill] sm:$0xff]  ;;  %v22093_v36 = vld [vmem:[#allocation13_spill] sm:$0xff] }
 0x3fb   : > { %v5221_v3 = vsel %vm611_vm1, %v5189_v7, %v5120_v16  ;;  %7117 = vrot.lane.b32.xlu1 %v18607_v53, %s14822_s6  ;;  %22090 = vst [vmem:[#allocation127_spill] sm:$0xff] %v18634_v41  ;;  %v5192_v61 = vsel %vm578_vm0, %v18180_v10, %v22092_v52  ;;  %v18655_v10 = vld [vmem:[%s14870_s23 + $0x1d8] sm:$0xff] }
 0x3fc   : > { %7115 = vrot.lane.b32.xlu0 %v18610_v1, %s14822_s6  ;;  %v18627_v23 = vpop.f32.mrb[48].mxu1  ;;  %13949 = vmatprep.mubr.msk.f32.mxu0 %vm1068_vm2, %v5221_v3  ;;  %v5191_v3 = vsel %vm578_vm0, %v12512_v4, %v22093_v36  ;;  %v12401_v4 = vld [vmem:[%s14870_s23 + $0x84] sm:$0xff] }
 0x3fd   : > { %22088 = vst [vmem:[#allocation125_spill] sm:$0xff] %v18627_v23  ;;  %v18636_v16 = vpop.f32.mrb[49].mxu1  ;;  %13950 = vmatmul.mubr.msk.f32.gmra.mrb[58].mxu0 %vm1068_vm2, %v5222_v28  ;;  %v5126_v7 = vpop.permute.xlu1 %5125  ;;  %v12514_v28 = vld [vmem:[%s14870_s23 + $0x2e4] sm:$0xff] }
 0x3fe   : > { %22091 = vst [vmem:[#allocation128_spill] sm:$0xff] %v18636_v16  ;;  %v5224_v23 = vsel %vm611_vm1, %v5192_v61, %v5126_v7  ;;  %v5124_v2 = vpop.permute.xlu0 %5123  ;;  %v18658_v61 = vld [vmem:[%s14870_s23 + $0x1d0] sm:$0xff]  ;;  %v22096_v7 = vld [vmem:[#allocation14_spill] sm:$0xff] }
 0x3ff   : > { %v5223_v53 = vsel %vm611_vm1, %v5191_v3, %v5124_v2  ;;  %7121 = vrot.lane.b32.xlu1 %v18631_v62, %s14822_s6  ;;  %v5194_v3 = vsel %vm578_vm0, %v18191_v19, %v22096_v7 }
 0x400   : > { %7119 = vrot.lane.b32.xlu0 %v18634_v41, %s14822_s6  ;;  %v18651_v16 = vpop.f32.mrb[50].mxu1  ;;  %13952 = vmatprep.mubr.msk.f32.mxu0 %vm1068_vm2, %v5223_v53  ;;  %v22097_v53 = vld [vmem:[#allocation15_spill] sm:$0xff] }
 0x401   : > { %22094 = vst [vmem:[#allocation129_spill] sm:$0xff] %v18651_v16  ;;  %v18661_v2 = vpop.f32.mrb[51].mxu1  ;;  %13953 = vmatmul.mubr.msk.f32.gmra.mrb[60].mxu0 %vm1068_vm2, %v5224_v23  ;;  %v5130_v62 = vpop.permute.xlu1 %5129  ;;  %v5193_v36 = vsel %vm578_vm0, %v12514_v28, %v22097_v53  ;;  %v4919_v23 = vsel %vm578_vm0, %v12401_v4, %v18015_v43  ;;  %v18684_v28 = vld [vmem:[%s14870_s23 + $0x1f0] sm:$0xff] }
 0x402   : > { %22095 = vst [vmem:[#allocation130_spill] sm:$0xff] %v18661_v2  ;;  %v5226_v16 = vsel %vm611_vm1, %v5194_v3, %v5130_v62  ;;  %v5128_v52 = vpop.permute.xlu0 %5127  ;;  %v18681_v62 = vld [vmem:[%s14870_s23 + $0x1f8] sm:$0xff] }
 0x403   : > { %v5225_v41 = vsel %vm611_vm1, %v5193_v36, %v5128_v52  ;;  %7125 = vrot.lane.b32.xlu1 %v18655_v10, %s14822_s6  ;;  %v12403_v36 = vld [vmem:[%s14870_s23 + $0xa4] sm:$0xff]  ;;  %v4951_v52 = vsel %vm611_vm1, %v4919_v23, %v18166_v38 }
 0x404   : > { %7123 = vrot.lane.b32.xlu0 %v18658_v61, %s14822_s6  ;;  %v18677_v19 = vpop.f32.mrb[52].mxu1  ;;  %13955 = vmatprep.mubr.msk.f32.mxu0 %vm1068_vm2, %v5225_v41  ;;  %v14787_v41 = vld [vmem:[%s14870_s23 + $0x8c] sm:$0xff]  ;;  %v4921_v38 = vsel %vm578_vm0, %v12403_v36, %v18030_v37 }
 0x405   : > { %22098 = vst [vmem:[#allocation14_spill] sm:$0xff] %v18677_v19  ;;  %v18689_v3 = vpop.f32.mrb[53].mxu1  ;;  %13956 = vmatmul.mubr.msk.f32.gmra.mrb[62].mxu0 %vm1068_vm2, %v5226_v16  ;;  %v18692_v43 = vpop.permute.xlu1 %5988  ;;  %v4920_v19 = vsel %vm578_vm0, %v14787_v41, %v18013_v22  ;;  %v12405_v22 = vld [vmem:[%s14870_s23 + $0xc4] sm:$0xff]  ;;  %v4953_v41 = vsel %vm611_vm1, %v4921_v38, %v18177_v56  ;;  %v14788_v36 = vld [vmem:[%s14870_s23 + $0xac] sm:$0xff] }
 0x406   : > { %22099 = vst [vmem:[#allocation15_spill] sm:$0xff] %v18689_v3  ;;  %v18694_v4 = vpop.permute.xlu0 %5986  ;;  %13964 = vmatprep.mubr.msk.f32.mxu0 %vm1068_vm2, %v4951_v52  ;;  %v4952_v16 = vsel %vm611_vm1, %v4920_v19, %v18164_v6  ;;  %v18711_v52 = vld [vmem:[%s14870_s23 + $0x218] sm:$0xff]  ;;  %v18714_v3 = vld [vmem:[%s14870_s23 + $0x210] sm:$0xff]  ;;  %v4922_v56 = vsel %vm578_vm0, %v14788_v36, %v18028_v31  ;;  %v4923_v38 = vsel %vm578_vm0, %v12405_v22, %v18041_v42  ;;  %v12407_v31 = vld [vmem:[%s14870_s23 + $0xe4] sm:$0xff] }
 0x407   : > { %7129 = vrot.lane.b32.xlu1 %v18681_v62, %s14822_s6  ;;  %v12681_v6 = vld [vmem:[%s21522_s1 + $0xd0] sm:$0xff]  ;;  %v4955_v36 = vsel %vm611_vm1, %v4923_v38, %v18188_v25  ;;  %v4925_v25 = vsel %vm578_vm0, %v12407_v31, %v18051_v32 }
 0x408   : > { %7127 = vrot.lane.b32.xlu0 %v18684_v28, %s14822_s6  ;;  %v18708_v23 = vpop.f32.mrb[54].mxu1 }
 0x409   : > { %22100 = vst [vmem:[#allocation131_spill] sm:$0xff] %v18708_v23  ;;  %v18719_v2 = vpop.f32.mrb[55].mxu1  ;;  %13965 = vmatmul.mubr.msk.f32.vlgmr.msra.gmra.mrb[32].mxu0 %vm1068_vm2, %v4952_v16  ;;  %v18722_v37 = vpop.permute.xlu1 %5992  ;;  %v4954_v16 = vsel %vm611_vm1, %v4922_v56, %v18175_v0  ;;  %v14789_v0 = vld [vmem:[%s14870_s23 + $0xcc] sm:$0xff] }
 0x40a   : > { %22101 = vst [vmem:[#allocation132_spill] sm:$0xff] %v18719_v2  ;;  %v18727_v19 = vpop.permute.xlu0 %5990  ;;  %13967 = vmatprep.mubr.msk.f32.mxu0 %vm1068_vm2, %v4953_v41  ;;  %14425 = vmatpush3.bf16.msra.mxu0 %v18360_v26  ;;  %v12768_v26 = vld [vmem:[%s14870_s23 + $0x238] sm:$0xff]  ;;  %v18746_v2 = vld [vmem:[%s14870_s23 + $0x230] sm:$0xff]  ;;  %v4924_v56 = vsel %vm578_vm0, %v14789_v0, %v18039_v11  ;;  %v4957_v11 = vsel %vm611_vm1, %v4925_v25, %v18198_v24 }
 0x40b   : > { %7133 = vrot.lane.b32.xlu1 %v18711_v52, %s14822_s6  ;;  %22103 = vst [vmem:[#allocation134_spill] sm:$0xff] %v18746_v2  ;;  %14016 = vmatprep.subr.mxu0 %v12681_v6  ;;  %v4956_v38 = vsel %vm611_vm1, %v4924_v56, %v18186_v29  ;;  %v14790_v29 = vld [vmem:[%s14870_s23 + $0xec] sm:$0xff]  ;;  %v4927_v24 = vsel %vm578_vm0, %v18311_v51, %v18059_v50  ;;  %v22108_v56 = vld [vmem:[#allocation81_spill] sm:$0xff] }
 0x40c   : > { %7131 = vrot.lane.b32.xlu0 %v18714_v3, %s14822_s6  ;;  %v18742_v41 = vpop.f32.mrb[56].mxu1  ;;  %v4926_v31 = vsel %vm578_vm0, %v14790_v29, %v18049_v34  ;;  %v4959_v34 = vsel %vm611_vm1, %v4927_v24, %v18206_v60  ;;  %v14791_v50 = vld [vmem:[%s14870_s23 + $0x10c] sm:$0xff]  ;;  %v22111_v51 = vld [vmem:[#allocation73_spill] sm:$0xff] }
 0x40d   : > { %22102 = vst [vmem:[#allocation133_spill] sm:$0xff] %v18742_v41  ;;  %v18751_v23 = vpop.f32.mrb[57].mxu1  ;;  %13968 = vmatmul.mubr.msk.f32.gmra.mrb[34].mxu0 %vm1068_vm2, %v4954_v16  ;;  %v18754_v42 = vpop.permute.xlu1 %5996  ;;  %v4958_v25 = vsel %vm611_vm1, %v4926_v31, %v22108_v56  ;;  %v4928_v31 = vsel %vm578_vm0, %v14791_v50, %v22111_v51  ;;  %v22112_v60 = vld [vmem:[#allocation91_spill] sm:$0xff]  ;;  %v22115_v50 = vld [vmem:[#allocation76_spill] sm:$0xff] }
 0x40e   : > { %22104 = vst [vmem:[#allocation135_spill] sm:$0xff] %v18751_v23  ;;  %v18756_v22 = vpop.permute.xlu0 %5994  ;;  %13970 = vmatprep.mubr.msk.f32.mxu0 %vm1068_vm2, %v4955_v36  ;;  %14017 = vmatpush3.msra.mxu0 %v12681_v6  ;;  %v12770_v6 = vld [vmem:[%s14870_s23 + $0x258] sm:$0xff]  ;;  %v18773_v36 = vld [vmem:[%s14870_s23 + $0x250] sm:$0xff]  ;;  %v4929_v24 = vsel %vm578_vm0, %v18325_v21, %v22112_v60  ;;  %v4960_v56 = vsel %vm611_vm1, %v4928_v31, %v18204_v12  ;;  %v22137_v23 = vld [vmem:[#allocation50_spill] sm:$0xff] }
 0x40f   : > { %7137 = vrot.lane.b32.xlu1 %v12768_v26, %s14822_s6  ;;  %22106 = vst [vmem:[#allocation137_spill] sm:$0xff] %v18773_v36  ;;  %v14792_v21 = vld [vmem:[%s14870_s23 + $0x12c] sm:$0xff]  ;;  %v12776_v60 = vld [vmem:[%s14870_s23 + $0x2b8] sm:$0xff] }
 0x410   : > { %7135 = vrot.lane.b32.xlu0 %v18746_v2, %s14822_s6  ;;  %v18769_v16 = vpop.f32.mrb[58].mxu1  ;;  %v4930_v12 = vsel %vm578_vm0, %v14792_v21, %v22115_v50  ;;  %v22120_v50 = vld [vmem:[#allocation87_spill] sm:$0xff] }
 0x411   : > { %22105 = vst [vmem:[#allocation136_spill] sm:$0xff] %v18769_v16  ;;  %v18777_v26 = vpop.f32.mrb[59].mxu1  ;;  %13971 = vmatmul.mubr.msk.f32.gmra.mrb[36].mxu0 %vm1068_vm2, %v4956_v38  ;;  %v18780_v0 = vpop.permute.xlu1 %6000  ;;  %v4962_v31 = vsel %vm611_vm1, %v4930_v12, %v18212_v5  ;;  %v22121_v12 = vld [vmem:[#allocation33_spill] sm:$0xff]  ;;  %v14801_v2 = vld [vmem:[%s14870_s23 + $0x24c] sm:$0xff] }
 0x412   : > { %22107 = vst [vmem:[#allocation138_spill] sm:$0xff] %v18777_v26  ;;  %v18782_v32 = vpop.permute.xlu0 %5998  ;;  %13973 = vmatprep.mubr.msk.f32.mxu0 %vm1068_vm2, %v4957_v11  ;;  %v12772_v11 = vld [vmem:[%s14870_s23 + $0x278] sm:$0xff]  ;;  %v12771_v26 = vld [vmem:[%s14870_s23 + $0x270] sm:$0xff] }
 0x413   : > { %7141 = vrot.lane.b32.xlu1 %v12770_v6, %s14822_s6 }
 0x414   : > { %7139 = vrot.lane.b32.xlu0 %v18773_v36, %s14822_s6  ;;  %v18796_v38 = vpop.f32.mrb[60].mxu1 }
 0x415   : > { %22109 = vst [vmem:[#allocation81_spill] sm:$0xff] %v18796_v38  ;;  %v18802_v29 = vpop.f32.mrb[61].mxu1  ;;  %13974 = vmatmul.mubr.msk.f32.gmra.mrb[38].mxu0 %vm1068_vm2, %v4958_v25  ;;  %v18805_v6 = vpop.permute.xlu1 %6004 }
 0x416   : > { %22110 = vst [vmem:[#allocation139_spill] sm:$0xff] %v18802_v29  ;;  %v18807_v16 = vpop.permute.xlu0 %6002  ;;  %13976 = vmatprep.mubr.msk.f32.mxu0 %vm1068_vm2, %v4959_v34  ;;  %v12774_v29 = vld [vmem:[%s14870_s23 + $0x298] sm:$0xff]  ;;  %v4961_v34 = vsel %vm611_vm1, %v4929_v24, %v18214_v18  ;;  %v22116_v18 = vld [vmem:[#allocation42_spill] sm:$0xff] }
 0x417   : > { %7145 = vrot.lane.b32.xlu1 %v12772_v11, %s14822_s6  ;;  %v4931_v51 = vsel %vm578_vm0, %v18352_v15, %v22116_v18  ;;  %v12715_v15 = vld [vmem:[%s21522_s1 + $0xe0] sm:$0xff]  ;;  %v4933_v18 = vsel %vm578_vm0, %v18371_v9, %v22121_v12  ;;  %v22126_v9 = vld [vmem:[#allocation106_spill] sm:$0xff] }
 0x418   : > { %7143 = vrot.lane.b32.xlu0 %v12771_v26, %s14822_s6  ;;  %v18820_v25 = vpop.f32.mrb[62].mxu1  ;;  %v4963_v24 = vsel %vm611_vm1, %v4931_v51, %v18222_v14  ;;  %v14793_v14 = vld [vmem:[%s14870_s23 + $0x14c] sm:$0xff]  ;;  %v22122_v51 = vld [vmem:[#allocation84_spill] sm:$0xff] }
 0x419   : > { %22113 = vst [vmem:[#allocation73_spill] sm:$0xff] %v18820_v25  ;;  %v18825_v38 = vpop.f32.mrb[63].mxu1  ;;  %13977 = vmatmul.mubr.msk.f32.gmra.mrb[40].mxu0 %vm1068_vm2, %v4960_v56  ;;  %v18828_v11 = vpop.permute.xlu1 %6008  ;;  %v22128_v12 = vld [vmem:[#allocation78_spill] sm:$0xff] }
 0x41a   : > { %22114 = vst [vmem:[#allocation91_spill] sm:$0xff] %v18825_v38  ;;  %v18830_v26 = vpop.permute.xlu0 %6006  ;;  %13979 = vmatprep.mubr.msk.f32.mxu0 %vm1068_vm2, %v4961_v34  ;;  %v22119_v34 = vld [vmem:[#allocation92_spill] sm:$0xff]  ;;  %v18918_v25 = vld [vmem:[%s14870_s23 + $0x8] sm:$0xff] }
 0x41b   : > { %7149 = vrot.lane.b32.xlu1 %v12774_v29, %s14822_s6  ;;  %v4932_v21 = vsel %vm578_vm0, %v14793_v14, %v22119_v34  ;;  %v14794_v34 = vld [vmem:[%s14870_s23 + $0x16c] sm:$0xff] }
 0x41c   : > { %7147 = vrot.lane.b32.xlu0 %v18261_v45, %s14822_s6  ;;  %v12714_v45 = vld [vmem:[%s21522_s1 + $0xd8] sm:$0xff] }
 0x41d   : > { %13980 = vmatmul.mubr.msk.f32.gmra.mrb[42].mxu0 %vm1068_vm2, %v4962_v31  ;;  %v18848_v56 = vpop.permute.xlu1 %6012  ;;  %v18859_v5 = vpack.c.bf16 %v12715_v15, %v12714_v45  ;;  %v4964_v31 = vsel %vm611_vm1, %v4932_v21, %v22122_v51  ;;  %v22123_v45 = vld [vmem:[#allocation37_spill] sm:$0xff] }
 0x41e   : > { %22117 = vst [vmem:[#allocation76_spill] sm:$0xff] %v18848_v56  ;;  %v18856_v29 = vpop.permute.xlu0 %6010  ;;  %13982 = vmatprep.mubr.msk.f32.mxu0 %vm1068_vm2, %v4963_v24  ;;  %v12778_v24 = vld [vmem:[%s14870_s23 + $0x2d8] sm:$0xff]  ;;  %v4965_v15 = vsel %vm611_vm1, %v4933_v18, %v22123_v45  ;;  %v22127_v21 = vld [vmem:[#allocation17_spill] sm:$0xff]  ;;  %v4935_v18 = vsel %vm578_vm0, %v18387_v59, %v22128_v12  ;;  %v19000_v56 = vld [vmem:[%s14870_s23 + $0x20c] sm:$0xff] }
 0x41f   : > { %22118 = vst [vmem:[#allocation42_spill] sm:$0xff] %v18856_v29  ;;  %7153 = vrot.lane.b32.xlu1 %v12776_v60, %s14822_s6  ;;  %14431 = vmatprep.subr.bf16.mxu1 %v18859_v5  ;;  %v22129_v51 = vld [vmem:[#allocation45_spill] sm:$0xff]  ;;  %v12780_v45 = vld [vmem:[%s14870_s23 + $0x2f8] sm:$0xff] }
 0x420   : > { %7151 = vrot.lane.b32.xlu0 %v22120_v50, %s14822_s6  ;;  %v4934_v50 = vsel %vm578_vm0, %v14794_v34, %v22126_v9  ;;  %v18903_v9 = vld [vmem:[%s14870_s23 + $0x18c] sm:$0xff]  ;;  %v22158_v29 = vld [vmem:[#allocation16_spill] sm:$0xff] }
 0x421   : > { %13983 = vmatmul.mubr.msk.f32.gmra.mrb[44].mxu0 %vm1068_vm2, %v4964_v31  ;;  %v18877_v60 = vpop.permute.xlu1 %6016  ;;  %v4966_v31 = vsel %vm611_vm1, %v4934_v50, %v22129_v51  ;;  %v22134_v50 = vld [vmem:[#allocation41_spill] sm:$0xff] }
 0x422   : > { %22124 = vst [vmem:[#allocation92_spill] sm:$0xff] %v18877_v60  ;;  %v18879_v14 = vpop.permute.xlu0 %6014  ;;  %13985 = vmatprep.mubr.msk.f32.mxu0 %vm1068_vm2, %v4965_v15  ;;  %v22130_v15 = vld [vmem:[#allocation86_spill] sm:$0xff] }
 0x423   : > { %22125 = vst [vmem:[#allocation87_spill] sm:$0xff] %v18879_v14  ;;  %7157 = vrot.lane.b32.xlu1 %v12778_v24, %s14822_s6  ;;  %v4967_v38 = vsel %vm611_vm1, %v4935_v18, %v22130_v15  ;;  %v22135_v18 = vld [vmem:[#allocation96_spill] sm:$0xff]  ;;  %v22146_v60 = vld [vmem:[#allocation30_spill] sm:$0xff] }
 0x424   : > { %7155 = vrot.lane.b32.xlu0 %v22127_v21, %s14822_s6  ;;  %v22133_v21 = vld [vmem:[#allocation75_spill] sm:$0xff]  ;;  %v4937_v51 = vsel %vm578_vm0, %v18404_v58, %v22135_v18 }
 0x425   : > { %13986 = vmatmul.mubr.msk.f32.gmra.mrb[46].mxu0 %vm1068_vm2, %v4966_v31  ;;  %v18897_v34 = vpop.permute.xlu1 %6020  ;;  %v4936_v12 = vsel %vm578_vm0, %v18903_v9, %v22133_v21  ;;  %v22136_v31 = vld [vmem:[#allocation83_spill] sm:$0xff]  ;;  %v4969_v41 = vsel %vm611_vm1, %v4937_v51, %v22137_v23  ;;  %v22141_v23 = vld [vmem:[#allocation46_spill] sm:$0xff] }
 0x426   : > { %22131 = vst [vmem:[#allocation33_spill] sm:$0xff] %v18897_v34  ;;  %v18899_v24 = vpop.permute.xlu0 %6018  ;;  %13988 = vmatprep.mubr.msk.f32.mxu0 %vm1068_vm2, %v4967_v38  ;;  %v4968_v15 = vsel %vm611_vm1, %v4936_v12, %v22136_v31  ;;  %v6663_v38 = vld [vmem:[%s14870_s23 + $0x10] sm:$0xff]  ;;  %v4939_v51 = vsel %vm578_vm0, %v18427_v48, %v22141_v23  ;;  %v22142_v31 = vld [vmem:[#allocation34_spill] sm:$0xff] }
 0x427   : > { %22132 = vst [vmem:[#allocation84_spill] sm:$0xff] %v18899_v24  ;;  %7161 = vrot.lane.b32.xlu1 %v12780_v45, %s14822_s6  ;;  %v22140_v18 = vld [vmem:[#allocation95_spill] sm:$0xff] }
 0x428   : > { %7159 = vrot.lane.b32.xlu0 %v22134_v50, %s14822_s6  ;;  %v18929_v50 = vld [vmem:[%s14870_s23 + $0x1ac] sm:$0xff] }
 0x429   : > { %13989 = vmatmul.mubr.msk.f32.gmra.mrb[48].mxu0 %vm1068_vm2, %v4968_v15  ;;  %v18923_v45 = vpop.permute.xlu1 %6024  ;;  %v4938_v12 = vsel %vm578_vm0, %v18929_v50, %v22140_v18  ;;  %v6679_v15 = vld [vmem:[%s14870_s23 + $0x18] sm:$0xff]  ;;  %v18952_v24 = vld [vmem:[%s14870_s23 + $0x1cc] sm:$0xff] }
 0x42a   : > { %22138 = vst [vmem:[#allocation37_spill] sm:$0xff] %v18923_v45  ;;  %v18925_v21 = vpop.permute.xlu0 %6022  ;;  %13991 = vmatprep.mubr.msk.f32.mxu0 %vm1068_vm2, %v4969_v41  ;;  %v4970_v41 = vsel %vm611_vm1, %v4938_v12, %v22142_v31  ;;  %v22143_v45 = vld [vmem:[#allocation88_spill] sm:$0xff]  ;;  %v4940_v23 = vsel %vm578_vm0, %v18952_v24, %v22146_v60 }
 0x42b   : > { %22139 = vst [vmem:[#allocation106_spill] sm:$0xff] %v18925_v21  ;;  %6729 = vrot.lane.b32.xlu1 %v6663_v38, %s14821_s24  ;;  %v4971_v21 = vsel %vm611_vm1, %v4939_v51, %v22143_v45  ;;  %v22147_v45 = vld [vmem:[#allocation80_spill] sm:$0xff]  ;;  %v22148_v51 = vld [vmem:[#allocation85_spill] sm:$0xff] }
 0x42c   : > { %6727 = vrot.lane.b32.xlu0 %v18918_v25, %s14821_s24  ;;  %v4941_v12 = vsel %vm578_vm0, %v18448_v27, %v22147_v45  ;;  %v4972_v31 = vsel %vm611_vm1, %v4940_v23, %v22148_v51  ;;  %v22152_v45 = vld [vmem:[#allocation77_spill] sm:$0xff]  ;;  %v22154_v51 = vld [vmem:[#allocation47_spill] sm:$0xff] }
 0x42d   : > { %13992 = vmatmul.mubr.msk.f32.gmra.mrb[50].mxu0 %vm1068_vm2, %v4970_v41  ;;  %v18946_v18 = vpop.permute.xlu1 %6028  ;;  %v6664_v41 = vld [vmem:[%s14870_s23 + $0x30] sm:$0xff] }
 0x42e   : > { %22144 = vst [vmem:[#allocation17_spill] sm:$0xff] %v18946_v18  ;;  %v18948_v34 = vpop.permute.xlu0 %6026  ;;  %13994 = vmatprep.mubr.msk.f32.mxu0 %vm1068_vm2, %v4971_v21  ;;  %v18966_v21 = vld [vmem:[%s14870_s23 + $0x28] sm:$0xff]  ;;  %v22149_v18 = vld [vmem:[#allocation49_spill] sm:$0xff] }
 0x42f   : > { %22145 = vst [vmem:[#allocation78_spill] sm:$0xff] %v18948_v34  ;;  %6841 = vrot.lane.b32.xlu1 %v6679_v15, %s14822_s6  ;;  %v4973_v34 = vsel %vm611_vm1, %v4941_v12, %v22149_v18  ;;  %v18977_v15 = vld [vmem:[%s14870_s23 + $0x1ec] sm:$0xff] }
 0x430   : > { %6839 = vrot.lane.b32.xlu0 %v6663_v38, %s14822_s6  ;;  %v4942_v23 = vsel %vm578_vm0, %v18977_v15, %v22152_v45  ;;  %v22153_v18 = vld [vmem:[#allocation99_spill] sm:$0xff] }
 0x431   : > { %13995 = vmatmul.mubr.msk.f32.gmra.mrb[52].mxu0 %vm1068_vm2, %v4972_v31  ;;  %v18971_v60 = vpop.permute.xlu1 %6032  ;;  %v4943_v12 = vsel %vm578_vm0, %v18472_v63, %v22153_v18  ;;  %v6680_v31 = vld [vmem:[%s14870_s23 + $0x38] sm:$0xff]  ;;  %v4944_v18 = vsel %vm578_vm0, %v19000_v56, %v22158_v29 }
 0x432   : > { %22150 = vst [vmem:[#allocation45_spill] sm:$0xff] %v18971_v60  ;;  %v18973_v38 = vpop.permute.xlu0 %6030  ;;  %13997 = vmatprep.mubr.msk.f32.mxu0 %vm1068_vm2, %v4973_v34  ;;  %v4974_v34 = vsel %vm611_vm1, %v4942_v23, %v22154_v51  ;;  %v22155_v60 = vld [vmem:[#allocation39_spill] sm:$0xff] }
 0x433   : > { %22151 = vst [vmem:[#allocation86_spill] sm:$0xff] %v18973_v38  ;;  %6733 = vrot.lane.b32.xlu1 %v6664_v41, %s14821_s24  ;;  %v4975_v38 = vsel %vm611_vm1, %v4943_v12, %v22155_v60  ;;  %v22159_v60 = vld [vmem:[#allocation35_spill] sm:$0xff]  ;;  %v22160_v12 = vld [vmem:[#allocation90_spill] sm:$0xff] }
 0x434   : > { %6731 = vrot.lane.b32.xlu0 %v18966_v21, %s14821_s24  ;;  %v4945_v23 = vsel %vm578_vm0, %v18493_v33, %v22159_v60  ;;  %v4976_v51 = vsel %vm611_vm1, %v4944_v18, %v22160_v12  ;;  %v22165_v60 = vld [vmem:[#allocation43_spill] sm:$0xff]  ;;  %v22167_v12 = vld [vmem:[#allocation89_spill] sm:$0xff] }
 0x435   : > { %13998 = vmatmul.mubr.msk.f32.gmra.mrb[54].mxu0 %vm1068_vm2, %v4974_v34  ;;  %v18994_v45 = vpop.permute.xlu1 %6036  ;;  %v6665_v34 = vld [vmem:[%s14870_s23 + $0x50] sm:$0xff] }
 0x436   : > { %22156 = vst [vmem:[#allocation75_spill] sm:$0xff] %v18994_v45  ;;  %v18996_v14 = vpop.permute.xlu0 %6034  ;;  %14000 = vmatprep.mubr.msk.f32.mxu0 %vm1068_vm2, %v4975_v38  ;;  %v19014_v38 = vld [vmem:[%s14870_s23 + $0x48] sm:$0xff] }
 0x437   : > { %22157 = vst [vmem:[#allocation41_spill] sm:$0xff] %v18996_v14  ;;  %6845 = vrot.lane.b32.xlu1 %v6680_v31, %s14822_s6  ;;  %22161 = vst [vmem:[#allocation96_spill] sm:$0xff] %v19014_v38  ;;  %v22162_v45 = vld [vmem:[#allocation94_spill] sm:$0xff] }
 0x438   : > { %6843 = vrot.lane.b32.xlu0 %v6664_v41, %s14822_s6  ;;  %v4977_v14 = vsel %vm611_vm1, %v4945_v23, %v22162_v45  ;;  %v19025_v31 = vld [vmem:[%s14870_s23 + $0x22c] sm:$0xff] }
 0x439   : > { %14001 = vmatmul.mubr.msk.f32.gmra.mrb[56].mxu0 %vm1068_vm2, %v4976_v51  ;;  %v19019_v29 = vpop.permute.xlu1 %6040  ;;  %v4946_v18 = vsel %vm578_vm0, %v19025_v31, %v22165_v60  ;;  %v22166_v45 = vld [vmem:[#allocation82_spill] sm:$0xff]  ;;  %v6681_v51 = vld [vmem:[%s14870_s23 + $0x58] sm:$0xff] }
 0x43a   : > { %22163 = vst [vmem:[#allocation83_spill] sm:$0xff] %v19019_v29  ;;  %v19021_v41 = vpop.permute.xlu0 %6038  ;;  %14003 = vmatprep.mubr.msk.f32.mxu0 %vm1068_vm2, %v4977_v14  ;;  %v4947_v23 = vsel %vm578_vm0, %v18520_v20, %v22166_v45  ;;  %v4978_v14 = vsel %vm611_vm1, %v4946_v18, %v22167_v12  ;;  %v22168_v29 = vld [vmem:[#allocation93_spill] sm:$0xff]  ;;  %v22171_v18 = vld [vmem:[#allocation48_spill] sm:$0xff]  ;;  %v6666_v12 = vld [vmem:[%s14870_s23 + $0x70] sm:$0xff] }
 0x43b   : > { %22164 = vst [vmem:[#allocation50_spill] sm:$0xff] %v19021_v41  ;;  %6737 = vrot.lane.b32.xlu1 %v6665_v34, %s14821_s24  ;;  %v4979_v41 = vsel %vm611_vm1, %v4947_v23, %v22168_v29  ;;  %v4949_v29 = vsel %vm578_vm0, %v18547_v54, %v22171_v18  ;;  %v22172_v45 = vld [vmem:[#allocation40_spill] sm:$0xff] }
 0x43c   : > { %6735 = vrot.lane.b32.xlu0 %v19014_v38, %s14821_s24  ;;  %v22170_v38 = vld [vmem:[#allocation79_spill] sm:$0xff] }
 0x43d   : > { %14004 = vmatmul.mubr.msk.f32.gmra.mrb[58].mxu0 %vm1068_vm2, %v4978_v14  ;;  %v19042_v60 = vpop.permute.xlu1 %6044  ;;  %v4948_v20 = vsel %vm578_vm0, %v14801_v2, %v22170_v38  ;;  %v19059_v14 = vld [vmem:[%s14870_s23 + $0x68] sm:$0xff] }
 0x43e   : > { %22169 = vst [vmem:[#allocation95_spill] sm:$0xff] %v19042_v60  ;;  %v19044_v36 = vpop.permute.xlu0 %6042  ;;  %14006 = vmatprep.mubr.msk.f32.mxu0 %vm1068_vm2, %v4979_v41  ;;  %v4980_v23 = vsel %vm611_vm1, %v4948_v20, %v22172_v45  ;;  %v22173_v41 = vld [vmem:[#allocation19_spill] sm:$0xff]  ;;  %v22175_v20 = vld [vmem:[#allocation98_spill] sm:$0xff]  ;;  %v6211_v45 = vsel %vm578_vm0, %v18903_v9, %v18692_v43 }
 0x43f   : > { %6849 = vrot.lane.b32.xlu1 %v6681_v51, %s14822_s6  ;;  %v4981_v60 = vsel %vm611_vm1, %v4949_v29, %v22173_v41  ;;  %v22174_v51 = vld [vmem:[#allocation32_spill] sm:$0xff]  ;;  %v6667_v43 = vld [vmem:[%s14870_s23 + $0x90] sm:$0xff]  ;;  %v19092_v9 = vld [vmem:[%s14870_s23 + $0x88] sm:$0xff] }
 0x440   : > { %6847 = vrot.lane.b32.xlu0 %v6665_v34, %s14822_s6  ;;  %v14802_v34 = vld [vmem:[%s14870_s23 + $0x26c] sm:$0xff]  ;;  %v6682_v29 = vld [vmem:[%s14870_s23 + $0x78] sm:$0xff] }
 0x441   : > { %14007 = vmatmul.mubr.msk.f32.gmra.mrb[60].mxu0 %vm1068_vm2, %v4980_v23  ;;  %v19064_v2 = vpop.permute.xlu1 %6048  ;;  %v4950_v54 = vsel %vm578_vm0, %v14802_v34, %v22174_v51  ;;  %v6210_v23 = vsel %vm578_vm0, %v18387_v59, %v18694_v4  ;;  %v6212_v4 = vsel %vm578_vm0, %v18404_v58, %v18727_v19  ;;  %v6214_v19 = vsel %vm578_vm0, %v18427_v48, %v18756_v22 }
 0x442   : > { %v19066_v38 = vpop.permute.xlu0 %6046  ;;  %14009 = vmatprep.mubr.msk.f32.mxu0 %vm1068_vm2, %v4981_v60  ;;  %v4982_v18 = vsel %vm611_vm1, %v4950_v54, %v22175_v20  ;;  %v6213_v54 = vsel %vm578_vm0, %v18929_v50, %v18722_v37  ;;  %v6683_v37 = vld [vmem:[%s14870_s23 + $0x98] sm:$0xff]  ;;  %v6215_v50 = vsel %vm578_vm0, %v18952_v24, %v18754_v42  ;;  %v6668_v42 = vld [vmem:[%s14870_s23 + $0xb0] sm:$0xff]  ;;  %v19122_v24 = vld [vmem:[%s14870_s23 + $0xa8] sm:$0xff]  ;;  %v6216_v22 = vsel %vm578_vm0, %v18448_v27, %v18782_v32 }
 0x443   : > { %6741 = vrot.lane.b32.xlu1 %v6666_v12, %s14821_s24  ;;  %v6218_v32 = vsel %vm578_vm0, %v18472_v63, %v18807_v16  ;;  %v6221_v63 = vsel %vm578_vm0, %v19025_v31, %v18828_v11  ;;  %v19170_v11 = vld [vmem:[%s14870_s23 + $0x100] sm:$0xff] }
 0x444   : > { %6739 = vrot.lane.b32.xlu0 %v19059_v14, %s14821_s24 }
 0x445   : > { %14010 = vmatmul.mubr.msk.f32.gmra.mrb[62].mxu0 %vm1068_vm2, %v4982_v18  ;;  %v6117_v60 = vpop.permute.xlu1 %6116 }
 0x446   : > { %v6243_v41 = vsel %vm611_vm1, %v6211_v45, %v6117_v60  ;;  %v6115_v34 = vpop.permute.xlu0 %6114 }
 0x447   : > { %v6242_v51 = vsel %vm611_vm1, %v6210_v23, %v6115_v34  ;;  %6853 = vrot.lane.b32.xlu1 %v6682_v29, %s14822_s6  ;;  %v6217_v23 = vsel %vm578_vm0, %v18977_v15, %v18780_v0  ;;  %v6684_v0 = vld [vmem:[%s14870_s23 + $0xb8] sm:$0xff]  ;;  %v6219_v15 = vsel %vm578_vm0, %v19000_v56, %v18805_v6  ;;  %v6669_v6 = vld [vmem:[%s14870_s23 + $0xd0] sm:$0xff]  ;;  %v19152_v56 = vld [vmem:[%s14870_s23 + $0xc8] sm:$0xff] }
 0x448   : > { %6851 = vrot.lane.b32.xlu0 %v6666_v12, %s14822_s6  ;;  %14018 = vmatprep.mubr.msk.f32.mxu0 %vm1068_vm2, %v6242_v51 }
 0x449   : > { %14019 = vmatmul.mubr.msk.f32.vlgmr.msra.gmra.mrb[32].mxu0 %vm1068_vm2, %v6243_v41  ;;  %v6121_v59 = vpop.permute.xlu1 %6120 }
 0x44a   : > { %v6245_v20 = vsel %vm611_vm1, %v6213_v54, %v6121_v59  ;;  %v6119_v18 = vpop.permute.xlu0 %6118 }
 0x44b   : > { %v6244_v12 = vsel %vm611_vm1, %v6212_v4, %v6119_v18  ;;  %6745 = vrot.lane.b32.xlu1 %v6667_v43, %s14821_s24  ;;  %v6220_v4 = vsel %vm578_vm0, %v18493_v33, %v18830_v26  ;;  %v6685_v33 = vld [vmem:[%s14870_s23 + $0xd8] sm:$0xff] }
 0x44c   : > { %6743 = vrot.lane.b32.xlu0 %v19092_v9, %s14821_s24  ;;  %14021 = vmatprep.mubr.msk.f32.mxu0 %vm1068_vm2, %v6244_v12  ;;  %v19163_v12 = vld [vmem:[%s14870_s23 + $0x108] sm:$0xff]  ;;  %v22176_v26 = vld [vmem:[#allocation20_spill] sm:$0xff] }
 0x44d   : > { %14022 = vmatmul.mubr.msk.f32.gmra.mrb[34].mxu0 %vm1068_vm2, %v6245_v20  ;;  %v6125_v58 = vpop.permute.xlu1 %6124  ;;  %v7196_v31 = vsel %vm578_vm0, %v19163_v12, %v22176_v26 }
 0x44e   : > { %v6247_v29 = vsel %vm611_vm1, %v6215_v50, %v6125_v58  ;;  %v6123_v45 = vpop.permute.xlu0 %6122 }
 0x44f   : > { %v6246_v60 = vsel %vm611_vm1, %v6214_v19, %v6123_v45  ;;  %6857 = vrot.lane.b32.xlu1 %v6683_v37, %s14822_s6  ;;  %v22177_v19 = vld [vmem:[#allocation21_spill] sm:$0xff] }
 0x450   : > { %6855 = vrot.lane.b32.xlu0 %v6667_v43, %s14822_s6  ;;  %14024 = vmatprep.mubr.msk.f32.mxu0 %vm1068_vm2, %v6246_v60  ;;  %v19183_v60 = vld [vmem:[%s14870_s23 + $0x128] sm:$0xff] }
 0x451   : > { %14025 = vmatmul.mubr.msk.f32.gmra.mrb[36].mxu0 %vm1068_vm2, %v6247_v29  ;;  %v6129_v48 = vpop.permute.xlu1 %6128  ;;  %v7195_v29 = vsel %vm578_vm0, %v19170_v11, %v22177_v19 }
 0x452   : > { %v6249_v41 = vsel %vm611_vm1, %v6217_v23, %v6129_v48  ;;  %v6127_v34 = vpop.permute.xlu0 %6126  ;;  %v19189_v23 = vld [vmem:[%s14870_s23 + $0x120] sm:$0xff]  ;;  %v6670_v48 = vld [vmem:[%s14870_s23 + $0xf0] sm:$0xff] }
 0x453   : > { %v6248_v51 = vsel %vm611_vm1, %v6216_v22, %v6127_v34  ;;  %6749 = vrot.lane.b32.xlu1 %v6668_v42, %s14821_s24  ;;  %v19194_v22 = vld [vmem:[%s14870_s23 + $0xe8] sm:$0xff] }
 0x454   : > { %6747 = vrot.lane.b32.xlu0 %v19122_v24, %s14821_s24  ;;  %14027 = vmatprep.mubr.msk.f32.mxu0 %vm1068_vm2, %v6248_v51 }
 0x455   : > { %14028 = vmatmul.mubr.msk.f32.gmra.mrb[38].mxu0 %vm1068_vm2, %v6249_v41  ;;  %v6133_v27 = vpop.permute.xlu1 %6132  ;;  %v22178_v41 = vld [vmem:[#allocation22_spill] sm:$0xff] }
 0x456   : > { %v6251_v43 = vsel %vm611_vm1, %v6219_v15, %v6133_v27  ;;  %v6131_v54 = vpop.permute.xlu0 %6130  ;;  %v7198_v34 = vsel %vm578_vm0, %v19183_v60, %v22178_v41  ;;  %v22179_v27 = vld [vmem:[#allocation23_spill] sm:$0xff] }
 0x457   : > { %v6250_v59 = vsel %vm611_vm1, %v6218_v32, %v6131_v54  ;;  %6861 = vrot.lane.b32.xlu1 %v6684_v0, %s14822_s6  ;;  %v12716_v0 = vld [vmem:[%s21522_s1 + $0xe8] sm:$0xff]  ;;  %v7197_v32 = vsel %vm578_vm0, %v19189_v23, %v22179_v27 }
 0x458   : > { %6859 = vrot.lane.b32.xlu0 %v6668_v42, %s14822_s6  ;;  %14030 = vmatprep.mubr.msk.f32.mxu0 %vm1068_vm2, %v6250_v59  ;;  %v19208_v54 = vld [vmem:[%s14870_s23 + $0x148] sm:$0xff] }
 0x459   : > { %14031 = vmatmul.mubr.msk.f32.gmra.mrb[40].mxu0 %vm1068_vm2, %v6251_v43  ;;  %v6137_v16 = vpop.permute.xlu1 %6136  ;;  %v19267_v27 = vld [vmem:[%s14870_s23 + $0x1a8] sm:$0xff] }
 0x45a   : > { %v6253_v20 = vsel %vm611_vm1, %v6221_v63, %v6137_v16  ;;  %v6135_v18 = vpop.permute.xlu0 %6134  ;;  %v6686_v63 = vld [vmem:[%s14870_s23 + $0xf8] sm:$0xff] }
 0x45b   : > { %v6252_v37 = vsel %vm611_vm1, %v6220_v4, %v6135_v18  ;;  %6753 = vrot.lane.b32.xlu1 %v6669_v6, %s14821_s24 }
 0x45c   : > { %6751 = vrot.lane.b32.xlu0 %v19152_v56, %s14821_s24  ;;  %14033 = vmatprep.mubr.msk.f32.mxu0 %vm1068_vm2, %v6252_v37  ;;  %v19229_v37 = vld [vmem:[%s14870_s23 + $0x168] sm:$0xff] }
 0x45d   : > { %14034 = vmatmul.mubr.msk.f32.gmra.mrb[42].mxu0 %vm1068_vm2, %v6253_v20  ;;  %v7102_v50 = vpop.permute.xlu1 %7101 }
 0x45e   : > { %v7228_v58 = vsel %vm611_vm1, %v7196_v31, %v7102_v50  ;;  %v7100_v45 = vpop.permute.xlu0 %7099  ;;  %v22180_v50 = vld [vmem:[#allocation54_spill] sm:$0xff] }
 0x45f   : > { %v7227_v42 = vsel %vm611_vm1, %v7195_v29, %v7100_v45  ;;  %6865 = vrot.lane.b32.xlu1 %v6685_v33, %s14822_s6  ;;  %v19247_v29 = vld [vmem:[%s14870_s23 + $0x188] sm:$0xff] }
 0x460   : > { %6863 = vrot.lane.b32.xlu0 %v6669_v6, %s14822_s6  ;;  %14072 = vmatprep.mubr.msk.f32.mxu1 %vm1068_vm2, %v7227_v42  ;;  %v19216_v6 = vld [vmem:[%s14870_s23 + $0x140] sm:$0xff]  ;;  %v22181_v42 = vld [vmem:[#allocation3_spill] sm:$0xff] }
 0x461   : > { %14073 = vmatmul.mubr.msk.f32.vlgmr.msra.gmra.mrb[64].mxu1 %vm1068_vm2, %v7228_v58  ;;  %v7106_v51 = vpop.permute.xlu1 %7105  ;;  %v7199_v20 = vsel %vm578_vm0, %v19216_v6, %v22049_v17  ;;  %v7202_v17 = vsel %vm578_vm0, %v19229_v37, %v22050_v55  ;;  %v19255_v55 = vld [vmem:[%s14870_s23 + $0x180] sm:$0xff] }
 0x462   : > { %v7230_v15 = vsel %vm611_vm1, %v7198_v34, %v7106_v51  ;;  %v7104_v43 = vpop.permute.xlu0 %7103  ;;  %14433 = vmatpush3.bf16.msra.mxu1 %v18859_v5  ;;  %v7200_v5 = vsel %vm578_vm0, %v19208_v54, %v21866_v40  ;;  %v19235_v40 = vld [vmem:[%s14870_s23 + $0x160] sm:$0xff]  ;;  %v22182_v51 = vld [vmem:[#allocation4_spill] sm:$0xff] }
 0x463   : > { %v7229_v59 = vsel %vm611_vm1, %v7197_v32, %v7104_v43  ;;  %6757 = vrot.lane.b32.xlu1 %v6670_v48, %s14821_s24  ;;  %14124 = vmatprep.subr.mxu1 %v12716_v0  ;;  %v7201_v58 = vsel %vm578_vm0, %v19235_v40, %v22180_v50  ;;  %v19275_v43 = vld [vmem:[%s14870_s23 + $0x1a0] sm:$0xff] }
 0x464   : > { %6755 = vrot.lane.b32.xlu0 %v19194_v22, %s14821_s24  ;;  %14075 = vmatprep.mubr.msk.f32.mxu1 %vm1068_vm2, %v7229_v59  ;;  %v7206_v59 = vsel %vm578_vm0, %v19267_v27, %v22054_v49  ;;  %v19295_v49 = vld [vmem:[%s14870_s23 + $0x1c0] sm:$0xff] }
 0x465   : > { %14076 = vmatmul.mubr.msk.f32.gmra.mrb[66].mxu1 %vm1068_vm2, %v7230_v15  ;;  %v7110_v16 = vpop.permute.xlu1 %7109 }
 0x466   : > { %v7232_v4 = vsel %vm611_vm1, %v7200_v5, %v7110_v16  ;;  %v7108_v18 = vpop.permute.xlu0 %7107  ;;  %14125 = vmatpush3.msra.mxu1 %v12716_v0  ;;  %v7203_v0 = vsel %vm578_vm0, %v19255_v55, %v22182_v51  ;;  %v22184_v51 = vld [vmem:[#allocation104_spill] sm:$0xff] }
 0x467   : > { %v7231_v33 = vsel %vm611_vm1, %v7199_v20, %v7108_v18  ;;  %6869 = vrot.lane.b32.xlu1 %v6686_v63, %s14822_s6  ;;  %v12913_v20 = vld [vmem:[%s21522_s1 + $0x110] sm:$0xff] }
 0x468   : > { %6867 = vrot.lane.b32.xlu0 %v6670_v48, %s14822_s6  ;;  %14078 = vmatprep.mubr.msk.f32.mxu1 %vm1068_vm2, %v7231_v33  ;;  %v7204_v48 = vsel %vm578_vm0, %v19247_v29, %v22181_v42 }
 0x469   : > { %14079 = vmatmul.mubr.msk.f32.gmra.mrb[68].mxu1 %vm1068_vm2, %v7232_v4  ;;  %v7114_v26 = vpop.permute.xlu1 %7113 }
 0x46a   : > { %v7234_v31 = vsel %vm611_vm1, %v7202_v17, %v7114_v26  ;;  %v7112_v19 = vpop.permute.xlu0 %7111 }
 0x46b   : > { %v7233_v45 = vsel %vm611_vm1, %v7201_v58, %v7112_v19  ;;  %6761 = vrot.lane.b32.xlu1 %v18507_v57, %s14821_s24  ;;  %v19315_v58 = vld [vmem:[%s14870_s23 + $0x1e8] sm:$0xff] }
 0x46c   : > { %6759 = vrot.lane.b32.xlu0 %v19163_v12, %s14821_s24  ;;  %14081 = vmatprep.mubr.msk.f32.mxu1 %vm1068_vm2, %v7233_v45 }
 0x46d   : > { %14082 = vmatmul.mubr.msk.f32.gmra.mrb[70].mxu1 %vm1068_vm2, %v7234_v31  ;;  %v7118_v41 = vpop.permute.xlu1 %7117  ;;  %v7207_v31 = vsel %vm578_vm0, %v19295_v49, %v21877_v47  ;;  %v7210_v47 = vsel %vm578_vm0, %v19315_v58, %v21879_v39  ;;  %v19344_v39 = vld [vmem:[%s14870_s23 + $0x200] sm:$0xff] }
 0x46e   : > { %v7236_v34 = vsel %vm611_vm1, %v7204_v48, %v7118_v41  ;;  %v7116_v15 = vpop.permute.xlu0 %7115  ;;  %v19336_v41 = vld [vmem:[%s14870_s23 + $0x208] sm:$0xff] }
 0x46f   : > { %v7235_v32 = vsel %vm611_vm1, %v7203_v0, %v7116_v15  ;;  %6873 = vrot.lane.b32.xlu1 %v18504_v30, %s14822_s6  ;;  %v7205_v30 = vsel %vm578_vm0, %v19275_v43, %v22055_v8  ;;  %v12912_v8 = vld [vmem:[%s21522_s1 + $0x108] sm:$0xff]  ;;  %v22185_v0 = vld [vmem:[#allocation56_spill] sm:$0xff] }
 0x470   : > { %6871 = vrot.lane.b32.xlu0 %v18507_v57, %s14822_s6  ;;  %14084 = vmatprep.mubr.msk.f32.mxu1 %vm1068_vm2, %v7235_v32  ;;  %v19287_v57 = vld [vmem:[%s14870_s23 + $0x1c8] sm:$0xff]  ;;  %v19308_v17 = vpack.c.bf16 %v12913_v20, %v12912_v8  ;;  %v7212_v15 = vsel %vm578_vm0, %v19336_v41, %v22185_v0  ;;  %v22187_v8 = vld [vmem:[#allocation69_spill] sm:$0xff] }
 0x471   : > { %14085 = vmatmul.mubr.msk.f32.gmra.mrb[72].mxu1 %vm1068_vm2, %v7236_v34  ;;  %v7122_v63 = vpop.permute.xlu1 %7121  ;;  %v7208_v18 = vsel %vm578_vm0, %v19287_v57, %v21875_v46  ;;  %v19323_v46 = vld [vmem:[%s14870_s23 + $0x1e0] sm:$0xff] }
 0x472   : > { %v7238_v5 = vsel %vm611_vm1, %v7206_v59, %v7122_v63  ;;  %v7120_v16 = vpop.permute.xlu0 %7119  ;;  %14435 = vmatprep.subr.bf16.mxu1 %v19308_v17  ;;  %v22186_v63 = vld [vmem:[#allocation57_spill] sm:$0xff] }
 0x473   : > { %v7237_v4 = vsel %vm611_vm1, %v7205_v30, %v7120_v16  ;;  %6765 = vrot.lane.b32.xlu1 %v18534_v44, %s14821_s24  ;;  %v19356_v16 = vld [vmem:[%s14870_s23 + $0x228] sm:$0xff]  ;;  %v19364_v20 = vld [vmem:[%s14870_s23 + $0x220] sm:$0xff] }
 0x474   : > { %6763 = vrot.lane.b32.xlu0 %v19183_v60, %s14821_s24  ;;  %14087 = vmatprep.mubr.msk.f32.mxu1 %vm1068_vm2, %v7237_v4  ;;  %v22191_v0 = vld [vmem:[#allocation61_spill] sm:$0xff] }
 0x475   : > { %14088 = vmatmul.mubr.msk.f32.gmra.mrb[74].mxu1 %vm1068_vm2, %v7238_v5  ;;  %v7126_v33 = vpop.permute.xlu1 %7125  ;;  %v7211_v5 = vsel %vm578_vm0, %v19344_v39, %v22186_v63 }
 0x476   : > { %v7240_v26 = vsel %vm611_vm1, %v7208_v18, %v7126_v33  ;;  %v7124_v50 = vpop.permute.xlu0 %7123  ;;  %v22188_v18 = vld [vmem:[#allocation58_spill] sm:$0xff] }
 0x477   : > { %v7239_v19 = vsel %vm611_vm1, %v7207_v31, %v7124_v50  ;;  %6877 = vrot.lane.b32.xlu1 %v18531_v35, %s14822_s6  ;;  %v22183_v35 = vld [vmem:[#allocation55_spill] sm:$0xff]  ;;  %v7214_v33 = vsel %vm578_vm0, %v19356_v16, %v22188_v18 }
 0x478   : > { %6875 = vrot.lane.b32.xlu0 %v18534_v44, %s14822_s6  ;;  %14090 = vmatprep.mubr.msk.f32.mxu1 %vm1068_vm2, %v7239_v19  ;;  %v7209_v44 = vsel %vm578_vm0, %v19323_v46, %v22183_v35  ;;  %v22189_v50 = vld [vmem:[#allocation59_spill] sm:$0xff]  ;;  %v19384_v35 = vld [vmem:[%s14870_s23 + $0x240] sm:$0xff] }
 0x479   : > { %14091 = vmatmul.mubr.msk.f32.gmra.mrb[76].mxu1 %vm1068_vm2, %v7240_v26  ;;  %v7130_v45 = vpop.permute.xlu1 %7129  ;;  %v7213_v19 = vsel %vm578_vm0, %v19364_v20, %v22189_v50 }
 0x47a   : > { %v7242_v42 = vsel %vm611_vm1, %v7210_v47, %v7130_v45  ;;  %v7128_v48 = vpop.permute.xlu0 %7127  ;;  %v19376_v45 = vld [vmem:[%s14870_s23 + $0x248] sm:$0xff] }
 0x47b   : > { %v7241_v34 = vsel %vm611_vm1, %v7209_v44, %v7128_v48  ;;  %6769 = vrot.lane.b32.xlu1 %v22184_v51, %s14821_s24  ;;  %v22190_v44 = vld [vmem:[#allocation60_spill] sm:$0xff] }
 0x47c   : > { %6767 = vrot.lane.b32.xlu0 %v19208_v54, %s14821_s24  ;;  %14093 = vmatprep.mubr.msk.f32.mxu1 %vm1068_vm2, %v7241_v34  ;;  %v7216_v48 = vsel %vm578_vm0, %v19376_v45, %v22190_v44 }
 0x47d   : > { %14094 = vmatmul.mubr.msk.f32.gmra.mrb[78].mxu1 %vm1068_vm2, %v7242_v42  ;;  %v7134_v32 = vpop.permute.xlu1 %7133 }
 0x47e   : > { %v7244_v59 = vsel %vm611_vm1, %v7212_v15, %v7134_v32  ;;  %v7132_v30 = vpop.permute.xlu0 %7131  ;;  %v7215_v15 = vsel %vm578_vm0, %v19384_v35, %v22191_v0 }
 0x47f   : > { %v7243_v4 = vsel %vm611_vm1, %v7211_v5, %v7132_v30  ;;  %6881 = vrot.lane.b32.xlu1 %v22187_v8, %s14822_s6  ;;  %v22192_v5 = vld [vmem:[#allocation5_spill] sm:$0xff] }
 0x480   : > { %6879 = vrot.lane.b32.xlu0 %v22184_v51, %s14822_s6  ;;  %14096 = vmatprep.mubr.msk.f32.mxu1 %vm1068_vm2, %v7243_v4  ;;  %v19404_v30 = vld [vmem:[%s14870_s23 + $0x260] sm:$0xff]  ;;  %v22193_v4 = vld [vmem:[#allocation62_spill] sm:$0xff] }
 0x481   : > { %14097 = vmatmul.mubr.msk.f32.gmra.mrb[80].mxu1 %vm1068_vm2, %v7244_v59  ;;  %v7138_v26 = vpop.permute.xlu1 %7137  ;;  %v19396_v59 = vld [vmem:[%s14870_s23 + $0x268] sm:$0xff] }
 0x482   : > { %v7246_v31 = vsel %vm611_vm1, %v7214_v33, %v7138_v26  ;;  %v7136_v47 = vpop.permute.xlu0 %7135  ;;  %v7218_v8 = vsel %vm578_vm0, %v19396_v59, %v22193_v4  ;;  %v22194_v26 = vld [vmem:[#allocation63_spill] sm:$0xff]  ;;  %v19444_v4 = vld [vmem:[%s14870_s23 + $0x2a0] sm:$0xff] }
 0x483   : > { %v7245_v42 = vsel %vm611_vm1, %v7213_v19, %v7136_v47  ;;  %6773 = vrot.lane.b32.xlu1 %v18586_v13, %s14821_s24  ;;  %v19424_v47 = vld [vmem:[%s14870_s23 + $0x280] sm:$0xff] }
 0x484   : > { %6771 = vrot.lane.b32.xlu0 %v19229_v37, %s14821_s24  ;;  %14099 = vmatprep.mubr.msk.f32.mxu1 %vm1068_vm2, %v7245_v42  ;;  %v22195_v42 = vld [vmem:[#allocation64_spill] sm:$0xff] }
 0x485   : > { %14100 = vmatmul.mubr.msk.f32.gmra.mrb[82].mxu1 %vm1068_vm2, %v7246_v31  ;;  %v7142_v34 = vpop.permute.xlu1 %7141  ;;  %v7217_v31 = vsel %vm578_vm0, %v19404_v30, %v22194_v26 }
 0x486   : > { %v7248_v51 = vsel %vm611_vm1, %v7216_v48, %v7142_v34  ;;  %v7140_v32 = vpop.permute.xlu0 %7139 }
 0x487   : > { %v7247_v63 = vsel %vm611_vm1, %v7215_v15, %v7140_v32  ;;  %6885 = vrot.lane.b32.xlu1 %v22192_v5, %s14822_s6  ;;  %v19436_v32 = vld [vmem:[%s14870_s23 + $0x2a8] sm:$0xff]  ;;  %v22197_v5 = vld [vmem:[#allocation123_spill] sm:$0xff] }
 0x488   : > { %6883 = vrot.lane.b32.xlu0 %v18586_v13, %s14822_s6  ;;  %14102 = vmatprep.mubr.msk.f32.mxu1 %vm1068_vm2, %v7247_v63  ;;  %v19416_v13 = vld [vmem:[%s14870_s23 + $0x288] sm:$0xff] }
 0x489   : > { %14103 = vmatmul.mubr.msk.f32.gmra.mrb[84].mxu1 %vm1068_vm2, %v7248_v51  ;;  %v7146_v18 = vpop.permute.xlu1 %7145  ;;  %v7220_v44 = vsel %vm578_vm0, %v19416_v13, %v22195_v42  ;;  %v22196_v51 = vld [vmem:[#allocation65_spill] sm:$0xff] }
 0x48a   : > { %v7250_v33 = vsel %vm611_vm1, %v7218_v8, %v7146_v18  ;;  %v7144_v50 = vpop.permute.xlu0 %7143  ;;  %v7219_v0 = vsel %vm578_vm0, %v19424_v47, %v22196_v51  ;;  %v22198_v8 = vld [vmem:[#allocation10_spill] sm:$0xff] }
 0x48b   : > { %v7249_v19 = vsel %vm611_vm1, %v7217_v31, %v7144_v50  ;;  %6777 = vrot.lane.b32.xlu1 %v18610_v1, %s14821_s24  ;;  %v7222_v18 = vsel %vm578_vm0, %v19436_v32, %v22198_v8  ;;  %v22199_v31 = vld [vmem:[#allocation11_spill] sm:$0xff] }
 0x48c   : > { %6775 = vrot.lane.b32.xlu0 %v19247_v29, %s14821_s24  ;;  %14105 = vmatprep.mubr.msk.f32.mxu1 %vm1068_vm2, %v7249_v19  ;;  %v7221_v50 = vsel %vm578_vm0, %v19444_v4, %v22199_v31  ;;  %v22203_v31 = vld [vmem:[#allocation126_spill] sm:$0xff] }
 0x48d   : > { %14106 = vmatmul.mubr.msk.f32.gmra.mrb[86].mxu1 %vm1068_vm2, %v7250_v33  ;;  %v7150_v48 = vpop.permute.xlu1 %7149 }
 0x48e   : > { %v7252_v34 = vsel %vm611_vm1, %v7220_v44, %v7150_v48  ;;  %v7148_v15 = vpop.permute.xlu0 %7147  ;;  %v22200_v44 = vld [vmem:[#allocation127_spill] sm:$0xff]  ;;  %v19464_v48 = vld [vmem:[%s14870_s23 + $0x2c0] sm:$0xff] }
 0x48f   : > { %v7251_v63 = vsel %vm611_vm1, %v7219_v0, %v7148_v15  ;;  %6889 = vrot.lane.b32.xlu1 %v22197_v5, %s14822_s6 }
 0x490   : > { %6887 = vrot.lane.b32.xlu0 %v18610_v1, %s14822_s6  ;;  %14108 = vmatprep.mubr.msk.f32.mxu1 %vm1068_vm2, %v7251_v63  ;;  %v19456_v1 = vld [vmem:[%s14870_s23 + $0x2c8] sm:$0xff]  ;;  %v22202_v63 = vld [vmem:[#allocation13_spill] sm:$0xff] }
 0x491   : > { %14109 = vmatmul.mubr.msk.f32.gmra.mrb[88].mxu1 %vm1068_vm2, %v7252_v34  ;;  %v7154_v33 = vpop.permute.xlu1 %7153  ;;  %v22201_v34 = vld [vmem:[#allocation12_spill] sm:$0xff]  ;;  %v7223_v5 = vsel %vm578_vm0, %v19464_v48, %v22202_v63 }
 0x492   : > { %v7254_v26 = vsel %vm611_vm1, %v7222_v18, %v7154_v33  ;;  %v7152_v19 = vpop.permute.xlu0 %7151  ;;  %v7224_v51 = vsel %vm578_vm0, %v19456_v1, %v22201_v34  ;;  %v19476_v18 = vld [vmem:[%s14870_s23 + $0x2e8] sm:$0xff] }
 0x493   : > { %v7253_v42 = vsel %vm611_vm1, %v7221_v50, %v7152_v19  ;;  %6781 = vrot.lane.b32.xlu1 %v22200_v44, %s14821_s24  ;;  %v7226_v50 = vsel %vm578_vm0, %v19476_v18, %v22096_v7 }
 0x494   : > { %6779 = vrot.lane.b32.xlu0 %v19267_v27, %s14821_s24  ;;  %14111 = vmatprep.mubr.msk.f32.mxu1 %vm1068_vm2, %v7253_v42 }
 0x495   : > { %14112 = vmatmul.mubr.msk.f32.gmra.mrb[90].mxu1 %vm1068_vm2, %v7254_v26  ;;  %v7158_v0 = vpop.permute.xlu1 %7157  ;;  %v19484_v26 = vld [vmem:[%s14870_s23 + $0x2e0] sm:$0xff] }
 0x496   : > { %v7256_v15 = vsel %vm611_vm1, %v7224_v51, %v7158_v0  ;;  %v7156_v8 = vpop.permute.xlu0 %7155  ;;  %v7225_v34 = vsel %vm578_vm0, %v19484_v26, %v22097_v53 }
 0x497   : > { %v7255_v33 = vsel %vm611_vm1, %v7223_v5, %v7156_v8  ;;  %6893 = vrot.lane.b32.xlu1 %v22203_v31, %s14822_s6 }
 0x498   : > { %6891 = vrot.lane.b32.xlu0 %v22200_v44, %s14822_s6  ;;  %14114 = vmatprep.mubr.msk.f32.mxu1 %vm1068_vm2, %v7255_v33 }
 0x499   : > { %14115 = vmatmul.mubr.msk.f32.gmra.mrb[92].mxu1 %vm1068_vm2, %v7256_v15  ;;  %v7162_v19 = vpop.permute.xlu1 %7161  ;;  %v6631_v15 = vld [vmem:[%s14870_s23] sm:$0xff] }
 0x49a   : > { %v7258_v42 = vsel %vm611_vm1, %v7226_v50, %v7162_v19  ;;  %v7160_v51 = vpop.permute.xlu0 %7159  ;;  %v6633_v50 = vld [vmem:[%s14870_s23 + $0x20] sm:$0xff] }
 0x49b   : > { %v7257_v44 = vsel %vm611_vm1, %v7225_v34, %v7160_v51  ;;  %6785 = vrot.lane.b32.xlu1 %v18658_v61, %s14821_s24 }
 0x49c   : > { %6783 = vrot.lane.b32.xlu0 %v19287_v57, %s14821_s24  ;;  %14117 = vmatprep.mubr.msk.f32.mxu1 %vm1068_vm2, %v7257_v44 }
 0x49d   : > { %14118 = vmatmul.mubr.msk.f32.gmra.mrb[94].mxu1 %vm1068_vm2, %v7258_v42  ;;  %v6730_v7 = vpop.permute.xlu1 %6729 }
 0x49e   : > { %v6728_v0 = vpop.permute.xlu0 %6727  ;;  %v6936_v53 = vsel %vm578_vm0, %v18918_v25, %v6730_v7  ;;  %v22204_v7 = vld [vmem:[#allocation96_spill] sm:$0xff] }
 0x49f   : > { %6897 = vrot.lane.b32.xlu1 %v18655_v10, %s14822_s6  ;;  %v6935_v5 = vsel %vm578_vm0, %v6631_v15, %v6728_v0 }
 0x4a0   : > { %6895 = vrot.lane.b32.xlu0 %v18658_v61, %s14822_s6  ;;  %v12914_v61 = vld [vmem:[%s21522_s1 + $0x118] sm:$0xff] }
 0x4a1   : > { %v6842_v63 = vpop.permute.xlu1 %6841 }
 0x4a2   : > { %v6968_v8 = vsel %vm611_vm1, %v6936_v53, %v6842_v63  ;;  %v6840_v33 = vpop.permute.xlu0 %6839 }
 0x4a3   : > { %v6967_v31 = vsel %vm611_vm1, %v6935_v5, %v6840_v33  ;;  %6789 = vrot.lane.b32.xlu1 %v18684_v28, %s14821_s24  ;;  %v22205_v33 = vld [vmem:[#allocation134_spill] sm:$0xff] }
 0x4a4   : > { %6787 = vrot.lane.b32.xlu0 %v19315_v58, %s14821_s24  ;;  %14126 = vmatprep.mubr.msk.f32.mxu1 %vm1068_vm2, %v6967_v31 }
 0x4a5   : > { %14127 = vmatmul.mubr.msk.f32.vlgmr.msra.gmra.mrb[64].mxu1 %vm1068_vm2, %v6968_v8  ;;  %v6734_v10 = vpop.permute.xlu1 %6733 }
 0x4a6   : > { %v6732_v25 = vpop.permute.xlu0 %6731  ;;  %14437 = vmatpush3.bf16.msra.mxu1 %v19308_v17  ;;  %v6938_v19 = vsel %vm578_vm0, %v18966_v21, %v6734_v10  ;;  %v6635_v21 = vld [vmem:[%s14870_s23 + $0x40] sm:$0xff] }
 0x4a7   : > { %6901 = vrot.lane.b32.xlu1 %v18681_v62, %s14822_s6  ;;  %14178 = vmatprep.subr.mxu1 %v12914_v61  ;;  %v6937_v34 = vsel %vm578_vm0, %v6633_v50, %v6732_v25  ;;  %v6637_v10 = vld [vmem:[%s14870_s23 + $0x60] sm:$0xff] }
 0x4a8   : > { %6899 = vrot.lane.b32.xlu0 %v18684_v28, %s14822_s6 }
 0x4a9   : > { %v6846_v42 = vpop.permute.xlu1 %6845 }
 0x4aa   : > { %v6970_v51 = vsel %vm611_vm1, %v6938_v19, %v6846_v42  ;;  %v6844_v44 = vpop.permute.xlu0 %6843  ;;  %14179 = vmatpush3.msra.mxu1 %v12914_v61 }
 0x4ab   : > { %v6969_v17 = vsel %vm611_vm1, %v6937_v34, %v6844_v44  ;;  %8004 = vrot.lane.b32.xlu1 %v18714_v3, %s14821_s24  ;;  %v12898_v44 = vld [vmem:[%s14870_s23 + $0x258] sm:$0xff] }
 0x4ac   : > { %8002 = vrot.lane.b32.xlu0 %v19336_v41, %s14821_s24  ;;  %14129 = vmatprep.mubr.msk.f32.mxu1 %vm1068_vm2, %v6969_v17 }
 0x4ad   : > { %14130 = vmatmul.mubr.msk.f32.gmra.mrb[66].mxu1 %vm1068_vm2, %v6970_v51  ;;  %v6738_v62 = vpop.permute.xlu1 %6737  ;;  %v22206_v51 = vld [vmem:[#allocation137_spill] sm:$0xff] }
 0x4ae   : > { %v6736_v28 = vpop.permute.xlu0 %6735  ;;  %v6940_v0 = vsel %vm578_vm0, %v22204_v7, %v6738_v62  ;;  %v6639_v62 = vld [vmem:[%s14870_s23 + $0x80] sm:$0xff] }
 0x4af   : > { %8116 = vrot.lane.b32.xlu1 %v18711_v52, %s14822_s6  ;;  %v6939_v53 = vsel %vm578_vm0, %v6635_v21, %v6736_v28  ;;  %v12883_v28 = vld [vmem:[%s14870_s23 + $0x270] sm:$0xff] }
 0x4b0   : > { %8114 = vrot.lane.b32.xlu0 %v18714_v3, %s14822_s6  ;;  %v12897_v3 = vld [vmem:[%s14870_s23 + $0x238] sm:$0xff] }
 0x4b1   : > { %v6850_v15 = vpop.permute.xlu1 %6849 }
 0x4b2   : > { %v6972_v63 = vsel %vm611_vm1, %v6940_v0, %v6850_v15  ;;  %v6848_v5 = vpop.permute.xlu0 %6847 }
 0x4b3   : > { %v6971_v8 = vsel %vm611_vm1, %v6939_v53, %v6848_v5  ;;  %8008 = vrot.lane.b32.xlu1 %v22205_v33, %s14821_s24  ;;  %v12899_v5 = vld [vmem:[%s14870_s23 + $0x278] sm:$0xff] }
 0x4b4   : > { %8006 = vrot.lane.b32.xlu0 %v19356_v16, %s14821_s24  ;;  %14132 = vmatprep.mubr.msk.f32.mxu1 %vm1068_vm2, %v6971_v8 }
 0x4b5   : > { %14133 = vmatmul.mubr.msk.f32.gmra.mrb[68].mxu1 %vm1068_vm2, %v6972_v63  ;;  %v6742_v52 = vpop.permute.xlu1 %6741 }
 0x4b6   : > { %v6740_v31 = vpop.permute.xlu0 %6739  ;;  %v6942_v61 = vsel %vm578_vm0, %v19059_v14, %v6742_v52 }
 0x4b7   : > { %8120 = vrot.lane.b32.xlu1 %v12897_v3, %s14822_s6  ;;  %v6941_v50 = vsel %vm578_vm0, %v6637_v10, %v6740_v31  ;;  %v12884_v3 = vld [vmem:[%s14870_s23 + $0x290] sm:$0xff] }
 0x4b8   : > { %8118 = vrot.lane.b32.xlu0 %v22205_v33, %s14822_s6  ;;  %v6641_v33 = vld [vmem:[%s14870_s23 + $0xa0] sm:$0xff] }
 0x4b9   : > { %v6854_v25 = vpop.permute.xlu1 %6853 }
 0x4ba   : > { %v6974_v19 = vsel %vm611_vm1, %v6942_v61, %v6854_v25  ;;  %v6852_v42 = vpop.permute.xlu0 %6851 }
 0x4bb   : > { %v6973_v34 = vsel %vm611_vm1, %v6941_v50, %v6852_v42  ;;  %8012 = vrot.lane.b32.xlu1 %v22206_v51, %s14821_s24 }
 0x4bc   : > { %8010 = vrot.lane.b32.xlu0 %v19376_v45, %s14821_s24  ;;  %14135 = vmatprep.mubr.msk.f32.mxu1 %vm1068_vm2, %v6973_v34  ;;  %v6643_v34 = vld [vmem:[%s14870_s23 + $0xc0] sm:$0xff] }
 0x4bd   : > { %14136 = vmatmul.mubr.msk.f32.gmra.mrb[70].mxu1 %vm1068_vm2, %v6974_v19  ;;  %v6746_v14 = vpop.permute.xlu1 %6745  ;;  %v12900_v19 = vld [vmem:[%s14870_s23 + $0x298] sm:$0xff] }
 0x4be   : > { %v6744_v17 = vpop.permute.xlu0 %6743  ;;  %v6944_v21 = vsel %vm578_vm0, %v19092_v9, %v6746_v14 }
 0x4bf   : > { %8124 = vrot.lane.b32.xlu1 %v12898_v44, %s14822_s6  ;;  %v6943_v0 = vsel %vm578_vm0, %v6639_v62, %v6744_v17 }
 0x4c0   : > { %8122 = vrot.lane.b32.xlu0 %v22206_v51, %s14822_s6  ;;  %v12885_v51 = vld [vmem:[%s14870_s23 + $0x2b0] sm:$0xff] }
 0x4c1   : > { %v6858_v7 = vpop.permute.xlu1 %6857 }
 0x4c2   : > { %v6976_v15 = vsel %vm611_vm1, %v6944_v21, %v6858_v7  ;;  %v6856_v53 = vpop.permute.xlu0 %6855  ;;  %v12901_v7 = vld [vmem:[%s14870_s23 + $0x2b8] sm:$0xff] }
 0x4c3   : > { %v6975_v63 = vsel %vm611_vm1, %v6943_v0, %v6856_v53  ;;  %8016 = vrot.lane.b32.xlu1 %v12883_v28, %s14821_s24 }
 0x4c4   : > { %8014 = vrot.lane.b32.xlu0 %v19396_v59, %s14821_s24  ;;  %14138 = vmatprep.mubr.msk.f32.mxu1 %vm1068_vm2, %v6975_v63 }
 0x4c5   : > { %14139 = vmatmul.mubr.msk.f32.gmra.mrb[72].mxu1 %vm1068_vm2, %v6976_v15  ;;  %v6750_v9 = vpop.permute.xlu1 %6749  ;;  %v6645_v15 = vld [vmem:[%s14870_s23 + $0xe0] sm:$0xff] }
 0x4c6   : > { %v6748_v8 = vpop.permute.xlu0 %6747  ;;  %v6946_v52 = vsel %vm578_vm0, %v19122_v24, %v6750_v9 }
 0x4c7   : > { %8128 = vrot.lane.b32.xlu1 %v12899_v5, %s14822_s6  ;;  %v6945_v10 = vsel %vm578_vm0, %v6641_v33, %v6748_v8  ;;  %v19623_v5 = vld [vmem:[%s14870_s23 + $0x24c] sm:$0xff] }
 0x4c8   : > { %8126 = vrot.lane.b32.xlu0 %v12883_v28, %s14822_s6 }
 0x4c9   : > { %v6862_v31 = vpop.permute.xlu1 %6861 }
 0x4ca   : > { %v6978_v61 = vsel %vm611_vm1, %v6946_v52, %v6862_v31  ;;  %v6860_v25 = vpop.permute.xlu0 %6859  ;;  %v12669_v52 = vld [vmem:[%s14870_s23 + $0x254] sm:$0xff] }
 0x4cb   : > { %v6977_v50 = vsel %vm611_vm1, %v6945_v10, %v6860_v25  ;;  %8020 = vrot.lane.b32.xlu1 %v12884_v3, %s14821_s24 }
 0x4cc   : > { %8018 = vrot.lane.b32.xlu0 %v19416_v13, %s14821_s24  ;;  %14141 = vmatprep.mubr.msk.f32.mxu1 %vm1068_vm2, %v6977_v50 }
 0x4cd   : > { %14142 = vmatmul.mubr.msk.f32.gmra.mrb[74].mxu1 %vm1068_vm2, %v6978_v61  ;;  %v6754_v24 = vpop.permute.xlu1 %6753  ;;  %v12902_v61 = vld [vmem:[%s14870_s23 + $0x2d8] sm:$0xff] }
 0x4ce   : > { %v6752_v42 = vpop.permute.xlu0 %6751  ;;  %v6948_v44 = vsel %vm578_vm0, %v19152_v56, %v6754_v24 }
 0x4cf   : > { %8132 = vrot.lane.b32.xlu1 %v12900_v19, %s14822_s6  ;;  %v6947_v17 = vsel %vm578_vm0, %v6643_v34, %v6752_v42 }
 0x4d0   : > { %8130 = vrot.lane.b32.xlu0 %v12884_v3, %s14822_s6 }
 0x4d1   : > { %v6866_v14 = vpop.permute.xlu1 %6865 }
 0x4d2   : > { %v6980_v62 = vsel %vm611_vm1, %v6948_v44, %v6866_v14  ;;  %v6864_v28 = vpop.permute.xlu0 %6863  ;;  %v12670_v14 = vld [vmem:[%s14870_s23 + $0x274] sm:$0xff] }
 0x4d3   : > { %v6979_v21 = vsel %vm611_vm1, %v6947_v17, %v6864_v28  ;;  %8024 = vrot.lane.b32.xlu1 %v12885_v51, %s14821_s24 }
 0x4d4   : > { %8022 = vrot.lane.b32.xlu0 %v19436_v32, %s14821_s24  ;;  %14144 = vmatprep.mubr.msk.f32.mxu1 %vm1068_vm2, %v6979_v21 }
 0x4d5   : > { %14145 = vmatmul.mubr.msk.f32.gmra.mrb[76].mxu1 %vm1068_vm2, %v6980_v62  ;;  %v6758_v56 = vpop.permute.xlu1 %6757 }
 0x4d6   : > { %v6756_v0 = vpop.permute.xlu0 %6755  ;;  %v6950_v53 = vsel %vm578_vm0, %v19194_v22, %v6758_v56  ;;  %v12886_v22 = vld [vmem:[%s14870_s23 + $0x2d0] sm:$0xff] }
 0x4d7   : > { %8136 = vrot.lane.b32.xlu1 %v12901_v7, %s14822_s6  ;;  %v6949_v9 = vsel %vm578_vm0, %v6645_v15, %v6756_v0  ;;  %v12903_v0 = vld [vmem:[%s14870_s23 + $0x2f8] sm:$0xff] }
 0x4d8   : > { %8134 = vrot.lane.b32.xlu0 %v12885_v51, %s14822_s6 }
 0x4d9   : > { %v6870_v63 = vpop.permute.xlu1 %6869 }
 0x4da   : > { %v6982_v8 = vsel %vm611_vm1, %v6950_v53, %v6870_v63  ;;  %v6868_v33 = vpop.permute.xlu0 %6867 }
 0x4db   : > { %v6981_v3 = vsel %vm611_vm1, %v6949_v9, %v6868_v33  ;;  %8026 = vrot.lane.b32.xlu1 %v19456_v1, %s14821_s24 }
 0x4dc   : > { %6138 = vrot.lane.b32.xlu0 %v19623_v5, %s14822_s6  ;;  %14147 = vmatprep.mubr.msk.f32.mxu1 %vm1068_vm2, %v6981_v3 }
 0x4dd   : > { %14148 = vmatmul.mubr.msk.f32.gmra.mrb[78].mxu1 %vm1068_vm2, %v6982_v8  ;;  %v6762_v31 = vpop.permute.xlu1 %6761 }
 0x4de   : > { %v6760_v10 = vpop.permute.xlu0 %6759  ;;  %v6952_v25 = vsel %vm578_vm0, %v19163_v12, %v6762_v31  ;;  %v19650_v12 = vld [vmem:[%s14870_s23 + $0x26c] sm:$0xff] }
 0x4df   : > { %8028 = vrot.lane.b32.xlu1 %v12886_v22, %s14821_s24  ;;  %v6951_v19 = vsel %vm578_vm0, %v19170_v11, %v6760_v10  ;;  %v12887_v11 = vld [vmem:[%s14870_s23 + $0x2f0] sm:$0xff]  ;;  %v12904_v10 = vld [vmem:[%s14870_s23 + $0x318] sm:$0xff] }
 0x4e0   : > { %6140 = vrot.lane.b32.xlu0 %v12669_v52, %s14822_s6  ;;  %v12671_v52 = vld [vmem:[%s14870_s23 + $0x294] sm:$0xff] }
 0x4e1   : > { %v6874_v50 = vpop.permute.xlu1 %6873 }
 0x4e2   : > { %v6984_v24 = vsel %vm611_vm1, %v6952_v25, %v6874_v50  ;;  %v6872_v42 = vpop.permute.xlu0 %6871 }
 0x4e3   : > { %v6983_v34 = vsel %vm611_vm1, %v6951_v19, %v6872_v42  ;;  %8140 = vrot.lane.b32.xlu1 %v12902_v61, %s14822_s6 }
 0x4e4   : > { %8138 = vrot.lane.b32.xlu0 %v12886_v22, %s14822_s6  ;;  %14150 = vmatprep.mubr.msk.f32.mxu1 %vm1068_vm2, %v6983_v34  ;;  %v19683_v22 = vld [vmem:[%s14870_s23 + $0x28c] sm:$0xff] }
 0x4e5   : > { %14151 = vmatmul.mubr.msk.f32.gmra.mrb[80].mxu1 %vm1068_vm2, %v6984_v24  ;;  %v6766_v51 = vpop.permute.xlu1 %6765  ;;  %v19704_v34 = vld [vmem:[%s14870_s23 + $0x328] sm:$0xff] }
 0x4e6   : > { %v6764_v44 = vpop.permute.xlu0 %6763  ;;  %v6954_v17 = vsel %vm578_vm0, %v19183_v60, %v6766_v51 }
 0x4e7   : > { %8030 = vrot.lane.b32.xlu1 %v19476_v18, %s14821_s24  ;;  %v6953_v28 = vsel %vm578_vm0, %v19189_v23, %v6764_v44  ;;  %v19672_v23 = vld [vmem:[%s14870_s23 + $0x308] sm:$0xff]  ;;  %v12889_v44 = vld [vmem:[%s14870_s23 + $0x330] sm:$0xff] }
 0x4e8   : > { %6142 = vrot.lane.b32.xlu0 %v19650_v12, %s14822_s6 }
 0x4e9   : > { %v6878_v62 = vpop.permute.xlu1 %6877 }
 0x4ea   : > { %v6986_v21 = vsel %vm611_vm1, %v6954_v17, %v6878_v62  ;;  %v6876_v7 = vpop.permute.xlu0 %6875 }
 0x4eb   : > { %v6985_v56 = vsel %vm611_vm1, %v6953_v28, %v6876_v7  ;;  %8032 = vrot.lane.b32.xlu1 %v12887_v11, %s14821_s24 }
 0x4ec   : > { %6144 = vrot.lane.b32.xlu0 %v12670_v14, %s14822_s6  ;;  %14153 = vmatprep.mubr.msk.f32.mxu1 %vm1068_vm2, %v6985_v56  ;;  %v12905_v56 = vld [vmem:[%s14870_s23 + $0x338] sm:$0xff] }
 0x4ed   : > { %14154 = vmatmul.mubr.msk.f32.gmra.mrb[82].mxu1 %vm1068_vm2, %v6986_v21  ;;  %v6770_v60 = vpop.permute.xlu1 %6769 }
 0x4ee   : > { %v6768_v15 = vpop.permute.xlu0 %6767  ;;  %v6956_v53 = vsel %vm578_vm0, %v19208_v54, %v6770_v60  ;;  %v12888_v54 = vld [vmem:[%s14870_s23 + $0x310] sm:$0xff] }
 0x4ef   : > { %8144 = vrot.lane.b32.xlu1 %v12903_v0, %s14822_s6  ;;  %v6955_v9 = vsel %vm578_vm0, %v19216_v6, %v6768_v15 }
 0x4f0   : > { %8142 = vrot.lane.b32.xlu0 %v12887_v11, %s14822_s6  ;;  %v12672_v11 = vld [vmem:[%s14870_s23 + $0x2b4] sm:$0xff] }
 0x4f1   : > { %v6882_v63 = vpop.permute.xlu1 %6881 }
 0x4f2   : > { %v6988_v8 = vsel %vm611_vm1, %v6956_v53, %v6882_v63  ;;  %v6880_v33 = vpop.permute.xlu0 %6879 }
 0x4f3   : > { %v6987_v3 = vsel %vm611_vm1, %v6955_v9, %v6880_v33  ;;  %8034 = vrot.lane.b32.xlu1 %v19672_v23, %s14821_s24  ;;  %v19741_v33 = vld [vmem:[%s14870_s23 + $0x2cc] sm:$0xff] }
 0x4f4   : > { %6146 = vrot.lane.b32.xlu0 %v19683_v22, %s14822_s6  ;;  %14156 = vmatprep.mubr.msk.f32.mxu1 %vm1068_vm2, %v6987_v3  ;;  %v12673_v3 = vld [vmem:[%s14870_s23 + $0x2d4] sm:$0xff] }
 0x4f5   : > { %14157 = vmatmul.mubr.msk.f32.gmra.mrb[84].mxu1 %vm1068_vm2, %v6988_v8  ;;  %v6774_v6 = vpop.permute.xlu1 %6773 }
 0x4f6   : > { %v6772_v31 = vpop.permute.xlu0 %6771  ;;  %v6958_v61 = vsel %vm578_vm0, %v19229_v37, %v6774_v6 }
 0x4f7   : > { %8036 = vrot.lane.b32.xlu1 %v12888_v54, %s14821_s24  ;;  %v6957_v50 = vsel %vm578_vm0, %v19235_v40, %v6772_v31  ;;  %v19710_v40 = vld [vmem:[%s14870_s23 + $0x2ac] sm:$0xff] }
 0x4f8   : > { %6148 = vrot.lane.b32.xlu0 %v12671_v52, %s14822_s6  ;;  %v12906_v52 = vld [vmem:[%s14870_s23 + $0x358] sm:$0xff] }
 0x4f9   : > { %v6886_v25 = vpop.permute.xlu1 %6885 }
 0x4fa   : > { %v6990_v19 = vsel %vm611_vm1, %v6958_v61, %v6886_v25  ;;  %v6884_v24 = vpop.permute.xlu0 %6883 }
 0x4fb   : > { %v6989_v42 = vsel %vm611_vm1, %v6957_v50, %v6884_v24  ;;  %8148 = vrot.lane.b32.xlu1 %v12904_v10, %s14822_s6 }
 0x4fc   : > { %8146 = vrot.lane.b32.xlu0 %v12888_v54, %s14822_s6  ;;  %14159 = vmatprep.mubr.msk.f32.mxu1 %vm1068_vm2, %v6989_v42  ;;  %v12891_v42 = vld [vmem:[%s14870_s23 + $0x370] sm:$0xff] }
 0x4fd   : > { %14160 = vmatmul.mubr.msk.f32.gmra.mrb[86].mxu1 %vm1068_vm2, %v6990_v19  ;;  %v6778_v37 = vpop.permute.xlu1 %6777  ;;  %v19762_v19 = vld [vmem:[%s14870_s23 + $0x368] sm:$0xff] }
 0x4fe   : > { %v6776_v51 = vpop.permute.xlu0 %6775  ;;  %v6960_v14 = vsel %vm578_vm0, %v19247_v29, %v6778_v37  ;;  %v12674_v37 = vld [vmem:[%s14870_s23 + $0x2f4] sm:$0xff] }
 0x4ff   : > { %8038 = vrot.lane.b32.xlu1 %v19704_v34, %s14821_s24  ;;  %v6959_v62 = vsel %vm578_vm0, %v19255_v55, %v6776_v51  ;;  %v19730_v55 = vld [vmem:[%s14870_s23 + $0x348] sm:$0xff] }
 0x500   : > { %6150 = vrot.lane.b32.xlu0 %v19710_v40, %s14822_s6 }
 0x501   : > { %v6890_v17 = vpop.permute.xlu1 %6889 }
 0x502   : > { %v6992_v28 = vsel %vm611_vm1, %v6960_v14, %v6890_v17  ;;  %v6888_v21 = vpop.permute.xlu0 %6887 }
 0x503   : > { %v6991_v7 = vsel %vm611_vm1, %v6959_v62, %v6888_v21  ;;  %8040 = vrot.lane.b32.xlu1 %v12889_v44, %s14821_s24 }
 0x504   : > { %6152 = vrot.lane.b32.xlu0 %v12672_v11, %s14822_s6  ;;  %14162 = vmatprep.mubr.msk.f32.mxu1 %vm1068_vm2, %v6991_v7 }
 0x505   : > { %14163 = vmatmul.mubr.msk.f32.gmra.mrb[88].mxu1 %vm1068_vm2, %v6992_v28  ;;  %v6782_v29 = vpop.permute.xlu1 %6781 }
 0x506   : > { %v6780_v0 = vpop.permute.xlu0 %6779  ;;  %v6962_v60 = vsel %vm578_vm0, %v19267_v27, %v6782_v29  ;;  %v12890_v27 = vld [vmem:[%s14870_s23 + $0x350] sm:$0xff]  ;;  %v19794_v29 = vld [vmem:[%s14870_s23 + $0x388] sm:$0xff] }
 0x507   : > { %8152 = vrot.lane.b32.xlu1 %v12905_v56, %s14822_s6  ;;  %v6961_v53 = vsel %vm578_vm0, %v19275_v43, %v6780_v0 }
 0x508   : > { %8150 = vrot.lane.b32.xlu0 %v12889_v44, %s14822_s6 }
 0x509   : > { %v6894_v15 = vpop.permute.xlu1 %6893 }
 0x50a   : > { %v6994_v63 = vsel %vm611_vm1, %v6962_v60, %v6894_v15  ;;  %v6892_v9 = vpop.permute.xlu0 %6891 }
 0x50b   : > { %v6993_v8 = vsel %vm611_vm1, %v6961_v53, %v6892_v9  ;;  %8042 = vrot.lane.b32.xlu1 %v19730_v55, %s14821_s24  ;;  %v19801_v53 = vld [vmem:[%s14870_s23 + $0x30c] sm:$0xff] }
 0x50c   : > { %6154 = vrot.lane.b32.xlu0 %v19741_v33, %s14822_s6  ;;  %14165 = vmatprep.mubr.msk.f32.mxu1 %vm1068_vm2, %v6993_v8 }
 0x50d   : > { %14166 = vmatmul.mubr.msk.f32.gmra.mrb[90].mxu1 %vm1068_vm2, %v6994_v63  ;;  %v6786_v43 = vpop.permute.xlu1 %6785 }
 0x50e   : > { %v6784_v54 = vpop.permute.xlu0 %6783  ;;  %v6964_v6 = vsel %vm578_vm0, %v19287_v57, %v6786_v43  ;;  %v12675_v43 = vld [vmem:[%s14870_s23 + $0x314] sm:$0xff] }
 0x50f   : > { %8044 = vrot.lane.b32.xlu1 %v12890_v27, %s14821_s24  ;;  %v6963_v10 = vsel %vm578_vm0, %v19295_v49, %v6784_v54  ;;  %v19768_v49 = vld [vmem:[%s14870_s23 + $0x2ec] sm:$0xff] }
 0x510   : > { %6156 = vrot.lane.b32.xlu0 %v12673_v3, %s14822_s6  ;;  %v12892_v3 = vld [vmem:[%s14870_s23 + $0x390] sm:$0xff] }
 0x511   : > { %v6898_v31 = vpop.permute.xlu1 %6897 }
 0x512   : > { %v6996_v61 = vsel %vm611_vm1, %v6964_v6, %v6898_v31  ;;  %v6896_v25 = vpop.permute.xlu0 %6895  ;;  %v12908_v31 = vld [vmem:[%s14870_s23 + $0x398] sm:$0xff] }
 0x513   : > { %v6995_v50 = vsel %vm611_vm1, %v6963_v10, %v6896_v25  ;;  %8156 = vrot.lane.b32.xlu1 %v12906_v52, %s14822_s6 }
 0x514   : > { %8154 = vrot.lane.b32.xlu0 %v12890_v27, %s14822_s6  ;;  %14168 = vmatprep.mubr.msk.f32.mxu1 %vm1068_vm2, %v6995_v50 }
 0x515   : > { %14169 = vmatmul.mubr.msk.f32.gmra.mrb[92].mxu1 %vm1068_vm2, %v6996_v61  ;;  %v6790_v57 = vpop.permute.xlu1 %6789 }
 0x516   : > { %v6788_v24 = vpop.permute.xlu0 %6787  ;;  %v6966_v51 = vsel %vm578_vm0, %v19315_v58, %v6790_v57  ;;  %v12907_v58 = vld [vmem:[%s14870_s23 + $0x378] sm:$0xff] }
 0x517   : > { %8046 = vrot.lane.b32.xlu1 %v19762_v19, %s14821_s24  ;;  %v6965_v11 = vsel %vm578_vm0, %v19323_v46, %v6788_v24 }
 0x518   : > { %6158 = vrot.lane.b32.xlu0 %v19768_v49, %s14822_s6 }
 0x519   : > { %v6902_v44 = vpop.permute.xlu1 %6901 }
 0x51a   : > { %v6998_v14 = vsel %vm611_vm1, %v6966_v51, %v6902_v44  ;;  %v6900_v17 = vpop.permute.xlu0 %6899  ;;  %v19844_v44 = vld [vmem:[%s14870_s23 + $0x32c] sm:$0xff] }
 0x51b   : > { %v6997_v62 = vsel %vm611_vm1, %v6965_v11, %v6900_v17  ;;  %8048 = vrot.lane.b32.xlu1 %v12891_v42, %s14821_s24  ;;  %v12893_v17 = vld [vmem:[%s14870_s23 + $0x3b0] sm:$0xff] }
 0x51c   : > { %6160 = vrot.lane.b32.xlu0 %v12674_v37, %s14822_s6  ;;  %v19782_v28 = vpop.f32.mrb[32].mxu0  ;;  %14171 = vmatprep.mubr.msk.f32.mxu1 %vm1068_vm2, %v6997_v62  ;;  %v12676_v62 = vld [vmem:[%s14870_s23 + $0x334] sm:$0xff] }
 0x51d   : > { %v19786_v21 = vpop.f32.mrb[33].mxu0  ;;  %14172 = vmatmul.mubr.msk.f32.gmra.mrb[94].mxu1 %vm1068_vm2, %v6998_v14  ;;  %v8005_v46 = vpop.permute.xlu1 %8004 }
 0x51e   : > { %v8003_v7 = vpop.permute.xlu0 %8002  ;;  %v8211_v0 = vsel %vm578_vm0, %v19336_v41, %v8005_v46 }
 0x51f   : > { %8160 = vrot.lane.b32.xlu1 %v12907_v58, %s14822_s6  ;;  %v8210_v63 = vsel %vm578_vm0, %v19344_v39, %v8003_v7 }
 0x520   : > { %8158 = vrot.lane.b32.xlu0 %v12891_v42, %s14822_s6  ;;  %v19791_v56 = vpop.f32.mrb[34].mxu0 }
 0x521   : > { %v19798_v60 = vpop.f32.mrb[35].mxu0  ;;  %v8117_v15 = vpop.permute.xlu1 %8116 }
 0x522   : > { %v8243_v9 = vsel %vm611_vm1, %v8211_v0, %v8117_v15  ;;  %v8115_v8 = vpop.permute.xlu0 %8114 }
 0x523   : > { %v8242_v27 = vsel %vm611_vm1, %v8210_v63, %v8115_v8  ;;  %8050 = vrot.lane.b32.xlu1 %v19794_v29, %s14821_s24 }
 0x524   : > { %6162 = vrot.lane.b32.xlu0 %v19801_v53, %s14822_s6  ;;  %v19811_v41 = vpop.f32.mrb[36].mxu0  ;;  %14180 = vmatprep.mubr.msk.f32.mxu1 %vm1068_vm2, %v8242_v27 }
 0x525   : > { %v19816_v54 = vpop.f32.mrb[37].mxu0  ;;  %14181 = vmatmul.mubr.msk.f32.vlgmr.msra.gmra.mrb[64].mxu1 %vm1068_vm2, %v8243_v9  ;;  %v8009_v39 = vpop.permute.xlu1 %8008 }
 0x526   : > { %v8007_v52 = vpop.permute.xlu0 %8006  ;;  %v8213_v10 = vsel %vm578_vm0, %v19356_v16, %v8009_v39  ;;  %v19838_v16 = vld [vmem:[%s14870_s23 + $0x3a8] sm:$0xff] }
 0x527   : > { %8052 = vrot.lane.b32.xlu1 %v12892_v3, %s14821_s24  ;;  %v8212_v50 = vsel %vm578_vm0, %v19364_v20, %v8007_v52  ;;  %v19875_v39 = vld [vmem:[%s14870_s23 + $0x34c] sm:$0xff] }
 0x528   : > { %6164 = vrot.lane.b32.xlu0 %v12675_v43, %s14822_s6  ;;  %v19821_v6 = vpop.f32.mrb[38].mxu0 }
 0x529   : > { %v19826_v61 = vpop.f32.mrb[39].mxu0  ;;  %v8121_v25 = vpop.permute.xlu1 %8120 }
 0x52a   : > { %v8245_v57 = vsel %vm611_vm1, %v8213_v10, %v8121_v25  ;;  %v8119_v24 = vpop.permute.xlu0 %8118 }
 0x52b   : > { %v8244_v42 = vsel %vm611_vm1, %v8212_v50, %v8119_v24  ;;  %8164 = vrot.lane.b32.xlu1 %v12908_v31, %s14822_s6  ;;  %v12677_v50 = vld [vmem:[%s14870_s23 + $0x354] sm:$0xff] }
 0x52c   : > { %8162 = vrot.lane.b32.xlu0 %v12892_v3, %s14822_s6  ;;  %v19834_v37 = vpop.f32.mrb[40].mxu0  ;;  %14183 = vmatprep.mubr.msk.f32.mxu1 %vm1068_vm2, %v8244_v42  ;;  %v12910_v24 = vld [vmem:[%s14870_s23 + $0x3d8] sm:$0xff] }
 0x52d   : > { %v19840_v51 = vpop.f32.mrb[41].mxu0  ;;  %14184 = vmatmul.mubr.msk.f32.gmra.mrb[66].mxu1 %vm1068_vm2, %v8245_v57  ;;  %v8013_v20 = vpop.permute.xlu1 %8012 }
 0x52e   : > { %v8011_v11 = vpop.permute.xlu0 %8010  ;;  %v8215_v58 = vsel %vm578_vm0, %v19376_v45, %v8013_v20  ;;  %v12909_v45 = vld [vmem:[%s14870_s23 + $0x3b8] sm:$0xff] }
 0x52f   : > { %8054 = vrot.lane.b32.xlu1 %v19838_v16, %s14821_s24  ;;  %v8214_v0 = vsel %vm578_vm0, %v19384_v35, %v8011_v11  ;;  %v19870_v35 = vld [vmem:[%s14870_s23 + $0x3c8] sm:$0xff] }
 0x530   : > { %6166 = vrot.lane.b32.xlu0 %v19844_v44, %s14822_s6  ;;  %v19850_v14 = vpop.f32.mrb[42].mxu0 }
 0x531   : > { %v19856_v46 = vpop.f32.mrb[43].mxu0  ;;  %v8125_v7 = vpop.permute.xlu1 %8124 }
 0x532   : > { %v8247_v15 = vsel %vm611_vm1, %v8215_v58, %v8125_v7  ;;  %v8123_v63 = vpop.permute.xlu0 %8122  ;;  %v19902_v7 = vld [vmem:[%s14870_s23 + $0x3e8] sm:$0xff] }
 0x533   : > { %v8246_v9 = vsel %vm611_vm1, %v8214_v0, %v8123_v63  ;;  %8056 = vrot.lane.b32.xlu1 %v12893_v17, %s14821_s24  ;;  %v19906_v0 = vld [vmem:[%s14870_s23 + $0x36c] sm:$0xff]  ;;  %v12678_v63 = vld [vmem:[%s14870_s23 + $0x374] sm:$0xff] }
 0x534   : > { %6168 = vrot.lane.b32.xlu0 %v12676_v62, %s14822_s6  ;;  %14186 = vmatprep.mubr.msk.f32.mxu1 %vm1068_vm2, %v8246_v9 }
 0x535   : > { %14187 = vmatmul.mubr.msk.f32.gmra.mrb[68].mxu1 %vm1068_vm2, %v8247_v15  ;;  %v8017_v8 = vpop.permute.xlu1 %8016  ;;  %v12895_v15 = vld [vmem:[%s14870_s23 + $0x3f0] sm:$0xff] }
 0x536   : > { %v8015_v27 = vpop.permute.xlu0 %8014  ;;  %v8217_v3 = vsel %vm578_vm0, %v19396_v59, %v8017_v8  ;;  %v12894_v59 = vld [vmem:[%s14870_s23 + $0x3d0] sm:$0xff] }
 0x537   : > { %8168 = vrot.lane.b32.xlu1 %v12909_v45, %s14822_s6  ;;  %v8216_v52 = vsel %vm578_vm0, %v19404_v30, %v8015_v27 }
 0x538   : > { %8166 = vrot.lane.b32.xlu0 %v12893_v17, %s14822_s6 }
 0x539   : > { %v8129_v43 = vpop.permute.xlu1 %8128 }
 0x53a   : > { %v8249_v31 = vsel %vm611_vm1, %v8217_v3, %v8129_v43  ;;  %v8127_v10 = vpop.permute.xlu0 %8126 }
 0x53b   : > { %v8248_v25 = vsel %vm611_vm1, %v8216_v52, %v8127_v10  ;;  %8058 = vrot.lane.b32.xlu1 %v19870_v35, %s14821_s24  ;;  %v12911_v52 = vld [vmem:[%s14870_s23 + $0x3f8] sm:$0xff]  ;;  %v22207_v10 = vld [vmem:[#allocation42_spill] sm:$0xff] }
 0x53c   : > { %6170 = vrot.lane.b32.xlu0 %v19875_v39, %s14822_s6  ;;  %14189 = vmatprep.mubr.msk.f32.mxu1 %vm1068_vm2, %v8248_v25 }
 0x53d   : > { %14190 = vmatmul.mubr.msk.f32.gmra.mrb[70].mxu1 %vm1068_vm2, %v8249_v31  ;;  %v8021_v57 = vpop.permute.xlu1 %8020 }
 0x53e   : > { %v8019_v30 = vpop.permute.xlu0 %8018  ;;  %v8219_v42 = vsel %vm578_vm0, %v19416_v13, %v8021_v57  ;;  %v22208_v57 = vld [vmem:[#allocation76_spill] sm:$0xff] }
 0x53f   : > { %8060 = vrot.lane.b32.xlu1 %v12894_v59, %s14821_s24  ;;  %v8218_v11 = vsel %vm578_vm0, %v19424_v47, %v8019_v30  ;;  %v6223_v30 = vsel %vm578_vm0, %v19623_v5, %v22208_v57 }
 0x540   : > { %6172 = vrot.lane.b32.xlu0 %v12677_v50, %s14822_s6 }
 0x541   : > { %v8133_v20 = vpop.permute.xlu1 %8132 }
 0x542   : > { %v8251_v17 = vsel %vm611_vm1, %v8219_v42, %v8133_v20  ;;  %v8131_v62 = vpop.permute.xlu0 %8130  ;;  %v22209_v20 = vld [vmem:[#allocation66_spill] sm:$0xff] }
 0x543   : > { %v8250_v58 = vsel %vm611_vm1, %v8218_v11, %v8131_v62  ;;  %8172 = vrot.lane.b32.xlu1 %v12910_v24, %s14822_s6  ;;  %v22210_v11 = vld [vmem:[#allocation97_spill] sm:$0xff] }
 0x544   : > { %8170 = vrot.lane.b32.xlu0 %v12894_v59, %s14822_s6  ;;  %14192 = vmatprep.mubr.msk.f32.mxu1 %vm1068_vm2, %v8250_v58 }
 0x545   : > { %14193 = vmatmul.mubr.msk.f32.gmra.mrb[72].mxu1 %vm1068_vm2, %v8251_v17  ;;  %v8025_v13 = vpop.permute.xlu1 %8024 }
 0x546   : > { %v8023_v47 = vpop.permute.xlu0 %8022  ;;  %v8221_v9 = vsel %vm578_vm0, %v19436_v32, %v8025_v13  ;;  %v14807_v32 = vld [vmem:[%s14870_s23 + $0x244] sm:$0xff] }
 0x547   : > { %8062 = vrot.lane.b32.xlu1 %v19902_v7, %s14821_s24  ;;  %v8220_v8 = vsel %vm578_vm0, %v19444_v4, %v8023_v47  ;;  %v6222_v25 = vsel %vm578_vm0, %v14807_v32, %v22207_v10 }
 0x548   : > { %6174 = vrot.lane.b32.xlu0 %v19906_v0, %s14822_s6 }
 0x549   : > { %v8137_v45 = vpop.permute.xlu1 %8136 }
 0x54a   : > { %v8253_v27 = vsel %vm611_vm1, %v8221_v9, %v8137_v45  ;;  %v8135_v3 = vpop.permute.xlu0 %8134  ;;  %v14808_v9 = vld [vmem:[%s14870_s23 + $0x264] sm:$0xff]  ;;  %v22213_v45 = vld [vmem:[#allocation87_spill] sm:$0xff] }
 0x54b   : > { %v8252_v43 = vsel %vm611_vm1, %v8220_v8, %v8135_v3  ;;  %8064 = vrot.lane.b32.xlu1 %v12895_v15, %s14821_s24  ;;  %v22214_v3 = vld [vmem:[#allocation68_spill] sm:$0xff] }
 0x54c   : > { %6176 = vrot.lane.b32.xlu0 %v12678_v63, %s14822_s6  ;;  %14195 = vmatprep.mubr.msk.f32.mxu1 %vm1068_vm2, %v8252_v43  ;;  %v22212_v63 = vld [vmem:[#allocation18_spill] sm:$0xff]  ;;  %v22215_v43 = vld [vmem:[#allocation100_spill] sm:$0xff] }
 0x54d   : > { %14196 = vmatmul.mubr.msk.f32.gmra.mrb[74].mxu1 %vm1068_vm2, %v8253_v27  ;;  %v8027_v31 = vpop.permute.xlu1 %8026 }
 0x54e   : > { %v6139_v4 = vpop.permute.xlu0 %6138  ;;  %v8222_v5 = vsel %vm578_vm0, %v19464_v48, %v8027_v31  ;;  %v6224_v48 = vsel %vm578_vm0, %v14808_v9, %v22213_v45  ;;  %v22216_v31 = vld [vmem:[#allocation92_spill] sm:$0xff]  ;;  %v12864_v45 = vld [vmem:[%s14870_s23 + $0x300] sm:$0xff] }
 0x54f   : > { %v6254_v59 = vsel %vm611_vm1, %v6222_v25, %v6139_v4  ;;  %8176 = vrot.lane.b32.xlu1 %v12911_v52, %s14822_s6  ;;  %v6225_v32 = vsel %vm578_vm0, %v19650_v12, %v22216_v31  ;;  %v22217_v4 = vld [vmem:[#allocation103_spill] sm:$0xff] }
 0x550   : > { %8174 = vrot.lane.b32.xlu0 %v12895_v15, %s14822_s6  ;;  %14036 = vmatprep.mubr.msk.f32.mxu0 %vm1068_vm2, %v6254_v59  ;;  %v22211_v15 = vld [vmem:[#allocation101_spill] sm:$0xff]  ;;  %v22218_v59 = vld [vmem:[#allocation67_spill] sm:$0xff] }
 0x551   : > { %v8029_v50 = vpop.permute.xlu1 %8028 }
 0x552   : > { %v6141_v24 = vpop.permute.xlu0 %6140  ;;  %v8223_v17 = vsel %vm578_vm0, %v19456_v1, %v8029_v50 }
 0x553   : > { %v6255_v42 = vsel %vm611_vm1, %v6223_v30, %v6141_v24  ;;  %8665 = vrot.lane.b32.xlu1 %v22209_v20, %s14823_s13  ;;  %v22219_v20 = vld [vmem:[#allocation70_spill] sm:$0xff] }
 0x554   : > { %8663 = vrot.lane.b32.xlu0 %v22210_v11, %s14823_s13  ;;  %14037 = vmatmul.mubr.msk.f32.gmra.mrb[44].mxu0 %vm1068_vm2, %v6255_v42  ;;  %v22220_v11 = vld [vmem:[#allocation102_spill] sm:$0xff] }
 0x555   : > { %v8141_v62 = vpop.permute.xlu1 %8140 }
 0x556   : > { %v8255_v58 = vsel %vm611_vm1, %v8223_v17, %v8141_v62  ;;  %v8139_v13 = vpop.permute.xlu0 %8138  ;;  %v14809_v17 = vld [vmem:[%s14870_s23 + $0x284] sm:$0xff]  ;;  %v22221_v62 = vld [vmem:[#allocation84_spill] sm:$0xff] }
 0x557   : > { %v8254_v47 = vsel %vm611_vm1, %v8222_v5, %v8139_v13  ;;  %8669 = vrot.lane.b32.xlu1 %v22211_v15, %s14823_s13  ;;  %v22222_v13 = vld [vmem:[#allocation105_spill] sm:$0xff] }
 0x558   : > { %8667 = vrot.lane.b32.xlu0 %v22212_v63, %s14823_s13  ;;  %14198 = vmatprep.mubr.msk.f32.mxu1 %vm1068_vm2, %v8254_v47  ;;  %v22223_v47 = vld [vmem:[#allocation52_spill] sm:$0xff]  ;;  %v22224_v63 = vld [vmem:[#allocation33_spill] sm:$0xff] }
 0x559   : > { %14199 = vmatmul.mubr.msk.f32.gmra.mrb[76].mxu1 %vm1068_vm2, %v8255_v58  ;;  %v8031_v1 = vpop.permute.xlu1 %8030 }
 0x55a   : > { %v6143_v8 = vpop.permute.xlu0 %6142  ;;  %v8224_v30 = vsel %vm578_vm0, %v19484_v26, %v8031_v1  ;;  %v6226_v26 = vsel %vm578_vm0, %v14809_v17, %v22221_v62  ;;  %v6227_v1 = vsel %vm578_vm0, %v19683_v22, %v22224_v63  ;;  %v12866_v17 = vld [vmem:[%s14870_s23 + $0x320] sm:$0xff] }
 0x55b   : > { %v6256_v27 = vsel %vm611_vm1, %v6224_v48, %v6143_v8  ;;  %8673 = vrot.lane.b32.xlu1 %v22214_v3, %s14823_s13  ;;  %v22225_v8 = vld [vmem:[#allocation53_spill] sm:$0xff] }
 0x55c   : > { %8671 = vrot.lane.b32.xlu0 %v22215_v43, %s14823_s13  ;;  %14039 = vmatprep.mubr.msk.f32.mxu0 %vm1068_vm2, %v6256_v27  ;;  %v22226_v27 = vld [vmem:[#allocation6_spill] sm:$0xff] }
 0x55d   : > { %v8033_v52 = vpop.permute.xlu1 %8032 }
 0x55e   : > { %v6145_v10 = vpop.permute.xlu0 %6144  ;;  %v8225_v50 = vsel %vm578_vm0, %v19476_v18, %v8033_v52 }
 0x55f   : > { %v6257_v25 = vsel %vm611_vm1, %v6225_v32, %v6145_v10  ;;  %8677 = vrot.lane.b32.xlu1 %v22217_v4, %s14823_s13  ;;  %v22227_v10 = vld [vmem:[#allocation122_spill] sm:$0xff] }
 0x560   : > { %8675 = vrot.lane.b32.xlu0 %v22218_v59, %s14823_s13  ;;  %14040 = vmatmul.mubr.msk.f32.gmra.mrb[46].mxu0 %vm1068_vm2, %v6257_v25  ;;  %v22228_v25 = vld [vmem:[#allocation124_spill] sm:$0xff]  ;;  %v14810_v4 = vld [vmem:[%s14870_s23 + $0x2a4] sm:$0xff] }
 0x561   : > { %v8145_v57 = vpop.permute.xlu1 %8144  ;;  %v22229_v59 = vld [vmem:[#allocation106_spill] sm:$0xff] }
 0x562   : > { %v8257_v12 = vsel %vm611_vm1, %v8225_v50, %v8145_v57  ;;  %v8143_v24 = vpop.permute.xlu0 %8142  ;;  %v6228_v50 = vsel %vm578_vm0, %v14810_v4, %v22229_v59  ;;  %v14812_v4 = vld [vmem:[%s14870_s23 + $0x2e4] sm:$0xff] }
 0x563   : > { %v8256_v42 = vsel %vm611_vm1, %v8224_v30, %v8143_v24  ;;  %8681 = vrot.lane.b32.xlu1 %v22219_v20, %s14823_s13  ;;  %v22231_v24 = vld [vmem:[#allocation128_spill] sm:$0xff]  ;;  %v22232_v20 = vld [vmem:[#allocation37_spill] sm:$0xff]  ;;  %v22237_v59 = vld [vmem:[#allocation86_spill] sm:$0xff] }
 0x564   : > { %8679 = vrot.lane.b32.xlu0 %v22220_v11, %s14823_s13  ;;  %14201 = vmatprep.mubr.msk.f32.mxu1 %vm1068_vm2, %v8256_v42  ;;  %v6229_v11 = vsel %vm578_vm0, %v19710_v40, %v22232_v20  ;;  %v12870_v20 = vld [vmem:[%s14870_s23 + $0x360] sm:$0xff] }
 0x565   : > { %14202 = vmatmul.mubr.msk.f32.gmra.mrb[78].mxu1 %vm1068_vm2, %v8257_v12  ;;  %v8035_v18 = vpop.permute.xlu1 %8034  ;;  %v22230_v12 = vld [vmem:[#allocation125_spill] sm:$0xff] }
 0x566   : > { %v6147_v5 = vpop.permute.xlu0 %6146  ;;  %v8226_v52 = vsel %vm578_vm0, %v12864_v45, %v8035_v18 }
 0x567   : > { %v6258_v58 = vsel %vm611_vm1, %v6226_v26, %v6147_v5  ;;  %8685 = vrot.lane.b32.xlu1 %v22222_v13, %s14823_s13  ;;  %v22233_v26 = vld [vmem:[#allocation129_spill] sm:$0xff]  ;;  %v22234_v5 = vld [vmem:[#allocation130_spill] sm:$0xff] }
 0x568   : > { %8683 = vrot.lane.b32.xlu0 %v22223_v47, %s14823_s13  ;;  %14042 = vmatprep.mubr.msk.f32.mxu0 %vm1068_vm2, %v6258_v58 }
 0x569   : > { %v8037_v15 = vpop.permute.xlu1 %8036 }
 0x56a   : > { %v6149_v9 = vpop.permute.xlu0 %6148  ;;  %v8227_v3 = vsel %vm578_vm0, %v19672_v23, %v8037_v15 }
 0x56b   : > { %v6259_v48 = vsel %vm611_vm1, %v6227_v1, %v6149_v9  ;;  %8689 = vrot.lane.b32.xlu1 %v22225_v8, %s14823_s13  ;;  %v14811_v1 = vld [vmem:[%s14870_s23 + $0x2c4] sm:$0xff] }
 0x56c   : > { %8687 = vrot.lane.b32.xlu0 %v22226_v27, %s14823_s13  ;;  %14043 = vmatmul.mubr.msk.f32.gmra.mrb[48].mxu0 %vm1068_vm2, %v6259_v48  ;;  %v22235_v9 = vld [vmem:[#allocation78_spill] sm:$0xff] }
 0x56d   : > { %v8149_v43 = vpop.permute.xlu1 %8148  ;;  %v6230_v45 = vsel %vm578_vm0, %v14811_v1, %v22235_v9 }
 0x56e   : > { %v8259_v22 = vsel %vm611_vm1, %v8227_v3, %v8149_v43  ;;  %v8147_v31 = vpop.permute.xlu0 %8146  ;;  %v12868_v43 = vld [vmem:[%s14870_s23 + $0x340] sm:$0xff] }
 0x56f   : > { %v8258_v32 = vsel %vm611_vm1, %v8226_v52, %v8147_v31  ;;  %8693 = vrot.lane.b32.xlu1 %v22227_v10, %s14823_s13 }
 0x570   : > { %8691 = vrot.lane.b32.xlu0 %v22228_v25, %s14823_s13  ;;  %14204 = vmatprep.mubr.msk.f32.mxu1 %vm1068_vm2, %v8258_v32 }
 0x571   : > { %14205 = vmatmul.mubr.msk.f32.gmra.mrb[80].mxu1 %vm1068_vm2, %v8259_v22  ;;  %v8039_v23 = vpop.permute.xlu1 %8038 }
 0x572   : > { %v6151_v57 = vpop.permute.xlu0 %6150  ;;  %v8228_v47 = vsel %vm578_vm0, %v12866_v17, %v8039_v23 }
 0x573   : > { %v6260_v30 = vsel %vm611_vm1, %v6228_v50, %v6151_v57  ;;  %8697 = vrot.lane.b32.xlu1 %v22230_v12, %s14823_s13  ;;  %v6232_v50 = vsel %vm578_vm0, %v14812_v4, %v22237_v59  ;;  %v22238_v12 = vld [vmem:[#allocation45_spill] sm:$0xff] }
 0x574   : > { %8695 = vrot.lane.b32.xlu0 %v22231_v24, %s14823_s13  ;;  %14045 = vmatprep.mubr.msk.f32.mxu0 %vm1068_vm2, %v6260_v30  ;;  %v6233_v24 = vsel %vm578_vm0, %v19768_v49, %v22238_v12  ;;  %v12874_v4 = vld [vmem:[%s14870_s23 + $0x3a0] sm:$0xff] }
 0x575   : > { %v8041_v42 = vpop.permute.xlu1 %8040 }
 0x576   : > { %v6153_v18 = vpop.permute.xlu0 %6152  ;;  %v8229_v58 = vsel %vm578_vm0, %v19704_v34, %v8041_v42 }
 0x577   : > { %v6261_v62 = vsel %vm611_vm1, %v6229_v11, %v6153_v18  ;;  %8701 = vrot.lane.b32.xlu1 %v22233_v26, %s14823_s13 }
 0x578   : > { %8699 = vrot.lane.b32.xlu0 %v22234_v5, %s14823_s13  ;;  %14046 = vmatmul.mubr.msk.f32.gmra.mrb[50].mxu0 %vm1068_vm2, %v6261_v62 }
 0x579   : > { %v8153_v13 = vpop.permute.xlu1 %8152 }
 0x57a   : > { %v8261_v40 = vsel %vm611_vm1, %v8229_v58, %v8153_v13  ;;  %v8151_v15 = vpop.permute.xlu0 %8150  ;;  %v12623_v58 = vld [vmem:[%s14870_s23 + $0x304] sm:$0xff] }
 0x57b   : > { %v8260_v63 = vsel %vm611_vm1, %v8228_v47, %v8151_v15  ;;  %8793 = vrot.lane.b32.xlu1 %v19782_v28, %s14824_s14  ;;  %v22236_v28 = vld [vmem:[#allocation17_spill] sm:$0xff] }
 0x57c   : > { %8791 = vrot.lane.b32.xlu0 %v19786_v21, %s14824_s14  ;;  %14207 = vmatprep.mubr.msk.f32.mxu1 %vm1068_vm2, %v8260_v63  ;;  %v6231_v21 = vsel %vm578_vm0, %v19741_v33, %v22236_v28  ;;  %v22239_v47 = vld [vmem:[#allocation41_spill] sm:$0xff] }
 0x57d   : > { %14208 = vmatmul.mubr.msk.f32.gmra.mrb[82].mxu1 %vm1068_vm2, %v8261_v40  ;;  %v8043_v34 = vpop.permute.xlu1 %8042  ;;  %v6234_v40 = vsel %vm578_vm0, %v12623_v58, %v22239_v47 }
 0x57e   : > { %v6155_v48 = vpop.permute.xlu0 %6154  ;;  %v8230_v32 = vsel %vm578_vm0, %v12868_v43, %v8043_v34  ;;  %v22240_v34 = vld [vmem:[#allocation75_spill] sm:$0xff]  ;;  %v12625_v43 = vld [vmem:[%s14870_s23 + $0x324] sm:$0xff] }
 0x57f   : > { %v6262_v8 = vsel %vm611_vm1, %v6230_v45, %v6155_v48  ;;  %v6235_v1 = vsel %vm578_vm0, %v19801_v53, %v22240_v34  ;;  %v12872_v45 = vld [vmem:[%s14870_s23 + $0x380] sm:$0xff] }
 0x580   : > { %14048 = vmatprep.mubr.msk.f32.mxu0 %vm1068_vm2, %v6262_v8 }
 0x581   : > { %v8045_v27 = vpop.permute.xlu1 %8044 }
 0x582   : > { %v6157_v3 = vpop.permute.xlu0 %6156  ;;  %v8231_v22 = vsel %vm578_vm0, %v19730_v55, %v8045_v27 }
 0x583   : > { %v6263_v52 = vsel %vm611_vm1, %v6231_v21, %v6157_v3 }
 0x584   : > { %14049 = vmatmul.mubr.msk.f32.gmra.mrb[52].mxu0 %vm1068_vm2, %v6263_v52 }
 0x585   : > { %v8157_v31 = vpop.permute.xlu1 %8156 }
 0x586   : > { %v8263_v10 = vsel %vm611_vm1, %v8231_v22, %v8157_v31  ;;  %v8155_v25 = vpop.permute.xlu0 %8154  ;;  %v22241_v22 = vld [vmem:[#allocation50_spill] sm:$0xff] }
 0x587   : > { %v8262_v23 = vsel %vm611_vm1, %v8230_v32, %v8155_v25  ;;  %v6236_v31 = vsel %vm578_vm0, %v12625_v43, %v22241_v22  ;;  %v22242_v25 = vld [vmem:[#allocation83_spill] sm:$0xff] }
 0x588   : > { %14210 = vmatprep.mubr.msk.f32.mxu1 %vm1068_vm2, %v8262_v23  ;;  %v6237_v23 = vsel %vm578_vm0, %v19844_v44, %v22242_v25 }
 0x589   : > { %14211 = vmatmul.mubr.msk.f32.gmra.mrb[84].mxu1 %vm1068_vm2, %v8263_v10  ;;  %v8047_v33 = vpop.permute.xlu1 %8046 }
 0x58a   : > { %v6159_v55 = vpop.permute.xlu0 %6158  ;;  %v8232_v62 = vsel %vm578_vm0, %v12870_v20, %v8047_v33 }
 0x58b   : > { %v6264_v57 = vsel %vm611_vm1, %v6232_v50, %v6159_v55 }
 0x58c   : > { %14051 = vmatprep.mubr.msk.f32.mxu0 %vm1068_vm2, %v6264_v57 }
 0x58d   : > { %v8049_v30 = vpop.permute.xlu1 %8048 }
 0x58e   : > { %v6161_v42 = vpop.permute.xlu0 %6160  ;;  %v8233_v18 = vsel %vm578_vm0, %v19762_v19, %v8049_v30 }
 0x58f   : > { %v6265_v11 = vsel %vm611_vm1, %v6233_v24, %v6161_v42  ;;  %v12627_v24 = vld [vmem:[%s14870_s23 + $0x344] sm:$0xff] }
 0x590   : > { %14052 = vmatmul.mubr.msk.f32.gmra.mrb[54].mxu0 %vm1068_vm2, %v6265_v11  ;;  %v6238_v20 = vsel %vm578_vm0, %v12627_v24, %v19044_v36 }
 0x591   : > { %v8161_v17 = vpop.permute.xlu1 %8160 }
 0x592   : > { %v8265_v26 = vsel %vm611_vm1, %v8233_v18, %v8161_v17  ;;  %v8159_v5 = vpop.permute.xlu0 %8158  ;;  %v22243_v17 = vld [vmem:[#allocation95_spill] sm:$0xff] }
 0x593   : > { %v8264_v13 = vsel %vm611_vm1, %v8232_v62, %v8159_v5  ;;  %v6239_v62 = vsel %vm578_vm0, %v19875_v39, %v22243_v17  ;;  %v12876_v5 = vld [vmem:[%s14870_s23 + $0x3c0] sm:$0xff] }
 0x594   : > { %14213 = vmatprep.mubr.msk.f32.mxu1 %vm1068_vm2, %v8264_v13 }
 0x595   : > { %14214 = vmatmul.mubr.msk.f32.gmra.mrb[86].mxu1 %vm1068_vm2, %v8265_v26  ;;  %v8051_v49 = vpop.permute.xlu1 %8050 }
 0x596   : > { %v6163_v19 = vpop.permute.xlu0 %6162  ;;  %v8234_v28 = vsel %vm578_vm0, %v12872_v45, %v8051_v49 }
 0x597   : > { %v6266_v15 = vsel %vm611_vm1, %v6234_v40, %v6163_v19  ;;  %v12629_v19 = vld [vmem:[%s14870_s23 + $0x364] sm:$0xff] }
 0x598   : > { %14054 = vmatprep.mubr.msk.f32.mxu0 %vm1068_vm2, %v6266_v15 }
 0x599   : > { %v8053_v63 = vpop.permute.xlu1 %8052 }
 0x59a   : > { %v6165_v9 = vpop.permute.xlu0 %6164  ;;  %v8235_v8 = vsel %vm578_vm0, %v19794_v29, %v8053_v63  ;;  %v6240_v63 = vsel %vm578_vm0, %v12629_v19, %v19066_v38 }
 0x59b   : > { %v6267_v48 = vsel %vm611_vm1, %v6235_v1, %v6165_v9  ;;  %v6241_v9 = vsel %vm578_vm0, %v19906_v0, %v19064_v2 }
 0x59c   : > { %14055 = vmatmul.mubr.msk.f32.gmra.mrb[56].mxu0 %vm1068_vm2, %v6267_v48  ;;  %v12878_v48 = vld [vmem:[%s14870_s23 + $0x3e0] sm:$0xff]  ;;  %s14825_s23 = smov 6  }
 0x59d   : > { %v8165_v27 = vpop.permute.xlu1 %8164 }
 0x59e   : > { %v8267_v21 = vsel %vm611_vm1, %v8235_v8, %v8165_v27  ;;  %v8163_v3 = vpop.permute.xlu0 %8162 }
 0x59f   : > { %v8266_v52 = vsel %vm611_vm1, %v8234_v28, %v8163_v3 }
 0x5a0   : > { %14216 = vmatprep.mubr.msk.f32.mxu1 %vm1068_vm2, %v8266_v52 }
 0x5a1   : > { %14217 = vmatmul.mubr.msk.f32.gmra.mrb[88].mxu1 %vm1068_vm2, %v8267_v21  ;;  %v8055_v53 = vpop.permute.xlu1 %8054 }
 0x5a2   : > { %v6167_v29 = vpop.permute.xlu0 %6166  ;;  %v8236_v57 = vsel %vm578_vm0, %v12874_v4, %v8055_v53 }
 0x5a3   : > { %v6268_v32 = vsel %vm611_vm1, %v6236_v31, %v6167_v29 }
 0x5a4   : > { %14057 = vmatprep.mubr.msk.f32.mxu0 %vm1068_vm2, %v6268_v32 }
 0x5a5   : > { %v8057_v10 = vpop.permute.xlu1 %8056 }
 0x5a6   : > { %v6169_v33 = vpop.permute.xlu0 %6168  ;;  %v8237_v50 = vsel %vm578_vm0, %v19838_v16, %v8057_v10 }
 0x5a7   : > { %v6269_v59 = vsel %vm611_vm1, %v6237_v23, %v6169_v33 }
 0x5a8   : > { %14058 = vmatmul.mubr.msk.f32.gmra.mrb[58].mxu0 %vm1068_vm2, %v6269_v59 }
 0x5a9   : > { %v8169_v55 = vpop.permute.xlu1 %8168 }
 0x5aa   : > { %v8269_v30 = vsel %vm611_vm1, %v8237_v50, %v8169_v55  ;;  %v8167_v12 = vpop.permute.xlu0 %8166 }
 0x5ab   : > { %v8268_v42 = vsel %vm611_vm1, %v8236_v57, %v8167_v12 }
 0x5ac   : > { %14219 = vmatprep.mubr.msk.f32.mxu1 %vm1068_vm2, %v8268_v42 }
 0x5ad   : > { %14220 = vmatmul.mubr.msk.f32.gmra.mrb[90].mxu1 %vm1068_vm2, %v8269_v30  ;;  %v8059_v44 = vpop.permute.xlu1 %8058 }
 0x5ae   : > { %v6171_v16 = vpop.permute.xlu0 %6170  ;;  %v8238_v49 = vsel %vm578_vm0, %v12876_v5, %v8059_v44 }
 0x5af   : > { %v6270_v11 = vsel %vm611_vm1, %v6238_v20, %v6171_v16 }
 0x5b0   : > { %14060 = vmatprep.mubr.msk.f32.mxu0 %vm1068_vm2, %v6270_v11 }
 0x5b1   : > { %v8061_v18 = vpop.permute.xlu1 %8060 }
 0x5b2   : > { %v6173_v26 = vpop.permute.xlu0 %6172  ;;  %v8239_v13 = vsel %vm578_vm0, %v19870_v35, %v8061_v18 }
 0x5b3   : > { %v6271_v58 = vsel %vm611_vm1, %v6239_v62, %v6173_v26 }
 0x5b4   : > { %14061 = vmatmul.mubr.msk.f32.gmra.mrb[60].mxu0 %vm1068_vm2, %v6271_v58 }
 0x5b5   : > { %v8173_v36 = vpop.permute.xlu1 %8172 }
 0x5b6   : > { %v8271_v47 = vsel %vm611_vm1, %v8239_v13, %v8173_v36  ;;  %v8171_v40 = vpop.permute.xlu0 %8170  ;;  %v22244_v36 = vld [vmem:[#allocation14_spill] sm:$0xff] }
 0x5b7   : > { %v8270_v15 = vsel %vm611_vm1, %v8238_v49, %v8171_v40 }
 0x5b8   : > { %14222 = vmatprep.mubr.msk.f32.mxu1 %vm1068_vm2, %v8270_v15 }
 0x5b9   : > { %14223 = vmatmul.mubr.msk.f32.gmra.mrb[92].mxu1 %vm1068_vm2, %v8271_v47  ;;  %v8063_v39 = vpop.permute.xlu1 %8062  ;;  %v22245_v47 = vld [vmem:[#allocation15_spill] sm:$0xff] }
 0x5ba   : > { %v6175_v34 = vpop.permute.xlu0 %6174  ;;  %v8240_v28 = vsel %vm578_vm0, %v12878_v48, %v8063_v39 }
 0x5bb   : > { %v6272_v35 = vsel %vm611_vm1, %v6240_v63, %v6175_v34 }
 0x5bc   : > { %14063 = vmatprep.mubr.msk.f32.mxu0 %vm1068_vm2, %v6272_v35 }
 0x5bd   : > { %v8065_v1 = vpop.permute.xlu1 %8064 }
 0x5be   : > { %v6177_v45 = vpop.permute.xlu0 %6176  ;;  %v8241_v27 = vsel %vm578_vm0, %v19902_v7, %v8065_v1  ;;  %v22246_v1 = vld [vmem:[#allocation131_spill] sm:$0xff] }
 0x5bf   : > { %v6273_v8 = vsel %vm611_vm1, %v6241_v9, %v6177_v45  ;;  %v22247_v45 = vld [vmem:[#allocation132_spill] sm:$0xff] }
 0x5c0   : > { %14064 = vmatmul.mubr.msk.f32.gmra.mrb[62].mxu0 %vm1068_vm2, %v6273_v8 }
 0x5c1   : > { %v8177_v38 = vpop.permute.xlu1 %8176 }
 0x5c2   : > { %v8273_v21 = vsel %vm611_vm1, %v8241_v27, %v8177_v38  ;;  %v8175_v3 = vpop.permute.xlu0 %8174 }
 0x5c3   : > { %v8272_v43 = vsel %vm611_vm1, %v8240_v28, %v8175_v3  ;;  %v22248_v3 = vld [vmem:[#allocation25_spill] sm:$0xff] }
 0x5c4   : > { %14225 = vmatprep.mubr.msk.f32.mxu1 %vm1068_vm2, %v8272_v43 }
 0x5c5   : > { %14226 = vmatmul.mubr.msk.f32.gmra.mrb[94].mxu1 %vm1068_vm2, %v8273_v21  ;;  %v20185_v31 = vpop.permute.xlu1 %8665 }
 0x5c6   : > { %v20187_v29 = vpop.permute.xlu0 %8663  ;;  %v9017_v43 = vsel %vm9015_vm3, %v22248_v3, %v20185_v31 }
 0x5ca   : > { %v20193_v10 = vpop.permute.xlu0 %8667 }
 0x5ce   : > { %v20199_v4 = vpop.permute.xlu0 %8671 }
 0x5d2   : > { %v20205_v57 = vpop.permute.xlu0 %8675 }
 0x5d6   : > { %v20211_v42 = vpop.permute.xlu0 %8679 }
 0x5da   : > { %v20217_v11 = vpop.permute.xlu0 %8683 }
 0x5de   : > { %v20223_v26 = vpop.permute.xlu0 %8687 }
 0x5e2   : > { %v20231_v49 = vpop.permute.xlu0 %8691 }
 0x5e6   : > { %v20239_v39 = vpop.permute.xlu0 %8695 }
 0x5ea   : > { %v20247_v9 = vpop.permute.xlu0 %8699 }
 0x5ee   : > { %v8792_v38 = vpop.permute.xlu0 %8791 }
 0x5f8   : > { %v14182_v2 = vpop.f32.mrb[64].mxu1 }
 0x5f9   : > { %v8440_v0 = vpop.f32.mrb[65].mxu1  ;;  %8921 = vrot.lane.b32.xlu1 %v14182_v2, %s14825_s23  ;;  %v20261_v2 = vld [vmem:[%s21523_s2] ss:$0 sm:$0xff] }
 0x5fa   : > { %8919 = vrot.lane.b32.xlu0 %v8440_v0, %s14825_s23  ;;  %v22249_v0 = vld [vmem:[#allocation7_spill] sm:$0xff] }
 0x5fd   : > { %8797 = vrot.lane.b32.xlu1 %v19791_v56, %s14824_s14 }
 0x5fe   : > { %8795 = vrot.lane.b32.xlu0 %v19798_v60, %s14824_s14 }
 0x600   : > { %v14185_v7 = vpop.f32.mrb[66].mxu1 }
 0x601   : > { %v8450_v52 = vpop.f32.mrb[67].mxu1  ;;  %8925 = vrot.lane.b32.xlu1 %v14185_v7, %s14825_s23  ;;  %v9016_v7 = vsel %vm9015_vm3, %v22249_v0, %v20187_v29 }
 0x602   : > { %8923 = vrot.lane.b32.xlu0 %v8450_v52, %s14825_s23 }
 0x605   : > { %8801 = vrot.lane.b32.xlu1 %v19811_v41, %s14824_s14 }
 0x606   : > { %8799 = vrot.lane.b32.xlu0 %v19816_v54, %s14824_s14 }
 0x608   : > { %v14188_v53 = vpop.f32.mrb[68].mxu1 }
 0x609   : > { %v8460_v22 = vpop.f32.mrb[69].mxu1  ;;  %8929 = vrot.lane.b32.xlu1 %v14188_v53, %s14825_s23 }
 0x60a   : > { %8927 = vrot.lane.b32.xlu0 %v8460_v22, %s14825_s23  ;;  %v9049_v22 = vsel %vm9048_vm4, %v9016_v7, %v8792_v38 }
 0x60d   : > { %8805 = vrot.lane.b32.xlu1 %v19821_v6, %s14824_s14 }
 0x60e   : > { %8803 = vrot.lane.b32.xlu0 %v19826_v61, %s14824_s14 }
 0x610   : > { %v14191_v56 = vpop.f32.mrb[70].mxu1 }
 0x611   : > { %v8470_v60 = vpop.f32.mrb[71].mxu1  ;;  %8933 = vrot.lane.b32.xlu1 %v14191_v56, %s14825_s23 }
 0x612   : > { %8931 = vrot.lane.b32.xlu0 %v8470_v60, %s14825_s23 }
 0x615   : > { %8809 = vrot.lane.b32.xlu1 %v19834_v37, %s14824_s14 }
 0x616   : > { %8807 = vrot.lane.b32.xlu0 %v19840_v51, %s14824_s14 }
 0x618   : > { %v14194_v41 = vpop.f32.mrb[72].mxu1 }
 0x619   : > { %v8480_v54 = vpop.f32.mrb[73].mxu1  ;;  %8937 = vrot.lane.b32.xlu1 %v14194_v41, %s14825_s23 }
 0x61a   : > { %8935 = vrot.lane.b32.xlu0 %v8480_v54, %s14825_s23 }
 0x61d   : > { %8813 = vrot.lane.b32.xlu1 %v19850_v14, %s14824_s14 }
 0x61e   : > { %8811 = vrot.lane.b32.xlu0 %v19856_v46, %s14824_s14  ;;  %v20191_v46 = vpop.permute.xlu1 %8669 }
 0x620   : > { %v14197_v6 = vpop.f32.mrb[74].mxu1 }
 0x621   : > { %v8490_v61 = vpop.f32.mrb[75].mxu1  ;;  %8941 = vrot.lane.b32.xlu1 %v14197_v6, %s14825_s23  ;;  %v22250_v6 = vld [vmem:[#allocation133_spill] sm:$0xff] }
 0x622   : > { %8939 = vrot.lane.b32.xlu0 %v8490_v61, %s14825_s23  ;;  %v20197_v33 = vpop.permute.xlu1 %8673 }
 0x626   : > { %v20203_v55 = vpop.permute.xlu1 %8677 }
 0x627   : > { %v14038_v37 = vpop.f32.mrb[44].mxu0 }
 0x628   : > { %8817 = vrot.lane.b32.xlu1 %v14038_v37, %s14824_s14  ;;  %v6500_v51 = vpop.f32.mrb[45].mxu0  ;;  %v22251_v37 = vld [vmem:[#allocation135_spill] sm:$0xff] }
 0x629   : > { %8815 = vrot.lane.b32.xlu0 %v6500_v51, %s14824_s14 }
 0x62a   : > { %v20209_v24 = vpop.permute.xlu1 %8681 }
 0x62c   : > { %v14200_v14 = vpop.f32.mrb[76].mxu1 }
 0x62d   : > { %v8500_v32 = vpop.f32.mrb[77].mxu1  ;;  %8945 = vrot.lane.b32.xlu1 %v14200_v14, %s14825_s23 }
 0x62e   : > { %8943 = vrot.lane.b32.xlu0 %v8500_v32, %s14825_s23  ;;  %v20215_v16 = vpop.permute.xlu1 %8685 }
 0x632   : > { %v20221_v62 = vpop.permute.xlu1 %8689 }
 0x633   : > { %v14041_v25 = vpop.f32.mrb[46].mxu0 }
 0x634   : > { %8821 = vrot.lane.b32.xlu1 %v14041_v25, %s14824_s14  ;;  %v6510_v23 = vpop.f32.mrb[47].mxu0 }
 0x635   : > { %8819 = vrot.lane.b32.xlu0 %v6510_v23, %s14824_s14  ;;  %v22252_v23 = vld [vmem:[#allocation8_spill] sm:$0xff] }
 0x636   : > { %v20227_v13 = vpop.permute.xlu1 %8693 }
 0x638   : > { %v14203_v59 = vpop.f32.mrb[78].mxu1 }
 0x639   : > { %v8510_v50 = vpop.f32.mrb[79].mxu1  ;;  %8949 = vrot.lane.b32.xlu1 %v14203_v59, %s14825_s23  ;;  %v9019_v59 = vsel %vm9015_vm3, %v22252_v23, %v20191_v46 }
 0x63a   : > { %8947 = vrot.lane.b32.xlu0 %v8510_v50, %s14825_s23  ;;  %v20237_v15 = vpop.permute.xlu1 %8697  ;;  %v22253_v50 = vld [vmem:[#allocation9_spill] sm:$0xff] }
 0x63e   : > { %v20243_v35 = vpop.permute.xlu1 %8701 }
 0x63f   : > { %v14044_v30 = vpop.f32.mrb[48].mxu0 }
 0x640   : > { %8825 = vrot.lane.b32.xlu1 %v14044_v30, %s14824_s14  ;;  %v6520_v12 = vpop.f32.mrb[49].mxu0  ;;  %v9018_v30 = vsel %vm9015_vm3, %v22253_v50, %v20193_v10 }
 0x641   : > { %8823 = vrot.lane.b32.xlu0 %v6520_v12, %s14824_s14 }
 0x642   : > { %v8794_v27 = vpop.permute.xlu1 %8793 }
 0x643   : > { %v9050_v52 = vsel %vm9048_vm4, %v9017_v43, %v8794_v27 }
 0x644   : > { %v14206_v44 = vpop.f32.mrb[80].mxu1 }
 0x645   : > { %v8520_v20 = vpop.f32.mrb[81].mxu1  ;;  %8953 = vrot.lane.b32.xlu1 %v14206_v44, %s14825_s23 }
 0x646   : > { %8951 = vrot.lane.b32.xlu0 %v8520_v20, %s14825_s23 }
 0x64b   : > { %v14047_v18 = vpop.f32.mrb[50].mxu0 }
 0x64c   : > { %8829 = vrot.lane.b32.xlu1 %v14047_v18, %s14824_s14  ;;  %v6530_v17 = vpop.f32.mrb[51].mxu0 }
 0x64d   : > { %8827 = vrot.lane.b32.xlu0 %v6530_v17, %s14824_s14 }
 0x650   : > { %v14209_v5 = vpop.f32.mrb[82].mxu1 }
 0x651   : > { %v8530_v58 = vpop.f32.mrb[83].mxu1  ;;  %8957 = vrot.lane.b32.xlu1 %v14209_v5, %s14825_s23 }
 0x652   : > { %8955 = vrot.lane.b32.xlu0 %v8530_v58, %s14825_s23 }
 0x655   : > { %8705 = vrot.lane.b32.xlu1 %v22244_v36, %s14823_s13 }
 0x656   : > { %8703 = vrot.lane.b32.xlu0 %v22245_v47, %s14823_s13 }
 0x657   : > { %v14050_v40 = vpop.f32.mrb[52].mxu0 }
 0x658   : > { %v6540_v19 = vpop.f32.mrb[53].mxu0 }
 0x659   : > { %8833 = vrot.lane.b32.xlu1 %v14050_v40, %s14824_s14 }
 0x65a   : > { %8831 = vrot.lane.b32.xlu0 %v6540_v19, %s14824_s14 }
 0x65c   : > { %v14212_v63 = vpop.f32.mrb[84].mxu1 }
 0x65d   : > { %v8540_v34 = vpop.f32.mrb[85].mxu1  ;;  %8961 = vrot.lane.b32.xlu1 %v14212_v63, %s14825_s23 }
 0x65e   : > { %8959 = vrot.lane.b32.xlu0 %v8540_v34, %s14825_s23  ;;  %v22254_v34 = vld [vmem:[#allocation136_spill] sm:$0xff] }
 0x661   : > { %8709 = vrot.lane.b32.xlu1 %v22246_v1, %s14823_s13  ;;  %v22255_v1 = vld [vmem:[#allocation108_spill] sm:$0xff] }
 0x662   : > { %8707 = vrot.lane.b32.xlu0 %v22247_v45, %s14823_s13  ;;  %v9021_v45 = vsel %vm9015_vm3, %v22255_v1, %v20197_v33 }
 0x663   : > { %v14053_v48 = vpop.f32.mrb[54].mxu0 }
 0x664   : > { %v6550_v8 = vpop.f32.mrb[55].mxu0 }
 0x665   : > { %8837 = vrot.lane.b32.xlu1 %v14053_v48, %s14824_s14  ;;  %v22256_v48 = vld [vmem:[#allocation138_spill] sm:$0xff] }
 0x666   : > { %8835 = vrot.lane.b32.xlu0 %v6550_v8, %s14824_s14  ;;  %v22257_v8 = vld [vmem:[#allocation109_spill] sm:$0xff] }
 0x667   : > { %v9020_v27 = vsel %vm9015_vm3, %v22257_v8, %v20199_v4 }
 0x668   : > { %v14215_v28 = vpop.f32.mrb[86].mxu1 }
 0x669   : > { %v8550_v21 = vpop.f32.mrb[87].mxu1  ;;  %8965 = vrot.lane.b32.xlu1 %v14215_v28, %s14825_s23 }
 0x66a   : > { %8963 = vrot.lane.b32.xlu0 %v8550_v21, %s14825_s23 }
 0x66b   : > { %v8922_v53 = vpop.permute.xlu1 %8921 }
 0x66c   : > { %v9083_v56 = vsel %vm9081_vm5, %v9050_v52, %v8922_v53  ;;  %v8920_v60 = vpop.permute.xlu0 %8919 }
 0x66d   : > { %v9122_v41 = vadd.f32 %v20261_v2, %v9083_v56  ;;  %v9082_v54 = vsel %vm9081_vm5, %v9049_v22, %v8920_v60  ;;  %8713 = vrot.lane.b32.xlu1 %v22250_v6, %s14823_s13  ;;  %v22258_v6 = vld [vmem:[#allocation110_spill] sm:$0xff] }
 0x66e   : > { %v9121_v61 = vadd.f32 %v20261_v2, %v9082_v54  ;;  %8711 = vrot.lane.b32.xlu0 %v22251_v37, %s14823_s13  ;;  %v22259_v37 = vld [vmem:[#allocation111_spill] sm:$0xff] }
 0x66f   : > { %v9154_v51 = vmax.f32 %v9122_v41, 0.0  ;;  %v8798_v31 = vpop.permute.xlu1 %8797  ;;  %v14056_v29 = vpop.f32.mrb[56].mxu0 }
 0x670   : > { %v9153_v14 = vmax.f32 %v9121_v61, 0.0  ;;  %v8796_v32 = vpop.permute.xlu0 %8795  ;;  %v6560_v25 = vpop.f32.mrb[57].mxu0  ;;  %v9052_v12 = vsel %vm9048_vm4, %v9019_v59, %v8798_v31  ;;  %v9023_v61 = vsel %vm9015_vm3, %v22258_v6, %v20203_v55  ;;  %v22260_v59 = vld [vmem:[#allocation81_spill] sm:$0xff] }
 0x671   : > { %9188 = vst.msk [vmem:[#allocation2 + $0x21] sm:$0xff] %vm578_vm0, %v9154_v51  ;;  %8841 = vrot.lane.b32.xlu1 %v14056_v29, %s14824_s14  ;;  %v9051_v20 = vsel %vm9048_vm4, %v9018_v30, %v8796_v32  ;;  %v22261_v30 = vld [vmem:[#allocation139_spill] sm:$0xff] }
 0x672   : > { %9242 = vst.msk [vmem:[#allocation2 + $0x23] sm:$0x40] %vm9240_vm6, %v9154_v51  ;;  %8839 = vrot.lane.b32.xlu0 %v6560_v25, %s14824_s14  ;;  %v9022_v51 = vsel %vm9015_vm3, %v22259_v37, %v20205_v57 }
 0x673   : > { %9187 = vst.msk [vmem:[#allocation2 + $0x19] sm:$0xff] %vm578_vm0, %v9153_v14  ;;  %v8926_v44 = vpop.permute.xlu1 %8925 }
 0x674   : > { %9223 = vst.msk [vmem:[#allocation2 + $0x17] sm:$0x2] %vm9221_vm7, %v9153_v14  ;;  %v9085_v18 = vsel %vm9081_vm5, %v9052_v12, %v8926_v44  ;;  %v14218_v17 = vpop.f32.mrb[88].mxu1  ;;  %v8924_v5 = vpop.permute.xlu0 %8923 }
 0x675   : > { %v9124_v46 = vadd.f32 %v20261_v2, %v9085_v18  ;;  %v9084_v58 = vsel %vm9081_vm5, %v9051_v20, %v8924_v5  ;;  %v8560_v36 = vpop.f32.mrb[89].mxu1  ;;  %8969 = vrot.lane.b32.xlu1 %v14218_v17, %s14825_s23  ;;  %v22262_v5 = vld [vmem:[#allocation112_spill] sm:$0xff] }
 0x676   : > { %v9123_v47 = vadd.f32 %v20261_v2, %v9084_v58  ;;  %8967 = vrot.lane.b32.xlu0 %v8560_v36, %s14825_s23  ;;  %v22263_v58 = vld [vmem:[#allocation36_spill] sm:$0xff] }
 0x677   : > { %v9156_v10 = vmax.f32 %v9124_v46, 0.0  ;;  %v8802_v40 = vpop.permute.xlu1 %8801  ;;  %v9025_v46 = vsel %vm9015_vm3, %v22262_v5, %v20209_v24  ;;  %v9024_v36 = vsel %vm9015_vm3, %v22263_v58, %v20211_v42 }
 0x678   : > { %v9155_v19 = vmax.f32 %v9123_v47, 0.0  ;;  %v8800_v63 = vpop.permute.xlu0 %8799  ;;  %v9054_v38 = vsel %vm9048_vm4, %v9021_v45, %v8802_v40 }
 0x679   : > { %9186 = vst.msk [vmem:[#allocation2 + $0x9] sm:$0xff] %vm578_vm0, %v9156_v10  ;;  %9190 = vst.msk [vmem:[#allocation2 + $0x39] sm:$0xff] %vm578_vm0, %v9156_v10  ;;  %8717 = vrot.lane.b32.xlu1 %v22254_v34, %s14823_s13  ;;  %v9053_v33 = vsel %vm9048_vm4, %v9020_v27, %v8800_v63  ;;  %v12948_v27 = vld [vmem:[%s21524_s3 + $0x18] sm:$0xff]  ;;  %v20418_v5 = vld [vmem:[#allocation2 + $0x22] sm:$0xff] }
 0x67a   : > { %9241 = vst.msk [vmem:[#allocation2 + $0xb] sm:$0x40] %vm9240_vm6, %v9156_v10  ;;  %9243 = vst.msk [vmem:[#allocation2 + $0x3b] sm:$0x40] %vm9240_vm6, %v9156_v10  ;;  %8715 = vrot.lane.b32.xlu0 %v22256_v48, %s14823_s13  ;;  %v20424_v58 = vld [vmem:[#allocation2 + $0x1a] sm:$0xff] }
 0x67b   : > { %9185 = vst.msk [vmem:[#allocation2 + $0x1] sm:$0xff] %vm578_vm0, %v9155_v19  ;;  %9189 = vst.msk [vmem:[#allocation2 + $0x31] sm:$0xff] %vm578_vm0, %v9155_v19  ;;  %v8930_v28 = vpop.permute.xlu1 %8929  ;;  %v14059_v21 = vpop.f32.mrb[58].mxu0 }
 0x67c   : > { %9222 = vst.msk [vmem:[#allocation2 - $0x1] sm:$0x2] %vm9221_vm7, %v9155_v19  ;;  %9224 = vst.msk [vmem:[#allocation2 + $0x2f] sm:$0x2] %vm9221_vm7, %v9155_v19  ;;  %v9087_v3 = vsel %vm9081_vm5, %v9054_v38, %v8930_v28  ;;  %v8928_v43 = vpop.permute.xlu0 %8927  ;;  %v6570_v0 = vpop.f32.mrb[59].mxu0  ;;  %v12949_v38 = vld [vmem:[%s21524_s3 + $0x20] sm:$0xff] }
 0x67d   : > { %v9126_v7 = vadd.f32 %v20261_v2, %v9087_v3  ;;  %v9086_v52 = vsel %vm9081_vm5, %v9053_v33, %v8928_v43  ;;  %8845 = vrot.lane.b32.xlu1 %v14059_v21, %s14824_s14  ;;  %v14438_v33 = vpack.c.bf16 %v12949_v38, %v12948_v27  ;;  %v22264_v3 = vld [vmem:[#allocation73_spill] sm:$0xff]  ;;  %v22265_v43 = vld [vmem:[#allocation51_spill] sm:$0xff] }
 0x67e   : > { %v9125_v53 = vadd.f32 %v20261_v2, %v9086_v52  ;;  %8843 = vrot.lane.b32.xlu0 %v6570_v0, %s14824_s14  ;;  %v9027_v0 = vsel %vm9015_vm3, %v22265_v43, %v20215_v16  ;;  %v22267_v52 = vld [vmem:[#allocation38_spill] sm:$0xff] }
 0x67f   : > { %v9158_v4 = vmax.f32 %v9126_v7, 0.0  ;;  %v8806_v22 = vpop.permute.xlu1 %8805  ;;  %v22266_v7 = vld [vmem:[#allocation91_spill] sm:$0xff]  ;;  %14439 = vmatprep.subr.bf16.mxu0 %v14438_v33 }
 0x680   : > { %v9157_v56 = vmax.f32 %v9125_v53, 0.0  ;;  %v14221_v60 = vpop.f32.mrb[90].mxu1  ;;  %v8804_v41 = vpop.permute.xlu0 %8803  ;;  %v9056_v31 = vsel %vm9048_vm4, %v9023_v61, %v8806_v22  ;;  %v9026_v53 = vsel %vm9015_vm3, %v22267_v52, %v20217_v11  ;;  %14441 = vmatpush3.bf16.msra.mxu0 %v14438_v33  ;;  %v12950_v11 = vld [vmem:[%s21524_s3 + $0x28] sm:$0xff] }
 0x681   : > { %9192 = vst.msk [vmem:[#allocation2 + $0x51] sm:$0xff] %vm578_vm0, %v9158_v4  ;;  %v8570_v54 = vpop.f32.mrb[91].mxu1  ;;  %8973 = vrot.lane.b32.xlu1 %v14221_v60, %s14825_s23  ;;  %v9055_v14 = vsel %vm9048_vm4, %v9022_v51, %v8804_v41  ;;  %14232 = vmatprep.subr.mxu0 %v12950_v11 }
 0x682   : > { %9244 = vst.msk [vmem:[#allocation2 + $0x53] sm:$0x40] %vm9240_vm6, %v9158_v4  ;;  %8971 = vrot.lane.b32.xlu0 %v8570_v54, %s14825_s23 }
 0x683   : > { %9191 = vst.msk [vmem:[#allocation2 + $0x49] sm:$0xff] %vm578_vm0, %v9157_v56  ;;  %v8934_v29 = vpop.permute.xlu1 %8933 }
 0x684   : > { %9225 = vst.msk [vmem:[#allocation2 + $0x47] sm:$0x2] %vm9221_vm7, %v9157_v56  ;;  %v9089_v32 = vsel %vm9081_vm5, %v9056_v31, %v8934_v29  ;;  %v8932_v25 = vpop.permute.xlu0 %8931  ;;  %14233 = vmatpush3.msra.mxu0 %v12950_v11 }
 0x685   : > { %v9128_v55 = vadd.f32 %v20261_v2, %v9089_v32  ;;  %v9088_v23 = vsel %vm9081_vm5, %v9055_v14, %v8932_v25  ;;  %8721 = vrot.lane.b32.xlu1 %v22260_v59, %s14823_s13  ;;  %v22268_v59 = vld [vmem:[#allocation113_spill] sm:$0xff] }
 0x686   : > { %v9127_v50 = vadd.f32 %v20261_v2, %v9088_v23  ;;  %8719 = vrot.lane.b32.xlu0 %v22261_v30, %s14823_s13  ;;  %v20405_v23 = vld [vmem:[#allocation2 + $0x19] sm:$0xff]  ;;  %v22269_v30 = vld [vmem:[#allocation114_spill] sm:$0xff] }
 0x687   : > { %v9160_v57 = vmax.f32 %v9128_v55, 0.0  ;;  %v8810_v12 = vpop.permute.xlu1 %8809  ;;  %v14062_v44 = vpop.f32.mrb[60].mxu0  ;;  %v20401_v55 = vld [vmem:[#allocation2 + $0x21] sm:$0xff] }
 0x688   : > { %v9159_v20 = vmax.f32 %v9127_v50, 0.0  ;;  %v8808_v18 = vpop.permute.xlu0 %8807  ;;  %v6580_v17 = vpop.f32.mrb[61].mxu0  ;;  %v9058_v47 = vsel %vm9048_vm4, %v9025_v46, %v8810_v12  ;;  %v9029_v50 = vsel %vm9015_vm3, %v22268_v59, %v20221_v62  ;;  %v20458_v33 = vld [vmem:[#allocation2 + $0x51] sm:$0xff] }
 0x689   : > { %9194 = vst.msk [vmem:[#allocation2 + $0x69] sm:$0xff] %vm578_vm0, %v9160_v57  ;;  %8849 = vrot.lane.b32.xlu1 %v14062_v44, %s14824_s14  ;;  %v9057_v40 = vsel %vm9048_vm4, %v9024_v36, %v8808_v18  ;;  %v20469_v52 = vld [vmem:[#allocation2 + $0x52] sm:$0xff] }
 0x68a   : > { %9245 = vst.msk [vmem:[#allocation2 + $0x6b] sm:$0x40] %vm9240_vm6, %v9160_v57  ;;  %8847 = vrot.lane.b32.xlu0 %v6580_v17, %s14824_s14  ;;  %v9028_v57 = vsel %vm9015_vm3, %v22269_v30, %v20223_v26  ;;  %v20464_v43 = vld [vmem:[#allocation2 + $0x49] sm:$0xff] }
 0x68b   : > { %9193 = vst.msk [vmem:[#allocation2 + $0x61] sm:$0xff] %vm578_vm0, %v9159_v20  ;;  %v8938_v10 = vpop.permute.xlu1 %8937 }
 0x68c   : > { %9226 = vst.msk [vmem:[#allocation2 + $0x5f] sm:$0x2] %vm9221_vm7, %v9159_v20  ;;  %v9091_v19 = vsel %vm9081_vm5, %v9058_v47, %v8938_v10  ;;  %v14224_v63 = vpop.f32.mrb[92].mxu1  ;;  %v8936_v34 = vpop.permute.xlu0 %8935  ;;  %v20429_v10 = vld [vmem:[#allocation2 + $0x39] sm:$0xff] }
 0x68d   : > { %v9130_v24 = vadd.f32 %v20261_v2, %v9091_v19  ;;  %v9090_v1 = vsel %vm9081_vm5, %v9057_v40, %v8936_v34  ;;  %v8580_v45 = vpop.f32.mrb[93].mxu1  ;;  %8977 = vrot.lane.b32.xlu1 %v14224_v63, %s14825_s23  ;;  %v20435_v40 = vld [vmem:[#allocation2 + $0x31] sm:$0xff]  ;;  %v20441_v34 = vld [vmem:[#allocation2 + $0x3a] sm:$0xff] }
 0x68e   : > { %v9129_v48 = vadd.f32 %v20261_v2, %v9090_v1  ;;  %8975 = vrot.lane.b32.xlu0 %v8580_v45, %s14825_s23  ;;  %v22270_v1 = vld [vmem:[#allocation115_spill] sm:$0xff] }
 0x68f   : > { %v9162_v42 = vmax.f32 %v9130_v24, 0.0  ;;  %v8814_v8 = vpop.permute.xlu1 %8813  ;;  %v20445_v24 = vld [vmem:[#allocation2 + $0x32] sm:$0xff]  ;;  %v9031_v45 = vsel %vm9015_vm3, %v22270_v1, %v20227_v13 }
 0x690   : > { %v9161_v28 = vmax.f32 %v9129_v48, 0.0  ;;  %v8812_v21 = vpop.permute.xlu0 %8811  ;;  %v9060_v4 = vsel %vm9048_vm4, %v9027_v0, %v8814_v8  ;;  %v22271_v48 = vld [vmem:[#allocation116_spill] sm:$0xff] }
 0x691   : > { %9196 = vst.msk [vmem:[#allocation2 + $0x81] sm:$0xff] %vm578_vm0, %v9162_v42  ;;  %8725 = vrot.lane.b32.xlu1 %v22264_v3, %s14823_s13  ;;  %v9059_v60 = vsel %vm9048_vm4, %v9026_v53, %v8812_v21  ;;  %v20475_v53 = vld [vmem:[#allocation2 + $0x4a] sm:$0xff] }
 0x692   : > { %9246 = vst.msk [vmem:[#allocation2 + $0x83] sm:$0x40] %vm9240_vm6, %v9162_v42  ;;  %8723 = vrot.lane.b32.xlu0 %v22266_v7, %s14823_s13  ;;  %v9030_v42 = vsel %vm9015_vm3, %v22271_v48, %v20231_v49 }
 0x693   : > { %9195 = vst.msk [vmem:[#allocation2 + $0x79] sm:$0xff] %vm578_vm0, %v9161_v28  ;;  %v8942_v22 = vpop.permute.xlu1 %8941  ;;  %v14065_v56 = vpop.f32.mrb[62].mxu0 }
 0x694   : > { %9227 = vst.msk [vmem:[#allocation2 + $0x77] sm:$0x2] %vm9221_vm7, %v9161_v28  ;;  %v9093_v16 = vsel %vm9081_vm5, %v9060_v4, %v8942_v22  ;;  %v8940_v41 = vpop.permute.xlu0 %8939  ;;  %v6590_v54 = vpop.f32.mrb[63].mxu0 }
 0x695   : > { %v9132_v6 = vadd.f32 %v20261_v2, %v9093_v16  ;;  %v9092_v61 = vsel %vm9081_vm5, %v9059_v60, %v8940_v41  ;;  %8853 = vrot.lane.b32.xlu1 %v14065_v56, %s14824_s14  ;;  %v20481_v56 = vld [vmem:[#allocation2 + $0x69] sm:$0xff]  ;;  %v20485_v60 = vld [vmem:[#allocation2 + $0x61] sm:$0xff] }
 0x696   : > { %v9131_v37 = vadd.f32 %v20261_v2, %v9092_v61  ;;  %8851 = vrot.lane.b32.xlu0 %v6590_v54, %s14824_s14  ;;  %v22272_v16 = vld [vmem:[#allocation117_spill] sm:$0xff]  ;;  %v22273_v54 = vld [vmem:[#allocation118_spill] sm:$0xff] }
 0x697   : > { %v9164_v51 = vmax.f32 %v9132_v6, 0.0  ;;  %v9033_v41 = vsel %vm9015_vm3, %v22272_v16, %v20237_v15  ;;  %v9032_v6 = vsel %vm9015_vm3, %v22273_v54, %v20239_v39 }
 0x698   : > { %v9163_v31 = vmax.f32 %v9131_v37, 0.0  ;;  %v14227_v29 = vpop.f32.mrb[94].mxu1 }
 0x699   : > { %9198 = vst.msk [vmem:[#allocation2 + $0x99] sm:$0xff] %vm578_vm0, %v9164_v51  ;;  %v8590_v14 = vpop.f32.mrb[95].mxu1  ;;  %8981 = vrot.lane.b32.xlu1 %v14227_v29, %s14825_s23  ;;  %v20498_v29 = vld [vmem:[#allocation2 + $0x6a] sm:$0xff] }
 0x69a   : > { %9247 = vst.msk [vmem:[#allocation2 + $0x9b] sm:$0x40] %vm9240_vm6, %v9164_v51  ;;  %v8818_v32 = vpop.permute.xlu1 %8817  ;;  %8979 = vrot.lane.b32.xlu0 %v8590_v14, %s14825_s23  ;;  %v20515_v30 = vld [vmem:[#allocation2 + $0x79] sm:$0xff] }
 0x69b   : > { %9197 = vst.msk [vmem:[#allocation2 + $0x91] sm:$0xff] %vm578_vm0, %v9163_v31  ;;  %v8816_v25 = vpop.permute.xlu0 %8815  ;;  %v9062_v12 = vsel %vm9048_vm4, %v9029_v50, %v8818_v32  ;;  %v20504_v32 = vld [vmem:[#allocation2 + $0x62] sm:$0xff] }
 0x69c   : > { %9228 = vst.msk [vmem:[#allocation2 + $0x8f] sm:$0x2] %vm9221_vm7, %v9163_v31  ;;  %v9061_v20 = vsel %vm9048_vm4, %v9028_v57, %v8816_v25  ;;  %v20509_v50 = vld [vmem:[#allocation2 + $0x81] sm:$0xff] }
 0x69d   : > { %9809 = vrot.lane.b32.xlu1 %v20401_v55, %s14821_s24 }
 0x69e   : > { %9807 = vrot.lane.b32.xlu0 %v20405_v23, %s14821_s24 }
 0x69f   : > { %v8946_v44 = vpop.permute.xlu1 %8945 }
 0x6a0   : > { %v9095_v18 = vsel %vm9081_vm5, %v9062_v12, %v8946_v44  ;;  %v8944_v17 = vpop.permute.xlu0 %8943  ;;  %v20521_v44 = vld [vmem:[#allocation2 + $0x82] sm:$0xff]  ;;  %v20538_v1 = vld [vmem:[#allocation2 + $0x99] sm:$0xff] }
 0x6a1   : > { %v9134_v46 = vadd.f32 %v20261_v2, %v9095_v18  ;;  %v9094_v62 = vsel %vm9081_vm5, %v9061_v20, %v8944_v17  ;;  %9937 = vrot.lane.b32.xlu1 %v20418_v5, %s14822_s6  ;;  %v20525_v20 = vld [vmem:[#allocation2 + $0x7a] sm:$0xff]  ;;  %v22274_v18 = vld [vmem:[#allocation119_spill] sm:$0xff] }
 0x6a2   : > { %v9133_v26 = vadd.f32 %v20261_v2, %v9094_v62  ;;  %9935 = vrot.lane.b32.xlu0 %v20424_v58, %s14822_s6  ;;  %v9035_v17 = vsel %vm9015_vm3, %v22274_v18, %v20243_v35  ;;  %v20544_v48 = vld [vmem:[#allocation2 + $0x91] sm:$0xff] }
 0x6a3   : > { %v9166_v36 = vmax.f32 %v9134_v46, 0.0  ;;  %v22275_v46 = vld [vmem:[#allocation120_spill] sm:$0xff] }
 0x6a4   : > { %v9165_v47 = vmax.f32 %v9133_v26, 0.0  ;;  %v9034_v62 = vsel %vm9015_vm3, %v22275_v46, %v20247_v9 }
 0x6a5   : > { %9200 = vst.msk [vmem:[#allocation2 + $0xb1] sm:$0xff] %vm578_vm0, %v9166_v36  ;;  %9813 = vrot.lane.b32.xlu1 %v20429_v10, %s14821_s24 }
 0x6a6   : > { %9248 = vst.msk [vmem:[#allocation2 + $0xb3] sm:$0x40] %vm9240_vm6, %v9166_v36  ;;  %v8822_v19 = vpop.permute.xlu1 %8821  ;;  %9811 = vrot.lane.b32.xlu0 %v20435_v40, %s14821_s24 }
 0x6a7   : > { %9199 = vst.msk [vmem:[#allocation2 + $0xa9] sm:$0xff] %vm578_vm0, %v9165_v47  ;;  %v8820_v63 = vpop.permute.xlu0 %8819  ;;  %v9064_v8 = vsel %vm9048_vm4, %v9031_v45, %v8822_v19 }
 0x6a8   : > { %9229 = vst.msk [vmem:[#allocation2 + $0xa7] sm:$0x2] %vm9221_vm7, %v9165_v47  ;;  %v9063_v38 = vsel %vm9048_vm4, %v9030_v42, %v8820_v63 }
 0x6a9   : > { %9941 = vrot.lane.b32.xlu1 %v20441_v34, %s14822_s6 }
 0x6aa   : > { %9939 = vrot.lane.b32.xlu0 %v20445_v24, %s14822_s6 }
 0x6ab   : > { %v8950_v27 = vpop.permute.xlu1 %8949 }
 0x6ac   : > { %v9097_v28 = vsel %vm9081_vm5, %v9064_v8, %v8950_v27  ;;  %v8948_v21 = vpop.permute.xlu0 %8947 }
 0x6ad   : > { %v9136_v3 = vadd.f32 %v20261_v2, %v9097_v28  ;;  %v9096_v13 = vsel %vm9081_vm5, %v9063_v38, %v8948_v21  ;;  %9817 = vrot.lane.b32.xlu1 %v20458_v33, %s14821_s24  ;;  %v20549_v28 = vld [vmem:[#allocation2 + $0x9a] sm:$0xff]  ;;  %v20555_v21 = vld [vmem:[#allocation2 + $0x92] sm:$0xff] }
 0x6ae   : > { %v9135_v49 = vadd.f32 %v20261_v2, %v9096_v13  ;;  %9815 = vrot.lane.b32.xlu0 %v20464_v43, %s14821_s24 }
 0x6af   : > { %v9168_v0 = vmax.f32 %v9136_v3, 0.0 }
 0x6b0   : > { %v9167_v7 = vmax.f32 %v9135_v49, 0.0  ;;  %v20561_v49 = vld [vmem:[#allocation2 + $0xb1] sm:$0xff] }
 0x6b1   : > { %9202 = vst.msk [vmem:[#allocation2 + $0xc9] sm:$0xff] %vm578_vm0, %v9168_v0  ;;  %9945 = vrot.lane.b32.xlu1 %v20469_v52, %s14822_s6 }
 0x6b2   : > { %9249 = vst.msk [vmem:[#allocation2 + $0xcb] sm:$0x40] %vm9240_vm6, %v9168_v0  ;;  %v8826_v4 = vpop.permute.xlu1 %8825  ;;  %9943 = vrot.lane.b32.xlu0 %v20475_v53, %s14822_s6  ;;  %v20565_v0 = vld [vmem:[#allocation2 + $0xa9] sm:$0xff] }
 0x6b3   : > { %9201 = vst.msk [vmem:[#allocation2 + $0xc1] sm:$0xff] %vm578_vm0, %v9167_v7  ;;  %v8824_v22 = vpop.permute.xlu0 %8823  ;;  %v9066_v61 = vsel %vm9048_vm4, %v9033_v41, %v8826_v4 }
 0x6b4   : > { %9230 = vst.msk [vmem:[#allocation2 + $0xbf] sm:$0x2] %vm9221_vm7, %v9167_v7  ;;  %v9065_v37 = vsel %vm9048_vm4, %v9032_v6, %v8824_v22  ;;  %v22276_v7 = vld [vmem:[#allocation26_spill] sm:$0xff]  ;;  %v22277_v22 = vld [vmem:[#allocation121_spill] sm:$0xff] }
 0x6b5   : > { %9821 = vrot.lane.b32.xlu1 %v20481_v56, %s14821_s24 }
 0x6b6   : > { %9819 = vrot.lane.b32.xlu0 %v20485_v60, %s14821_s24 }
 0x6b7   : > { %v8954_v11 = vpop.permute.xlu1 %8953 }
 0x6b8   : > { %v9099_v51 = vsel %vm9081_vm5, %v9066_v61, %v8954_v11  ;;  %v8952_v31 = vpop.permute.xlu0 %8951 }
 0x6b9   : > { %v9138_v14 = vadd.f32 %v20261_v2, %v9099_v51  ;;  %v9098_v15 = vsel %vm9081_vm5, %v9065_v37, %v8952_v31  ;;  %9949 = vrot.lane.b32.xlu1 %v20498_v29, %s14822_s6  ;;  %v20576_v37 = vld [vmem:[#allocation2 + $0xb2] sm:$0xff] }
 0x6ba   : > { %v9137_v39 = vadd.f32 %v20261_v2, %v9098_v15  ;;  %9947 = vrot.lane.b32.xlu0 %v20504_v32, %s14822_s6  ;;  %v20593_v18 = vld [vmem:[#allocation2 + $0xc1] sm:$0xff] }
 0x6bb   : > { %v9170_v25 = vmax.f32 %v9138_v14, 0.0  ;;  %v20582_v14 = vld [vmem:[#allocation2 + $0xaa] sm:$0xff] }
 0x6bc   : > { %v9169_v59 = vmax.f32 %v9137_v39, 0.0 }
 0x6bd   : > { %9204 = vst.msk [vmem:[#allocation2 + $0xe1] sm:$0xff] %vm578_vm0, %v9170_v25  ;;  %9825 = vrot.lane.b32.xlu1 %v20509_v50, %s14821_s24 }
 0x6be   : > { %9250 = vst.msk [vmem:[#allocation2 + $0xe3] sm:$0x40] %vm9240_vm6, %v9170_v25  ;;  %v8830_v57 = vpop.permute.xlu1 %8829  ;;  %9823 = vrot.lane.b32.xlu0 %v20515_v30, %s14821_s24 }
 0x6bf   : > { %9203 = vst.msk [vmem:[#allocation2 + $0xd9] sm:$0xff] %vm578_vm0, %v9169_v59  ;;  %v8828_v12 = vpop.permute.xlu0 %8827  ;;  %v9068_v26 = vsel %vm9048_vm4, %v9035_v17, %v8830_v57 }
 0x6c0   : > { %9231 = vst.msk [vmem:[#allocation2 + $0xd7] sm:$0x2] %vm9221_vm7, %v9169_v59  ;;  %v9067_v47 = vsel %vm9048_vm4, %v9034_v62, %v8828_v12  ;;  %v20587_v12 = vld [vmem:[#allocation2 + $0xc9] sm:$0xff] }
 0x6c1   : > { %9953 = vrot.lane.b32.xlu1 %v20521_v44, %s14822_s6  ;;  %v20599_v62 = vld [vmem:[#allocation2 + $0xca] sm:$0xff] }
 0x6c2   : > { %9951 = vrot.lane.b32.xlu0 %v20525_v20, %s14822_s6 }
 0x6c3   : > { %v8958_v36 = vpop.permute.xlu1 %8957 }
 0x6c4   : > { %v9101_v19 = vsel %vm9081_vm5, %v9068_v26, %v8958_v36  ;;  %v8956_v63 = vpop.permute.xlu0 %8955  ;;  %v20603_v26 = vld [vmem:[#allocation2 + $0xc2] sm:$0xff]  ;;  %v22278_v36 = vld [vmem:[#allocation27_spill] sm:$0xff] }
 0x6c5   : > { %v9140_v45 = vadd.f32 %v20261_v2, %v9101_v19  ;;  %v9100_v35 = vsel %vm9081_vm5, %v9067_v47, %v8956_v63  ;;  %9829 = vrot.lane.b32.xlu1 %v20538_v1, %s14821_s24  ;;  %v22279_v19 = vld [vmem:[#allocation28_spill] sm:$0xff] }
 0x6c6   : > { %v9139_v9 = vadd.f32 %v20261_v2, %v9100_v35  ;;  %9827 = vrot.lane.b32.xlu0 %v20544_v48, %s14821_s24 }
 0x6c7   : > { %v9172_v42 = vmax.f32 %v9140_v45, 0.0  ;;  %v8706_v8 = vpop.permute.xlu1 %8705 }
 0x6c8   : > { %v9171_v27 = vmax.f32 %v9139_v9, 0.0  ;;  %v8704_v38 = vpop.permute.xlu0 %8703  ;;  %v9037_v4 = vsel %vm9015_vm3, %v22276_v7, %v8706_v8 }
 0x6c9   : > { %9206 = vst.msk [vmem:[#allocation2 + $0xf9] sm:$0xff] %vm578_vm0, %v9172_v42  ;;  %9957 = vrot.lane.b32.xlu1 %v20549_v28, %s14822_s6  ;;  %v9036_v16 = vsel %vm9015_vm3, %v22277_v22, %v8704_v38 }
 0x6ca   : > { %9251 = vst.msk [vmem:[#allocation2 + $0xfb] sm:$0x40] %vm9240_vm6, %v9172_v42  ;;  %9955 = vrot.lane.b32.xlu0 %v20555_v21, %s14822_s6 }
 0x6cb   : > { %9205 = vst.msk [vmem:[#allocation2 + $0xf1] sm:$0xff] %vm578_vm0, %v9171_v27  ;;  %v8834_v3 = vpop.permute.xlu1 %8833 }
 0x6cc   : > { %9232 = vst.msk [vmem:[#allocation2 + $0xef] sm:$0x2] %vm9221_vm7, %v9171_v27  ;;  %v8832_v13 = vpop.permute.xlu0 %8831  ;;  %v9070_v41 = vsel %vm9048_vm4, %v9037_v4, %v8834_v3  ;;  %v20614_v27 = vld [vmem:[#allocation2 + $0xe1] sm:$0xff] }
 0x6cd   : > { %9833 = vrot.lane.b32.xlu1 %v20561_v49, %s14821_s24  ;;  %v9069_v6 = vsel %vm9048_vm4, %v9036_v16, %v8832_v13  ;;  %v20620_v13 = vld [vmem:[#allocation2 + $0xd9] sm:$0xff] }
 0x6ce   : > { %9831 = vrot.lane.b32.xlu0 %v20565_v0, %s14821_s24 }
 0x6cf   : > { %v8962_v54 = vpop.permute.xlu1 %8961 }
 0x6d0   : > { %v9103_v61 = vsel %vm9081_vm5, %v9070_v41, %v8962_v54  ;;  %v8960_v11 = vpop.permute.xlu0 %8959  ;;  %v20625_v54 = vld [vmem:[#allocation2 + $0xe2] sm:$0xff] }
 0x6d1   : > { %v9142_v51 = vadd.f32 %v20261_v2, %v9103_v61  ;;  %v9102_v31 = vsel %vm9081_vm5, %v9069_v6, %v8960_v11  ;;  %9961 = vrot.lane.b32.xlu1 %v20576_v37, %s14822_s6  ;;  %v20631_v6 = vld [vmem:[#allocation2 + $0xda] sm:$0xff] }
 0x6d2   : > { %v9141_v15 = vadd.f32 %v20261_v2, %v9102_v31  ;;  %9959 = vrot.lane.b32.xlu0 %v20582_v14, %s14822_s6  ;;  %v20641_v31 = vld [vmem:[#allocation2 + $0xf1] sm:$0xff] }
 0x6d3   : > { %v9174_v39 = vmax.f32 %v9142_v51, 0.0  ;;  %v8710_v25 = vpop.permute.xlu1 %8709  ;;  %v20637_v51 = vld [vmem:[#allocation2 + $0xf9] sm:$0xff] }
 0x6d4   : > { %v9173_v59 = vmax.f32 %v9141_v15, 0.0  ;;  %v8708_v57 = vpop.permute.xlu0 %8707  ;;  %v9039_v47 = vsel %vm9015_vm3, %v22278_v36, %v8710_v25  ;;  %v22280_v15 = vld [vmem:[#allocation72_spill] sm:$0xff]  ;;  %v22281_v25 = vld [vmem:[#allocation29_spill] sm:$0xff] }
 0x6d5   : > { %9208 = vst.msk [vmem:[#allocation2 + $0x111] sm:$0xff] %vm578_vm0, %v9174_v39  ;;  %9837 = vrot.lane.b32.xlu1 %v20587_v12, %s14821_s24  ;;  %v9038_v63 = vsel %vm9015_vm3, %v22279_v19, %v8708_v57  ;;  %v20652_v19 = vld [vmem:[#allocation2 + $0xfa] sm:$0xff] }
 0x6d6   : > { %9252 = vst.msk [vmem:[#allocation2 + $0x113] sm:$0x40] %vm9240_vm6, %v9174_v39  ;;  %9835 = vrot.lane.b32.xlu0 %v20593_v18, %s14821_s24 }
 0x6d7   : > { %9207 = vst.msk [vmem:[#allocation2 + $0x109] sm:$0xff] %vm578_vm0, %v9173_v59  ;;  %v8838_v17 = vpop.permute.xlu1 %8837 }
 0x6d8   : > { %9233 = vst.msk [vmem:[#allocation2 + $0x107] sm:$0x2] %vm9221_vm7, %v9173_v59  ;;  %v8836_v46 = vpop.permute.xlu0 %8835  ;;  %v9072_v45 = vsel %vm9048_vm4, %v9039_v47, %v8838_v17 }
 0x6d9   : > { %9965 = vrot.lane.b32.xlu1 %v20599_v62, %s14822_s6  ;;  %v9071_v9 = vsel %vm9048_vm4, %v9038_v63, %v8836_v46 }
 0x6da   : > { %9963 = vrot.lane.b32.xlu0 %v20603_v26, %s14822_s6 }
 0x6db   : > { %v8966_v35 = vpop.permute.xlu1 %8965 }
 0x6dc   : > { %v9105_v42 = vsel %vm9081_vm5, %v9072_v45, %v8966_v35  ;;  %v8964_v8 = vpop.permute.xlu0 %8963  ;;  %v20658_v35 = vld [vmem:[#allocation2 + $0xf2] sm:$0xff] }
 0x6dd   : > { %v9144_v38 = vadd.f32 %v20261_v2, %v9105_v42  ;;  %v9104_v3 = vsel %vm9081_vm5, %v9071_v9, %v8964_v8  ;;  %9841 = vrot.lane.b32.xlu1 %v20614_v27, %s14821_s24 }
 0x6de   : > { %v9143_v7 = vadd.f32 %v20261_v2, %v9104_v3  ;;  %9839 = vrot.lane.b32.xlu0 %v20620_v13, %s14821_s24 }
 0x6df   : > { %v9176_v4 = vmax.f32 %v9144_v38, 0.0  ;;  %v8714_v22 = vpop.permute.xlu1 %8713 }
 0x6e0   : > { %v9175_v16 = vmax.f32 %v9143_v7, 0.0  ;;  %v8712_v41 = vpop.permute.xlu0 %8711  ;;  %v9041_v39 = vsel %vm9015_vm3, %v22280_v15, %v8714_v22  ;;  %v20663_v7 = vld [vmem:[#allocation2 + $0x111] sm:$0xff] }
 0x6e1   : > { %9210 = vst.msk [vmem:[#allocation2 + $0x129] sm:$0xff] %vm578_vm0, %v9176_v4  ;;  %9969 = vrot.lane.b32.xlu1 %v20625_v54, %s14822_s6  ;;  %v9040_v59 = vsel %vm9015_vm3, %v22281_v25, %v8712_v41  ;;  %v20675_v41 = vld [vmem:[#allocation2 + $0x112] sm:$0xff] }
 0x6e2   : > { %9253 = vst.msk [vmem:[#allocation2 + $0x12b] sm:$0x40] %vm9240_vm6, %v9176_v4  ;;  %9967 = vrot.lane.b32.xlu0 %v20631_v6, %s14822_s6  ;;  %v20669_v4 = vld [vmem:[#allocation2 + $0x109] sm:$0xff] }
 0x6e3   : > { %9209 = vst.msk [vmem:[#allocation2 + $0x121] sm:$0xff] %vm578_vm0, %v9175_v16  ;;  %v8842_v61 = vpop.permute.xlu1 %8841 }
 0x6e4   : > { %9234 = vst.msk [vmem:[#allocation2 + $0x11f] sm:$0x2] %vm9221_vm7, %v9175_v16  ;;  %v8840_v11 = vpop.permute.xlu0 %8839  ;;  %v9074_v57 = vsel %vm9048_vm4, %v9041_v39, %v8842_v61  ;;  %v20679_v61 = vld [vmem:[#allocation2 + $0x10a] sm:$0xff] }
 0x6e5   : > { %9845 = vrot.lane.b32.xlu1 %v20637_v51, %s14821_s24  ;;  %v9073_v46 = vsel %vm9048_vm4, %v9040_v59, %v8840_v11  ;;  %v22282_v11 = vld [vmem:[#allocation31_spill] sm:$0xff] }
 0x6e6   : > { %9843 = vrot.lane.b32.xlu0 %v20641_v31, %s14821_s24  ;;  %v22283_v39 = vld [vmem:[#allocation71_spill] sm:$0xff] }
 0x6e7   : > { %v8970_v17 = vpop.permute.xlu1 %8969 }
 0x6e8   : > { %v9107_v36 = vsel %vm9081_vm5, %v9074_v57, %v8970_v17  ;;  %v8968_v47 = vpop.permute.xlu0 %8967 }
 0x6e9   : > { %v9146_v63 = vadd.f32 %v20261_v2, %v9107_v36  ;;  %v9106_v45 = vsel %vm9081_vm5, %v9073_v46, %v8968_v47  ;;  %9973 = vrot.lane.b32.xlu1 %v20652_v19, %s14822_s6  ;;  %v20690_v47 = vld [vmem:[#allocation2 + $0x129] sm:$0xff] }
 0x6ea   : > { %v9145_v9 = vadd.f32 %v20261_v2, %v9106_v45  ;;  %9971 = vrot.lane.b32.xlu0 %v20658_v35, %s14822_s6 }
 0x6eb   : > { %v9178_v42 = vmax.f32 %v9146_v63, 0.0  ;;  %v8718_v8 = vpop.permute.xlu1 %8717 }
 0x6ec   : > { %v9177_v38 = vmax.f32 %v9145_v9, 0.0  ;;  %v8716_v3 = vpop.permute.xlu0 %8715  ;;  %v9043_v15 = vsel %vm9015_vm3, %v22282_v11, %v8718_v8  ;;  %v20696_v9 = vld [vmem:[#allocation2 + $0x121] sm:$0xff] }
 0x6ed   : > { %9212 = vst.msk [vmem:[#allocation2 + $0x141] sm:$0xff] %vm578_vm0, %v9178_v42  ;;  %9849 = vrot.lane.b32.xlu1 %v20663_v7, %s14821_s24  ;;  %v9042_v25 = vsel %vm9015_vm3, %v22283_v39, %v8716_v3  ;;  %v20707_v11 = vld [vmem:[#allocation2 + $0x122] sm:$0xff] }
 0x6ee   : > { %9254 = vst.msk [vmem:[#allocation2 + $0x143] sm:$0x40] %vm9240_vm6, %v9178_v42  ;;  %9847 = vrot.lane.b32.xlu0 %v20669_v4, %s14821_s24  ;;  %22284 = vst [vmem:[#allocation46_spill] sm:$0xff] %v20707_v11 }
 0x6ef   : > { %9211 = vst.msk [vmem:[#allocation2 + $0x139] sm:$0xff] %vm578_vm0, %v9177_v38  ;;  %v8846_v22 = vpop.permute.xlu1 %8845 }
 0x6f0   : > { %9235 = vst.msk [vmem:[#allocation2 + $0x137] sm:$0x2] %vm9221_vm7, %v9177_v38  ;;  %v8844_v16 = vpop.permute.xlu0 %8843  ;;  %v9076_v59 = vsel %vm9048_vm4, %v9043_v15, %v8846_v22 }
 0x6f1   : > { %9977 = vrot.lane.b32.xlu1 %v20675_v41, %s14822_s6  ;;  %v9075_v17 = vsel %vm9048_vm4, %v9042_v25, %v8844_v16  ;;  %v20701_v16 = vld [vmem:[#allocation2 + $0x12a] sm:$0xff] }
 0x6f2   : > { %9975 = vrot.lane.b32.xlu0 %v20679_v61, %s14822_s6 }
 0x6f3   : > { %v8974_v57 = vpop.permute.xlu1 %8973 }
 0x6f4   : > { %v9109_v46 = vsel %vm9081_vm5, %v9076_v59, %v8974_v57  ;;  %v8972_v36 = vpop.permute.xlu0 %8971  ;;  %v20713_v25 = vld [vmem:[#allocation2 + $0x141] sm:$0xff] }
 0x6f5   : > { %v9148_v63 = vadd.f32 %v20261_v2, %v9109_v46  ;;  %v9108_v45 = vsel %vm9081_vm5, %v9075_v17, %v8972_v36  ;;  %9853 = vrot.lane.b32.xlu1 %v20690_v47, %s14821_s24  ;;  %22285 = vst [vmem:[#allocation34_spill] sm:$0xff] %v20713_v25  ;;  %v22287_v57 = vld [vmem:[#allocation74_spill] sm:$0xff]  ;;  %v22288_v46 = vld [vmem:[#allocation24_spill] sm:$0xff] }
 0x6f6   : > { %v9147_v42 = vadd.f32 %v20261_v2, %v9108_v45  ;;  %9851 = vrot.lane.b32.xlu0 %v20696_v9, %s14821_s24  ;;  %v20717_v59 = vld [vmem:[#allocation2 + $0x139] sm:$0xff] }
 0x6f7   : > { %v9180_v8 = vmax.f32 %v9148_v63, 0.0  ;;  %v8722_v38 = vpop.permute.xlu1 %8721  ;;  %22286 = vst [vmem:[#allocation88_spill] sm:$0xff] %v20717_v59 }
 0x6f8   : > { %v9179_v3 = vmax.f32 %v9147_v42, 0.0  ;;  %v8720_v22 = vpop.permute.xlu0 %8719  ;;  %v9045_v17 = vsel %vm9015_vm3, %v22287_v57, %v8722_v38  ;;  %v20734_v57 = vld [vmem:[#allocation2 + $0x13a] sm:$0xff] }
 0x6f9   : > { %9214 = vst.msk [vmem:[#allocation2 + $0x159] sm:$0xff] %vm578_vm0, %v9180_v8  ;;  %9981 = vrot.lane.b32.xlu1 %v20701_v16, %s14822_s6  ;;  %v9044_v36 = vsel %vm9015_vm3, %v22288_v46, %v8720_v22  ;;  %22290 = vst [vmem:[#allocation80_spill] sm:$0xff] %v20734_v57 }
 0x6fa   : > { %9255 = vst.msk [vmem:[#allocation2 + $0x15b] sm:$0x40] %vm9240_vm6, %v9180_v8  ;;  %9979 = vrot.lane.b32.xlu0 %v20707_v11, %s14822_s6 }
 0x6fb   : > { %9213 = vst.msk [vmem:[#allocation2 + $0x151] sm:$0xff] %vm578_vm0, %v9179_v3  ;;  %v8850_v15 = vpop.permute.xlu1 %8849 }
 0x6fc   : > { %9236 = vst.msk [vmem:[#allocation2 + $0x14f] sm:$0x2] %vm9221_vm7, %v9179_v3  ;;  %v8848_v39 = vpop.permute.xlu0 %8847  ;;  %v9078_v63 = vsel %vm9048_vm4, %v9045_v17, %v8850_v15 }
 0x6fd   : > { %9857 = vrot.lane.b32.xlu1 %v20713_v25, %s14821_s24  ;;  %v9077_v42 = vsel %vm9048_vm4, %v9044_v36, %v8848_v39  ;;  %v20728_v25 = vld [vmem:[#allocation2 + $0x142] sm:$0xff] }
 0x6fe   : > { %9855 = vrot.lane.b32.xlu0 %v20717_v59, %s14821_s24  ;;  %22289 = vst [vmem:[#allocation30_spill] sm:$0xff] %v20728_v25 }
 0x6ff   : > { %v8978_v45 = vpop.permute.xlu1 %8977 }
 0x700   : > { %v9111_v8 = vsel %vm9081_vm5, %v9078_v63, %v8978_v45  ;;  %v8976_v3 = vpop.permute.xlu0 %8975  ;;  %v20739_v36 = vld [vmem:[#allocation2 + $0x159] sm:$0xff] }
 0x701   : > { %v9150_v11 = vadd.f32 %v20261_v2, %v9111_v8  ;;  %v9110_v38 = vsel %vm9081_vm5, %v9077_v42, %v8976_v3  ;;  %9985 = vrot.lane.b32.xlu1 %v20728_v25, %s14822_s6  ;;  %22291 = vst [vmem:[#allocation85_spill] sm:$0xff] %v20739_v36  ;;  %v20755_v42 = vld [vmem:[#allocation2 + $0x15a] sm:$0xff] }
 0x702   : > { %v9149_v22 = vadd.f32 %v20261_v2, %v9110_v38  ;;  %9983 = vrot.lane.b32.xlu0 %v20734_v57, %s14822_s6  ;;  %v20747_v63 = vld [vmem:[#allocation2 + $0x151] sm:$0xff]  ;;  %22293 = vst [vmem:[#allocation77_spill] sm:$0xff] %v20755_v42 }
 0x703   : > { %v9182_v15 = vmax.f32 %v9150_v11, 0.0  ;;  %v8726_v39 = vpop.permute.xlu1 %8725  ;;  %22292 = vst [vmem:[#allocation49_spill] sm:$0xff] %v20747_v63  ;;  %v20759_v8 = vld [vmem:[#allocation2 + $0x152] sm:$0xff] }
 0x704   : > { %v9181_v17 = vmax.f32 %v9149_v22, 0.0  ;;  %v8724_v46 = vpop.permute.xlu0 %8723  ;;  %v22294_v3 = vld [vmem:[#allocation44_spill] sm:$0xff]  ;;  %v22295_v22 = vld [vmem:[#allocation107_spill] sm:$0xff] }
 0x705   : > { %9216 = vst.msk [vmem:[#allocation2 + $0x171] sm:$0xff] %vm578_vm0, %v9182_v15  ;;  %9220 = vst.msk [vmem:[#allocation2 + $0x1a1] sm:$0xff] %vm578_vm0, %v9182_v15  ;;  %9861 = vrot.lane.b32.xlu1 %v20739_v36, %s14821_s24  ;;  %v9047_v38 = vsel %vm9015_vm3, %v22294_v3, %v8726_v39 }
 0x706   : > { %9256 = vst.msk [vmem:[#allocation2 + $0x173] sm:$0x40] %vm9240_vm6, %v9182_v15  ;;  %9258 = vst.msk [vmem:[#allocation2 + $0x1a3] sm:$0x40] %vm9240_vm6, %v9182_v15  ;;  %9859 = vrot.lane.b32.xlu0 %v20747_v63, %s14821_s24  ;;  %v9046_v15 = vsel %vm9015_vm3, %v22295_v22, %v8724_v46 }
 0x707   : > { %9215 = vst.msk [vmem:[#allocation2 + $0x169] sm:$0xff] %vm578_vm0, %v9181_v17  ;;  %9219 = vst.msk [vmem:[#allocation2 + $0x199] sm:$0xff] %vm578_vm0, %v9181_v17  ;;  %v8854_v11 = vpop.permute.xlu1 %8853 }
 0x708   : > { %9237 = vst.msk [vmem:[#allocation2 + $0x167] sm:$0x2] %vm9221_vm7, %v9181_v17  ;;  %9239 = vst.msk [vmem:[#allocation2 + $0x197] sm:$0x2] %vm9221_vm7, %v9181_v17  ;;  %v8852_v45 = vpop.permute.xlu0 %8851  ;;  %v9080_v17 = vsel %vm9048_vm4, %v9047_v38, %v8854_v11 }
 0x709   : > { %9989 = vrot.lane.b32.xlu1 %v20755_v42, %s14822_s6  ;;  %v9079_v36 = vsel %vm9048_vm4, %v9046_v15, %v8852_v45 }
 0x70a   : > { %9987 = vrot.lane.b32.xlu0 %v20759_v8, %s14822_s6 }
 0x70b   : > { %v8982_v63 = vpop.permute.xlu1 %8981 }
 0x70c   : > { %v9113_v57 = vsel %vm9081_vm5, %v9080_v17, %v8982_v63  ;;  %v8980_v25 = vpop.permute.xlu0 %8979  ;;  %v20770_v42 = vld [vmem:[#allocation2 + $0x171] sm:$0xff]  ;;  %v9675_v17 = vld [vmem:[%s21524_s3] sm:$0xff] }
 0x70d   : > { %v9152_v59 = vadd.f32 %v20261_v2, %v9113_v57  ;;  %v9112_v39 = vsel %vm9081_vm5, %v9079_v36, %v8980_v25  ;;  %9865 = vrot.lane.b32.xlu1 %v20770_v42, %s14821_s24  ;;  %v20781_v22 = vld [vmem:[#allocation2 + $0x172] sm:$0xff]  ;;  %v20795_v57 = vld [vmem:[#allocation2 + $0x20] sm:$0xff] }
 0x70e   : > { %v20776_v3 = vld [vmem:[#allocation2 + $0x169] sm:$0xff]  ;;  %v9151_v46 = vadd.f32 %v20261_v2, %v9112_v39  ;;  %22297 = vst [vmem:[#allocation47_spill] sm:$0xff] %v20781_v22  ;;  %v20793_v2 = vld [vmem:[#allocation2 + $0x18] sm:$0xff] }
 0x70f   : > { %22296 = vst [vmem:[#allocation99_spill] sm:$0xff] %v20776_v3  ;;  %9863 = vrot.lane.b32.xlu0 %v20776_v3, %s14821_s24  ;;  %v9184_v11 = vmax.f32 %v9152_v59, 0.0  ;;  %v9810_v45 = vpop.permute.xlu1 %9809  ;;  %v20787_v25 = vld [vmem:[#allocation2 + $0x16a] sm:$0xff]  ;;  %22299 = vst [vmem:[#allocation16_spill] sm:$0xff] %v20793_v2 }
 0x710   : > { %v9183_v63 = vmax.f32 %v9151_v46, 0.0  ;;  %v9808_v38 = vpop.permute.xlu0 %9807  ;;  %22298 = vst [vmem:[#allocation39_spill] sm:$0xff] %v20787_v25  ;;  %v9676_v39 = vld [vmem:[%s21524_s3 + $0x8] sm:$0xff]  ;;  %v10032_v46 = vsel %vm578_vm0, %v20795_v57, %v9810_v45  ;;  %v9677_v45 = vld [vmem:[%s21524_s3 + $0x10] sm:$0xff] }
 0x711   : > { %9218 = vst.msk [vmem:[#allocation2 + $0x189] sm:$0xff] %vm578_vm0, %v9184_v11  ;;  %9993 = vrot.lane.b32.xlu1 %v20781_v22, %s14822_s6  ;;  %v10031_v36 = vsel %vm578_vm0, %v20793_v2, %v9808_v38 }
 0x712   : > { %9257 = vst.msk [vmem:[#allocation2 + $0x18b] sm:$0x40] %vm9240_vm6, %v9184_v11 }
 0x713   : > { %9217 = vst.msk [vmem:[#allocation2 + $0x181] sm:$0xff] %vm578_vm0, %v9183_v63  ;;  %9991 = vrot.lane.b32.xlu0 %v20787_v25, %s14822_s6  ;;  %v9938_v59 = vpop.permute.xlu1 %9937 }
 0x714   : > { %9238 = vst.msk [vmem:[#allocation2 + $0x17f] sm:$0x2] %vm9221_vm7, %v9183_v63  ;;  %v9936_v15 = vpop.permute.xlu0 %9935  ;;  %v14442_v63 = vpack.c.bf16 %v9676_v39, %v9675_v17  ;;  %v10064_v25 = vsel %vm611_vm1, %v10032_v46, %v9938_v59 }
 0x715   : > { %v10063_v11 = vsel %vm611_vm1, %v10031_v36, %v9936_v15  ;;  %v20816_v36 = vld [vmem:[#allocation2 + $0x30] sm:$0xff]  ;;  %v20818_v15 = vld [vmem:[#allocation2 + $0x38] sm:$0xff] }
 0x716   : > { %14234 = vmatprep.mubr.msk.f32.mxu0 %vm1068_vm2, %v10063_v11  ;;  %14443 = vmatprep.subr.bf16.mxu0 %v14442_v63  ;;  %22300 = vst [vmem:[#allocation35_spill] sm:$0xff] %v20816_v36 }
 0x717   : > { %v9814_v38 = vpop.permute.xlu1 %9813  ;;  %14235 = vmatmul.mubr.msk.f32.vlgmr.msra.gmra.mrb[64].mxu0 %vm1068_vm2, %v10064_v25 }
 0x718   : > { %v9812_v2 = vpop.permute.xlu0 %9811  ;;  %v9742_v22 = vld [vmem:[#allocation2 + $0x189] sm:$0xff]  ;;  %14445 = vmatpush3.bf16.msra.mxu0 %v14442_v63 }
 0x719   : > { %9869 = vrot.lane.b32.xlu1 %v9742_v22, %s14821_s24  ;;  %14286 = vmatprep.subr.mxu0 %v9677_v45  ;;  %v10033_v25 = vsel %vm578_vm0, %v20816_v36, %v9812_v2  ;;  %v9774_v39 = vld [vmem:[#allocation2 + $0x18a] sm:$0xff]  ;;  %v10034_v22 = vsel %vm578_vm0, %v20818_v15, %v9814_v38 }
 0x71a   : > { %v9741_v3 = vld [vmem:[#allocation2 + $0x181] sm:$0xff]  ;;  %v9292_v36 = vld [vmem:[#allocation2 + $0x9] sm:$0xff] }
 0x71b   : > { %9867 = vrot.lane.b32.xlu0 %v9741_v3, %s14821_s24  ;;  %v9942_v59 = vpop.permute.xlu1 %9941  ;;  %v9773_v46 = vld [vmem:[#allocation2 + $0x182] sm:$0xff] }
 0x71c   : > { %v9940_v17 = vpop.permute.xlu0 %9939  ;;  %14287 = vmatpush3.msra.mxu0 %v9677_v45  ;;  %v10066_v11 = vsel %vm611_vm1, %v10034_v22, %v9942_v59  ;;  %v9291_v45 = vld [vmem:[#allocation2 + $0x1] sm:$0xff]  ;;  %v9324_v22 = vld [vmem:[#allocation2 + $0xa] sm:$0xff] }
 0x71d   : > { %v10065_v3 = vsel %vm611_vm1, %v10033_v25, %v9940_v17  ;;  %9997 = vrot.lane.b32.xlu1 %v9774_v39, %s14822_s6  ;;  %v20832_v38 = vld [vmem:[#allocation2 + $0x48] sm:$0xff]  ;;  %v20834_v17 = vld [vmem:[#allocation2 + $0x50] sm:$0xff] }
 0x71e   : > { %14237 = vmatprep.mubr.msk.f32.mxu0 %vm1068_vm2, %v10065_v3 }
 0x71f   : > { %9995 = vrot.lane.b32.xlu0 %v9773_v46, %s14822_s6  ;;  %v9818_v63 = vpop.permute.xlu1 %9817  ;;  %14238 = vmatmul.mubr.msk.f32.gmra.mrb[66].mxu0 %vm1068_vm2, %v10066_v11 }
 0x720   : > { %v9816_v2 = vpop.permute.xlu0 %9815  ;;  %v10036_v3 = vsel %vm578_vm0, %v20834_v17, %v9818_v63  ;;  %v20850_v63 = vld [vmem:[#allocation2 + $0x60] sm:$0xff] }
 0x721   : > { %9389 = vrot.lane.b32.xlu1 %v9292_v36, %s14821_s24  ;;  %v10035_v59 = vsel %vm578_vm0, %v20832_v38, %v9816_v2  ;;  %v9323_v36 = vld [vmem:[#allocation2 + $0x2] sm:$0xff] }
 0x723   : > { %9387 = vrot.lane.b32.xlu0 %v9291_v45, %s14821_s24  ;;  %v9946_v25 = vpop.permute.xlu1 %9945 }
 0x724   : > { %v9944_v39 = vpop.permute.xlu0 %9943  ;;  %v10068_v11 = vsel %vm611_vm1, %v10036_v3, %v9946_v25 }
 0x725   : > { %v10067_v46 = vsel %vm611_vm1, %v10035_v59, %v9944_v39  ;;  %9517 = vrot.lane.b32.xlu1 %v9324_v22, %s14822_s6  ;;  %v20852_v39 = vld [vmem:[#allocation2 + $0x68] sm:$0xff] }
 0x726   : > { %14240 = vmatprep.mubr.msk.f32.mxu0 %vm1068_vm2, %v10067_v46 }
 0x727   : > { %9515 = vrot.lane.b32.xlu0 %v9323_v36, %s14822_s6  ;;  %v9822_v45 = vpop.permute.xlu1 %9821  ;;  %14241 = vmatmul.mubr.msk.f32.gmra.mrb[68].mxu0 %vm1068_vm2, %v10068_v11  ;;  %v20870_v11 = vld [vmem:[#allocation2 + $0x78] sm:$0xff] }
 0x728   : > { %v9820_v2 = vpop.permute.xlu0 %9819  ;;  %v10038_v3 = vsel %vm578_vm0, %v20852_v39, %v9822_v45  ;;  %v20872_v45 = vld [vmem:[#allocation2 + $0x80] sm:$0xff] }
 0x729   : > { %9393 = vrot.lane.b32.xlu1 %v20401_v55, %s14821_s24  ;;  %v10037_v25 = vsel %vm578_vm0, %v20850_v63, %v9820_v2 }
 0x72b   : > { %9391 = vrot.lane.b32.xlu0 %v20405_v23, %s14821_s24  ;;  %v9950_v59 = vpop.permute.xlu1 %9949 }
 0x72c   : > { %v9948_v22 = vpop.permute.xlu0 %9947  ;;  %v10070_v55 = vsel %vm611_vm1, %v10038_v3, %v9950_v59  ;;  %v20890_v3 = vld [vmem:[#allocation2 + $0x90] sm:$0xff] }
 0x72d   : > { %v10069_v46 = vsel %vm611_vm1, %v10037_v25, %v9948_v22  ;;  %9521 = vrot.lane.b32.xlu1 %v20418_v5, %s14822_s6 }
 0x72e   : > { %14243 = vmatprep.mubr.msk.f32.mxu0 %vm1068_vm2, %v10069_v46  ;;  %v20892_v46 = vld [vmem:[#allocation2 + $0x98] sm:$0xff] }
 0x72f   : > { %9519 = vrot.lane.b32.xlu0 %v20424_v58, %s14822_s6  ;;  %v9826_v23 = vpop.permute.xlu1 %9825  ;;  %14244 = vmatmul.mubr.msk.f32.gmra.mrb[70].mxu0 %vm1068_vm2, %v10070_v55 }
 0x730   : > { %v9824_v36 = vpop.permute.xlu0 %9823  ;;  %v10040_v58 = vsel %vm578_vm0, %v20872_v45, %v9826_v23 }
 0x731   : > { %9397 = vrot.lane.b32.xlu1 %v20429_v10, %s14821_s24  ;;  %v10039_v2 = vsel %vm578_vm0, %v20870_v11, %v9824_v36 }
 0x733   : > { %9395 = vrot.lane.b32.xlu0 %v20435_v40, %s14821_s24  ;;  %v9954_v5 = vpop.permute.xlu1 %9953 }
 0x734   : > { %v9952_v59 = vpop.permute.xlu0 %9951  ;;  %v10072_v10 = vsel %vm611_vm1, %v10040_v58, %v9954_v5 }
 0x735   : > { %v10071_v25 = vsel %vm611_vm1, %v10039_v2, %v9952_v59  ;;  %9525 = vrot.lane.b32.xlu1 %v20441_v34, %s14822_s6  ;;  %v20910_v2 = vld [vmem:[#allocation2 + $0xa8] sm:$0xff]  ;;  %v20912_v59 = vld [vmem:[#allocation2 + $0xb0] sm:$0xff] }
 0x736   : > { %14246 = vmatprep.mubr.msk.f32.mxu0 %vm1068_vm2, %v10071_v25 }
 0x737   : > { %9523 = vrot.lane.b32.xlu0 %v20445_v24, %s14822_s6  ;;  %v9830_v40 = vpop.permute.xlu1 %9829  ;;  %14247 = vmatmul.mubr.msk.f32.gmra.mrb[72].mxu0 %vm1068_vm2, %v10072_v10 }
 0x738   : > { %v9828_v22 = vpop.permute.xlu0 %9827  ;;  %v10042_v24 = vsel %vm578_vm0, %v20892_v46, %v9830_v40 }
 0x739   : > { %9401 = vrot.lane.b32.xlu1 %v20458_v33, %s14821_s24  ;;  %v10041_v55 = vsel %vm578_vm0, %v20890_v3, %v9828_v22  ;;  %v20930_v22 = vld [vmem:[#allocation2 + $0xc0] sm:$0xff] }
 0x73b   : > { %9399 = vrot.lane.b32.xlu0 %v20464_v43, %s14821_s24  ;;  %v9958_v34 = vpop.permute.xlu1 %9957 }
 0x73c   : > { %v9956_v23 = vpop.permute.xlu0 %9955  ;;  %v10074_v33 = vsel %vm611_vm1, %v10042_v24, %v9958_v34  ;;  %v20932_v34 = vld [vmem:[#allocation2 + $0xc8] sm:$0xff] }
 0x73d   : > { %v10073_v36 = vsel %vm611_vm1, %v10041_v55, %v9956_v23  ;;  %9529 = vrot.lane.b32.xlu1 %v20469_v52, %s14822_s6 }
 0x73e   : > { %14249 = vmatprep.mubr.msk.f32.mxu0 %vm1068_vm2, %v10073_v36 }
 0x73f   : > { %9527 = vrot.lane.b32.xlu0 %v20475_v53, %s14822_s6  ;;  %v9834_v43 = vpop.permute.xlu1 %9833  ;;  %14250 = vmatmul.mubr.msk.f32.gmra.mrb[74].mxu0 %vm1068_vm2, %v10074_v33  ;;  %v20950_v33 = vld [vmem:[#allocation2 + $0xd8] sm:$0xff] }
 0x740   : > { %v9832_v5 = vpop.permute.xlu0 %9831  ;;  %v10044_v53 = vsel %vm578_vm0, %v20912_v59, %v9834_v43  ;;  %v20952_v43 = vld [vmem:[#allocation2 + $0xe0] sm:$0xff] }
 0x741   : > { %9405 = vrot.lane.b32.xlu1 %v20481_v56, %s14821_s24  ;;  %v10043_v58 = vsel %vm578_vm0, %v20910_v2, %v9832_v5 }
 0x743   : > { %9403 = vrot.lane.b32.xlu0 %v20485_v60, %s14821_s24  ;;  %v9962_v52 = vpop.permute.xlu1 %9961 }
 0x744   : > { %v9960_v25 = vpop.permute.xlu0 %9959  ;;  %v10076_v56 = vsel %vm611_vm1, %v10044_v53, %v9962_v52  ;;  %v20970_v53 = vld [vmem:[#allocation2 + $0xf0] sm:$0xff] }
 0x745   : > { %v10075_v10 = vsel %vm611_vm1, %v10043_v58, %v9960_v25  ;;  %9533 = vrot.lane.b32.xlu1 %v20498_v29, %s14822_s6 }
 0x746   : > { %14252 = vmatprep.mubr.msk.f32.mxu0 %vm1068_vm2, %v10075_v10  ;;  %v20972_v10 = vld [vmem:[#allocation2 + $0xf8] sm:$0xff] }
 0x747   : > { %9531 = vrot.lane.b32.xlu0 %v20504_v32, %s14822_s6  ;;  %v9838_v60 = vpop.permute.xlu1 %9837  ;;  %14253 = vmatmul.mubr.msk.f32.gmra.mrb[76].mxu0 %vm1068_vm2, %v10076_v56 }
 0x748   : > { %v9836_v40 = vpop.permute.xlu0 %9835  ;;  %v10046_v32 = vsel %vm578_vm0, %v20932_v34, %v9838_v60 }
 0x749   : > { %9409 = vrot.lane.b32.xlu1 %v20509_v50, %s14821_s24  ;;  %v10045_v55 = vsel %vm578_vm0, %v20930_v22, %v9836_v40 }
 0x74b   : > { %9407 = vrot.lane.b32.xlu0 %v20515_v30, %s14821_s24  ;;  %v9966_v29 = vpop.permute.xlu1 %9965 }
 0x74c   : > { %v9964_v23 = vpop.permute.xlu0 %9963  ;;  %v10078_v50 = vsel %vm611_vm1, %v10046_v32, %v9966_v29 }
 0x74d   : > { %v10077_v24 = vsel %vm611_vm1, %v10045_v55, %v9964_v23  ;;  %9537 = vrot.lane.b32.xlu1 %v20521_v44, %s14822_s6  ;;  %v20990_v55 = vld [vmem:[#allocation2 + $0x108] sm:$0xff]  ;;  %v20992_v23 = vld [vmem:[#allocation2 + $0x110] sm:$0xff] }
 0x74e   : > { %14255 = vmatprep.mubr.msk.f32.mxu0 %vm1068_vm2, %v10077_v24 }
 0x74f   : > { %9535 = vrot.lane.b32.xlu0 %v20525_v20, %s14822_s6  ;;  %v9842_v30 = vpop.permute.xlu1 %9841  ;;  %14256 = vmatmul.mubr.msk.f32.gmra.mrb[78].mxu0 %vm1068_vm2, %v10078_v50 }
 0x750   : > { %v9840_v36 = vpop.permute.xlu0 %9839  ;;  %v10048_v20 = vsel %vm578_vm0, %v20952_v43, %v9842_v30 }
 0x751   : > { %9413 = vrot.lane.b32.xlu1 %v20538_v1, %s14821_s24  ;;  %v10047_v5 = vsel %vm578_vm0, %v20950_v33, %v9840_v36  ;;  %v21010_v36 = vld [vmem:[#allocation2 + $0x120] sm:$0xff] }
 0x753   : > { %9411 = vrot.lane.b32.xlu0 %v20544_v48, %s14821_s24  ;;  %v9970_v44 = vpop.permute.xlu1 %9969 }
 0x754   : > { %v9968_v52 = vpop.permute.xlu0 %9967  ;;  %v10080_v1 = vsel %vm611_vm1, %v10048_v20, %v9970_v44  ;;  %v21012_v44 = vld [vmem:[#allocation2 + $0x128] sm:$0xff] }
 0x755   : > { %v10079_v58 = vsel %vm611_vm1, %v10047_v5, %v9968_v52  ;;  %9541 = vrot.lane.b32.xlu1 %v20549_v28, %s14822_s6 }
 0x756   : > { %14258 = vmatprep.mubr.msk.f32.mxu0 %vm1068_vm2, %v10079_v58 }
 0x757   : > { %9539 = vrot.lane.b32.xlu0 %v20555_v21, %s14822_s6  ;;  %v9846_v48 = vpop.permute.xlu1 %9845  ;;  %14259 = vmatmul.mubr.msk.f32.gmra.mrb[80].mxu0 %vm1068_vm2, %v10080_v1  ;;  %v21030_v1 = vld [vmem:[#allocation2 + $0x138] sm:$0xff] }
 0x758   : > { %v9844_v25 = vpop.permute.xlu0 %9843  ;;  %v10050_v21 = vsel %vm578_vm0, %v20972_v10, %v9846_v48  ;;  %v21032_v48 = vld [vmem:[#allocation2 + $0x140] sm:$0xff] }
 0x759   : > { %9417 = vrot.lane.b32.xlu1 %v20561_v49, %s14821_s24  ;;  %v10049_v56 = vsel %vm578_vm0, %v20970_v53, %v9844_v25 }
 0x75b   : > { %9415 = vrot.lane.b32.xlu0 %v20565_v0, %s14821_s24  ;;  %v9974_v28 = vpop.permute.xlu1 %9973 }
 0x75c   : > { %v9972_v60 = vpop.permute.xlu0 %9971  ;;  %v10082_v49 = vsel %vm611_vm1, %v10050_v21, %v9974_v28  ;;  %v21050_v21 = vld [vmem:[#allocation2 + $0x150] sm:$0xff] }
 0x75d   : > { %v10081_v40 = vsel %vm611_vm1, %v10049_v56, %v9972_v60  ;;  %9545 = vrot.lane.b32.xlu1 %v20576_v37, %s14822_s6 }
 0x75e   : > { %14261 = vmatprep.mubr.msk.f32.mxu0 %vm1068_vm2, %v10081_v40  ;;  %v21052_v40 = vld [vmem:[#allocation2 + $0x158] sm:$0xff] }
 0x75f   : > { %9543 = vrot.lane.b32.xlu0 %v20582_v14, %s14822_s6  ;;  %v9850_v0 = vpop.permute.xlu1 %9849  ;;  %14262 = vmatmul.mubr.msk.f32.gmra.mrb[82].mxu0 %vm1068_vm2, %v10082_v49 }
 0x760   : > { %v9848_v29 = vpop.permute.xlu0 %9847  ;;  %v10052_v14 = vsel %vm578_vm0, %v20992_v23, %v9850_v0 }
 0x761   : > { %9421 = vrot.lane.b32.xlu1 %v20587_v12, %s14821_s24  ;;  %v10051_v32 = vsel %vm578_vm0, %v20990_v55, %v9848_v29 }
 0x763   : > { %9419 = vrot.lane.b32.xlu0 %v20593_v18, %s14821_s24  ;;  %v9978_v37 = vpop.permute.xlu1 %9977 }
 0x764   : > { %v9976_v24 = vpop.permute.xlu0 %9975  ;;  %v10084_v12 = vsel %vm611_vm1, %v10052_v14, %v9978_v37 }
 0x765   : > { %v10083_v50 = vsel %vm611_vm1, %v10051_v32, %v9976_v24  ;;  %9549 = vrot.lane.b32.xlu1 %v20599_v62, %s14822_s6  ;;  %v21070_v32 = vld [vmem:[#allocation2 + $0x168] sm:$0xff]  ;;  %v21072_v24 = vld [vmem:[#allocation2 + $0x170] sm:$0xff] }
 0x766   : > { %14264 = vmatprep.mubr.msk.f32.mxu0 %vm1068_vm2, %v10083_v50 }
 0x767   : > { %9547 = vrot.lane.b32.xlu0 %v20603_v26, %s14822_s6  ;;  %v9854_v18 = vpop.permute.xlu1 %9853  ;;  %14265 = vmatmul.mubr.msk.f32.gmra.mrb[84].mxu0 %vm1068_vm2, %v10084_v12 }
 0x768   : > { %v9852_v30 = vpop.permute.xlu0 %9851  ;;  %v10054_v26 = vsel %vm578_vm0, %v21012_v44, %v9854_v18  ;;  %v22302_v18 = vld [vmem:[#allocation34_spill] sm:$0xff] }
 0x769   : > { %9425 = vrot.lane.b32.xlu1 %v20614_v27, %s14821_s24  ;;  %v10053_v5 = vsel %vm578_vm0, %v21010_v36, %v9852_v30  ;;  %v22303_v30 = vld [vmem:[#allocation88_spill] sm:$0xff] }
 0x76b   : > { %9423 = vrot.lane.b32.xlu0 %v20620_v13, %s14821_s24  ;;  %v9982_v62 = vpop.permute.xlu1 %9981 }
 0x76c   : > { %v9980_v52 = vpop.permute.xlu0 %9979  ;;  %v10086_v27 = vsel %vm611_vm1, %v10054_v26, %v9982_v62  ;;  %v9709_v26 = vld [vmem:[#allocation2 + $0x180] sm:$0xff] }
 0x76d   : > { %v10085_v20 = vsel %vm611_vm1, %v10053_v5, %v9980_v52  ;;  %9553 = vrot.lane.b32.xlu1 %v20625_v54, %s14822_s6  ;;  %v22304_v52 = vld [vmem:[#allocation30_spill] sm:$0xff] }
 0x76e   : > { %14267 = vmatprep.mubr.msk.f32.mxu0 %vm1068_vm2, %v10085_v20 }
 0x76f   : > { %9551 = vrot.lane.b32.xlu0 %v20631_v6, %s14822_s6  ;;  %v9858_v13 = vpop.permute.xlu1 %9857  ;;  %14268 = vmatmul.mubr.msk.f32.gmra.mrb[86].mxu0 %vm1068_vm2, %v10086_v27  ;;  %v9710_v27 = vld [vmem:[#allocation2 + $0x188] sm:$0xff] }
 0x770   : > { %v9856_v58 = vpop.permute.xlu0 %9855  ;;  %v10056_v6 = vsel %vm578_vm0, %v21032_v48, %v9858_v13 }
 0x771   : > { %9429 = vrot.lane.b32.xlu1 %v20637_v51, %s14821_s24  ;;  %v10055_v25 = vsel %vm578_vm0, %v21030_v1, %v9856_v58 }
 0x773   : > { %9427 = vrot.lane.b32.xlu0 %v20641_v31, %s14821_s24  ;;  %v9986_v54 = vpop.permute.xlu1 %9985 }
 0x774   : > { %v9984_v28 = vpop.permute.xlu0 %9983  ;;  %v10088_v51 = vsel %vm611_vm1, %v10056_v6, %v9986_v54 }
 0x775   : > { %v10087_v56 = vsel %vm611_vm1, %v10055_v25, %v9984_v28  ;;  %9557 = vrot.lane.b32.xlu1 %v20652_v19, %s14822_s6  ;;  %v22306_v28 = vld [vmem:[#allocation85_spill] sm:$0xff] }
 0x776   : > { %14270 = vmatprep.mubr.msk.f32.mxu0 %vm1068_vm2, %v10087_v56  ;;  %v22307_v56 = vld [vmem:[#allocation49_spill] sm:$0xff] }
 0x777   : > { %9555 = vrot.lane.b32.xlu0 %v20658_v35, %s14822_s6  ;;  %v9862_v31 = vpop.permute.xlu1 %9861  ;;  %14271 = vmatmul.mubr.msk.f32.gmra.mrb[88].mxu0 %vm1068_vm2, %v10088_v51 }
 0x778   : > { %v9860_v60 = vpop.permute.xlu0 %9859  ;;  %v10058_v35 = vsel %vm578_vm0, %v21052_v40, %v9862_v31 }
 0x779   : > { %9433 = vrot.lane.b32.xlu1 %v20663_v7, %s14821_s24  ;;  %v10057_v49 = vsel %vm578_vm0, %v21050_v21, %v9860_v60  ;;  %v22308_v60 = vld [vmem:[#allocation77_spill] sm:$0xff] }
 0x77b   : > { %9431 = vrot.lane.b32.xlu0 %v20669_v4, %s14821_s24  ;;  %v9990_v19 = vpop.permute.xlu1 %9989 }
 0x77c   : > { %v9988_v0 = vpop.permute.xlu0 %9987  ;;  %v10090_v7 = vsel %vm611_vm1, %v10058_v35, %v9990_v19  ;;  %v13015_v19 = vld [vmem:[%s21524_s3 + $0x30] sm:$0xff]  ;;  %v9259_v35 = vld [vmem:[#allocation2] sm:$0xff] }
 0x77d   : > { %v10089_v29 = vsel %vm611_vm1, %v10057_v49, %v9988_v0  ;;  %9561 = vrot.lane.b32.xlu1 %v20675_v41, %s14822_s6  ;;  %v13016_v49 = vld [vmem:[%s21524_s3 + $0x38] sm:$0xff] }
 0x77e   : > { %14273 = vmatprep.mubr.msk.f32.mxu0 %vm1068_vm2, %v10089_v29  ;;  %v14446_v0 = vpack.c.bf16 %v13016_v49, %v13015_v19  ;;  %v10776_v19 = vld [vmem:[#allocation2 + $0x49] sm:$0xff] }
 0x77f   : > { %9559 = vrot.lane.b32.xlu0 %v20679_v61, %s14822_s6  ;;  %v9866_v4 = vpop.permute.xlu1 %9865  ;;  %14274 = vmatmul.mubr.msk.f32.gmra.mrb[90].mxu0 %vm1068_vm2, %v10090_v7  ;;  %v9260_v7 = vld [vmem:[#allocation2 + $0x8] sm:$0xff] }
 0x780   : > { %v10060_v61 = vsel %vm578_vm0, %v21072_v24, %v9866_v4  ;;  %14447 = vmatprep.subr.bf16.mxu0 %v14446_v0 }
 0x781   : > { %v9864_v37 = vpop.permute.xlu0 %9863  ;;  %9437 = vrot.lane.b32.xlu1 %v20690_v47, %s14821_s24 }
 0x782   : > { %v10059_v14 = vsel %vm578_vm0, %v21070_v32, %v9864_v37 }
 0x783   : > { %9435 = vrot.lane.b32.xlu0 %v20696_v9, %s14821_s24  ;;  %v9994_v41 = vpop.permute.xlu1 %9993  ;;  %v22301_v9 = vld [vmem:[#allocation46_spill] sm:$0xff] }
 0x784   : > { %v10092_v47 = vsel %vm611_vm1, %v10060_v61, %v9994_v41  ;;  %v22309_v61 = vld [vmem:[#allocation99_spill] sm:$0xff] }
 0x785   : > { %v9992_v50 = vpop.permute.xlu0 %9991  ;;  %9565 = vrot.lane.b32.xlu1 %v20701_v16, %s14822_s6  ;;  %v22305_v16 = vld [vmem:[#allocation80_spill] sm:$0xff] }
 0x786   : > { %v10091_v12 = vsel %vm611_vm1, %v10059_v14, %v9992_v50 }
 0x787   : > { %14276 = vmatprep.mubr.msk.f32.mxu0 %vm1068_vm2, %v10091_v12  ;;  %9563 = vrot.lane.b32.xlu0 %v22301_v9, %s14822_s6  ;;  %v22310_v9 = vld [vmem:[#allocation47_spill] sm:$0xff] }
 0x788   : > { %14277 = vmatmul.mubr.msk.f32.gmra.mrb[92].mxu0 %vm1068_vm2, %v10092_v47 }
 0x789   : > { %9441 = vrot.lane.b32.xlu1 %v22302_v18, %s14821_s24 }
 0x78b   : > { %9439 = vrot.lane.b32.xlu0 %v22303_v30, %s14821_s24  ;;  %v9870_v62 = vpop.permute.xlu1 %9869  ;;  %v22312_v30 = vld [vmem:[#allocation16_spill] sm:$0xff] }
 0x78c   : > { %v10062_v54 = vsel %vm578_vm0, %v9710_v27, %v9870_v62 }
 0x78d   : > { %v9868_v5 = vpop.permute.xlu0 %9867  ;;  %9569 = vrot.lane.b32.xlu1 %v22304_v52, %s14822_s6  ;;  %v10775_v52 = vld [vmem:[#allocation2 + $0x39] sm:$0xff] }
 0x78e   : > { %v10061_v13 = vsel %vm578_vm0, %v9709_v26, %v9868_v5 }
 0x78f   : > { %9567 = vrot.lane.b32.xlu0 %v22305_v16, %s14822_s6  ;;  %v9998_v20 = vpop.permute.xlu1 %9997 }
 0x790   : > { %v10094_v6 = vsel %vm611_vm1, %v10062_v54, %v9998_v20  ;;  %v10774_v20 = vld [vmem:[#allocation2 + $0x31] sm:$0xff]  ;;  %v10807_v54 = vld [vmem:[#allocation2 + $0x3a] sm:$0xff] }
 0x791   : > { %v9996_v58 = vpop.permute.xlu0 %9995  ;;  %9445 = vrot.lane.b32.xlu1 %v22306_v28, %s14821_s24  ;;  %v22313_v28 = vld [vmem:[#allocation35_spill] sm:$0xff] }
 0x792   : > { %v10093_v25 = vsel %vm611_vm1, %v10061_v13, %v9996_v58 }
 0x793   : > { %9443 = vrot.lane.b32.xlu0 %v22307_v56, %s14821_s24  ;;  %14279 = vmatprep.mubr.msk.f32.mxu0 %vm1068_vm2, %v10093_v25  ;;  %v9390_v51 = vpop.permute.xlu1 %9389  ;;  %v10806_v25 = vld [vmem:[#allocation2 + $0x32] sm:$0xff] }
 0x794   : > { %14280 = vmatmul.mubr.msk.f32.gmra.mrb[94].mxu0 %vm1068_vm2, %v10094_v6  ;;  %v9612_v41 = vsel %vm578_vm0, %v9260_v7, %v9390_v51  ;;  %v10777_v51 = vld [vmem:[#allocation2 + $0x51] sm:$0xff] }
 0x795   : > { %v9388_v31 = vpop.permute.xlu0 %9387  ;;  %9573 = vrot.lane.b32.xlu1 %v22308_v60, %s14822_s6  ;;  %v10808_v7 = vld [vmem:[#allocation2 + $0x4a] sm:$0xff] }
 0x796   : > { %v9611_v4 = vsel %vm578_vm0, %v9259_v35, %v9388_v31 }
 0x797   : > { %9571 = vrot.lane.b32.xlu0 %v20759_v8, %s14822_s6  ;;  %v9518_v29 = vpop.permute.xlu1 %9517  ;;  %v13017_v8 = vld [vmem:[%s21524_s3 + $0x40] sm:$0xff] }
 0x798   : > { %v9644_v50 = vsel %vm611_vm1, %v9612_v41, %v9518_v29  ;;  %v10809_v29 = vld [vmem:[#allocation2 + $0x52] sm:$0xff]  ;;  %v10779_v41 = vld [vmem:[#allocation2 + $0x69] sm:$0xff] }
 0x799   : > { %v9516_v37 = vpop.permute.xlu0 %9515  ;;  %9449 = vrot.lane.b32.xlu1 %v20770_v42, %s14821_s24  ;;  %v22311_v42 = vld [vmem:[#allocation39_spill] sm:$0xff] }
 0x79a   : > { %v9643_v14 = vsel %vm611_vm1, %v9611_v4, %v9516_v37 }
 0x79b   : > { %9447 = vrot.lane.b32.xlu0 %v22309_v61, %s14821_s24  ;;  %14288 = vmatprep.mubr.msk.f32.mxu0 %vm1068_vm2, %v9643_v14  ;;  %v9394_v12 = vpop.permute.xlu1 %9393  ;;  %v10778_v61 = vld [vmem:[#allocation2 + $0x61] sm:$0xff] }
 0x79c   : > { %14289 = vmatmul.mubr.msk.f32.vlgmr.msra.gmra.mrb[64].mxu0 %vm1068_vm2, %v9644_v50  ;;  %v9614_v16 = vsel %vm578_vm0, %v20795_v57, %v9394_v12 }
 0x79d   : > { %v9392_v47 = vpop.permute.xlu0 %9391  ;;  %14449 = vmatpush3.bf16.msra.mxu0 %v14446_v0  ;;  %9577 = vrot.lane.b32.xlu1 %v22310_v9, %s14822_s6  ;;  %v10810_v9 = vld [vmem:[#allocation2 + $0x62] sm:$0xff] }
 0x79e   : > { %14340 = vmatprep.subr.mxu0 %v13017_v8  ;;  %v9613_v62 = vsel %vm578_vm0, %v22312_v30, %v9392_v47  ;;  %v10811_v47 = vld [vmem:[#allocation2 + $0x6a] sm:$0xff]  ;;  %v10781_v30 = vld [vmem:[#allocation2 + $0x81] sm:$0xff] }
 0x79f   : > { %9575 = vrot.lane.b32.xlu0 %v22311_v42, %s14822_s6  ;;  %v9522_v18 = vpop.permute.xlu1 %9521 }
 0x7a0   : > { %v9646_v27 = vsel %vm611_vm1, %v9614_v16, %v9522_v18 }
 0x7a1   : > { %v9520_v5 = vpop.permute.xlu0 %9519  ;;  %14341 = vmatpush3.msra.mxu0 %v13017_v8  ;;  %10872 = vrot.lane.b32.xlu1 %v10775_v52, %s14821_s24  ;;  %v10780_v52 = vld [vmem:[#allocation2 + $0x79] sm:$0xff] }
 0x7a2   : > { %v9645_v26 = vsel %vm611_vm1, %v9613_v62, %v9520_v5 }
 0x7a3   : > { %10870 = vrot.lane.b32.xlu0 %v10774_v20, %s14821_s24  ;;  %14291 = vmatprep.mubr.msk.f32.mxu0 %vm1068_vm2, %v9645_v26  ;;  %v9398_v13 = vpop.permute.xlu1 %9397  ;;  %v10813_v20 = vld [vmem:[#allocation2 + $0x82] sm:$0xff] }
 0x7a4   : > { %14292 = vmatmul.mubr.msk.f32.gmra.mrb[66].mxu0 %vm1068_vm2, %v9646_v27  ;;  %v9616_v31 = vsel %vm578_vm0, %v20818_v15, %v9398_v13  ;;  %v10812_v27 = vld [vmem:[#allocation2 + $0x7a] sm:$0xff] }
 0x7a5   : > { %v9396_v58 = vpop.permute.xlu0 %9395  ;;  %11000 = vrot.lane.b32.xlu1 %v10807_v54, %s14822_s6  ;;  %v10783_v54 = vld [vmem:[#allocation2 + $0x99] sm:$0xff] }
 0x7a6   : > { %v9615_v6 = vsel %vm578_vm0, %v22313_v28, %v9396_v58  ;;  %v10782_v28 = vld [vmem:[#allocation2 + $0x91] sm:$0xff] }
 0x7a7   : > { %10998 = vrot.lane.b32.xlu0 %v10806_v25, %s14822_s6  ;;  %v9526_v57 = vpop.permute.xlu1 %9525 }
 0x7a8   : > { %v9648_v49 = vsel %vm611_vm1, %v9616_v31, %v9526_v57  ;;  %v10814_v31 = vld [vmem:[#allocation2 + $0x92] sm:$0xff] }
 0x7a9   : > { %v9524_v56 = vpop.permute.xlu0 %9523  ;;  %10876 = vrot.lane.b32.xlu1 %v10777_v51, %s14821_s24  ;;  %v10815_v51 = vld [vmem:[#allocation2 + $0x9a] sm:$0xff] }
 0x7aa   : > { %v9647_v60 = vsel %vm611_vm1, %v9615_v6, %v9524_v56 }
 0x7ab   : > { %10874 = vrot.lane.b32.xlu0 %v10776_v19, %s14821_s24  ;;  %14294 = vmatprep.mubr.msk.f32.mxu0 %vm1068_vm2, %v9647_v60  ;;  %v9402_v0 = vpop.permute.xlu1 %9401 }
 0x7ac   : > { %14295 = vmatmul.mubr.msk.f32.gmra.mrb[68].mxu0 %vm1068_vm2, %v9648_v49  ;;  %v9618_v14 = vsel %vm578_vm0, %v20834_v17, %v9402_v0  ;;  %v10785_v49 = vld [vmem:[#allocation2 + $0xb1] sm:$0xff] }
 0x7ad   : > { %v9400_v35 = vpop.permute.xlu0 %9399  ;;  %11004 = vrot.lane.b32.xlu1 %v10809_v29, %s14822_s6  ;;  %v10784_v29 = vld [vmem:[#allocation2 + $0xa9] sm:$0xff] }
 0x7ae   : > { %v9617_v4 = vsel %vm578_vm0, %v20832_v38, %v9400_v35 }
 0x7af   : > { %11002 = vrot.lane.b32.xlu0 %v10808_v7, %s14822_s6  ;;  %v9530_v15 = vpop.permute.xlu1 %9529 }
 0x7b0   : > { %v9650_v8 = vsel %vm611_vm1, %v9618_v14, %v9530_v15 }
 0x7b1   : > { %v9528_v37 = vpop.permute.xlu0 %9527  ;;  %10880 = vrot.lane.b32.xlu1 %v10779_v41, %s14821_s24 }
 0x7b2   : > { %v9649_v50 = vsel %vm611_vm1, %v9617_v4, %v9528_v37  ;;  %v10817_v4 = vld [vmem:[#allocation2 + $0xb2] sm:$0xff]  ;;  %v10816_v37 = vld [vmem:[#allocation2 + $0xaa] sm:$0xff] }
 0x7b3   : > { %10878 = vrot.lane.b32.xlu0 %v10778_v61, %s14821_s24  ;;  %14297 = vmatprep.mubr.msk.f32.mxu0 %vm1068_vm2, %v9649_v50  ;;  %v9406_v12 = vpop.permute.xlu1 %9405  ;;  %v10787_v50 = vld [vmem:[#allocation2 + $0xc9] sm:$0xff] }
 0x7b4   : > { %14298 = vmatmul.mubr.msk.f32.gmra.mrb[70].mxu0 %vm1068_vm2, %v9650_v8  ;;  %v9620_v62 = vsel %vm578_vm0, %v20852_v39, %v9406_v12  ;;  %v10786_v12 = vld [vmem:[#allocation2 + $0xc1] sm:$0xff] }
 0x7b5   : > { %v9404_v38 = vpop.permute.xlu0 %9403  ;;  %11008 = vrot.lane.b32.xlu1 %v10811_v47, %s14822_s6 }
 0x7b6   : > { %v9619_v42 = vsel %vm578_vm0, %v20850_v63, %v9404_v38 }
 0x7b7   : > { %11006 = vrot.lane.b32.xlu0 %v10810_v9, %s14822_s6  ;;  %v9534_v17 = vpop.permute.xlu1 %9533  ;;  %v10819_v9 = vld [vmem:[#allocation2 + $0xca] sm:$0xff] }
 0x7b8   : > { %v9652_v16 = vsel %vm611_vm1, %v9620_v62, %v9534_v17  ;;  %v10818_v17 = vld [vmem:[#allocation2 + $0xc2] sm:$0xff] }
 0x7b9   : > { %v9532_v18 = vpop.permute.xlu0 %9531  ;;  %10884 = vrot.lane.b32.xlu1 %v10781_v30, %s14821_s24  ;;  %v10789_v30 = vld [vmem:[#allocation2 + $0xe1] sm:$0xff] }
 0x7ba   : > { %v9651_v5 = vsel %vm611_vm1, %v9619_v42, %v9532_v18 }
 0x7bb   : > { %10882 = vrot.lane.b32.xlu0 %v10780_v52, %s14821_s24  ;;  %14300 = vmatprep.mubr.msk.f32.mxu0 %vm1068_vm2, %v9651_v5  ;;  %v9410_v26 = vpop.permute.xlu1 %9409  ;;  %v10788_v52 = vld [vmem:[#allocation2 + $0xd9] sm:$0xff] }
 0x7bc   : > { %14301 = vmatmul.mubr.msk.f32.gmra.mrb[72].mxu0 %vm1068_vm2, %v9652_v16  ;;  %v9622_v25 = vsel %vm578_vm0, %v20872_v45, %v9410_v26 }
 0x7bd   : > { %v9408_v63 = vpop.permute.xlu0 %9407  ;;  %11012 = vrot.lane.b32.xlu1 %v10813_v20, %s14822_s6  ;;  %v10820_v20 = vld [vmem:[#allocation2 + $0xda] sm:$0xff] }
 0x7be   : > { %v9621_v13 = vsel %vm578_vm0, %v20870_v11, %v9408_v63  ;;  %v10821_v63 = vld [vmem:[#allocation2 + $0xe2] sm:$0xff] }
 0x7bf   : > { %11010 = vrot.lane.b32.xlu0 %v10812_v27, %s14822_s6  ;;  %v9538_v39 = vpop.permute.xlu1 %9537 }
 0x7c0   : > { %v9654_v6 = vsel %vm611_vm1, %v9622_v25, %v9538_v39  ;;  %v10790_v25 = vld [vmem:[#allocation2 + $0xf1] sm:$0xff] }
 0x7c1   : > { %v9536_v58 = vpop.permute.xlu0 %9535  ;;  %10888 = vrot.lane.b32.xlu1 %v10783_v54, %s14821_s24 }
 0x7c2   : > { %v9653_v57 = vsel %vm611_vm1, %v9621_v13, %v9536_v58  ;;  %v10791_v13 = vld [vmem:[#allocation2 + $0xf9] sm:$0xff] }
 0x7c3   : > { %10886 = vrot.lane.b32.xlu0 %v10782_v28, %s14821_s24  ;;  %14303 = vmatprep.mubr.msk.f32.mxu0 %vm1068_vm2, %v9653_v57  ;;  %v9414_v56 = vpop.permute.xlu1 %9413 }
 0x7c4   : > { %14304 = vmatmul.mubr.msk.f32.gmra.mrb[74].mxu0 %vm1068_vm2, %v9654_v6  ;;  %v9624_v0 = vsel %vm578_vm0, %v20892_v46, %v9414_v56  ;;  %v10823_v6 = vld [vmem:[#allocation2 + $0xfa] sm:$0xff]  ;;  %v10822_v56 = vld [vmem:[#allocation2 + $0xf2] sm:$0xff] }
 0x7c5   : > { %v9412_v11 = vpop.permute.xlu0 %9411  ;;  %11016 = vrot.lane.b32.xlu1 %v10815_v51, %s14822_s6 }
 0x7c6   : > { %v9623_v60 = vsel %vm578_vm0, %v20890_v3, %v9412_v11 }
 0x7c7   : > { %11014 = vrot.lane.b32.xlu0 %v10814_v31, %s14822_s6  ;;  %v9542_v45 = vpop.permute.xlu1 %9541  ;;  %v10793_v31 = vld [vmem:[#allocation2 + $0x111] sm:$0xff] }
 0x7c8   : > { %v9656_v7 = vsel %vm611_vm1, %v9624_v0, %v9542_v45 }
 0x7c9   : > { %v9540_v19 = vpop.permute.xlu0 %9539  ;;  %10892 = vrot.lane.b32.xlu1 %v10785_v49, %s14821_s24 }
 0x7ca   : > { %v9655_v35 = vsel %vm611_vm1, %v9623_v60, %v9540_v19  ;;  %v10792_v19 = vld [vmem:[#allocation2 + $0x109] sm:$0xff] }
 0x7cb   : > { %10890 = vrot.lane.b32.xlu0 %v10784_v29, %s14821_s24  ;;  %14306 = vmatprep.mubr.msk.f32.mxu0 %vm1068_vm2, %v9655_v35  ;;  %v9418_v15 = vpop.permute.xlu1 %9417  ;;  %v10825_v35 = vld [vmem:[#allocation2 + $0x112] sm:$0xff]  ;;  %v10824_v29 = vld [vmem:[#allocation2 + $0x10a] sm:$0xff] }
 0x7cc   : > { %14307 = vmatmul.mubr.msk.f32.gmra.mrb[76].mxu0 %vm1068_vm2, %v9656_v7  ;;  %v9626_v61 = vsel %vm578_vm0, %v20912_v59, %v9418_v15 }
 0x7cd   : > { %v9416_v3 = vpop.permute.xlu0 %9415  ;;  %11020 = vrot.lane.b32.xlu1 %v10817_v4, %s14822_s6 }
 0x7ce   : > { %v9625_v41 = vsel %vm578_vm0, %v20910_v2, %v9416_v3  ;;  %v10795_v3 = vld [vmem:[#allocation2 + $0x129] sm:$0xff] }
 0x7cf   : > { %11018 = vrot.lane.b32.xlu0 %v10816_v37, %s14822_s6  ;;  %v9546_v46 = vpop.permute.xlu1 %9545 }
 0x7d0   : > { %v9658_v38 = vsel %vm611_vm1, %v9626_v61, %v9546_v46  ;;  %v10794_v46 = vld [vmem:[#allocation2 + $0x121] sm:$0xff] }
 0x7d1   : > { %v9544_v14 = vpop.permute.xlu0 %9543  ;;  %10896 = vrot.lane.b32.xlu1 %v10787_v50, %s14821_s24  ;;  %v10827_v50 = vld [vmem:[#allocation2 + $0x12a] sm:$0xff]  ;;  %v10826_v61 = vld [vmem:[#allocation2 + $0x122] sm:$0xff] }
 0x7d2   : > { %v9657_v8 = vsel %vm611_vm1, %v9625_v41, %v9544_v14 }
 0x7d3   : > { %10894 = vrot.lane.b32.xlu0 %v10786_v12, %s14821_s24  ;;  %14309 = vmatprep.mubr.msk.f32.mxu0 %vm1068_vm2, %v9657_v8  ;;  %v9422_v47 = vpop.permute.xlu1 %9421 }
 0x7d4   : > { %14310 = vmatmul.mubr.msk.f32.gmra.mrb[78].mxu0 %vm1068_vm2, %v9658_v38  ;;  %v9628_v62 = vsel %vm578_vm0, %v20932_v34, %v9422_v47  ;;  %v10797_v38 = vld [vmem:[#allocation2 + $0x141] sm:$0xff] }
 0x7d5   : > { %v9420_v2 = vpop.permute.xlu0 %9419  ;;  %11024 = vrot.lane.b32.xlu1 %v10819_v9, %s14822_s6  ;;  %v10796_v9 = vld [vmem:[#allocation2 + $0x139] sm:$0xff] }
 0x7d6   : > { %v9627_v42 = vsel %vm578_vm0, %v20930_v22, %v9420_v2 }
 0x7d7   : > { %11022 = vrot.lane.b32.xlu0 %v10818_v17, %s14822_s6  ;;  %v9550_v59 = vpop.permute.xlu1 %9549 }
 0x7d8   : > { %v9660_v16 = vsel %vm611_vm1, %v9628_v62, %v9550_v59 }
 0x7d9   : > { %v9548_v18 = vpop.permute.xlu0 %9547  ;;  %10900 = vrot.lane.b32.xlu1 %v10789_v30, %s14821_s24 }
 0x7da   : > { %v9659_v5 = vsel %vm611_vm1, %v9627_v42, %v9548_v18  ;;  %v10829_v42 = vld [vmem:[#allocation2 + $0x142] sm:$0xff]  ;;  %v10828_v18 = vld [vmem:[#allocation2 + $0x13a] sm:$0xff] }
 0x7db   : > { %10898 = vrot.lane.b32.xlu0 %v10788_v52, %s14821_s24  ;;  %14312 = vmatprep.mubr.msk.f32.mxu0 %vm1068_vm2, %v9659_v5  ;;  %v9426_v26 = vpop.permute.xlu1 %9425  ;;  %v10799_v5 = vld [vmem:[#allocation2 + $0x159] sm:$0xff] }
 0x7dc   : > { %14313 = vmatmul.mubr.msk.f32.gmra.mrb[80].mxu0 %vm1068_vm2, %v9660_v16  ;;  %v9630_v58 = vsel %vm578_vm0, %v20952_v43, %v9426_v26  ;;  %v10798_v26 = vld [vmem:[#allocation2 + $0x151] sm:$0xff] }
 0x7dd   : > { %v9424_v22 = vpop.permute.xlu0 %9423  ;;  %11028 = vrot.lane.b32.xlu1 %v10821_v63, %s14822_s6 }
 0x7de   : > { %v9629_v27 = vsel %vm578_vm0, %v20950_v33, %v9424_v22 }
 0x7df   : > { %11026 = vrot.lane.b32.xlu0 %v10820_v20, %s14822_s6  ;;  %v9554_v34 = vpop.permute.xlu1 %9553  ;;  %v10831_v20 = vld [vmem:[#allocation2 + $0x15a] sm:$0xff] }
 0x7e0   : > { %v9662_v57 = vsel %vm611_vm1, %v9630_v58, %v9554_v34  ;;  %v10830_v34 = vld [vmem:[#allocation2 + $0x152] sm:$0xff] }
 0x7e1   : > { %v9552_v39 = vpop.permute.xlu0 %9551  ;;  %10904 = vrot.lane.b32.xlu1 %v10791_v13, %s14821_s24  ;;  %v10801_v13 = vld [vmem:[#allocation2 + $0x171] sm:$0xff] }
 0x7e2   : > { %v9661_v54 = vsel %vm611_vm1, %v9629_v27, %v9552_v39 }
 0x7e3   : > { %10902 = vrot.lane.b32.xlu0 %v10790_v25, %s14821_s24  ;;  %14315 = vmatprep.mubr.msk.f32.mxu0 %vm1068_vm2, %v9661_v54  ;;  %v9430_v28 = vpop.permute.xlu1 %9429  ;;  %v10800_v25 = vld [vmem:[#allocation2 + $0x169] sm:$0xff] }
 0x7e4   : > { %14316 = vmatmul.mubr.msk.f32.gmra.mrb[82].mxu0 %vm1068_vm2, %v9662_v57  ;;  %v9632_v45 = vsel %vm578_vm0, %v20972_v10, %v9430_v28 }
 0x7e5   : > { %v9428_v33 = vpop.permute.xlu0 %9427  ;;  %11032 = vrot.lane.b32.xlu1 %v10823_v6, %s14822_s6  ;;  %v10832_v6 = vld [vmem:[#allocation2 + $0x16a] sm:$0xff] }
 0x7e6   : > { %v9631_v11 = vsel %vm578_vm0, %v20970_v53, %v9428_v33  ;;  %v10833_v33 = vld [vmem:[#allocation2 + $0x172] sm:$0xff] }
 0x7e7   : > { %11030 = vrot.lane.b32.xlu0 %v10822_v56, %s14822_s6  ;;  %v9558_v43 = vpop.permute.xlu1 %9557 }
 0x7e8   : > { %v9664_v49 = vsel %vm611_vm1, %v9632_v45, %v9558_v43  ;;  %v10802_v45 = vld [vmem:[#allocation2 + $0x181] sm:$0xff] }
 0x7e9   : > { %v9556_v51 = vpop.permute.xlu0 %9555  ;;  %10908 = vrot.lane.b32.xlu1 %v10793_v31, %s14821_s24 }
 0x7ea   : > { %v9663_v60 = vsel %vm611_vm1, %v9631_v11, %v9556_v51  ;;  %v10803_v11 = vld [vmem:[#allocation2 + $0x189] sm:$0xff] }
 0x7eb   : > { %10906 = vrot.lane.b32.xlu0 %v10792_v19, %s14821_s24  ;;  %14318 = vmatprep.mubr.msk.f32.mxu0 %vm1068_vm2, %v9663_v60  ;;  %v9434_v0 = vpop.permute.xlu1 %9433 }
 0x7ec   : > { %14319 = vmatmul.mubr.msk.f32.gmra.mrb[84].mxu0 %vm1068_vm2, %v9664_v49  ;;  %v9634_v4 = vsel %vm578_vm0, %v20992_v23, %v9434_v0  ;;  %v10835_v49 = vld [vmem:[#allocation2 + $0x18a] sm:$0xff]  ;;  %v10834_v0 = vld [vmem:[#allocation2 + $0x182] sm:$0xff] }
 0x7ed   : > { %v9432_v53 = vpop.permute.xlu0 %9431  ;;  %11036 = vrot.lane.b32.xlu1 %v10825_v35, %s14822_s6  ;;  %v10743_v35 = vld [vmem:[#allocation2 + $0x38] sm:$0xff] }
 0x7ee   : > { %v9633_v7 = vsel %vm578_vm0, %v20990_v55, %v9432_v53 }
 0x7ef   : > { %11034 = vrot.lane.b32.xlu0 %v10824_v29, %s14822_s6  ;;  %v9562_v10 = vpop.permute.xlu1 %9561 }
 0x7f0   : > { %v9666_v41 = vsel %vm611_vm1, %v9634_v4, %v9562_v10  ;;  %v10804_v4 = vld [vmem:[#allocation2 + $0x199] sm:$0xff] }
 0x7f1   : > { %v9560_v15 = vpop.permute.xlu0 %9559  ;;  %10912 = vrot.lane.b32.xlu1 %v10795_v3, %s14821_s24 }
 0x7f2   : > { %v9665_v37 = vsel %vm611_vm1, %v9633_v7, %v9560_v15  ;;  %v10805_v7 = vld [vmem:[#allocation2 + $0x1a1] sm:$0xff] }
 0x7f3   : > { %10910 = vrot.lane.b32.xlu0 %v10794_v46, %s14821_s24  ;;  %14321 = vmatprep.mubr.msk.f32.mxu0 %vm1068_vm2, %v9665_v37  ;;  %v9438_v14 = vpop.permute.xlu1 %9437 }
 0x7f4   : > { %14322 = vmatmul.mubr.msk.f32.gmra.mrb[86].mxu0 %vm1068_vm2, %v9666_v41  ;;  %v9636_v47 = vsel %vm578_vm0, %v21012_v44, %v9438_v14  ;;  %v10837_v14 = vld [vmem:[#allocation2 + $0x1a2] sm:$0xff] }
 0x7f5   : > { %v9436_v55 = vpop.permute.xlu0 %9435  ;;  %11040 = vrot.lane.b32.xlu1 %v10827_v50, %s14822_s6  ;;  %v10744_v50 = vld [vmem:[#allocation2 + $0x48] sm:$0xff] }
 0x7f6   : > { %v9635_v8 = vsel %vm578_vm0, %v21010_v36, %v9436_v55  ;;  %v10836_v55 = vld [vmem:[#allocation2 + $0x19a] sm:$0xff] }
 0x7f7   : > { %11038 = vrot.lane.b32.xlu0 %v10826_v61, %s14822_s6  ;;  %v9566_v23 = vpop.permute.xlu1 %9565 }
 0x7f8   : > { %v9668_v17 = vsel %vm611_vm1, %v9636_v47, %v9566_v23  ;;  %v10745_v23 = vld [vmem:[#allocation2 + $0x50] sm:$0xff] }
 0x7f9   : > { %v9564_v12 = vpop.permute.xlu0 %9563  ;;  %10916 = vrot.lane.b32.xlu1 %v10797_v38, %s14821_s24 }
 0x7fa   : > { %v9667_v2 = vsel %vm611_vm1, %v9635_v8, %v9564_v12 }
 0x7fb   : > { %10914 = vrot.lane.b32.xlu0 %v10796_v9, %s14821_s24  ;;  %14324 = vmatprep.mubr.msk.f32.mxu0 %vm1068_vm2, %v9667_v2  ;;  %v9442_v59 = vpop.permute.xlu1 %9441 }
 0x7fc   : > { %14325 = vmatmul.mubr.msk.f32.gmra.mrb[88].mxu0 %vm1068_vm2, %v9668_v17  ;;  %v9638_v52 = vsel %vm578_vm0, %v21032_v48, %v9442_v59  ;;  %v10746_v59 = vld [vmem:[#allocation2 + $0x60] sm:$0xff] }
 0x7fd   : > { %v9440_v36 = vpop.permute.xlu0 %9439  ;;  %11044 = vrot.lane.b32.xlu1 %v10829_v42, %s14822_s6  ;;  %v10747_v42 = vld [vmem:[#allocation2 + $0x68] sm:$0xff] }
 0x7fe   : > { %v9637_v30 = vsel %vm578_vm0, %v21030_v1, %v9440_v36 }
 0x7ff   : > { %11042 = vrot.lane.b32.xlu0 %v10828_v18, %s14822_s6  ;;  %v9570_v44 = vpop.permute.xlu1 %9569 }
 0x800   : > { %v9670_v22 = vsel %vm611_vm1, %v9638_v52, %v9570_v44 }
 0x801   : > { %v9568_v62 = vpop.permute.xlu0 %9567  ;;  %10920 = vrot.lane.b32.xlu1 %v10799_v5, %s14821_s24 }
 0x802   : > { %v9669_v16 = vsel %vm611_vm1, %v9637_v30, %v9568_v62 }
 0x803   : > { %10918 = vrot.lane.b32.xlu0 %v10798_v26, %s14821_s24  ;;  %14327 = vmatprep.mubr.msk.f32.mxu0 %vm1068_vm2, %v9669_v16  ;;  %v9446_v63 = vpop.permute.xlu1 %9445  ;;  %v10748_v26 = vld [vmem:[#allocation2 + $0x78] sm:$0xff] }
 0x804   : > { %14328 = vmatmul.mubr.msk.f32.gmra.mrb[90].mxu0 %vm1068_vm2, %v9670_v22  ;;  %v9640_v58 = vsel %vm578_vm0, %v21052_v40, %v9446_v63  ;;  %v10749_v63 = vld [vmem:[#allocation2 + $0x80] sm:$0xff] }
 0x805   : > { %v9444_v1 = vpop.permute.xlu0 %9443  ;;  %11048 = vrot.lane.b32.xlu1 %v10831_v20, %s14822_s6 }
 0x806   : > { %v9639_v27 = vsel %vm578_vm0, %v21050_v21, %v9444_v1 }
 0x807   : > { %11046 = vrot.lane.b32.xlu0 %v10830_v34, %s14822_s6  ;;  %v9574_v48 = vpop.permute.xlu1 %9573 }
 0x808   : > { %v9672_v57 = vsel %vm611_vm1, %v9640_v58, %v9574_v48  ;;  %v10750_v58 = vld [vmem:[#allocation2 + $0x90] sm:$0xff] }
 0x809   : > { %v9572_v39 = vpop.permute.xlu0 %9571  ;;  %10924 = vrot.lane.b32.xlu1 %v10801_v13, %s14821_s24 }
 0x80a   : > { %v9671_v54 = vsel %vm611_vm1, %v9639_v27, %v9572_v39 }
 0x80b   : > { %10922 = vrot.lane.b32.xlu0 %v10800_v25, %s14821_s24  ;;  %14330 = vmatprep.mubr.msk.f32.mxu0 %vm1068_vm2, %v9671_v54  ;;  %v9450_v28 = vpop.permute.xlu1 %9449  ;;  %v10751_v25 = vld [vmem:[#allocation2 + $0x98] sm:$0xff] }
 0x80c   : > { %14331 = vmatmul.mubr.msk.f32.gmra.mrb[92].mxu0 %vm1068_vm2, %v9672_v57  ;;  %v9642_v51 = vsel %vm578_vm0, %v21072_v24, %v9450_v28  ;;  %v10742_v24 = vld [vmem:[#allocation2 + $0x30] sm:$0xff] }
 0x80d   : > { %v9448_v21 = vpop.permute.xlu0 %9447  ;;  %11052 = vrot.lane.b32.xlu1 %v10833_v33, %s14822_s6 }
 0x80e   : > { %v9641_v56 = vsel %vm578_vm0, %v21070_v32, %v9448_v21 }
 0x80f   : > { %11050 = vrot.lane.b32.xlu0 %v10832_v6, %s14822_s6  ;;  %v9578_v40 = vpop.permute.xlu1 %9577 }
 0x810   : > { %v9674_v60 = vsel %vm611_vm1, %v9642_v51, %v9578_v40  ;;  %v10753_v51 = vld [vmem:[#allocation2 + $0xb0] sm:$0xff] }
 0x811   : > { %v9576_v43 = vpop.permute.xlu0 %9575  ;;  %10928 = vrot.lane.b32.xlu1 %v10803_v11, %s14821_s24 }
 0x812   : > { %v9673_v31 = vsel %vm611_vm1, %v9641_v56, %v9576_v43  ;;  %v10752_v43 = vld [vmem:[#allocation2 + $0xa8] sm:$0xff] }
 0x813   : > { %10926 = vrot.lane.b32.xlu0 %v10802_v45, %s14821_s24  ;;  %14333 = vmatprep.mubr.msk.f32.mxu0 %vm1068_vm2, %v9673_v31  ;;  %v10873_v19 = vpop.permute.xlu1 %10872 }
 0x814   : > { %14334 = vmatmul.mubr.msk.f32.gmra.mrb[94].mxu0 %vm1068_vm2, %v9674_v60  ;;  %v11095_v15 = vsel %vm578_vm0, %v10743_v35, %v10873_v19  ;;  %v10755_v35 = vld [vmem:[#allocation2 + $0xc8] sm:$0xff] }
 0x815   : > { %v10871_v32 = vpop.permute.xlu0 %10870  ;;  %11056 = vrot.lane.b32.xlu1 %v10835_v49, %s14822_s6 }
 0x816   : > { %v11094_v29 = vsel %vm578_vm0, %v10742_v24, %v10871_v32  ;;  %v10754_v24 = vld [vmem:[#allocation2 + $0xc0] sm:$0xff] }
 0x817   : > { %11054 = vrot.lane.b32.xlu0 %v10834_v0, %s14822_s6  ;;  %v11001_v53 = vpop.permute.xlu1 %11000 }
 0x818   : > { %v11127_v37 = vsel %vm611_vm1, %v11095_v15, %v11001_v53 }
 0x819   : > { %v10999_v10 = vpop.permute.xlu0 %10998  ;;  %10932 = vrot.lane.b32.xlu1 %v10805_v7, %s14821_s24 }
 0x81a   : > { %v11126_v3 = vsel %vm611_vm1, %v11094_v29, %v10999_v10 }
 0x81b   : > { %10930 = vrot.lane.b32.xlu0 %v10804_v4, %s14821_s24  ;;  %14342 = vmatprep.mubr.msk.f32.mxu0 %vm1068_vm2, %v11126_v3  ;;  %v10877_v46 = vpop.permute.xlu1 %10876  ;;  %s13054_s24 = sshll.u32 %s22315_s19, 8 }
 0x81c   : > { %14343 = vmatmul.mubr.msk.f32.vlgmr.msra.gmra.mrb[64].mxu0 %vm1068_vm2, %v11127_v37  ;;  %v11097_v38 = vsel %vm578_vm0, %v10745_v23, %v10877_v46  ;;  %v10756_v46 = vld [vmem:[#allocation2 + $0xd8] sm:$0xff]  ;;  %s21420_s17 = scalar_lea.vmem %s21526_s5, %s13054_s24 }
 0x81d   : > { %v10875_v41 = vpop.permute.xlu0 %10874  ;;  %11060 = vrot.lane.b32.xlu1 %v10837_v14, %s14822_s6  ;;  %v10757_v14 = vld [vmem:[#allocation2 + $0xe0] sm:$0xff] }
 0x81e   : > { %v11096_v8 = vsel %vm578_vm0, %v10744_v50, %v10875_v41 }
 0x81f   : > { %11058 = vrot.lane.b32.xlu0 %v10836_v55, %s14822_s6  ;;  %v11005_v61 = vpop.permute.xlu1 %11004 }
 0x820   : > { %v11129_v2 = vsel %vm611_vm1, %v11097_v38, %v11005_v61 }
 0x821   : > { %v11003_v12 = vpop.permute.xlu0 %11002 }
 0x822   : > { %v11128_v47 = vsel %vm611_vm1, %v11096_v8, %v11003_v12 }
 0x823   : > { %14345 = vmatprep.mubr.msk.f32.mxu0 %vm1068_vm2, %v11128_v47  ;;  %v10881_v9 = vpop.permute.xlu1 %10880  ;;  %v10758_v47 = vld [vmem:[#allocation2 + $0xf0] sm:$0xff] }
 0x824   : > { %14346 = vmatmul.mubr.msk.f32.gmra.mrb[66].mxu0 %vm1068_vm2, %v11129_v2  ;;  %v11099_v30 = vsel %vm578_vm0, %v10747_v42, %v10881_v9  ;;  %v10759_v9 = vld [vmem:[#allocation2 + $0xf8] sm:$0xff] }
 0x825   : > { %v10879_v17 = vpop.permute.xlu0 %10878 }
 0x826   : > { %v11098_v18 = vsel %vm578_vm0, %v10746_v59, %v10879_v17 }
 0x827   : > { %v11009_v36 = vpop.permute.xlu1 %11008 }
 0x828   : > { %v11131_v5 = vsel %vm611_vm1, %v11099_v30, %v11009_v36 }
 0x829   : > { %v11007_v44 = vpop.permute.xlu0 %11006 }
 0x82a   : > { %v11130_v62 = vsel %vm611_vm1, %v11098_v18, %v11007_v44 }
 0x82b   : > { %14348 = vmatprep.mubr.msk.f32.mxu0 %vm1068_vm2, %v11130_v62  ;;  %v10885_v52 = vpop.permute.xlu1 %10884  ;;  %v10760_v62 = vld [vmem:[#allocation2 + $0x108] sm:$0xff] }
 0x82c   : > { %14349 = vmatmul.mubr.msk.f32.gmra.mrb[68].mxu0 %vm1068_vm2, %v11131_v5  ;;  %v11101_v34 = vsel %vm578_vm0, %v10749_v63, %v10885_v52  ;;  %v10761_v52 = vld [vmem:[#allocation2 + $0x110] sm:$0xff] }
 0x82d   : > { %v10883_v16 = vpop.permute.xlu0 %10882 }
 0x82e   : > { %v11100_v1 = vsel %vm578_vm0, %v10748_v26, %v10883_v16 }
 0x82f   : > { %v11013_v22 = vpop.permute.xlu1 %11012 }
 0x830   : > { %v11133_v27 = vsel %vm611_vm1, %v11101_v34, %v11013_v22 }
 0x831   : > { %v11011_v20 = vpop.permute.xlu0 %11010 }
 0x832   : > { %v11132_v48 = vsel %vm611_vm1, %v11100_v1, %v11011_v20 }
 0x833   : > { %14351 = vmatprep.mubr.msk.f32.mxu0 %vm1068_vm2, %v11132_v48  ;;  %v10889_v39 = vpop.permute.xlu1 %10888  ;;  %v10762_v48 = vld [vmem:[#allocation2 + $0x120] sm:$0xff] }
 0x834   : > { %14352 = vmatmul.mubr.msk.f32.gmra.mrb[70].mxu0 %vm1068_vm2, %v11133_v27  ;;  %v11103_v21 = vsel %vm578_vm0, %v10751_v25, %v10889_v39  ;;  %v10763_v39 = vld [vmem:[#allocation2 + $0x128] sm:$0xff] }
 0x835   : > { %v10887_v13 = vpop.permute.xlu0 %10886 }
 0x836   : > { %v11102_v57 = vsel %vm578_vm0, %v10750_v58, %v10887_v13 }
 0x837   : > { %v11017_v54 = vpop.permute.xlu1 %11016 }
 0x838   : > { %v11135_v6 = vsel %vm611_vm1, %v11103_v21, %v11017_v54 }
 0x839   : > { %v11015_v28 = vpop.permute.xlu0 %11014 }
 0x83a   : > { %v11134_v33 = vsel %vm611_vm1, %v11102_v57, %v11015_v28 }
 0x83b   : > { %14354 = vmatprep.mubr.msk.f32.mxu0 %vm1068_vm2, %v11134_v33  ;;  %v10893_v40 = vpop.permute.xlu1 %10892  ;;  %v10764_v33 = vld [vmem:[#allocation2 + $0x138] sm:$0xff] }
 0x83c   : > { %14355 = vmatmul.mubr.msk.f32.gmra.mrb[72].mxu0 %vm1068_vm2, %v11135_v6  ;;  %v11105_v60 = vsel %vm578_vm0, %v10753_v51, %v10893_v40  ;;  %v10765_v40 = vld [vmem:[#allocation2 + $0x140] sm:$0xff] }
 0x83d   : > { %v10891_v56 = vpop.permute.xlu0 %10890 }
 0x83e   : > { %v11104_v31 = vsel %vm578_vm0, %v10752_v43, %v10891_v56 }
 0x83f   : > { %v11021_v11 = vpop.permute.xlu1 %11020 }
 0x840   : > { %v11137_v32 = vsel %vm611_vm1, %v11105_v60, %v11021_v11 }
 0x841   : > { %v11019_v45 = vpop.permute.xlu0 %11018 }
 0x842   : > { %v11136_v19 = vsel %vm611_vm1, %v11104_v31, %v11019_v45 }
 0x843   : > { %14357 = vmatprep.mubr.msk.f32.mxu0 %vm1068_vm2, %v11136_v19  ;;  %v10897_v49 = vpop.permute.xlu1 %10896  ;;  %v10766_v19 = vld [vmem:[#allocation2 + $0x150] sm:$0xff] }
 0x844   : > { %14358 = vmatmul.mubr.msk.f32.gmra.mrb[74].mxu0 %vm1068_vm2, %v11137_v32  ;;  %v11107_v7 = vsel %vm578_vm0, %v10755_v35, %v10897_v49  ;;  %v10767_v49 = vld [vmem:[#allocation2 + $0x158] sm:$0xff] }
 0x845   : > { %v10895_v0 = vpop.permute.xlu0 %10894 }
 0x846   : > { %v11106_v29 = vsel %vm578_vm0, %v10754_v24, %v10895_v0 }
 0x847   : > { %v11025_v53 = vpop.permute.xlu1 %11024 }
 0x848   : > { %v11139_v3 = vsel %vm611_vm1, %v11107_v7, %v11025_v53 }
 0x849   : > { %v11023_v10 = vpop.permute.xlu0 %11022 }
 0x84a   : > { %v11138_v15 = vsel %vm611_vm1, %v11106_v29, %v11023_v10 }
 0x84b   : > { %14360 = vmatprep.mubr.msk.f32.mxu0 %vm1068_vm2, %v11138_v15  ;;  %v10901_v4 = vpop.permute.xlu1 %10900  ;;  %v10768_v15 = vld [vmem:[#allocation2 + $0x168] sm:$0xff] }
 0x84c   : > { %14361 = vmatmul.mubr.msk.f32.gmra.mrb[76].mxu0 %vm1068_vm2, %v11139_v3  ;;  %v11109_v61 = vsel %vm578_vm0, %v10757_v14, %v10901_v4  ;;  %v10769_v4 = vld [vmem:[#allocation2 + $0x170] sm:$0xff] }
 0x84d   : > { %v10899_v37 = vpop.permute.xlu0 %10898 }
 0x84e   : > { %v11108_v55 = vsel %vm578_vm0, %v10756_v46, %v10899_v37 }
 0x84f   : > { %v11029_v41 = vpop.permute.xlu1 %11028 }
 0x850   : > { %v11141_v8 = vsel %vm611_vm1, %v11109_v61, %v11029_v41 }
 0x851   : > { %v11027_v50 = vpop.permute.xlu0 %11026 }
 0x852   : > { %v11140_v23 = vsel %vm611_vm1, %v11108_v55, %v11027_v50 }
 0x853   : > { %14363 = vmatprep.mubr.msk.f32.mxu0 %vm1068_vm2, %v11140_v23  ;;  %v10905_v12 = vpop.permute.xlu1 %10904  ;;  %v10770_v23 = vld [vmem:[#allocation2 + $0x180] sm:$0xff] }
 0x854   : > { %14364 = vmatmul.mubr.msk.f32.gmra.mrb[78].mxu0 %vm1068_vm2, %v11141_v8  ;;  %v11111_v36 = vsel %vm578_vm0, %v10759_v9, %v10905_v12  ;;  %v10771_v12 = vld [vmem:[#allocation2 + $0x188] sm:$0xff] }
 0x855   : > { %v10903_v38 = vpop.permute.xlu0 %10902 }
 0x856   : > { %v11110_v17 = vsel %vm578_vm0, %v10758_v47, %v10903_v38 }
 0x857   : > { %v11033_v2 = vpop.permute.xlu1 %11032 }
 0x858   : > { %v11143_v18 = vsel %vm611_vm1, %v11111_v36, %v11033_v2 }
 0x859   : > { %v11031_v59 = vpop.permute.xlu0 %11030 }
 0x85a   : > { %v11142_v42 = vsel %vm611_vm1, %v11110_v17, %v11031_v59 }
 0x85b   : > { %14366 = vmatprep.mubr.msk.f32.mxu0 %vm1068_vm2, %v11142_v42  ;;  %v10909_v44 = vpop.permute.xlu1 %10908  ;;  %v10772_v42 = vld [vmem:[#allocation2 + $0x198] sm:$0xff] }
 0x85c   : > { %14367 = vmatmul.mubr.msk.f32.gmra.mrb[80].mxu0 %vm1068_vm2, %v11143_v18  ;;  %v11113_v22 = vsel %vm578_vm0, %v10761_v52, %v10909_v44  ;;  %v10773_v44 = vld [vmem:[#allocation2 + $0x1a0] sm:$0xff] }
 0x85d   : > { %v10907_v30 = vpop.permute.xlu0 %10906 }
 0x85e   : > { %v11112_v16 = vsel %vm578_vm0, %v10760_v62, %v10907_v30 }
 0x85f   : > { %v11037_v5 = vpop.permute.xlu1 %11036 }
 0x860   : > { %v11145_v1 = vsel %vm611_vm1, %v11113_v22, %v11037_v5 }
 0x861   : > { %v11035_v26 = vpop.permute.xlu0 %11034 }
 0x862   : > { %v11144_v63 = vsel %vm611_vm1, %v11112_v16, %v11035_v26  ;;  %v21415_v26 = vld [vmem:[%s21525_s4] ss:$0 sm:$0xff] }
 0x863   : > { %14369 = vmatprep.mubr.msk.f32.mxu0 %vm1068_vm2, %v11144_v63  ;;  %v10913_v20 = vpop.permute.xlu1 %10912 }
 0x864   : > { %14370 = vmatmul.mubr.msk.f32.gmra.mrb[82].mxu0 %vm1068_vm2, %v11145_v1  ;;  %v11115_v54 = vsel %vm578_vm0, %v10763_v39, %v10913_v20 }
 0x865   : > { %v10911_v34 = vpop.permute.xlu0 %10910 }
 0x866   : > { %v11114_v13 = vsel %vm578_vm0, %v10762_v48, %v10911_v34 }
 0x867   : > { %v11041_v27 = vpop.permute.xlu1 %11040 }
 0x868   : > { %v11147_v57 = vsel %vm611_vm1, %v11115_v54, %v11041_v27 }
 0x869   : > { %v11039_v58 = vpop.permute.xlu0 %11038 }
 0x86a   : > { %v11146_v25 = vsel %vm611_vm1, %v11114_v13, %v11039_v58 }
 0x86b   : > { %14372 = vmatprep.mubr.msk.f32.mxu0 %vm1068_vm2, %v11146_v25  ;;  %v10917_v28 = vpop.permute.xlu1 %10916 }
 0x86c   : > { %14373 = vmatmul.mubr.msk.f32.gmra.mrb[84].mxu0 %vm1068_vm2, %v11147_v57  ;;  %v11117_v11 = vsel %vm578_vm0, %v10765_v40, %v10917_v28 }
 0x86d   : > { %v10915_v21 = vpop.permute.xlu0 %10914 }
 0x86e   : > { %v11116_v56 = vsel %vm578_vm0, %v10764_v33, %v10915_v21 }
 0x86f   : > { %v11045_v6 = vpop.permute.xlu1 %11044 }
 0x870   : > { %v11149_v31 = vsel %vm611_vm1, %v11117_v11, %v11045_v6 }
 0x871   : > { %v11043_v43 = vpop.permute.xlu0 %11042 }
 0x872   : > { %v11148_v51 = vsel %vm611_vm1, %v11116_v56, %v11043_v43 }
 0x873   : > { %14375 = vmatprep.mubr.msk.f32.mxu0 %vm1068_vm2, %v11148_v51  ;;  %v10921_v45 = vpop.permute.xlu1 %10920 }
 0x874   : > { %14376 = vmatmul.mubr.msk.f32.gmra.mrb[86].mxu0 %vm1068_vm2, %v11149_v31  ;;  %v11119_v53 = vsel %vm578_vm0, %v10767_v49, %v10921_v45 }
 0x875   : > { %v10919_v60 = vpop.permute.xlu0 %10918 }
 0x876   : > { %v11118_v0 = vsel %vm578_vm0, %v10766_v19, %v10919_v60 }
 0x877   : > { %v11049_v32 = vpop.permute.xlu1 %11048 }
 0x878   : > { %v11151_v29 = vsel %vm611_vm1, %v11119_v53, %v11049_v32 }
 0x879   : > { %v11047_v24 = vpop.permute.xlu0 %11046 }
 0x87a   : > { %v11150_v35 = vsel %vm611_vm1, %v11118_v0, %v11047_v24 }
 0x87b   : > { %14378 = vmatprep.mubr.msk.f32.mxu0 %vm1068_vm2, %v11150_v35  ;;  %v10925_v10 = vpop.permute.xlu1 %10924 }
 0x87c   : > { %14379 = vmatmul.mubr.msk.f32.gmra.mrb[88].mxu0 %vm1068_vm2, %v11151_v29  ;;  %v11121_v41 = vsel %vm578_vm0, %v10769_v4, %v10925_v10 }
 0x87d   : > { %v10923_v7 = vpop.permute.xlu0 %10922 }
 0x87e   : > { %v11120_v37 = vsel %vm578_vm0, %v10768_v15, %v10923_v7 }
 0x87f   : > { %v11053_v3 = vpop.permute.xlu1 %11052 }
 0x880   : > { %v11153_v55 = vsel %vm611_vm1, %v11121_v41, %v11053_v3 }
 0x881   : > { %v11051_v46 = vpop.permute.xlu0 %11050 }
 0x882   : > { %v11152_v14 = vsel %vm611_vm1, %v11120_v37, %v11051_v46 }
 0x883   : > { %14381 = vmatprep.mubr.msk.f32.mxu0 %vm1068_vm2, %v11152_v14  ;;  %v10929_v50 = vpop.permute.xlu1 %10928 }
 0x884   : > { %14382 = vmatmul.mubr.msk.f32.gmra.mrb[90].mxu0 %vm1068_vm2, %v11153_v55  ;;  %v11123_v2 = vsel %vm578_vm0, %v10771_v12, %v10929_v50 }
 0x885   : > { %v10927_v61 = vpop.permute.xlu0 %10926 }
 0x886   : > { %v11122_v38 = vsel %vm578_vm0, %v10770_v23, %v10927_v61 }
 0x887   : > { %v11057_v8 = vpop.permute.xlu1 %11056 }
 0x888   : > { %v11155_v17 = vsel %vm611_vm1, %v11123_v2, %v11057_v8 }
 0x889   : > { %v11055_v47 = vpop.permute.xlu0 %11054 }
 0x88a   : > { %v11154_v9 = vsel %vm611_vm1, %v11122_v38, %v11055_v47 }
 0x88b   : > { %14384 = vmatprep.mubr.msk.f32.mxu0 %vm1068_vm2, %v11154_v9  ;;  %v10933_v59 = vpop.permute.xlu1 %10932 }
 0x88c   : > { %14385 = vmatmul.mubr.msk.f32.gmra.mrb[92].mxu0 %vm1068_vm2, %v11155_v17  ;;  %v11125_v5 = vsel %vm578_vm0, %v10773_v44, %v10933_v59 }
 0x88d   : > { %v10931_v36 = vpop.permute.xlu0 %10930 }
 0x88e   : > { %v11124_v30 = vsel %vm578_vm0, %v10772_v42, %v10931_v36 }
 0x88f   : > { %v11061_v18 = vpop.permute.xlu1 %11060 }
 0x890   : > { %v11157_v16 = vsel %vm611_vm1, %v11125_v5, %v11061_v18 }
 0x891   : > { %v11059_v62 = vpop.permute.xlu0 %11058 }
 0x892   : > { %v11156_v52 = vsel %vm611_vm1, %v11124_v30, %v11059_v62 }
 0x893   : > { %14387 = vmatprep.mubr.msk.f32.mxu0 %vm1068_vm2, %v11156_v52 }
 0x894   : > { %14388 = vmatmul.mubr.msk.f32.gmra.mrb[94].mxu0 %vm1068_vm2, %v11157_v16 }
 0x8ef   : > { %v14344_v22 = vpop.f32.mrb[64].mxu0 }
 0x8f0   : > { %v11523_v63 = vadd.f32 %v14344_v22, %v21415_v26  ;;  %v11324_v1 = vpop.f32.mrb[65].mxu0 }
 0x8f1   : > { %v11522_v20 = vadd.f32 %v21415_v26, %v11324_v1 }
 0x8f2   : > { %11555 = vst.msk [vmem:[%s21420_s17 + $0x8] sm:$0xff] %vm578_vm0, %v11523_v63 }
 0x8f3   : > { %11554 = vst.msk [vmem:[%s21420_s17] sm:$0xff] %vm578_vm0, %v11522_v20 }
 0x8f7   : > { %v14347_v34 = vpop.f32.mrb[66].mxu0 }
 0x8f8   : > { %v11525_v48 = vadd.f32 %v14347_v34, %v21415_v26  ;;  %v11334_v27 = vpop.f32.mrb[67].mxu0 }
 0x8f9   : > { %v11524_v39 = vadd.f32 %v21415_v26, %v11334_v27 }
 0x8fa   : > { %11557 = vst.msk [vmem:[%s21420_s17 + $0x18] sm:$0xff] %vm578_vm0, %v11525_v48 }
 0x8fb   : > { %11556 = vst.msk [vmem:[%s21420_s17 + $0x10] sm:$0xff] %vm578_vm0, %v11524_v39 }
 0x8ff   : > { %v14350_v13 = vpop.f32.mrb[68].mxu0 }
 0x900   : > { %v11527_v58 = vadd.f32 %v14350_v13, %v21415_v26  ;;  %v11344_v54 = vpop.f32.mrb[69].mxu0 }
 0x901   : > { %v11526_v25 = vadd.f32 %v21415_v26, %v11344_v54 }
 0x902   : > { %11559 = vst.msk [vmem:[%s21420_s17 + $0x28] sm:$0xff] %vm578_vm0, %v11527_v58 }
 0x903   : > { %11558 = vst.msk [vmem:[%s21420_s17 + $0x20] sm:$0xff] %vm578_vm0, %v11526_v25 }
 0x907   : > { %v14353_v57 = vpop.f32.mrb[70].mxu0 }
 0x908   : > { %v11529_v28 = vadd.f32 %v14353_v57, %v21415_v26  ;;  %v11354_v21 = vpop.f32.mrb[71].mxu0 }
 0x909   : > { %v11528_v33 = vadd.f32 %v21415_v26, %v11354_v21 }
 0x90a   : > { %11561 = vst.msk [vmem:[%s21420_s17 + $0x38] sm:$0xff] %vm578_vm0, %v11529_v28 }
 0x90b   : > { %11560 = vst.msk [vmem:[%s21420_s17 + $0x30] sm:$0xff] %vm578_vm0, %v11528_v33 }
 0x90f   : > { %v14356_v6 = vpop.f32.mrb[72].mxu0 }
 0x910   : > { %v11531_v40 = vadd.f32 %v14356_v6, %v21415_v26  ;;  %v11364_v56 = vpop.f32.mrb[73].mxu0 }
 0x911   : > { %v11530_v43 = vadd.f32 %v21415_v26, %v11364_v56 }
 0x912   : > { %11563 = vst.msk [vmem:[%s21420_s17 + $0x48] sm:$0xff] %vm578_vm0, %v11531_v40 }
 0x913   : > { %11562 = vst.msk [vmem:[%s21420_s17 + $0x40] sm:$0xff] %vm578_vm0, %v11530_v43 }
 0x917   : > { %v14359_v11 = vpop.f32.mrb[74].mxu0 }
 0x918   : > { %v11533_v51 = vadd.f32 %v14359_v11, %v21415_v26  ;;  %v11374_v31 = vpop.f32.mrb[75].mxu0 }
 0x919   : > { %v11532_v45 = vadd.f32 %v21415_v26, %v11374_v31 }
 0x91a   : > { %11565 = vst.msk [vmem:[%s21420_s17 + $0x58] sm:$0xff] %vm578_vm0, %v11533_v51 }
 0x91b   : > { %11564 = vst.msk [vmem:[%s21420_s17 + $0x50] sm:$0xff] %vm578_vm0, %v11532_v45 }
 0x91f   : > { %v14362_v60 = vpop.f32.mrb[76].mxu0 }
 0x920   : > { %v11535_v19 = vadd.f32 %v14362_v60, %v21415_v26  ;;  %v11384_v32 = vpop.f32.mrb[77].mxu0 }
 0x921   : > { %v11534_v49 = vadd.f32 %v21415_v26, %v11384_v32 }
 0x922   : > { %11567 = vst.msk [vmem:[%s21420_s17 + $0x68] sm:$0xff] %vm578_vm0, %v11535_v19 }
 0x923   : > { %11566 = vst.msk [vmem:[%s21420_s17 + $0x60] sm:$0xff] %vm578_vm0, %v11534_v49 }
 0x927   : > { %v14365_v0 = vpop.f32.mrb[78].mxu0 }
 0x928   : > { %v11537_v24 = vadd.f32 %v14365_v0, %v21415_v26  ;;  %v11394_v53 = vpop.f32.mrb[79].mxu0 }
 0x929   : > { %v11536_v35 = vadd.f32 %v21415_v26, %v11394_v53 }
 0x92a   : > { %11569 = vst.msk [vmem:[%s21420_s17 + $0x78] sm:$0xff] %vm578_vm0, %v11537_v24 }
 0x92b   : > { %11568 = vst.msk [vmem:[%s21420_s17 + $0x70] sm:$0xff] %vm578_vm0, %v11536_v35 }
 0x92f   : > { %v14368_v29 = vpop.f32.mrb[80].mxu0 }
 0x930   : > { %v11539_v10 = vadd.f32 %v14368_v29, %v21415_v26  ;;  %v11404_v7 = vpop.f32.mrb[81].mxu0 }
 0x931   : > { %v11538_v15 = vadd.f32 %v21415_v26, %v11404_v7 }
 0x932   : > { %11571 = vst.msk [vmem:[%s21420_s17 + $0x88] sm:$0xff] %vm578_vm0, %v11539_v10 }
 0x933   : > { %11570 = vst.msk [vmem:[%s21420_s17 + $0x80] sm:$0xff] %vm578_vm0, %v11538_v15 }
 0x937   : > { %v14371_v3 = vpop.f32.mrb[82].mxu0 }
 0x938   : > { %v11541_v4 = vadd.f32 %v14371_v3, %v21415_v26  ;;  %v11414_v37 = vpop.f32.mrb[83].mxu0 }
 0x939   : > { %v11540_v46 = vadd.f32 %v21415_v26, %v11414_v37 }
 0x93a   : > { %11573 = vst.msk [vmem:[%s21420_s17 + $0x98] sm:$0xff] %vm578_vm0, %v11541_v4 }
 0x93b   : > { %11572 = vst.msk [vmem:[%s21420_s17 + $0x90] sm:$0xff] %vm578_vm0, %v11540_v46 }
 0x93f   : > { %v14374_v41 = vpop.f32.mrb[84].mxu0 }
 0x940   : > { %v11543_v14 = vadd.f32 %v14374_v41, %v21415_v26  ;;  %v11424_v55 = vpop.f32.mrb[85].mxu0 }
 0x941   : > { %v11542_v50 = vadd.f32 %v21415_v26, %v11424_v55 }
 0x942   : > { %11575 = vst.msk [vmem:[%s21420_s17 + $0xa8] sm:$0xff] %vm578_vm0, %v11543_v14 }
 0x943   : > { %11574 = vst.msk [vmem:[%s21420_s17 + $0xa0] sm:$0xff] %vm578_vm0, %v11542_v50 }
 0x947   : > { %v14377_v61 = vpop.f32.mrb[86].mxu0 }
 0x948   : > { %v11545_v23 = vadd.f32 %v14377_v61, %v21415_v26  ;;  %v11434_v8 = vpop.f32.mrb[87].mxu0 }
 0x949   : > { %v11544_v12 = vadd.f32 %v21415_v26, %v11434_v8 }
 0x94a   : > { %11577 = vst.msk [vmem:[%s21420_s17 + $0xb8] sm:$0xff] %vm578_vm0, %v11545_v23 }
 0x94b   : > { %11576 = vst.msk [vmem:[%s21420_s17 + $0xb0] sm:$0xff] %vm578_vm0, %v11544_v12 }
 0x94f   : > { %v14380_v38 = vpop.f32.mrb[88].mxu0 }
 0x950   : > { %v11547_v47 = vadd.f32 %v14380_v38, %v21415_v26  ;;  %v11444_v2 = vpop.f32.mrb[89].mxu0 }
 0x951   : > { %v11546_v9 = vadd.f32 %v21415_v26, %v11444_v2 }
 0x952   : > { %11579 = vst.msk [vmem:[%s21420_s17 + $0xc8] sm:$0xff] %vm578_vm0, %v11547_v47 }
 0x953   : > { %11578 = vst.msk [vmem:[%s21420_s17 + $0xc0] sm:$0xff] %vm578_vm0, %v11546_v9 }
 0x957   : > { %v14383_v17 = vpop.f32.mrb[90].mxu0 }
 0x958   : > { %v11549_v59 = vadd.f32 %v14383_v17, %v21415_v26  ;;  %v11454_v36 = vpop.f32.mrb[91].mxu0 }
 0x959   : > { %v11548_v42 = vadd.f32 %v21415_v26, %v11454_v36 }
 0x95a   : > { %11581 = vst.msk [vmem:[%s21420_s17 + $0xd8] sm:$0xff] %vm578_vm0, %v11549_v59 }
 0x95b   : > { %11580 = vst.msk [vmem:[%s21420_s17 + $0xd0] sm:$0xff] %vm578_vm0, %v11548_v42 }
 0x95f   : > { %v14386_v18 = vpop.f32.mrb[92].mxu0 }
 0x960   : > { %v11551_v44 = vadd.f32 %v14386_v18, %v21415_v26  ;;  %v11464_v30 = vpop.f32.mrb[93].mxu0 }
 0x961   : > { %v11550_v62 = vadd.f32 %v21415_v26, %v11464_v30 }
 0x962   : > { %11583 = vst.msk [vmem:[%s21420_s17 + $0xe8] sm:$0xff] %vm578_vm0, %v11551_v44 }
 0x963   : > { %11582 = vst.msk [vmem:[%s21420_s17 + $0xe0] sm:$0xff] %vm578_vm0, %v11550_v62 }
 0x967   : > { %v14389_v5 = vpop.f32.mrb[94].mxu0 }
 0x968   : > { %v11553_v52 = vadd.f32 %v14389_v5, %v21415_v26  ;;  %v11474_v16 = vpop.f32.mrb[95].mxu0 }
 0x969   : > { %v11552_v22 = vadd.f32 %v21415_v26, %v11474_v16 }
 0x96a   : > { %11585 = vst.msk [vmem:[%s21420_s17 + $0xf8] sm:$0xff] %vm578_vm0, %v11553_v52 }
 0x96b   : > { %11584 = vst.msk [vmem:[%s21420_s17 + $0xf0] sm:$0xff] %vm578_vm0, %v11552_v22 }
 0x96c PF: > { %s15_s18 = sadd.s32 1, %s14819_s18  }
 0x96d   : > { %p12_p4 = scmp.ge.s32.totalorder %s15_s18, 4  }
 0x96f   :  { %14 = sbr.rel (!%p12_p4) target bundleno = 1 (0x1), region = 93 }

</bundles_post_ra>
